<compile_context>
chip_gen: v5e
topology: v5e:2x2
jax: 0.10.0
libtpu: 0.0.40
codegen_flags: <defaults>
</compile_context>

<pallas_src>
import functools
import numpy as np
import jax
import jax.numpy as jnp
from jax.experimental import pallas as pl
from jax.experimental.pallas import tpu as pltpu


# --------------------------------------------------------------------------
# Fully fused kernel: one grid step = one batch element.
#   x_ref   : (N, C)    input tokens (f32)
#   w_all   : (C, 5C)   [Wq*scale | Wk | Wq*scale@rot | Wk@rot | Wv]  (bf16)
#   wp, bp  : (C, C) bf16, (1, C) f32   output projection
#   cos/sin : (N, 2C)   RoPE tables tiled over heads for q AND k (lane-dense)
#   o_ref   : (N, C)    output
#   out_scr : (N, C)    VMEM f32 scratch for head-concatenated attention out
# --------------------------------------------------------------------------
def _fused_attention_kernel(x_ref, w_all_ref, wp_ref, bp_ref, cos_ref, sin_ref,
                            o_ref, out_scr, *, num_heads, head_dim, bf16_exp):
    C = num_heads * head_dim
    N = x_ref.shape[0]

    x = x_ref[...].astype(jnp.bfloat16)                       # bf16 MXU operand

    # One wide fused projection (scale + rotate_half already folded in).
    qkvr = jnp.dot(x, w_all_ref[...],
                   preferred_element_type=jnp.float32)        # (N, 5C) f32

    # RoPE for q and k in a single full-width (N, 2C) = 128-lane pass:
    #   roped = lin * cos + (lin @ rot) * sin   (the @rot part is precomputed)
    qk = qkvr[:, :2 * C] * cos_ref[...] + qkvr[:, 2 * C:4 * C] * sin_ref[...]
    qk = qk.astype(jnp.bfloat16)                              # q | k  (N, 2C)
    v = qkvr[:, 4 * C:].astype(jnp.bfloat16)                  # (N, C)

    ones_col = jnp.ones((N, 1), jnp.bfloat16)                 # MXU row-sum vector

    # Per-head scaled-dot-product attention (non-causal). Dh=16 lane slices and
    # K=16 contractions are inherent to head_dim; heads written straight into
    # the VMEM scratch (no concatenate / relayout chain).
    for h in range(num_heads):
        sl = slice(h * head_dim, (h + 1) * head_dim)
        qh = qk[:, sl]                                        # (N, Dh) bf16
        kh = qk[:, C + h * head_dim: C + (h + 1) * head_dim]  # (N, Dh) bf16
        vh = v[:, sl]                                         # (N, Dh) bf16

        # Contract both last dims -> no explicit k transpose relayout.
        s = jax.lax.dot_general(qh, kh, (((1,), (1,)), ((), ())),
                                preferred_element_type=jnp.float32)   # (N, N)
        m = jnp.max(s, axis=-1, keepdims=True)                # XLU row max
        if bf16_exp:
            p = jnp.exp((s - m).astype(jnp.bfloat16))         # bf16 EUP exp
        else:
            p = jnp.exp(s - m)                                # f32 exp (v5e)
        p_mm = p.astype(jnp.bfloat16)

        # Row-sum on the MXU (frees the XLU; f32 accumulation of bf16 P).
        denom = jnp.dot(p_mm, ones_col, preferred_element_type=jnp.float32)
        inv = pl.reciprocal(denom, approx=True)               # EUP vrcp

        av = jnp.dot(p_mm, vh, preferred_element_type=jnp.float32)    # (N, Dh)
        out_scr[:, sl] = av * inv                             # normalize (N,Dh)

    # Output projection + bias; single lane-dense (N, C) store.
    y = jnp.dot(out_scr[...].astype(jnp.bfloat16), wp_ref[...],
                preferred_element_type=jnp.float32) + bp_ref[...]
    o_ref[...] = y.astype(o_ref.dtype)
    # TODO(synk): attn_drop / proj_drop have p=0.0 (eval) -> identity, not emitted.


# --------------------------------------------------------------------------
# VisionRotaryEmbeddingFast tables (host precompute of the module buffers).
# Returns per-head (N, head_dim) cos/sin, N = pt_seq_len ** 2.
# --------------------------------------------------------------------------
def build_rope_tables(head_dim, pt_seq_len=16, theta=10000.0):
    rope_dim = head_dim // 2                      # "dim" arg of the rope module
    freqs = 1.0 / (theta ** (np.arange(0, rope_dim, 2, dtype=np.float32) / rope_dim))
    t = np.arange(pt_seq_len, dtype=np.float32) / pt_seq_len * pt_seq_len
    f = t[:, None] * freqs[None, :]               # (pt, rope_dim//2)
    f = np.repeat(f, 2, axis=-1)                  # (pt, rope_dim)  '(n r)' interleave
    f2 = np.concatenate(
        [np.broadcast_to(f[:, None, :], (pt_seq_len, pt_seq_len, rope_dim)),
         np.broadcast_to(f[None, :, :], (pt_seq_len, pt_seq_len, rope_dim))],
        axis=-1,
    ).reshape(pt_seq_len * pt_seq_len, head_dim)  # (N, head_dim)
    return np.cos(f2).astype(np.float32), np.sin(f2).astype(np.float32)


# --------------------------------------------------------------------------
# Host-side weight folding (done once, outside jit):
#   * sdpa scale folded into Wq,
#   * rotate_half folded into Wq/Wk via a (C,C) sign/permutation matrix,
#   * all five projection blocks concatenated into one (C, 5C) bf16 operand,
#   * RoPE tables tiled to (N, 2C) so the kernel's RoPE pass is 128-lane dense.
# --------------------------------------------------------------------------
def prepare_kernel_params(params, num_heads, cos_head, sin_head):
    w_qkv = np.asarray(params["w_qkv"], np.float32)     # (3C, C) torch (out, in)
    w_proj = np.asarray(params["w_proj"], np.float32)   # (C, C)
    b_proj = np.asarray(params["b_proj"], np.float32)   # (C,)
    C = w_proj.shape[0]
    Dh = C // num_heads
    scale = Dh ** (-0.5)

    wq_t = w_qkv[:C].T * scale        # fold sdpa scale (RoPE is linear -> exact)
    wk_t = w_qkv[C:2 * C].T
    wv_t = w_qkv[2 * C:].T

    # rotate_half as a pair-interleave sign/permutation: out[2k]=-x[2k+1], out[2k+1]=x[2k]
    rot = np.zeros((C, C), np.float32)
    ev = np.arange(0, C, 2)
    rot[ev, ev + 1] = 1.0
    rot[ev + 1, ev] = -1.0

    w_all = np.concatenate([wq_t, wk_t, wq_t @ rot, wk_t @ rot, wv_t], axis=1)  # (C, 5C)

    cos2 = np.tile(cos_head, (1, 2 * num_heads))        # (N, 2C) for q|k halves
    sin2 = np.tile(sin_head, (1, 2 * num_heads))

    return {
        "w_all": jnp.asarray(w_all, jnp.bfloat16),
        "w_proj_t": jnp.asarray(w_proj.T, jnp.bfloat16),
        "b_proj": jnp.asarray(b_proj.reshape(1, C), jnp.float32),
        "cos2": jnp.asarray(cos2, jnp.float32),
        "sin2": jnp.asarray(sin2, jnp.float32),
    }


# --------------------------------------------------------------------------
# Full Attention forward — single fused pallas_call.
# --------------------------------------------------------------------------
def attention_forward(x, kparams, num_heads, bf16_exp=True):
    B, N, C = x.shape
    Dh = C // num_heads

    kern = functools.partial(_fused_attention_kernel,
                             num_heads=num_heads, head_dim=Dh, bf16_exp=bf16_exp)
    return pl.pallas_call(
        kern,
        out_shape=jax.ShapeDtypeStruct((B, N, C), x.dtype),
        grid=(B,),
        in_specs=[
            pl.BlockSpec((None, N, C), lambda b: (b, 0, 0)),     # x (batch squeezed)
            pl.BlockSpec((C, 5 * C), lambda b: (0, 0)),          # fused weights (bf16)
            pl.BlockSpec((C, C), lambda b: (0, 0)),              # proj weight (bf16)
            pl.BlockSpec((1, C), lambda b: (0, 0)),              # proj bias
            pl.BlockSpec((N, 2 * C), lambda b: (0, 0)),          # cos (q|k tiled)
            pl.BlockSpec((N, 2 * C), lambda b: (0, 0)),          # sin (q|k tiled)
        ],
        out_specs=pl.BlockSpec((None, N, C), lambda b: (b, 0, 0)),
        scratch_shapes=[pltpu.VMEM((N, C), jnp.float32)],        # head-output scratch
        compiler_params=pltpu.CompilerParams(
            dimension_semantics=("parallel",)),
    )(x, kparams["w_all"], kparams["w_proj_t"], kparams["b_proj"],
      kparams["cos2"], kparams["sin2"])


# --------------------------------------------------------------------------
# Pure-JAX reference (for correctness check only).
# --------------------------------------------------------------------------
def attention_reference(x, params, num_heads, cos_head, sin_head):
    B, N, C = x.shape
    Dh = C // num_heads
    cos = jnp.asarray(cos_head)
    sin = jnp.asarray(sin_head)
    qkv = x @ params["w_qkv"].T
    qkv = qkv.reshape(B, N, 3, num_heads, Dh).transpose(2, 0, 3, 1, 4)
    q, k, v = qkv[0], qkv[1], qkv[2]

    def rope(t):
        t2 = t.reshape(B, num_heads, N, Dh // 2, 2)
        rh = jnp.stack([-t2[..., 1], t2[..., 0]], axis=-1).reshape(B, num_heads, N, Dh)
        return t * cos + rh * sin

    q = rope(q)
    k = rope(k)
    s = jnp.einsum("bhnd,bhmd->bhnm", q, k) * (Dh ** -0.5)
    p = jax.nn.softmax(s, axis=-1)
    o = jnp.einsum("bhnm,bhmd->bhnd", p, v)
    o = o.transpose(0, 2, 1, 3).reshape(B, N, C)
    return o @ params["w_proj"].T + params["b_proj"]


if __name__ == "__main__":
    # Shapes consistent with the module: hw_seq_len=16 => N = 256.
    B, C, H = 2, 64, 4
    Dh = C // H
    N = 16 * 16

    key = jax.random.PRNGKey(0)
    kx, kw1, kw2, kb = jax.random.split(key, 4)
    x = jax.random.normal(kx, (B, N, C), jnp.float32)

    raw_params = {
        "w_qkv": 0.02 * jax.random.normal(kw1, (3 * C, C), jnp.float32),  # torch (out, in)
        "w_proj": 0.02 * jax.random.normal(kw2, (C, C), jnp.float32),
        "b_proj": 0.02 * jax.random.normal(kb, (C,), jnp.float32),
    }
    cos_head, sin_head = build_rope_tables(Dh, pt_seq_len=16)
    kparams = prepare_kernel_params(raw_params, H, cos_head, sin_head)

    fwd = jax.jit(attention_forward, static_argnums=2)
    y = jax.block_until_ready(fwd(x, kparams, H))

    y_ref = attention_reference(x, raw_params, H, cos_head, sin_head)
    # bf16 MXU operands + bf16 exp -> relaxed tolerance vs. the f32 reference.
    np.testing.assert_allclose(np.asarray(y), np.asarray(y_ref), rtol=1e-2, atol=1e-2)

    print("KERNEL_OK")
</pallas_src>

<mosaic_0001>
module attributes {stable_mosaic.version = 11 : i64} {
  func.func @_fused_attention_kernel(%arg0: i32, %arg1: memref<1x256x64xf32, #tpu.memory_space<vmem>>, %arg2: memref<64x320xbf16, #tpu.memory_space<vmem>>, %arg3: memref<64x64xbf16, #tpu.memory_space<vmem>>, %arg4: memref<1x64xf32, #tpu.memory_space<vmem>>, %arg5: memref<256x128xf32, #tpu.memory_space<vmem>>, %arg6: memref<256x128xf32, #tpu.memory_space<vmem>>, %arg7: memref<1x256x64xf32, #tpu.memory_space<vmem>>, %arg8: memref<256x64xf32, #tpu.memory_space<vmem>>) attributes {dimension_semantics = [#tpu.dimension_semantics<parallel>], iteration_bounds = array<i64: 2>, scalar_prefetch = 0 : i64, scratch_operands = 1 : i64, tpu.core_type = #tpu.core_type<tc>, window_params = [{transform_indices = @transform_0, window_bounds = array<i64: 1, 256, 64>}, {pipeline_mode = #tpu.pipeline_mode<synchronous>, transform_indices = @transform_1, window_bounds = array<i64: 64, 320>}, {pipeline_mode = #tpu.pipeline_mode<synchronous>, transform_indices = @transform_2, window_bounds = array<i64: 64, 64>}, {pipeline_mode = #tpu.pipeline_mode<synchronous>, transform_indices = @transform_3, window_bounds = array<i64: 1, 64>}, {pipeline_mode = #tpu.pipeline_mode<synchronous>, transform_indices = @transform_4, window_bounds = array<i64: 256, 128>}, {pipeline_mode = #tpu.pipeline_mode<synchronous>, transform_indices = @transform_5, window_bounds = array<i64: 256, 128>}, {transform_indices = @transform_6, window_bounds = array<i64: 1, 256, 64>}]} {
    %c0 = arith.constant 0 : index
    %c0_0 = arith.constant 0 : index
    %c0_1 = arith.constant 0 : index
    %0 = vector.load %arg1[%c0, %c0_0, %c0_1] : memref<1x256x64xf32, #tpu.memory_space<vmem>>, vector<1x256x64xf32>
    %1 = vector.shape_cast %0 : vector<1x256x64xf32> to vector<256x64xf32>
    %2 = arith.truncf %1 : vector<256x64xf32> to vector<256x64xbf16>
    %c0_2 = arith.constant 0 : index
    %c0_3 = arith.constant 0 : index
    %3 = vector.load %arg2[%c0_2, %c0_3] : memref<64x320xbf16, #tpu.memory_space<vmem>>, vector<64x320xbf16>
    %cst = arith.constant dense<0.000000e+00> : vector<256x320xf32>
    %4 = tpu.matmul %2, %3, %cst {dimension_numbers = #tpu.dot_dimension_numbers<[1], [0], [0], [1], [0, 0, 1, 1], [], []>} : vector<256x64xbf16>, vector<64x320xbf16>, vector<256x320xf32> -> vector<256x320xf32>
    %5 = vector.extract_strided_slice %4 {offsets = [0, 0], sizes = [256, 128], strides = [1, 1]} : vector<256x320xf32> to vector<256x128xf32>
    %c0_4 = arith.constant 0 : index
    %c0_5 = arith.constant 0 : index
    %6 = vector.load %arg5[%c0_4, %c0_5] : memref<256x128xf32, #tpu.memory_space<vmem>>, vector<256x128xf32>
    %7 = arith.mulf %5, %6 : vector<256x128xf32>
    %8 = vector.extract_strided_slice %4 {offsets = [0, 128], sizes = [256, 128], strides = [1, 1]} : vector<256x320xf32> to vector<256x128xf32>
    %c0_6 = arith.constant 0 : index
    %c0_7 = arith.constant 0 : index
    %9 = vector.load %arg6[%c0_6, %c0_7] : memref<256x128xf32, #tpu.memory_space<vmem>>, vector<256x128xf32>
    %10 = arith.mulf %8, %9 : vector<256x128xf32>
    %11 = arith.addf %7, %10 : vector<256x128xf32>
    %12 = arith.truncf %11 : vector<256x128xf32> to vector<256x128xbf16>
    %13 = vector.extract_strided_slice %4 {offsets = [0, 256], sizes = [256, 64], strides = [1, 1]} : vector<256x320xf32> to vector<256x64xf32>
    %14 = arith.truncf %13 : vector<256x64xf32> to vector<256x64xbf16>
    %cst_8 = arith.constant 1.000000e+00 : bf16
    %15 = vector.broadcast %cst_8 : bf16 to vector<256x1xbf16>
    %16 = vector.extract_strided_slice %12 {offsets = [0, 0], sizes = [256, 16], strides = [1, 1]} : vector<256x128xbf16> to vector<256x16xbf16>
    %17 = vector.extract_strided_slice %12 {offsets = [0, 64], sizes = [256, 16], strides = [1, 1]} : vector<256x128xbf16> to vector<256x16xbf16>
    %18 = vector.extract_strided_slice %14 {offsets = [0, 0], sizes = [256, 16], strides = [1, 1]} : vector<256x64xbf16> to vector<256x16xbf16>
    %cst_9 = arith.constant dense<0.000000e+00> : vector<256x256xf32>
    %19 = tpu.matmul %16, %17, %cst_9 {dimension_numbers = #tpu.dot_dimension_numbers<[1], [1], [0], [0], [0, 0, 1, 0], [], []>} : vector<256x16xbf16>, vector<256x16xbf16>, vector<256x256xf32> -> vector<256x256xf32>
    %cst_10 = arith.constant dense<0xFF800000> : vector<256xf32>
    %20 = vector.multi_reduction <maximumf>, %19, %cst_10 [1] : vector<256x256xf32> to vector<256xf32>
    %21 = vector.shape_cast %20 : vector<256xf32> to vector<256x1xf32>
    %22 = vector.broadcast %21 : vector<256x1xf32> to vector<256x256xf32>
    %23 = arith.subf %19, %22 : vector<256x256xf32>
    %24 = arith.truncf %23 : vector<256x256xf32> to vector<256x256xbf16>
    %25 = math.exp %24 : vector<256x256xbf16>
    %cst_11 = arith.constant dense<0.000000e+00> : vector<256x1xf32>
    %26 = tpu.matmul %25, %15, %cst_11 {dimension_numbers = #tpu.dot_dimension_numbers<[1], [0], [0], [1], [0, 0, 1, 1], [], []>} : vector<256x256xbf16>, vector<256x1xbf16>, vector<256x1xf32> -> vector<256x1xf32>
    %27 = tpu.reciprocal %26 {approx = true} : vector<256x1xf32> -> vector<256x1xf32>
    %cst_12 = arith.constant dense<0.000000e+00> : vector<256x16xf32>
    %28 = tpu.matmul %25, %18, %cst_12 {dimension_numbers = #tpu.dot_dimension_numbers<[1], [0], [0], [1], [0, 0, 1, 1], [], []>} : vector<256x256xbf16>, vector<256x16xbf16>, vector<256x16xf32> -> vector<256x16xf32>
    %29 = vector.broadcast %27 : vector<256x1xf32> to vector<256x16xf32>
    %30 = arith.mulf %28, %29 : vector<256x16xf32>
    %c0_13 = arith.constant 0 : index
    %c0_14 = arith.constant 0 : index
    %31 = vector.load %arg8[%c0_13, %c0_14] : memref<256x64xf32, #tpu.memory_space<vmem>>, vector<256x16xf32>
    tpu.vector_store %arg8[%c0_13, %c0_14], %30 {strides = array<i32>} : memref<256x64xf32, #tpu.memory_space<vmem>>, vector<256x16xf32>,
    %32 = vector.extract_strided_slice %12 {offsets = [0, 16], sizes = [256, 16], strides = [1, 1]} : vector<256x128xbf16> to vector<256x16xbf16>
    %33 = vector.extract_strided_slice %12 {offsets = [0, 80], sizes = [256, 16], strides = [1, 1]} : vector<256x128xbf16> to vector<256x16xbf16>
    %34 = vector.extract_strided_slice %14 {offsets = [0, 16], sizes = [256, 16], strides = [1, 1]} : vector<256x64xbf16> to vector<256x16xbf16>
    %cst_15 = arith.constant dense<0.000000e+00> : vector<256x256xf32>
    %35 = tpu.matmul %32, %33, %cst_15 {dimension_numbers = #tpu.dot_dimension_numbers<[1], [1], [0], [0], [0, 0, 1, 0], [], []>} : vector<256x16xbf16>, vector<256x16xbf16>, vector<256x256xf32> -> vector<256x256xf32>
    %cst_16 = arith.constant dense<0xFF800000> : vector<256xf32>
    %36 = vector.multi_reduction <maximumf>, %35, %cst_16 [1] : vector<256x256xf32> to vector<256xf32>
    %37 = vector.shape_cast %36 : vector<256xf32> to vector<256x1xf32>
    %38 = vector.broadcast %37 : vector<256x1xf32> to vector<256x256xf32>
    %39 = arith.subf %35, %38 : vector<256x256xf32>
    %40 = arith.truncf %39 : vector<256x256xf32> to vector<256x256xbf16>
    %41 = math.exp %40 : vector<256x256xbf16>
    %cst_17 = arith.constant dense<0.000000e+00> : vector<256x1xf32>
    %42 = tpu.matmul %41, %15, %cst_17 {dimension_numbers = #tpu.dot_dimension_numbers<[1], [0], [0], [1], [0, 0, 1, 1], [], []>} : vector<256x256xbf16>, vector<256x1xbf16>, vector<256x1xf32> -> vector<256x1xf32>
    %43 = tpu.reciprocal %42 {approx = true} : vector<256x1xf32> -> vector<256x1xf32>
    %cst_18 = arith.constant dense<0.000000e+00> : vector<256x16xf32>
    %44 = tpu.matmul %41, %34, %cst_18 {dimension_numbers = #tpu.dot_dimension_numbers<[1], [0], [0], [1], [0, 0, 1, 1], [], []>} : vector<256x256xbf16>, vector<256x16xbf16>, vector<256x16xf32> -> vector<256x16xf32>
    %45 = vector.broadcast %43 : vector<256x1xf32> to vector<256x16xf32>
    %46 = arith.mulf %44, %45 : vector<256x16xf32>
    %c0_19 = arith.constant 0 : index
    %c16 = arith.constant 16 : index
    %47 = vector.load %arg8[%c0_19, %c16] : memref<256x64xf32, #tpu.memory_space<vmem>>, vector<256x16xf32>
    tpu.vector_store %arg8[%c0_19, %c16], %46 {strides = array<i32>} : memref<256x64xf32, #tpu.memory_space<vmem>>, vector<256x16xf32>,
    %48 = vector.extract_strided_slice %12 {offsets = [0, 32], sizes = [256, 16], strides = [1, 1]} : vector<256x128xbf16> to vector<256x16xbf16>
    %49 = vector.extract_strided_slice %12 {offsets = [0, 96], sizes = [256, 16], strides = [1, 1]} : vector<256x128xbf16> to vector<256x16xbf16>
    %50 = vector.extract_strided_slice %14 {offsets = [0, 32], sizes = [256, 16], strides = [1, 1]} : vector<256x64xbf16> to vector<256x16xbf16>
    %cst_20 = arith.constant dense<0.000000e+00> : vector<256x256xf32>
    %51 = tpu.matmul %48, %49, %cst_20 {dimension_numbers = #tpu.dot_dimension_numbers<[1], [1], [0], [0], [0, 0, 1, 0], [], []>} : vector<256x16xbf16>, vector<256x16xbf16>, vector<256x256xf32> -> vector<256x256xf32>
    %cst_21 = arith.constant dense<0xFF800000> : vector<256xf32>
    %52 = vector.multi_reduction <maximumf>, %51, %cst_21 [1] : vector<256x256xf32> to vector<256xf32>
    %53 = vector.shape_cast %52 : vector<256xf32> to vector<256x1xf32>
    %54 = vector.broadcast %53 : vector<256x1xf32> to vector<256x256xf32>
    %55 = arith.subf %51, %54 : vector<256x256xf32>
    %56 = arith.truncf %55 : vector<256x256xf32> to vector<256x256xbf16>
    %57 = math.exp %56 : vector<256x256xbf16>
    %cst_22 = arith.constant dense<0.000000e+00> : vector<256x1xf32>
    %58 = tpu.matmul %57, %15, %cst_22 {dimension_numbers = #tpu.dot_dimension_numbers<[1], [0], [0], [1], [0, 0, 1, 1], [], []>} : vector<256x256xbf16>, vector<256x1xbf16>, vector<256x1xf32> -> vector<256x1xf32>
    %59 = tpu.reciprocal %58 {approx = true} : vector<256x1xf32> -> vector<256x1xf32>
    %cst_23 = arith.constant dense<0.000000e+00> : vector<256x16xf32>
    %60 = tpu.matmul %57, %50, %cst_23 {dimension_numbers = #tpu.dot_dimension_numbers<[1], [0], [0], [1], [0, 0, 1, 1], [], []>} : vector<256x256xbf16>, vector<256x16xbf16>, vector<256x16xf32> -> vector<256x16xf32>
    %61 = vector.broadcast %59 : vector<256x1xf32> to vector<256x16xf32>
    %62 = arith.mulf %60, %61 : vector<256x16xf32>
    %c0_24 = arith.constant 0 : index
    %c32 = arith.constant 32 : index
    %63 = vector.load %arg8[%c0_24, %c32] : memref<256x64xf32, #tpu.memory_space<vmem>>, vector<256x16xf32>
    tpu.vector_store %arg8[%c0_24, %c32], %62 {strides = array<i32>} : memref<256x64xf32, #tpu.memory_space<vmem>>, vector<256x16xf32>,
    %64 = vector.extract_strided_slice %12 {offsets = [0, 48], sizes = [256, 16], strides = [1, 1]} : vector<256x128xbf16> to vector<256x16xbf16>
    %65 = vector.extract_strided_slice %12 {offsets = [0, 112], sizes = [256, 16], strides = [1, 1]} : vector<256x128xbf16> to vector<256x16xbf16>
    %66 = vector.extract_strided_slice %14 {offsets = [0, 48], sizes = [256, 16], strides = [1, 1]} : vector<256x64xbf16> to vector<256x16xbf16>
    %cst_25 = arith.constant dense<0.000000e+00> : vector<256x256xf32>
    %67 = tpu.matmul %64, %65, %cst_25 {dimension_numbers = #tpu.dot_dimension_numbers<[1], [1], [0], [0], [0, 0, 1, 0], [], []>} : vector<256x16xbf16>, vector<256x16xbf16>, vector<256x256xf32> -> vector<256x256xf32>
    %cst_26 = arith.constant dense<0xFF800000> : vector<256xf32>
    %68 = vector.multi_reduction <maximumf>, %67, %cst_26 [1] : vector<256x256xf32> to vector<256xf32>
    %69 = vector.shape_cast %68 : vector<256xf32> to vector<256x1xf32>
    %70 = vector.broadcast %69 : vector<256x1xf32> to vector<256x256xf32>
    %71 = arith.subf %67, %70 : vector<256x256xf32>
    %72 = arith.truncf %71 : vector<256x256xf32> to vector<256x256xbf16>
    %73 = math.exp %72 : vector<256x256xbf16>
    %cst_27 = arith.constant dense<0.000000e+00> : vector<256x1xf32>
    %74 = tpu.matmul %73, %15, %cst_27 {dimension_numbers = #tpu.dot_dimension_numbers<[1], [0], [0], [1], [0, 0, 1, 1], [], []>} : vector<256x256xbf16>, vector<256x1xbf16>, vector<256x1xf32> -> vector<256x1xf32>
    %75 = tpu.reciprocal %74 {approx = true} : vector<256x1xf32> -> vector<256x1xf32>
    %cst_28 = arith.constant dense<0.000000e+00> : vector<256x16xf32>
    %76 = tpu.matmul %73, %66, %cst_28 {dimension_numbers = #tpu.dot_dimension_numbers<[1], [0], [0], [1], [0, 0, 1, 1], [], []>} : vector<256x256xbf16>, vector<256x16xbf16>, vector<256x16xf32> -> vector<256x16xf32>
    %77 = vector.broadcast %75 : vector<256x1xf32> to vector<256x16xf32>
    %78 = arith.mulf %76, %77 : vector<256x16xf32>
    %c0_29 = arith.constant 0 : index
    %c48 = arith.constant 48 : index
    %79 = vector.load %arg8[%c0_29, %c48] : memref<256x64xf32, #tpu.memory_space<vmem>>, vector<256x16xf32>
    tpu.vector_store %arg8[%c0_29, %c48], %78 {strides = array<i32>} : memref<256x64xf32, #tpu.memory_space<vmem>>, vector<256x16xf32>,
    %c0_30 = arith.constant 0 : index
    %c0_31 = arith.constant 0 : index
    %80 = vector.load %arg8[%c0_30, %c0_31] : memref<256x64xf32, #tpu.memory_space<vmem>>, vector<256x64xf32>
    %81 = arith.truncf %80 : vector<256x64xf32> to vector<256x64xbf16>
    %c0_32 = arith.constant 0 : index
    %c0_33 = arith.constant 0 : index
    %82 = vector.load %arg3[%c0_32, %c0_33] : memref<64x64xbf16, #tpu.memory_space<vmem>>, vector<64x64xbf16>
    %cst_34 = arith.constant dense<0.000000e+00> : vector<256x64xf32>
    %83 = tpu.matmul %81, %82, %cst_34 {dimension_numbers = #tpu.dot_dimension_numbers<[1], [0], [0], [1], [0, 0, 1, 1], [], []>} : vector<256x64xbf16>, vector<64x64xbf16>, vector<256x64xf32> -> vector<256x64xf32>
    %c0_35 = arith.constant 0 : index
    %c0_36 = arith.constant 0 : index
    %84 = vector.load %arg4[%c0_35, %c0_36] : memref<1x64xf32, #tpu.memory_space<vmem>>, vector<1x64xf32>
    %85 = vector.broadcast %84 : vector<1x64xf32> to vector<256x64xf32>
    %86 = arith.addf %83, %85 : vector<256x64xf32>
    %c0_37 = arith.constant 0 : index
    %c0_38 = arith.constant 0 : index
    %c0_39 = arith.constant 0 : index
    %87 = vector.load %arg7[%c0_37, %c0_38, %c0_39] : memref<1x256x64xf32, #tpu.memory_space<vmem>>, vector<1x256x64xf32>
    %88 = vector.shape_cast %87 : vector<1x256x64xf32> to vector<256x64xf32>
    %89 = vector.shape_cast %86 : vector<256x64xf32> to vector<1x256x64xf32>
    tpu.vector_store %arg7[%c0_37, %c0_38, %c0_39], %89 {strides = array<i32>} : memref<1x256x64xf32, #tpu.memory_space<vmem>>, vector<1x256x64xf32>,
    return
  }
  func.func @transform_0(%arg0: i32) -> (i32, i32, i32) {
    %c0_i32 = arith.constant 0 : i32
    %c0_i32_0 = arith.constant 0 : i32
    %c0_i32_1 = arith.constant 0 : i32
    return %arg0, %c0_i32, %c0_i32_0 : i32, i32, i32
  }
  func.func @transform_1(%arg0: i32) -> (i32, i32) {
    %c0_i32 = arith.constant 0 : i32
    %c0_i32_0 = arith.constant 0 : i32
    %c0_i32_1 = arith.constant 0 : i32
    return %c0_i32, %c0_i32_0 : i32, i32
  }
  func.func @transform_2(%arg0: i32) -> (i32, i32) {
    %c0_i32 = arith.constant 0 : i32
    %c0_i32_0 = arith.constant 0 : i32
    %c0_i32_1 = arith.constant 0 : i32
    return %c0_i32, %c0_i32_0 : i32, i32
  }
  func.func @transform_3(%arg0: i32) -> (i32, i32) {
    %c0_i32 = arith.constant 0 : i32
    %c0_i32_0 = arith.constant 0 : i32
    %c0_i32_1 = arith.constant 0 : i32
    return %c0_i32, %c0_i32_0 : i32, i32
  }
  func.func @transform_4(%arg0: i32) -> (i32, i32) {
    %c0_i32 = arith.constant 0 : i32
    %c0_i32_0 = arith.constant 0 : i32
    %c0_i32_1 = arith.constant 0 : i32
    return %c0_i32, %c0_i32_0 : i32, i32
  }
  func.func @transform_5(%arg0: i32) -> (i32, i32) {
    %c0_i32 = arith.constant 0 : i32
    %c0_i32_0 = arith.constant 0 : i32
    %c0_i32_1 = arith.constant 0 : i32
    return %c0_i32, %c0_i32_0 : i32, i32
  }
  func.func @transform_6(%arg0: i32) -> (i32, i32, i32) {
    %c0_i32 = arith.constant 0 : i32
    %c0_i32_0 = arith.constant 0 : i32
    %c0_i32_1 = arith.constant 0 : i32
    return %arg0, %c0_i32, %c0_i32_0 : i32, i32, i32
  }
}

</mosaic_0001>

<bundles_post_ra>
// kernel: attention_forward.1
= control target key start
LH: loop header
LB: loop body
LE: loop exit
PB: predicated region body
PF: predicated region fallthrough
CT: control target
= control target key end

     0   :  { %s8508_s21 = smov 0   ;;  %s12469_s0 = inlined_call_operand.vmem [shape: f32[2,256,64], index: 0, kind: input, shape index: {}]   ;;  %s12470_s1 = inlined_call_operand.vmem [shape: bf16[64,320], index: 1, kind: input, shape index: {}]   ;;  %s12471_s2 = inlined_call_operand.vmem [shape: bf16[64,64], index: 2, kind: input, shape index: {}]   ;;  %s12472_s3 = inlined_call_operand.vmem [shape: f32[1,64], index: 3, kind: input, shape index: {}]   ;;  %s12473_s4 = inlined_call_operand.vmem [shape: f32[256,128], index: 4, kind: input, shape index: {}]   ;;  %s12474_s5 = inlined_call_operand.vmem [shape: f32[256,128], index: 5, kind: input, shape index: {}]   ;;  %s12475_s6 = inlined_call_operand.vmem [shape: f32[2,256,64], index: 6, kind: output, shape index: {}]  }
   0x1 LB: > { %s7370_s22 = sadd.s32 4294967295, %s8462_s21   ;;  %p7374_p0 = scmp.ge.s32.totalorder %s8462_s21, 1  ;;  %s8462_s21 = sphi %s8508_s21, %s16_s21  }
   0x2   : > { %p212_p1 = scmp.lt.s32.totalorder %s8462_s21, 3 }
   0x4   : > { %p213_p2 = pnand %p7374_p0, %p212_p1 }
   0x6   : > { %216 = sbr.rel (%p213_p2) target bundleno = 3995 (0xf9b), region = 44 }
   0xb   : > { %v7417_v0 = vld [vmem:[%s12470_s1 + $0x48] sm:$0xf]  ;;  %v7649_v1 = vld [vmem:[%s12470_s1 + $0x50] sm:$0xf0]  ;;  %v7405_v2 = vld [vmem:[%s12470_s1 + $0x30] sm:$0xf] }
   0xc   : > { %v7418_v3 = vor.u32 %v7649_v1, %v7417_v0  ;;  %v7646_v4 = vld [vmem:[%s12470_s1 + $0x38] sm:$0xf0]  ;;  %p242_p3 = scmp.lt.s32.totalorder %s7370_s22, 1  ;;  %v7393_v6 = vld [vmem:[%s12470_s1 + $0x18] sm:$0xf]  ;;  %vm382_vm0 = vcmask 523264  }
   0xd   : > { %v7406_v5 = vor.u32 %v7646_v4, %v7405_v2  ;;  %v7643_v7 = vld [vmem:[%s12470_s1 + $0x20] sm:$0xf0]  ;;  %v7381_v9 = vld [vmem:[%s12470_s1] sm:$0xf]  ;;  %v7640_v10 = vld [vmem:[%s12470_s1 + $0x8] sm:$0xf0] }
   0xe   : > { %7655 = vmatpush.bf16.msra.mxu1 %v7418_v3  ;;  %435 = vmatpush.bf16.msra.mxu0 %v7418_v3  ;;  %s13176_s22 = smov (!%p242_p3, %s7370_s22), 1  ;;  %v7394_v8 = vor.u32 %v7643_v7, %v7393_v6  ;;  %v7648_v11 = vld [vmem:[%s12470_s1 + $0x4c] sm:$0xf]  ;;  %v7419_v12 = vld [vmem:[%s12470_s1 + $0x54] sm:$0xf0]  ;;  %v7382_v14 = vor.u32 %v7640_v10, %v7381_v9  ;;  %v698_v6 = vld [vmem:[%s12473_s4] sm:$0xff] }
   0xf   : > { %s7637_s11 = sshll.u32 %s13176_s22, 8  ;;  %v7422_v18 = vor.u32 %v7648_v11, %v7419_v12  ;;  %v7645_v19 = vld [vmem:[%s12470_s1 + $0x34] sm:$0xf]  ;;  %v7407_v20 = vld [vmem:[%s12470_s1 + $0x3c] sm:$0xf0]  ;;  %s8464_s18 = smov 64  }
  0x10   : > { %s8542_s14 = scalar_lea.vmem %s12469_s0, %s7637_s11  ;;  %v7410_v23 = vor.u32 %v7645_v19, %v7407_v20  ;;  %v7642_v24 = vld [vmem:[%s12470_s1 + $0x1c] sm:$0xf]  ;;  %v7395_v25 = vld [vmem:[%s12470_s1 + $0x24] sm:$0xf0]  ;;  %v7639_v27 = vld [vmem:[%s12470_s1 + $0x4] sm:$0xf]  ;;  %s12330_s16 = scalar_lea.vmem %s12475_s6, %s7637_s11 }
  0x11   : > { %v284_v13 = vld [vmem:[%s8542_s14 + $0xf0] sm:$0xff]  ;;  %v285_v15 = vld [vmem:[%s8542_s14 + $0xf8] sm:$0xff]  ;;  %v254_v16 = vld [vmem:[%s8542_s14] sm:$0xff]  ;;  %v7398_v26 = vor.u32 %v7642_v24, %v7395_v25  ;;  %vm1034_vm1 = vcmask 130048   ;;  %s8465_s13 = smov 48   ;;  %s8468_s20 = smov 32  }
  0x12   : > { %7656 = vmatpush.bf16.msra.mxu1 %v7406_v5  ;;  %436 = vmatpush.bf16.msra.mxu0 %v7406_v5  ;;  %v255_v17 = vld [vmem:[%s8542_s14 + $0x8] sm:$0xff]  ;;  %v8566_v21 = vpack.c.bf16 %v285_v15, %v284_v13  ;;  %v7383_v28 = vld [vmem:[%s12470_s1 + $0xc] sm:$0xf0]  ;;  %v257_v31 = vld [vmem:[%s8542_s14 + $0x18] sm:$0xff]  ;;  %s8469_s23 = smov 96   ;;  %s8471_s24 = smov 16  }
  0x13   : > { %v286_v22 = vpack.c.bf16 %v255_v17, %v254_v16  ;;  %v7386_v29 = vor.u32 %v7639_v27, %v7383_v28  ;;  %v256_v30 = vld [vmem:[%s8542_s14 + $0x10] sm:$0xff]  ;;  %v258_v33 = vld [vmem:[%s8542_s14 + $0x20] sm:$0xff]  ;;  %v259_v34 = vld [vmem:[%s8542_s14 + $0x28] sm:$0xff]  ;;  %s8472_s25 = smov 80   ;;  %vm3943_vm2 = vcmask 261248   ;;  %vm5486_vm3 = vcmask 392448  }
  0x14   : > { %v287_v32 = vpack.c.bf16 %v257_v31, %v256_v30  ;;  %v288_v35 = vpack.c.bf16 %v259_v34, %v258_v33  ;;  %v260_v36 = vld [vmem:[%s8542_s14 + $0x30] sm:$0xff]  ;;  %v261_v37 = vld [vmem:[%s8542_s14 + $0x38] sm:$0xff]  ;;  %v262_v42 = vld [vmem:[%s8542_s14 + $0x40] sm:$0xff]  ;;  %vm7029_vm4 = vcmask 523648  }
  0x15   : > { %v289_v38 = vpack.c.bf16 %v261_v37, %v260_v36  ;;  %v7425_v39 = vld [vmem:[%s12470_s1 + $0x50] sm:$0xf]  ;;  %v7650_v40 = vld [vmem:[%s12470_s1 + $0x58] sm:$0xf0]  ;;  %v263_v43 = vld [vmem:[%s8542_s14 + $0x48] sm:$0xff] }
  0x16   : > { %7657 = vmatpush.bf16.msra.mxu1 %v7394_v8  ;;  %437 = vmatpush.bf16.msra.mxu0 %v7394_v8  ;;  %v7426_v41 = vor.u32 %v7650_v40, %v7425_v39  ;;  %v290_v44 = vpack.c.bf16 %v263_v43, %v262_v42  ;;  %v7413_v45 = vld [vmem:[%s12470_s1 + $0x38] sm:$0xf]  ;;  %v7647_v46 = vld [vmem:[%s12470_s1 + $0x40] sm:$0xf0]  ;;  %v7401_v47 = vld [vmem:[%s12470_s1 + $0x20] sm:$0xf] }
  0x17   : > { %v7414_v48 = vor.u32 %v7647_v46, %v7413_v45  ;;  %v7644_v49 = vld [vmem:[%s12470_s1 + $0x28] sm:$0xf0]  ;;  %v7389_v51 = vld [vmem:[%s12470_s1 + $0x8] sm:$0xf]  ;;  %v7641_v52 = vld [vmem:[%s12470_s1 + $0x10] sm:$0xf0] }
  0x18   : > { %613 = vmatpush.bf16.msra.mxu2 %v7426_v41  ;;  %v7402_v50 = vor.u32 %v7644_v49, %v7401_v47  ;;  %v7390_v53 = vor.u32 %v7641_v52, %v7389_v51  ;;  %v264_v54 = vld [vmem:[%s8542_s14 + $0x50] sm:$0xff]  ;;  %v265_v55 = vld [vmem:[%s8542_s14 + $0x58] sm:$0xff]  ;;  %v266_v57 = vld [vmem:[%s8542_s14 + $0x60] sm:$0xff] }
  0x19   : > { %v291_v56 = vpack.c.bf16 %v265_v55, %v264_v54  ;;  %v267_v58 = vld [vmem:[%s8542_s14 + $0x68] sm:$0xff]  ;;  %v268_v60 = vld [vmem:[%s8542_s14 + $0x70] sm:$0xff]  ;;  %v269_v61 = vld [vmem:[%s8542_s14 + $0x78] sm:$0xff] }
  0x1a   : > { %7658 = vmatpush.bf16.msra.mxu1 %v7382_v14  ;;  %438 = vmatpush.bf16.msra.mxu0 %v7382_v14  ;;  %v8630_v59 = vpack.c.bf16 %v267_v58, %v266_v57  ;;  %v8638_v62 = vpack.c.bf16 %v269_v61, %v268_v60  ;;  %v270_v63 = vld [vmem:[%s8542_s14 + $0x80] sm:$0xff]  ;;  %v271_v0 = vld [vmem:[%s8542_s14 + $0x88] sm:$0xff]  ;;  %v272_v7 = vld [vmem:[%s8542_s14 + $0x90] sm:$0xff] }
  0x1b   : > { %v8647_v1 = vpack.c.bf16 %v271_v0, %v270_v63  ;;  %v273_v8 = vld [vmem:[%s8542_s14 + $0x98] sm:$0xff]  ;;  %v762_v9 = vld [vmem:[%s12474_s5] sm:$0xff]  ;;  %v699_v16 = vld [vmem:[%s12473_s4 + $0x8] sm:$0xff] }
  0x1c   : > { %614 = vmatpush.bf16.msra.mxu2 %v7414_v48  ;;  %v8666_v11 = vpack.c.bf16 %v273_v8, %v272_v7  ;;  %v763_v17 = vld [vmem:[%s12474_s5 + $0x8] sm:$0xff]  ;;  %v700_v25 = vld [vmem:[%s12473_s4 + $0x10] sm:$0xff]  ;;  %v701_v39 = vld [vmem:[%s12473_s4 + $0x18] sm:$0xff] }
  0x1d   : > { %7442 = vmatmul.msk.bf16.vlgmr.msra.gmra.mxu1 %vm382_vm0, %v8566_v21  ;;  %7427 = vmatmul.msk.bf16.vlgmr.msra.gmra.mxu0 %vm382_vm0, %v286_v22  ;;  %v275_v27 = vld [vmem:[%s8542_s14 + $0xa8] sm:$0xff]  ;;  %v765_v40 = vld [vmem:[%s12474_s5 + $0x18] sm:$0xff]  ;;  %v702_v47 = vld [vmem:[%s12473_s4 + $0x20] sm:$0xff] }
  0x1e   : > { %524 = vmatpush.bf16.msrb.mxu1 %v7422_v18  ;;  %v276_v48 = vld [vmem:[%s8542_s14 + $0xb0] sm:$0xff]  ;;  %v277_v49 = vld [vmem:[%s8542_s14 + $0xb8] sm:$0xff]  ;;  %v766_v51 = vld [vmem:[%s12474_s5 + $0x20] sm:$0xff] }
  0x1f   : > { %v8710_v55 = vpack.c.bf16 %v277_v49, %v276_v48  ;;  %v703_v63 = vld [vmem:[%s12473_s4 + $0x28] sm:$0xff] }
  0x20   : > { %615 = vmatpush.bf16.msra.mxu2 %v7402_v50  ;;  %v767_v0 = vld [vmem:[%s12474_s5 + $0x28] sm:$0xff] }
  0x22   : > { %525 = vmatpush.bf16.msrb.mxu1 %v7410_v23 }
  0x24   : > { %616 = vmatpush.bf16.msra.mxu2 %v7390_v53 }
  0x26   : > { %526 = vmatpush.bf16.msrb.mxu1 %v7398_v26  ;;  %v274_v26 = vld [vmem:[%s8542_s14 + $0xa0] sm:$0xff] }
  0x27   : > { %7459 = vmatmul.msk.bf16.vlgmr.msra.gmra.mxu2 %vm382_vm0, %v286_v22  ;;  %v8687_v33 = vpack.c.bf16 %v275_v27, %v274_v26  ;;  %v769_v26 = vld [vmem:[%s12474_s5 + $0x38] sm:$0xff] }
  0x2a   : > { %527 = vmatpush.bf16.msrb.mxu1 %v7386_v29  ;;  %v764_v29 = vld [vmem:[%s12474_s5 + $0x10] sm:$0xff] }
  0x2d   : > { %7443 = vmatmul.msk.bf16.vlgmr.msrb.gmra.mxu1 %vm382_vm0, %v286_v22  ;;  %7428 = vmatmul.msk.bf16.gmra.mxu0 %vm382_vm0, %v287_v32 }
  0x37   : > { %7460 = vmatmul.msk.bf16.gmra.mxu2 %vm382_vm0, %v287_v32 }
  0x3d   : > { %7444 = vmatmul.msk.bf16.gmra.mxu1 %vm382_vm0, %v287_v32  ;;  %7429 = vmatmul.msk.bf16.gmra.mxu0 %vm382_vm0, %v288_v35 }
  0x47   : > { %7461 = vmatmul.msk.bf16.gmra.mxu2 %vm382_vm0, %v288_v35 }
  0x4d   : > { %7445 = vmatmul.msk.bf16.gmra.mxu1 %vm382_vm0, %v288_v35  ;;  %7430 = vmatmul.msk.bf16.gmra.mxu0 %vm382_vm0, %v289_v38 }
  0x57   : > { %7462 = vmatmul.msk.bf16.gmra.mxu2 %vm382_vm0, %v289_v38 }
  0x5d   : > { %7446 = vmatmul.msk.bf16.gmra.mxu1 %vm382_vm0, %v289_v38  ;;  %7431 = vmatmul.msk.bf16.gmra.mxu0 %vm382_vm0, %v290_v44 }
  0x67   : > { %7463 = vmatmul.msk.bf16.gmra.mxu2 %vm382_vm0, %v290_v44 }
  0x6d   : > { %7447 = vmatmul.msk.bf16.gmra.mxu1 %vm382_vm0, %v290_v44  ;;  %7432 = vmatmul.msk.bf16.gmra.mxu0 %vm382_vm0, %v291_v56 }
  0x77   : > { %7464 = vmatmul.msk.bf16.gmra.mxu2 %vm382_vm0, %v291_v56 }
  0x7d   : > { %7448 = vmatmul.msk.bf16.gmra.mxu1 %vm382_vm0, %v291_v56  ;;  %7433 = vmatmul.msk.bf16.gmra.mxu0 %vm382_vm0, %v8630_v59 }
  0x87   : > { %7465 = vmatmul.msk.bf16.gmra.mxu2 %vm382_vm0, %v8630_v59 }
  0x8d   : > { %7449 = vmatmul.msk.bf16.gmra.mxu1 %vm382_vm0, %v8630_v59  ;;  %7434 = vmatmul.msk.bf16.gmra.mxu0 %vm382_vm0, %v8638_v62 }
  0x97   : > { %7466 = vmatmul.msk.bf16.gmra.mxu2 %vm382_vm0, %v8638_v62 }
  0x9a   : > { %v8649_v2 = vpop.f32.mrf.mxu1  ;;  %v440_v3 = vpop.f32.mrf.mxu0 }
  0x9b   : > { %v730_v10 = vmul.f32 %v698_v6, %v440_v3 }
  0x9d   : > { %7450 = vmatmul.msk.bf16.gmra.mxu1 %vm382_vm0, %v8638_v62  ;;  %7435 = vmatmul.msk.bf16.gmra.mxu0 %vm382_vm0, %v8647_v1 }
  0xa2   : > { %v8656_v4 = vpop.f32.mrf.mxu1  ;;  %v442_v5 = vpop.f32.mrf.mxu0 }
  0xa3   : > { %v731_v18 = vmul.f32 %v699_v16, %v442_v5 }
  0xa7   : > { %7467 = vmatmul.msk.bf16.gmra.mxu2 %vm382_vm0, %v8647_v1 }
  0xaa   : > { %v529_v12 = vpop.f32.mrf.mxu1  ;;  %v445_v13 = vpop.f32.mrf.mxu0 }
  0xab   : > { %v794_v14 = vmul.f32 %v762_v9, %v529_v12  ;;  %v732_v32 = vmul.f32 %v700_v25, %v445_v13  ;;  %v704_v9 = vld [vmem:[%s12473_s4 + $0x30] sm:$0xff]  ;;  %v279_v12 = vld [vmem:[%s8542_s14 + $0xc8] sm:$0xff]  ;;  %v705_v25 = vld [vmem:[%s12473_s4 + $0x38] sm:$0xff]  ;;  %v618_v48 = vpop.f32.mrf.mxu2 }
  0xad   : > { %v826_v15 = vadd.f32 %v794_v14, %v730_v10  ;;  %7451 = vmatmul.msk.bf16.gmra.mxu1 %vm382_vm0, %v8647_v1  ;;  %7436 = vmatmul.msk.bf16.gmra.mxu0 %vm382_vm0, %v8666_v11  ;;  %v278_v10 = vld [vmem:[%s8542_s14 + $0xc0] sm:$0xff]  ;;  %v768_v14 = vld [vmem:[%s12474_s5 + $0x30] sm:$0xff] }
  0xae   : > { %v708_v1 = vld [vmem:[%s12473_s4 + $0x50] sm:$0xff] }
  0xaf   : > { %v858_v23 = vpack.c.bf16 %v826_v15, %v826_v15 }
  0xb1   : > { %v954_v30 = vunpack.c.l.b16 %v858_v23 }
  0xb2   : > { %v531_v19 = vpop.f32.mrf.mxu1  ;;  %v447_v20 = vpop.f32.mrf.mxu0 }
  0xb3   : > { %v795_v22 = vmul.f32 %v763_v17, %v531_v19  ;;  %v733_v41 = vmul.f32 %v701_v39, %v447_v20 }
  0xb5   : > { %v827_v24 = vadd.f32 %v795_v22, %v731_v18  ;;  %v8734_v18 = vpack.c.bf16 %v279_v12, %v278_v10 }
  0xb7   : > { %v859_v28 = vpack.c.bf16 %v827_v24, %v827_v24  ;;  %7468 = vmatmul.msk.bf16.gmra.mxu2 %vm382_vm0, %v8666_v11 }
  0xb9   : > { %v955_v31 = vunpack.c.l.b16 %v859_v28 }
  0xba   : > { %v534_v34 = vpop.f32.mrf.mxu1  ;;  %v450_v35 = vpop.f32.mrf.mxu0 }
  0xbb   : > { %v8689_v36 = vpack.c.b16 %v955_v31, %v954_v30  ;;  %v796_v37 = vmul.f32 %v764_v29, %v534_v34  ;;  %v734_v54 = vmul.f32 %v702_v47, %v450_v35  ;;  %v280_v34 = vld [vmem:[%s8542_s14 + $0xd0] sm:$0xff]  ;;  %v281_v35 = vld [vmem:[%s8542_s14 + $0xd8] sm:$0xff] }
  0xbd   : > { %12630 = vst [vmem:[#allocation3_spill] sm:$0xff] %v8689_v36  ;;  %v828_v38 = vadd.f32 %v796_v37, %v732_v32  ;;  %7452 = vmatmul.msk.bf16.gmra.mxu1 %vm382_vm0, %v8666_v11  ;;  %7437 = vmatmul.msk.bf16.gmra.mxu0 %vm382_vm0, %v8687_v33  ;;  %v706_v32 = vld [vmem:[%s12473_s4 + $0x40] sm:$0xff]  ;;  %v773_v11 = vld [vmem:[%s12474_s5 + $0x58] sm:$0xff] }
  0xbf   : > { %v860_v45 = vpack.c.bf16 %v828_v38, %v828_v38  ;;  %v770_v38 = vld [vmem:[%s12474_s5 + $0x40] sm:$0xff] }
  0xc1   : > { %v956_v52 = vunpack.c.l.b16 %v860_v45 }
  0xc2   : > { %v536_v42 = vpop.f32.mrf.mxu1  ;;  %v452_v43 = vpop.f32.mrf.mxu0 }
  0xc3   : > { %v797_v44 = vmul.f32 %v765_v40, %v536_v42  ;;  %v735_v3 = vmul.f32 %v703_v63, %v452_v43  ;;  %v8760_v42 = vpack.c.bf16 %v281_v35, %v280_v34 }
  0xc5   : > { %v829_v46 = vadd.f32 %v797_v44, %v733_v41 }
  0xc7   : > { %v861_v50 = vpack.c.bf16 %v829_v46, %v829_v46  ;;  %7469 = vmatmul.msk.bf16.gmra.mxu2 %vm382_vm0, %v8687_v33 }
  0xc9   : > { %v957_v53 = vunpack.c.l.b16 %v861_v50 }
  0xca   : > { %v539_v56 = vpop.f32.mrf.mxu1  ;;  %v455_v57 = vpop.f32.mrf.mxu0 }
  0xcb   : > { %v8712_v58 = vpack.c.b16 %v957_v53, %v956_v52  ;;  %v798_v60 = vmul.f32 %v766_v51, %v539_v56  ;;  %v736_v17 = vmul.f32 %v704_v9, %v455_v57  ;;  %v282_v51 = vld [vmem:[%s8542_s14 + $0xe0] sm:$0xff]  ;;  %v283_v52 = vld [vmem:[%s8542_s14 + $0xe8] sm:$0xff]  ;;  %v620_v53 = vpop.f32.mrf.mxu2 }
  0xcc   : > { %v8776_v56 = vpack.c.bf16 %v283_v52, %v282_v51 }
  0xcd   : > { %12631 = vst [vmem:[#allocation4_spill] sm:$0xff] %v8712_v58  ;;  %v830_v61 = vadd.f32 %v798_v60, %v734_v54  ;;  %7453 = vmatmul.msk.bf16.gmra.mxu1 %vm382_vm0, %v8687_v33  ;;  %7438 = vmatmul.msk.bf16.gmra.mxu0 %vm382_vm0, %v8710_v55  ;;  %v890_v54 = vpack.c.bf16 %v618_v48, %v618_v48  ;;  %v772_v60 = vld [vmem:[%s12474_s5 + $0x50] sm:$0xff]  ;;  %v775_v33 = vld [vmem:[%s12474_s5 + $0x68] sm:$0xff] }
  0xcf   : > { %v862_v59 = vpack.c.bf16 %v830_v61, %v830_v61  ;;  %v1967_v63 = vunpack.c.l.b16 %v890_v54 }
  0xd1   : > { %v958_v15 = vunpack.c.l.b16 %v862_v59 }
  0xd2   : > { %v541_v5 = vpop.f32.mrf.mxu1  ;;  %v457_v6 = vpop.f32.mrf.mxu0 }
  0xd3   : > { %v799_v7 = vmul.f32 %v767_v0, %v541_v5  ;;  %v737_v27 = vmul.f32 %v705_v25, %v457_v6  ;;  %v891_v0 = vpack.c.bf16 %v620_v53, %v620_v53  ;;  %v623_v59 = vpop.f32.mrf.mxu2  ;;  %v710_v25 = vld [vmem:[%s12473_s4 + $0x60] sm:$0xff] }
  0xd5   : > { %v831_v8 = vadd.f32 %v799_v7, %v735_v3  ;;  %v1968_v6 = vunpack.c.l.b16 %v891_v0  ;;  %v709_v7 = vld [vmem:[%s12473_s4 + $0x58] sm:$0xff] }
  0xd7   : > { %v863_v13 = vpack.c.bf16 %v831_v8, %v831_v8  ;;  %v8793_v8 = vpack.c.b16 %v1968_v6, %v1967_v63  ;;  %7470 = vmatmul.msk.bf16.gmra.mxu2 %vm382_vm0, %v8710_v55 }
  0xd9   : > { %v959_v16 = vunpack.c.l.b16 %v863_v13  ;;  %12634 = vst [vmem:[#allocation7_spill] sm:$0xff] %v8793_v8 }
  0xda   : > { %v544_v19 = vpop.f32.mrf.mxu1  ;;  %v460_v20 = vpop.f32.mrf.mxu0 }
  0xdb   : > { %v8736_v22 = vpack.c.b16 %v959_v16, %v958_v15  ;;  %v800_v23 = vmul.f32 %v768_v14, %v544_v19  ;;  %v738_v41 = vmul.f32 %v706_v32, %v460_v20  ;;  %v892_v20 = vpack.c.bf16 %v623_v59, %v623_v59 }
  0xdd   : > { %12632 = vst [vmem:[#allocation5_spill] sm:$0xff] %v8736_v22  ;;  %v832_v24 = vadd.f32 %v800_v23, %v736_v17  ;;  %7454 = vmatmul.msk.bf16.gmra.mxu1 %vm382_vm0, %v8710_v55  ;;  %7439 = vmatmul.msk.bf16.gmra.mxu0 %vm382_vm0, %v8734_v18  ;;  %v625_v17 = vpop.f32.mrf.mxu2  ;;  %v777_v55 = vld [vmem:[%s12474_s5 + $0x78] sm:$0xff] }
  0xdf   : > { %v864_v30 = vpack.c.bf16 %v832_v24, %v832_v24 }
  0xe1   : > { %v960_v39 = vunpack.c.l.b16 %v864_v30  ;;  %v1969_v30 = vunpack.c.l.b16 %v892_v20  ;;  %v714_v20 = vld [vmem:[%s12473_s4 + $0x80] sm:$0xff] }
  0xe2   : > { %v546_v28 = vpop.f32.mrf.mxu1  ;;  %v8750_v29 = vpop.f32.mrf.mxu0 }
  0xe3   : > { %v801_v62 = vmul.f32 %v769_v26, %v546_v28 }
  0xe5   : > { %v833_v31 = vadd.f32 %v801_v62, %v737_v27  ;;  %v774_v27 = vld [vmem:[%s12474_s5 + $0x60] sm:$0xff] }
  0xe7   : > { %v865_v37 = vpack.c.bf16 %v833_v31, %v833_v31  ;;  %v893_v31 = vpack.c.bf16 %v625_v17, %v625_v17  ;;  %7471 = vmatmul.msk.bf16.gmra.mxu2 %vm382_vm0, %v8734_v18 }
  0xe9   : > { %v961_v40 = vunpack.c.l.b16 %v865_v37  ;;  %v1970_v35 = vunpack.c.l.b16 %v893_v31  ;;  %v711_v37 = vld [vmem:[%s12473_s4 + $0x68] sm:$0xff] }
  0xea   : > { %v549_v43 = vpop.f32.mrf.mxu1  ;;  %v465_v44 = vpop.f32.mrf.mxu0 }
  0xeb   : > { %v8762_v45 = vpack.c.b16 %v961_v40, %v960_v39  ;;  %v802_v46 = vmul.f32 %v770_v38, %v549_v43  ;;  %v740_v3 = vmul.f32 %v708_v1, %v465_v44  ;;  %v628_v38 = vpop.f32.mrf.mxu2  ;;  %v8815_v39 = vpack.c.b16 %v1970_v35, %v1969_v30 }
  0xec   : > { %v894_v53 = vpack.c.bf16 %v628_v38, %v628_v38 }
  0xed   : > { %12633 = vst [vmem:[#allocation6_spill] sm:$0xff] %v8762_v45  ;;  %v8766_v47 = vadd.f32 %v802_v46, %v738_v41  ;;  %7455 = vmatmul.msk.bf16.gmra.mxu1 %vm382_vm0, %v8734_v18  ;;  %7440 = vmatmul.msk.bf16.gmra.mxu0 %vm382_vm0, %v8760_v42  ;;  %v780_v18 = vld [vmem:[%s12474_s5 + $0x90] sm:$0xff] }
  0xee   : > { %12636 = vst [vmem:[#allocation9_spill] sm:$0xff] %v8815_v39 }
  0xf2   : > { %v8772_v49 = vpop.f32.mrf.mxu1  ;;  %v467_v50 = vpop.f32.mrf.mxu0 }
  0xf3   : > { %v741_v10 = vmul.f32 %v709_v7, %v467_v50  ;;  %v630_v51 = vpop.f32.mrf.mxu2 }
  0xf7   : > { %7472 = vmatmul.msk.bf16.gmra.mxu2 %vm382_vm0, %v8760_v42 }
  0xfa   : > { %v554_v57 = vpop.f32.mrf.mxu1  ;;  %v470_v61 = vpop.f32.mrf.mxu0 }
  0xfb   : > { %v804_v5 = vmul.f32 %v772_v60, %v554_v57  ;;  %v742_v32 = vmul.f32 %v710_v25, %v470_v61  ;;  %v712_v57 = vld [vmem:[%s12473_s4 + $0x70] sm:$0xff] }
  0xfc   : > { %v776_v61 = vld [vmem:[%s12474_s5 + $0x70] sm:$0xff] }
  0xfd   : > { %7456 = vmatmul.msk.bf16.gmra.mxu1 %vm382_vm0, %v8760_v42  ;;  %7441 = vmatmul.msk.bf16.gmra.mxu0 %vm382_vm0, %v8776_v56  ;;  %v836_v9 = vadd.f32 %v804_v5, %v740_v3  ;;  %v1971_v3 = vunpack.c.l.b16 %v894_v53  ;;  %v895_v5 = vpack.c.bf16 %v630_v51, %v630_v51 }
  0xff   : > { %v868_v15 = vpack.c.bf16 %v836_v9, %v836_v9  ;;  %v1972_v59 = vunpack.c.l.b16 %v895_v5  ;;  %v633_v9 = vpop.f32.mrf.mxu2  ;;  %v782_v5 = vld [vmem:[%s12474_s5 + $0xa0] sm:$0xff] }
 0x100   : > { %v896_v25 = vpack.c.bf16 %v633_v9, %v633_v9 }
 0x101   : > { %v964_v23 = vunpack.c.l.b16 %v868_v15 }
 0x102   : > { %v556_v12 = vpop.f32.mrf.mxu1  ;;  %v472_v13 = vpop.f32.mrf.mxu0 }
 0x103   : > { %v805_v14 = vmul.f32 %v773_v11, %v556_v12  ;;  %v743_v41 = vmul.f32 %v711_v37, %v472_v13  ;;  %v713_v11 = vld [vmem:[%s12473_s4 + $0x78] sm:$0xff]  ;;  %v1973_v37 = vunpack.c.l.b16 %v896_v25 }
 0x105   : > { %v837_v16 = vadd.f32 %v805_v14, %v741_v10  ;;  %v8837_v10 = vpack.c.b16 %v1972_v59, %v1971_v3 }
 0x107   : > { %v869_v19 = vpack.c.bf16 %v837_v16, %v837_v16  ;;  %12638 = vst [vmem:[#allocation11_spill] sm:$0xff] %v8837_v10  ;;  %7473 = vmatmul.msk.bf16.gmra.mxu2 %vm382_vm0, %v8776_v56 }
 0x109   : > { %v965_v24 = vunpack.c.l.b16 %v869_v19 }
 0x10a   : > { %v559_v26 = vpop.f32.mrf.mxu1  ;;  %v475_v28 = vpop.f32.mrf.mxu0 }
 0x10b   : > { %v8804_v62 = vpack.c.b16 %v965_v24, %v964_v23  ;;  %v806_v34 = vmul.f32 %v774_v27, %v559_v26  ;;  %v744_v6 = vmul.f32 %v712_v57, %v475_v28  ;;  %v635_v23 = vpop.f32.mrf.mxu2  ;;  %v778_v26 = vld [vmem:[%s12474_s5 + $0x80] sm:$0xff] }
 0x10c   : > { %v897_v38 = vpack.c.bf16 %v635_v23, %v635_v23 }
 0x10d   : > { %12635 = vst [vmem:[#allocation8_spill] sm:$0xff] %v8804_v62  ;;  %7457 = vmatmul.msk.bf16.gmra.mxu1 %vm382_vm0, %v8776_v56  ;;  %1012 = vrot.lane.b32.xlu2 %v8804_v62, %s8464_s18  ;;  %v838_v40 = vadd.f32 %v806_v34, %v742_v32 }
 0x10f   : > { %v870_v48 = vpack.c.bf16 %v838_v40, %v838_v40  ;;  %v1974_v40 = vunpack.c.l.b16 %v897_v38  ;;  %v788_v38 = vld [vmem:[%s12474_s5 + $0xd0] sm:$0xff] }
 0x111   : > { %v966_v54 = vunpack.c.l.b16 %v870_v48  ;;  %v716_v48 = vld [vmem:[%s12473_s4 + $0x90] sm:$0xff] }
 0x112   : > { %v561_v43 = vpop.f32.mrf.mxu1  ;;  %v477_v44 = vpop.f32.mrf.mxu0 }
 0x113   : > { %v807_v46 = vmul.f32 %v775_v33, %v561_v43  ;;  %v745_v13 = vmul.f32 %v713_v11, %v477_v44  ;;  %v8860_v43 = vpack.c.b16 %v1974_v40, %v1973_v37 }
 0x115   : > { %v839_v50 = vadd.f32 %v807_v46, %v743_v41  ;;  %v8858_v41 = vpop.f32.mrf.mxu2  ;;  %12640 = vst [vmem:[#allocation13_spill] sm:$0xff] %v8860_v43 }
 0x117   : > { %v871_v52 = vpack.c.bf16 %v839_v50, %v839_v50  ;;  %7474 = vmatmul.msk.bf16.gmra.mxu2 %vm382_vm0, %v8566_v21 }
 0x119   : > { %v967_v1 = vunpack.c.l.b16 %v871_v52 }
 0x11a   : > { %v564_v60 = vpop.f32.mrf.mxu1  ;;  %v480_v63 = vpop.f32.mrf.mxu0 }
 0x11b   : > { %v8826_v0 = vpack.c.b16 %v967_v1, %v966_v54  ;;  %v808_v7 = vmul.f32 %v776_v61, %v564_v60  ;;  %v746_v30 = vmul.f32 %v714_v20, %v480_v63  ;;  %v718_v63 = vld [vmem:[%s12473_s4 + $0xa0] sm:$0xff] }
 0x11d   : > { %12637 = vst [vmem:[#allocation10_spill] sm:$0xff] %v8826_v0  ;;  %7458 = vmatmul.msk.bf16.gmra.mxu1 %vm382_vm0, %v8566_v21  ;;  %1014 = vrot.lane.b32.xlu1 %v8826_v0, %s8464_s18  ;;  %v840_v12 = vadd.f32 %v808_v7, %v744_v6  ;;  %v8869_v50 = vpop.f32.mrf.mxu2  ;;  %v724_v21 = vld [vmem:[%s12473_s4 + $0xd0] sm:$0xff] }
 0x11f   : > { %v872_v17 = vpack.c.bf16 %v840_v12, %v840_v12 }
 0x121   : > { %v968_v27 = vunpack.c.l.b16 %v872_v17 }
 0x122   : > { %v566_v14 = vpop.f32.mrf.mxu1  ;;  %v8842_v15 = vpop.f32.mrf.mxu0 }
 0x123   : > { %v809_v16 = vmul.f32 %v777_v55, %v566_v14 }
 0x125   : > { %v841_v19 = vadd.f32 %v809_v16, %v745_v13  ;;  %v8878_v57 = vpop.f32.mrf.mxu2  ;;  %v720_v13 = vld [vmem:[%s12473_s4 + $0xb0] sm:$0xff] }
 0x126   : > { %v784_v16 = vld [vmem:[%s12474_s5 + $0xb0] sm:$0xff] }
 0x127   : > { %v873_v24 = vpack.c.bf16 %v841_v19, %v841_v19 }
 0x129   : > { %v969_v28 = vunpack.c.l.b16 %v873_v24 }
 0x12a   : > { %v569_v31 = vpop.f32.mrf.mxu1  ;;  %v485_v32 = vpop.f32.mrf.mxu0 }
 0x12b   : > { %v8850_v34 = vpack.c.b16 %v969_v28, %v968_v27  ;;  %v810_v35 = vmul.f32 %v778_v26, %v569_v31  ;;  %v748_v51 = vmul.f32 %v716_v48, %v485_v32 }
 0x12d   : > { %12639 = vst [vmem:[#allocation12_spill] sm:$0xff] %v8850_v34  ;;  %v8854_v33 = vadd.f32 %v810_v35, %v746_v30  ;;  %1016 = vrot.lane.b32.xlu0 %v8850_v34, %s8464_s18  ;;  %v8885_v3 = vpop.f32.mrf.mxu2 }
 0x132   : > { %v8862_v44 = vpop.f32.mrf.mxu1  ;;  %v8864_v46 = vpop.f32.mrf.mxu0 }
 0x135   : > { %v8894_v9 = vpop.f32.mrf.mxu2 }
 0x13a   : > { %v574_v52 = vpop.f32.mrf.mxu1  ;;  %v490_v53 = vpop.f32.mrf.mxu0 }
 0x13b   : > { %v812_v54 = vmul.f32 %v780_v18, %v574_v52  ;;  %v750_v6 = vmul.f32 %v718_v63, %v490_v53  ;;  %v789_v52 = vld [vmem:[%s12474_s5 + $0xd8] sm:$0xff] }
 0x13d   : > { %v8876_v1 = vadd.f32 %v812_v54, %v748_v51  ;;  %v8901_v14 = vpop.f32.mrf.mxu2  ;;  %v725_v51 = vld [vmem:[%s12473_s4 + $0xd8] sm:$0xff] }
 0x142   : > { %v8880_v60 = vpop.f32.mrf.mxu1  ;;  %v492_v61 = vpop.f32.mrf.mxu0 }
 0x145   : > { %v8910_v24 = vpop.f32.mrf.mxu2 }
 0x14a   : > { %v579_v7 = vpop.f32.mrf.mxu1  ;;  %v495_v42 = vpop.f32.mrf.mxu0 }
 0x14b   : > { %v814_v59 = vmul.f32 %v782_v5, %v579_v7  ;;  %v752_v17 = vmul.f32 %v720_v13, %v495_v42 }
 0x14d   : > { %v8892_v11 = vadd.f32 %v814_v59, %v750_v6  ;;  %v8914_v27 = vpop.f32.mrf.mxu2 }
 0x152   : > { %v581_v55 = vpop.f32.mrf.mxu1  ;;  %v8896_v12 = vpop.f32.mrf.mxu0 }
 0x155   : > { %v8916_v30 = vpop.f32.mrf.mxu2 }
 0x156   : > { %12641 = vst [vmem:[#allocation14_spill] sm:$0xff] %v8916_v30 }
 0x15a   : > { %v584_v19 = vpop.f32.mrf.mxu1  ;;  %v500_v20 = vpop.f32.mrf.mxu0 }
 0x15b   : > { %v816_v56 = vmul.f32 %v784_v16, %v584_v19  ;;  %v719_v16 = vld [vmem:[%s12473_s4 + $0xa8] sm:$0xff] }
 0x15d   : > { %v8908_v23 = vadd.f32 %v816_v56, %v752_v17  ;;  %v8918_v35 = vpop.f32.mrf.mxu2  ;;  %v783_v17 = vld [vmem:[%s12474_s5 + $0xa8] sm:$0xff] }
 0x15e   : > { %12642 = vst [vmem:[#allocation15_spill] sm:$0xff] %v8918_v35 }
 0x162   : > { %v8912_v25 = vpop.f32.mrf.mxu1  ;;  %v502_v26 = vpop.f32.mrf.mxu0 }
 0x165   : > { %v8932_v53 = vpop.f32.mrf.mxu2 }
 0x16a   : > { %v589_v28 = vpop.f32.mrf.mxu1  ;;  %v505_v31 = vpop.f32.mrf.mxu0 }
 0x16b   : > { %v756_v48 = vmul.f32 %v724_v21, %v505_v31  ;;  %v726_v31 = vld [vmem:[%s12473_s4 + $0xe0] sm:$0xff] }
 0x172   : > { %v591_v32 = vpop.f32.mrf.mxu1  ;;  %v507_v40 = vpop.f32.mrf.mxu0 }
 0x173   : > { %v757_v63 = vmul.f32 %v725_v51, %v507_v40  ;;  %v751_v40 = vmul.f32 %v719_v16, %v492_v61  ;;  %v787_v61 = vld [vmem:[%s12474_s5 + $0xc8] sm:$0xff] }
 0x17a   : > { %v594_v37 = vpop.f32.mrf.mxu1  ;;  %v510_v7 = vpop.f32.mrf.mxu0 }
 0x17b   : > { %v820_v18 = vmul.f32 %v788_v38, %v594_v37  ;;  %v790_v37 = vld [vmem:[%s12474_s5 + $0xe0] sm:$0xff]  ;;  %v8946_v38 = vpop.f32.mrf.mxu2  ;;  %v758_v51 = vmul.f32 %v726_v31, %v510_v7 }
 0x17d   : > { %v852_v54 = vadd.f32 %v820_v18, %v756_v48  ;;  %v815_v48 = vmul.f32 %v783_v17, %v581_v55  ;;  %v791_v55 = vld [vmem:[%s12474_s5 + $0xe8] sm:$0xff] }
 0x17f   : > { %v884_v42 = vpack.c.bf16 %v852_v54, %v852_v54 }
 0x181   : > { %v980_v19 = vunpack.c.l.b16 %v884_v42 }
 0x182   : > { %v596_v5 = vpop.f32.mrf.mxu1  ;;  %v512_v54 = vpop.f32.mrf.mxu0 }
 0x183   : > { %v821_v6 = vmul.f32 %v789_v52, %v596_v5  ;;  %v847_v5 = vadd.f32 %v815_v48, %v751_v40 }
 0x185   : > { %v853_v59 = vadd.f32 %v821_v6, %v757_v63  ;;  %v727_v63 = vld [vmem:[%s12473_s4 + $0xe8] sm:$0xff]  ;;  %v879_v17 = vpack.c.bf16 %v847_v5, %v847_v5 }
 0x186   : > { %v723_v6 = vld [vmem:[%s12473_s4 + $0xc8] sm:$0xff]  ;;  %v759_v42 = vmul.f32 %v727_v63, %v512_v54 }
 0x187   : > { %v885_v13 = vpack.c.bf16 %v853_v59, %v853_v59  ;;  %v722_v59 = vld [vmem:[%s12473_s4 + $0xc0] sm:$0xff]  ;;  %v975_v54 = vunpack.c.l.b16 %v879_v17  ;;  %v707_v17 = vld [vmem:[%s12473_s4 + $0x48] sm:$0xff] }
 0x188   : > { %v754_v40 = vmul.f32 %v722_v59, %v500_v20  ;;  %v729_v59 = vld [vmem:[%s12473_s4 + $0xf8] sm:$0xff] }
 0x189   : > { %v981_v56 = vunpack.c.l.b16 %v885_v13  ;;  %v786_v13 = vld [vmem:[%s12474_s5 + $0xc0] sm:$0xff] }
 0x18a   : > { %v599_v21 = vpop.f32.mrf.mxu1  ;;  %v818_v48 = vmul.f32 %v786_v13, %v589_v28 }
 0x18b   : > { %v8948_v18 = vpack.c.b16 %v981_v56, %v980_v19  ;;  %v822_v52 = vmul.f32 %v790_v37, %v599_v21  ;;  %v755_v19 = vmul.f32 %v723_v6, %v502_v26  ;;  %v819_v56 = vmul.f32 %v787_v61, %v591_v32  ;;  %v8972_v37 = vpop.f32.mrf.mxu2 }
 0x18c   : > { %v878_v21 = vpack.c.bf16 %v8892_v11, %v8892_v11  ;;  %v850_v5 = vadd.f32 %v818_v48, %v754_v40  ;;  %v792_v11 = vld [vmem:[%s12474_s5 + $0xf0] sm:$0xff] }
 0x18d   : > { %12643 = vst [vmem:[#allocation16_spill] sm:$0xff] %v8948_v18  ;;  %1028 = vrot.lane.b32.xlu2 %v8948_v18, %s8464_s18  ;;  %v854_v7 = vadd.f32 %v822_v52, %v758_v51  ;;  %v851_v63 = vadd.f32 %v819_v56, %v755_v19  ;;  %v771_v19 = vld [vmem:[%s12474_s5 + $0x48] sm:$0xff] }
 0x18e   : > { %v974_v30 = vunpack.c.l.b16 %v878_v21  ;;  %v781_v21 = vld [vmem:[%s12474_s5 + $0x98] sm:$0xff] }
 0x18f   : > { %v886_v51 = vpack.c.bf16 %v854_v7, %v854_v7  ;;  %v883_v20 = vpack.c.bf16 %v851_v63, %v851_v63  ;;  %v882_v7 = vpack.c.bf16 %v850_v5, %v850_v5  ;;  %v803_v63 = vmul.f32 %v771_v19, %v8772_v49  ;;  %v721_v49 = vld [vmem:[%s12473_s4 + $0xb8] sm:$0xff] }
 0x190   : > { %v8979_v61 = vpack.c.b16 %v975_v54, %v974_v30  ;;  %v739_v54 = vmul.f32 %v707_v17, %v8750_v29 }
 0x191   : > { %v982_v26 = vunpack.c.l.b16 %v886_v51  ;;  %v979_v13 = vunpack.c.l.b16 %v883_v20  ;;  %v978_v40 = vunpack.c.l.b16 %v882_v7  ;;  %v761_v51 = vmul.f32 %v729_v59, %v8656_v4 }
 0x192   : > { %v601_v16 = vpop.f32.mrf.mxu1  ;;  %12644 = vst [vmem:[#allocation17_spill] sm:$0xff] %v8979_v61  ;;  %v835_v4 = vadd.f32 %v803_v63, %v739_v54 }
 0x193   : > { %v823_v31 = vmul.f32 %v791_v55, %v601_v16  ;;  %v728_v55 = vld [vmem:[%s12473_s4 + $0xf0] sm:$0xff]  ;;  %v9015_v5 = vpack.c.b16 %v979_v13, %v978_v40 }
 0x194   : > { %v760_v30 = vmul.f32 %v728_v55, %v8649_v2  ;;  %v793_v2 = vld [vmem:[%s12474_s5 + $0xf8] sm:$0xff]  ;;  %v867_v13 = vpack.c.bf16 %v835_v4, %v835_v4 }
 0x195   : > { %v855_v52 = vadd.f32 %v823_v31, %v759_v42  ;;  %1008 = vrot.lane.b32.xlu2 %v8762_v45, %s8464_s18  ;;  %v717_v31 = vld [vmem:[%s12473_s4 + $0x98] sm:$0xff]  ;;  %12645 = vst [vmem:[#allocation18_spill] sm:$0xff] %v9015_v5 }
 0x197   : > { %v887_v35 = vpack.c.bf16 %v855_v52, %v855_v52 }
 0x199   : > { %v983_v32 = vunpack.c.l.b16 %v887_v35  ;;  %v8990_v35 = vpop.f32.mrf.mxu2 }
 0x19a   : > { %v604_v6 = vpop.f32.mrf.mxu1 }
 0x19b   : > { %v8981_v28 = vpack.c.b16 %v983_v32, %v982_v26  ;;  %v824_v42 = vmul.f32 %v792_v11, %v604_v6  ;;  %v749_v32 = vmul.f32 %v717_v31, %v8864_v46  ;;  %v813_v6 = vmul.f32 %v781_v21, %v8880_v60  ;;  %v1015_v11 = vpop.permute.xlu1 %1014  ;;  %v785_v46 = vld [vmem:[%s12474_s5 + $0xb8] sm:$0xff]  ;;  %v1013_v31 = vpop.permute.xlu2 %1012 }
 0x19c   : > { %v1102_v60 = vsel %vm1034_vm1, %v1015_v11, 0  ;;  %v817_v17 = vmul.f32 %v785_v46, %v8912_v25  ;;  %v876_v21 = vpack.c.bf16 %v8876_v1, %v8876_v1  ;;  %v880_v1 = vpack.c.bf16 %v8908_v23, %v8908_v23  ;;  %v779_v11 = vld [vmem:[%s12474_s5 + $0x88] sm:$0xff] }
 0x19d   : > { %1022 = vrot.lane.b32.xlu2 %v8979_v61, %s8464_s18  ;;  %1030 = vrot.lane.b32.xlu1 %v8981_v28, %s8464_s18  ;;  %v856_v48 = vadd.f32 %v824_v42, %v760_v30  ;;  %v845_v7 = vadd.f32 %v813_v6, %v749_v32  ;;  %v715_v6 = vld [vmem:[%s12473_s4 + $0x88] sm:$0xff] }
 0x19e   : > { %v747_v23 = vmul.f32 %v715_v6, %v8842_v15  ;;  %v874_v15 = vpack.c.bf16 %v8854_v33, %v8854_v33 }
 0x19f   : > { %v1017_v16 = vpop.permute.xlu0 %1016  ;;  %v888_v20 = vpack.c.bf16 %v856_v48, %v856_v48  ;;  %v1099_v48 = vsel %vm1034_vm1, %v1013_v31, 0 }
 0x1a0   : > { %v1105_v56 = vsel %vm1034_vm1, %v1017_v16, 0  ;;  %v753_v16 = vmul.f32 %v721_v49, %v8896_v12  ;;  %v963_v12 = vunpack.c.l.b16 %v867_v13 }
 0x1a1   : > { %1131 = vmatpush.bf16.xpose.msra.mxu3 %v1105_v56  ;;  %v9030_v42 = vpop.f32.mrf.mxu2  ;;  %v984_v30 = vunpack.c.l.b16 %v888_v20  ;;  %v877_v56 = vpack.c.bf16 %v845_v7, %v845_v7  ;;  %v976_v20 = vunpack.c.l.b16 %v880_v1 }
 0x1a2   : > { %v606_v52 = vpop.f32.mrf.mxu1  ;;  %v849_v25 = vadd.f32 %v817_v17, %v753_v16 }
 0x1a3   : > { %v825_v26 = vmul.f32 %v793_v2, %v606_v52  ;;  %v866_v2 = vpack.c.bf16 %v8766_v47, %v8766_v47  ;;  %v973_v40 = vunpack.c.l.b16 %v877_v56 }
 0x1a4   : > { %v881_v63 = vpack.c.bf16 %v849_v25, %v849_v25 }
 0x1a5   : > { %v857_v55 = vadd.f32 %v825_v26, %v761_v51  ;;  %1002 = vrot.lane.b32.xlu2 %v8689_v36, %s8464_s18  ;;  %1026 = vrot.lane.b32.xlu1 %v9015_v5, %s8464_s18  ;;  %v962_v47 = vunpack.c.l.b16 %v866_v2  ;;  %v972_v51 = vunpack.c.l.b16 %v876_v21 }
 0x1a6   : > { %v977_v32 = vunpack.c.l.b16 %v881_v63 }
 0x1a7   : > { %v889_v29 = vpack.c.bf16 %v857_v55, %v857_v55  ;;  %v9049_v54 = vpack.c.b16 %v963_v12, %v962_v47  ;;  %v9051_v26 = vpack.c.b16 %v973_v40, %v972_v51  ;;  %v811_v55 = vmul.f32 %v779_v11, %v8862_v44 }
 0x1a8   : > { %v9069_v4 = vpack.c.b16 %v977_v32, %v976_v20  ;;  %v905_v47 = vpack.c.bf16 %v8914_v27, %v8914_v27 }
 0x1a9   : > { %v985_v59 = vunpack.c.l.b16 %v889_v29  ;;  %1132 = vmatpush.bf16.xpose.msra.mxu3 %v1102_v60  ;;  %v9047_v52 = vpop.f32.mrf.mxu2  ;;  %12647 = vst [vmem:[#allocation20_spill] sm:$0xff] %v9049_v54  ;;  %v843_v7 = vadd.f32 %v811_v55, %v747_v23  ;;  %v12476_v60 = vmov 1065369472  }
 0x1aa   : > { %12648 = vst [vmem:[#allocation21_spill] sm:$0xff] %v9051_v26  ;;  %1725 = vmatpush.bf16.msra.mxu1 %v12476_v60  ;;  %1814 = vmatpush.bf16.msrb.mxu2 %v12476_v60  ;;  %v1982_v1 = vunpack.c.l.b16 %v905_v47 }
 0x1ab   : > { %v9034_v19 = vpack.c.b16 %v985_v59, %v984_v30  ;;  %12649 = vst [vmem:[#allocation22_spill] sm:$0xff] %v9069_v4  ;;  %v875_v49 = vpack.c.bf16 %v843_v7, %v843_v7  ;;  %v970_v30 = vunpack.c.l.b16 %v874_v15  ;;  %v898_v7 = vpack.c.bf16 %v8858_v41, %v8858_v41 }
 0x1ac   : > { %v899_v15 = vpack.c.bf16 %v8869_v50, %v8869_v50 }
 0x1ad   : > { %12646 = vst [vmem:[#allocation19_spill] sm:$0xff] %v9034_v19  ;;  %1032 = vrot.lane.b32.xlu0 %v9034_v19, %s8464_s18  ;;  %2479 = vrot.lane.b32.xlu2 %v8850_v34, %s8465_s13  ;;  %v971_v46 = vunpack.c.l.b16 %v875_v49 }
 0x1ae   : > { %1006 = vrot.lane.b32.xlu1 %v8736_v22, %s8464_s18  ;;  %1726 = vmatpush.bf16.msra.mxu1 %v12476_v60 }
 0x1af   : > { %v9091_v59 = vpack.c.b16 %v971_v46, %v970_v30  ;;  %1815 = vmatpush.bf16.msrb.mxu2 %v12476_v60  ;;  %v902_v46 = vpack.c.bf16 %v8894_v9, %v8894_v9  ;;  %v903_v30 = vpack.c.bf16 %v8901_v14, %v8901_v14 }
 0x1b1   : > { %1133 = vmatpush.bf16.xpose.msra.mxu3 %v1099_v48  ;;  %v9071_v29 = vpop.f32.mrf.mxu2  ;;  %12650 = vst [vmem:[#allocation23_spill] sm:$0xff] %v9091_v59  ;;  %v904_v48 = vpack.c.bf16 %v8910_v24, %v8910_v24 }
 0x1b2   : > { %1727 = vmatpush.bf16.msra.mxu1 %v12476_v60 }
 0x1b3   : > { %1816 = vmatpush.bf16.msrb.mxu2 %v12476_v60  ;;  %v1981_v63 = vunpack.c.l.b16 %v904_v48 }
 0x1b5   : > { %1010 = vrot.lane.b32.xlu0 %v9049_v54, %s8464_s18  ;;  %2477 = vrot.lane.b32.xlu2 %v8826_v0, %s8465_s13  ;;  %v9163_v6 = vpack.c.b16 %v1982_v1, %v1981_v63 }
 0x1b6   : > { %1020 = vrot.lane.b32.xlu1 %v9051_v26, %s8464_s18  ;;  %1728 = vmatpush.bf16.msra.mxu1 %v12476_v60 }
 0x1b7   : > { %1817 = vmatpush.bf16.msrb.mxu2 %v12476_v60  ;;  %12652 = vst [vmem:[#allocation25_spill] sm:$0xff] %v9163_v6 }
 0x1b9   : > { %v9087_v44 = vpop.f32.mrf.mxu2 }
 0x1ba   : > { %1729 = vmatpush.bf16.msra.mxu1 %v12476_v60  ;;  %v915_v48 = vpack.c.bf16 %v9087_v44, %v9087_v44  ;;  %v908_v44 = vpack.c.bf16 %v8932_v53, %v8932_v53 }
 0x1bb   : > { %1818 = vmatpush.bf16.msrb.mxu2 %v12476_v60 }
 0x1bc   : > { %v1985_v53 = vunpack.c.l.b16 %v908_v44 }
 0x1bd   : > { %1024 = vrot.lane.b32.xlu0 %v9069_v4, %s8464_s18  ;;  %2491 = vrot.lane.b32.xlu2 %v8948_v18, %s8465_s13 }
 0x1be   : > { %2487 = vrot.lane.b32.xlu1 %v9069_v4, %s8465_s13  ;;  %1730 = vmatpush.bf16.msra.mxu1 %v12476_v60 }
 0x1bf   : > { %1819 = vmatpush.bf16.msrb.mxu2 %v12476_v60 }
 0x1c1   : > { %v683_v33 = vpop.f32.mrf.mxu2 }
 0x1c2   : > { %1731 = vmatpush.bf16.msra.mxu1 %v12476_v60  ;;  %v916_v24 = vpack.c.bf16 %v683_v33, %v683_v33 }
 0x1c3   : > { %1820 = vmatpush.bf16.msrb.mxu2 %v12476_v60 }
 0x1c4   : > { %v1993_v20 = vunpack.c.l.b16 %v916_v24  ;;  %v1992_v24 = vunpack.c.l.b16 %v915_v48 }
 0x1c5   : > { %1004 = vrot.lane.b32.xlu0 %v8712_v58, %s8464_s18  ;;  %2475 = vrot.lane.b32.xlu2 %v8804_v62, %s8465_s13 }
 0x1c6   : > { %2469 = vrot.lane.b32.xlu1 %v8736_v22, %s8465_s13  ;;  %1732 = vmatpush.bf16.msra.mxu1 %v12476_v60 }
 0x1c7   : > { %1821 = vmatpush.bf16.msrb.mxu2 %v12476_v60 }
 0x1c9   : > { %v685_v13 = vpop.f32.mrf.mxu2 }
 0x1ca   : > { %v917_v11 = vpack.c.bf16 %v685_v13, %v685_v13  ;;  %v1975_v13 = vunpack.c.l.b16 %v898_v7  ;;  %v913_v7 = vpack.c.bf16 %v9047_v52, %v9047_v52 }
 0x1cc   : > { %v1994_v23 = vunpack.c.l.b16 %v917_v11 }
 0x1cd   : > { %1018 = vrot.lane.b32.xlu0 %v9091_v59, %s8464_s18  ;;  %2489 = vrot.lane.b32.xlu2 %v9015_v5, %s8465_s13  ;;  %s8467_s18 = smov 112  }
 0x1ce   : > { %2481 = vrot.lane.b32.xlu1 %v9091_v59, %s8465_s13  ;;  %v9180_v33 = vpack.c.b16 %v1994_v23, %v1993_v20 }
 0x1d0   : > { %12653 = vst [vmem:[#allocation26_spill] sm:$0xff] %v9180_v33 }
 0x1d1   : > { %v688_v16 = vpop.f32.mrf.mxu2 }
 0x1d2   : > { %v918_v31 = vpack.c.bf16 %v688_v16, %v688_v16  ;;  %v1976_v16 = vunpack.c.l.b16 %v899_v15  ;;  %v900_v15 = vpack.c.bf16 %v8878_v57, %v8878_v57 }
 0x1d4   : > { %v1995_v12 = vunpack.c.l.b16 %v918_v31  ;;  %v1980_v31 = vunpack.c.l.b16 %v903_v30 }
 0x1d5   : > { %2483 = vrot.lane.b32.xlu2 %v9051_v26, %s8465_s13  ;;  %2493 = vrot.lane.b32.xlu0 %v8981_v28, %s8465_s13 }
 0x1d6   : > { %2433 = vrot.lane.b32.xlu1 %v8689_v36, %s8467_s18 }
 0x1d9   : > { %v690_v56 = vpop.f32.mrf.mxu2 }
 0x1da   : > { %v919_v21 = vpack.c.bf16 %v690_v56, %v690_v56  ;;  %v1979_v56 = vunpack.c.l.b16 %v902_v46  ;;  %v901_v46 = vpack.c.bf16 %v8885_v3, %v8885_v3 }
 0x1dc   : > { %v1996_v25 = vunpack.c.l.b16 %v919_v21  ;;  %v9189_v21 = vpack.c.b16 %v1976_v16, %v1975_v13  ;;  %v1978_v52 = vunpack.c.l.b16 %v901_v46 }
 0x1dd   : > { %2439 = vrot.lane.b32.xlu2 %v8762_v45, %s8467_s18  ;;  %2473 = vrot.lane.b32.xlu0 %v9049_v54, %s8465_s13 }
 0x1de   : > { %2437 = vrot.lane.b32.xlu1 %v8736_v22, %s8467_s18  ;;  %v9153_v51 = vpack.c.b16 %v1996_v25, %v1995_v12  ;;  %12654 = vst [vmem:[#allocation27_spill] sm:$0xff] %v9189_v21  ;;  %v9191_v12 = vpack.c.b16 %v1980_v31, %v1979_v56  ;;  %v914_v25 = vpack.c.bf16 %v9071_v29, %v9071_v29 }
 0x1e0   : > { %12651 = vst [vmem:[#allocation24_spill] sm:$0xff] %v9153_v51  ;;  %v1991_v1 = vunpack.c.l.b16 %v914_v25  ;;  %v911_v25 = vpack.c.bf16 %v8990_v35, %v8990_v35 }
 0x1e1   : > { %v693_v27 = vpop.f32.mrf.mxu2  ;;  %12655 = vst [vmem:[#allocation28_spill] sm:$0xff] %v9191_v12 }
 0x1e2   : > { %v920_v47 = vpack.c.bf16 %v693_v27, %v693_v27  ;;  %v909_v27 = vpack.c.bf16 %v8946_v38, %v8946_v38  ;;  %v1990_v38 = vunpack.c.l.b16 %v913_v7 }
 0x1e4   : > { %v1997_v11 = vunpack.c.l.b16 %v920_v47  ;;  %v1986_v13 = vunpack.c.l.b16 %v909_v27 }
 0x1e5   : > { %2453 = vrot.lane.b32.xlu2 %v8979_v61, %s8467_s18  ;;  %2471 = vrot.lane.b32.xlu0 %v8762_v45, %s8465_s13 }
 0x1e6   : > { %2441 = vrot.lane.b32.xlu1 %v9049_v54, %s8467_s18  ;;  %v9227_v3 = vpack.c.b16 %v1986_v13, %v1985_v53 }
 0x1e7   : > { %v9131_v17 = vpop.permute.xlu2 %1028 }
 0x1e8   : > { %12658 = vst [vmem:[#allocation31_spill] sm:$0xff] %v9227_v3 }
 0x1e9   : > { %v695_v41 = vpop.f32.mrf.mxu2 }
 0x1ea   : > { %v921_v63 = vpack.c.bf16 %v695_v41, %v695_v41 }
 0x1ec   : > { %v1998_v20 = vunpack.c.l.b16 %v921_v63 }
 0x1ed   : > { %2455 = vrot.lane.b32.xlu2 %v9069_v4, %s8467_s18  ;;  %2485 = vrot.lane.b32.xlu0 %v8979_v61, %s8465_s13 }
 0x1ee   : > { %2443 = vrot.lane.b32.xlu1 %v8804_v62, %s8467_s18  ;;  %v9219_v30 = vpack.c.b16 %v1998_v20, %v1997_v11 }
 0x1ef   : > { %v9139_v2 = vpop.permute.xlu2 %1008 }
 0x1f0   : > { %12657 = vst [vmem:[#allocation30_spill] sm:$0xff] %v9219_v30 }
 0x1f5   : > { %2457 = vrot.lane.b32.xlu2 %v9015_v5, %s8467_s18  ;;  %2467 = vrot.lane.b32.xlu0 %v8712_v58, %s8465_s13 }
 0x1f6   : > { %2445 = vrot.lane.b32.xlu1 %v8826_v0, %s8467_s18 }
 0x1f7   : > { %v9147_v40 = vpop.permute.xlu2 %1022 }
 0x1fd   : > { %3425 = vrot.lane.b32.xlu2 %v9153_v51, %s8467_s18  ;;  %2465 = vrot.lane.b32.xlu0 %v8689_v36, %s8465_s13 }
 0x1fe   : > { %2447 = vrot.lane.b32.xlu1 %v8850_v34, %s8467_s18 }
 0x1ff   : > { %v9161_v32 = vpop.permute.xlu2 %1002 }
 0x205   : > { %3411 = vrot.lane.b32.xlu2 %v9163_v6, %s8467_s18  ;;  %2435 = vrot.lane.b32.xlu0 %v8712_v58, %s8467_s18 }
 0x206   : > { %2449 = vrot.lane.b32.xlu1 %v9091_v59, %s8467_s18 }
 0x207   : > { %v2480_v55 = vpop.permute.xlu2 %2479 }
 0x208   : > { %v2567_v49 = vsel %vm1034_vm1, %v2480_v55, 0  ;;  %v912_v55 = vpack.c.bf16 %v9030_v42, %v9030_v42  ;;  %v1977_v42 = vunpack.c.l.b16 %v900_v15 }
 0x209   : > { %2593 = vmatpush.bf16.xpose.msrb.mxu1 %v2567_v49  ;;  %v9213_v49 = vpack.c.b16 %v1992_v24, %v1991_v1  ;;  %v1988_v1 = vunpack.c.l.b16 %v911_v25 }
 0x20a   : > { %v1989_v16 = vunpack.c.l.b16 %v912_v55  ;;  %v9237_v47 = vpack.c.b16 %v1978_v52, %v1977_v42  ;;  %v1123_v55 = vsel %vm1034_vm1, %v9131_v17, 0  ;;  %v1084_v52 = vsel %vm1034_vm1, %v9161_v32, 0 }
 0x20b   : > { %12656 = vst [vmem:[#allocation29_spill] sm:$0xff] %v9213_v49 }
 0x20c   : > { %v9235_v48 = vpack.c.b16 %v1990_v38, %v1989_v16  ;;  %12660 = vst [vmem:[#allocation33_spill] sm:$0xff] %v9237_v47 }
 0x20d   : > { %3423 = vrot.lane.b32.xlu2 %v9180_v33, %s8467_s18  ;;  %2461 = vrot.lane.b32.xlu0 %v8981_v28, %s8467_s18 }
 0x20e   : > { %2451 = vrot.lane.b32.xlu1 %v9051_v26, %s8467_s18  ;;  %12659 = vst [vmem:[#allocation32_spill] sm:$0xff] %v9235_v48 }
 0x20f   : > { %v2478_v50 = vpop.permute.xlu2 %2477  ;;  %v1031_v9 = vpop.permute.xlu1 %1030 }
 0x210   : > { %v2564_v14 = vsel %vm1034_vm1, %v2478_v50, 0  ;;  %v1126_v11 = vsel %vm1034_vm1, %v1031_v9, 0  ;;  %v1093_v9 = vsel %vm1034_vm1, %v9139_v2, 0 }
 0x211   : > { %2594 = vmatpush.bf16.xpose.msrb.mxu1 %v2564_v14  ;;  %v910_v14 = vpack.c.bf16 %v8972_v37, %v8972_v37 }
 0x213   : > { %v1987_v63 = vunpack.c.l.b16 %v910_v14 }
 0x215   : > { %3409 = vrot.lane.b32.xlu2 %v9191_v12, %s8467_s18  ;;  %3405 = vrot.lane.b32.xlu0 %v9189_v21, %s8467_s18  ;;  %v9247_v20 = vpack.c.b16 %v1988_v1, %v1987_v63 }
 0x216   : > { %2459 = vrot.lane.b32.xlu1 %v8948_v18, %s8467_s18 }
 0x217   : > { %v9203_v29 = vpop.permute.xlu2 %2491  ;;  %v1027_v23 = vpop.permute.xlu1 %1026  ;;  %12661 = vst [vmem:[#allocation34_spill] sm:$0xff] %v9247_v20 }
 0x218   : > { %v1120_v53 = vsel %vm1034_vm1, %v1027_v23, 0  ;;  %v1114_v23 = vsel %vm1034_vm1, %v9147_v40, 0 }
 0x21d   : > { %3421 = vrot.lane.b32.xlu2 %v9213_v49, %s8467_s18  ;;  %3403 = vrot.lane.b32.xlu0 %v8860_v43, %s8467_s18 }
 0x21e   : > { %3427 = vrot.lane.b32.xlu1 %v9219_v30, %s8467_s18 }
 0x21f   : > { %v1033_v57 = vpop.permute.xlu0 %1032  ;;  %v2476_v56 = vpop.permute.xlu2 %2475 }
 0x220   : > { %v1007_v31 = vpop.permute.xlu1 %1006  ;;  %v1129_v41 = vsel %vm1034_vm1, %v1033_v57, 0  ;;  %v2561_v50 = vsel %vm1034_vm1, %v2476_v56, 0 }
 0x221   : > { %1220 = vmatpush.bf16.xpose.msrb.mxu0 %v1129_v41  ;;  %2595 = vmatpush.bf16.xpose.msrb.mxu1 %v2561_v50  ;;  %v1090_v46 = vsel %vm1034_vm1, %v1007_v31, 0 }
 0x225   : > { %3419 = vrot.lane.b32.xlu2 %v9235_v48, %s8467_s18  ;;  %3415 = vrot.lane.b32.xlu0 %v9227_v3, %s8467_s18 }
 0x226   : > { %3407 = vrot.lane.b32.xlu1 %v9237_v47, %s8467_s18 }
 0x227   : > { %v1011_v37 = vpop.permute.xlu0 %1010 }
 0x228   : > { %v1021_v24 = vpop.permute.xlu1 %1020  ;;  %v1096_v35 = vsel %vm1034_vm1, %v1011_v37, 0 }
 0x229   : > { %1134 = vmatpush.bf16.xpose.msra.mxu3 %v1096_v35  ;;  %1221 = vmatpush.bf16.xpose.msrb.mxu0 %v1126_v11  ;;  %v1111_v31 = vsel %vm1034_vm1, %v1021_v24, 0 }
 0x22d   : > { %3417 = vrot.lane.b32.xlu2 %v9247_v20, %s8467_s18  ;;  %4022 = vrot.lane.b32.xlu0 %v8850_v34, %s8468_s20 }
 0x22e   : > { %2495 = vrot.lane.b32.xlu1 %v9034_v19, %s8465_s13 }
 0x22f   : > { %v1025_v44 = vpop.permute.xlu0 %1024 }
 0x230   : > { %v9255_v27 = vpop.permute.xlu1 %2487  ;;  %v1117_v16 = vsel %vm1034_vm1, %v1025_v44, 0 }
 0x231   : > { %1135 = vmatpush.bf16.xpose.msra.mxu3 %v1093_v9  ;;  %1222 = vmatpush.bf16.xpose.msrb.mxu0 %v1123_v55 }
 0x235   : > { %2463 = vrot.lane.b32.xlu2 %v9034_v19, %s8467_s18  ;;  %3401 = vrot.lane.b32.xlu0 %v8837_v10, %s8467_s18 }
 0x237   : > { %v1005_v7 = vpop.permute.xlu0 %1004 }
 0x238   : > { %v2470_v15 = vpop.permute.xlu1 %2469  ;;  %v1087_v17 = vsel %vm1034_vm1, %v1005_v7, 0 }
 0x239   : > { %1136 = vmatpush.bf16.xpose.msra.mxu3 %v1090_v46  ;;  %1223 = vmatpush.bf16.xpose.msrb.mxu0 %v1120_v53  ;;  %v2552_v1 = vsel %vm1034_vm1, %v2470_v15, 0  ;;  %v12671_v46 = vld [vmem:[#allocation14_spill] sm:$0xff] }
 0x23a   : > { %v906_v53 = vpack.c.bf16 %v12671_v46, %v12671_v46 }
 0x23f   : > { %v1019_v2 = vpop.permute.xlu0 %1018 }
 0x240   : > { %v9267_v13 = vpop.permute.xlu1 %2481  ;;  %v1108_v50 = vsel %vm1034_vm1, %v1019_v2, 0  ;;  %v12672_v2 = vld [vmem:[#allocation15_spill] sm:$0xff] }
 0x241   : > { %1137 = vmatpush.bf16.xpose.msra.mxu3 %v1087_v17  ;;  %1224 = vmatpush.bf16.xpose.msrb.mxu0 %v1117_v16  ;;  %v907_v17 = vpack.c.bf16 %v12672_v2, %v12672_v2  ;;  %v1983_v16 = vunpack.c.l.b16 %v906_v53 }
 0x247   : > { %v9271_v38 = vpop.permute.xlu0 %2493 }
 0x248   : > { %v9273_v42 = vpop.permute.xlu1 %2433 }
 0x249   : > { %12662 = vst [vmem:[#allocation35_spill] sm:$0xff] %v9273_v42  ;;  %1138 = vmatpush.bf16.xpose.msra.mxu3 %v1084_v52  ;;  %1225 = vmatpush.bf16.xpose.msrb.mxu0 %v1114_v23  ;;  %v1984_v52 = vunpack.c.l.b16 %v907_v17 }
 0x24f   : > { %v2474_v57 = vpop.permute.xlu0 %2473 }
 0x250   : > { %v9281_v56 = vpop.permute.xlu1 %2437  ;;  %7475 = vmatmul.msk.bf16.vlgmr.msra.gmra.mxu3 %vm1034_vm1, %v8689_v36  ;;  %v2558_v41 = vsel %vm1034_vm1, %v2474_v57, 0  ;;  %v9359_v57 = vpack.c.b16 %v1984_v52, %v1983_v16 }
 0x251   : > { %7659 = vmatpush.bf16.msrb.mxu3 %v9163_v6  ;;  %12663 = vst [vmem:[#allocation36_spill] sm:$0xff] %v9281_v56  ;;  %1226 = vmatpush.bf16.xpose.msrb.mxu0 %v1111_v31 }
 0x252   : > { %2596 = vmatpush.bf16.xpose.msrb.mxu1 %v2558_v41  ;;  %12673 = vst [vmem:[#allocation14_spill] sm:$0xff] %v9359_v57 }
 0x255   : > { %7660 = vmatpush.bf16.msrb.mxu3 %v9191_v12 }
 0x257   : > { %v2472_v40 = vpop.permute.xlu0 %2471 }
 0x258   : > { %v9289_v32 = vpop.permute.xlu1 %2441  ;;  %v2555_v14 = vsel %vm1034_vm1, %v2472_v40, 0 }
 0x259   : > { %7661 = vmatpush.bf16.msrb.mxu3 %v9237_v47  ;;  %12664 = vst [vmem:[#allocation37_spill] sm:$0xff] %v9289_v32  ;;  %1227 = vmatpush.bf16.xpose.msrb.mxu0 %v1108_v50  ;;  %v2588_v50 = vsel %vm1034_vm1, %v9271_v38, 0  ;;  %v2579_v38 = vsel %vm1034_vm1, %v9255_v27, 0  ;;  %v2570_v27 = vsel %vm1034_vm1, %v9267_v13, 0 }
 0x25a   : > { %2597 = vmatpush.bf16.xpose.msrb.mxu1 %v2555_v14  ;;  %v2585_v14 = vsel %vm1034_vm1, %v9203_v29, 0 }
 0x25d   : > { %7662 = vmatpush.bf16.msrb.mxu3 %v9189_v21 }
 0x25f   : > { %v9297_v25 = vpop.permute.xlu0 %2485 }
 0x260   : > { %v9299_v63 = vpop.permute.xlu1 %2443  ;;  %7476 = vmatmul.msk.bf16.gmra.mxu3 %vm1034_vm1, %v8712_v58  ;;  %7491 = vmatmul.msk.bf16.vlgmr.msrb.gmra.mxu0 %vm1034_vm1, %v8689_v36 }
 0x261   : > { %2031 = vmatpush.bf16.msra.mxu0 %v9163_v6  ;;  %7663 = vmatpush.bf16.msrb.mxu3 %v8860_v43  ;;  %12665 = vst [vmem:[#allocation38_spill] sm:$0xff] %v9299_v63 }
 0x262   : > { %2598 = vmatpush.bf16.xpose.msrb.mxu1 %v2552_v1  ;;  %v2490_v1 = vpop.permute.xlu2 %2489 }
 0x265   : > { %2032 = vmatpush.bf16.msra.mxu0 %v9191_v12  ;;  %7664 = vmatpush.bf16.msrb.mxu3 %v8837_v10 }
 0x267   : > { %v2468_v37 = vpop.permute.xlu0 %2467 }
 0x268   : > { %v9311_v24 = vpop.permute.xlu1 %2445  ;;  %v2549_v35 = vsel %vm1034_vm1, %v2468_v37, 0  ;;  %v2582_v37 = vsel %vm1034_vm1, %v2490_v1, 0 }
 0x269   : > { %2033 = vmatpush.bf16.msra.mxu0 %v9237_v47  ;;  %7665 = vmatpush.bf16.msrb.mxu3 %v8815_v39  ;;  %12666 = vst [vmem:[#allocation39_spill] sm:$0xff] %v9311_v24 }
 0x26a   : > { %2599 = vmatpush.bf16.xpose.msrb.mxu1 %v2549_v35  ;;  %v2576_v35 = vsel %vm1034_vm1, %v9297_v25, 0  ;;  %v2484_v29 = vpop.permute.xlu2 %2483 }
 0x26d   : > { %2034 = vmatpush.bf16.msra.mxu0 %v9189_v21  ;;  %7666 = vmatpush.bf16.msrb.mxu3 %v8793_v8 }
 0x26f   : > { %v2466_v11 = vpop.permute.xlu0 %2465 }
 0x270   : > { %v9318_v44 = vpop.permute.xlu1 %2447  ;;  %7477 = vmatmul.msk.bf16.gmra.mxu3 %vm1034_vm1, %v8736_v22  ;;  %7492 = vmatmul.msk.bf16.gmra.mxu0 %vm1034_vm1, %v8712_v58  ;;  %v2546_v9 = vsel %vm1034_vm1, %v2466_v11, 0  ;;  %v2573_v11 = vsel %vm1034_vm1, %v2484_v29, 0 }
 0x271   : > { %3187 = vmatpush.bf16.msra.mxu3 %v12476_v60  ;;  %2035 = vmatpush.bf16.msra.mxu0 %v8860_v43  ;;  %12667 = vst [vmem:[#allocation40_spill] sm:$0xff] %v9318_v44 }
 0x272   : > { %2600 = vmatpush.bf16.xpose.msrb.mxu1 %v2546_v9  ;;  %v9407_v17 = vpop.permute.xlu2 %2439 }
 0x273   : > { %12674 = vst [vmem:[#allocation15_spill] sm:$0xff] %v9407_v17 }
 0x275   : > { %3188 = vmatpush.bf16.msra.mxu3 %v12476_v60  ;;  %2036 = vmatpush.bf16.msra.mxu0 %v8837_v10 }
 0x277   : > { %v9485_v21 = vpop.permute.xlu0 %2435 }
 0x278   : > { %v9330_v55 = vpop.permute.xlu1 %2449  ;;  %12678 = vst [vmem:[#allocation47_spill] sm:$0xff] %v9485_v21 }
 0x279   : > { %3189 = vmatpush.bf16.msra.mxu3 %v12476_v60  ;;  %2037 = vmatpush.bf16.msra.mxu0 %v8815_v39  ;;  %12668 = vst [vmem:[#allocation41_spill] sm:$0xff] %v9330_v55 }
 0x27d   : > { %3190 = vmatpush.bf16.msra.mxu3 %v12476_v60  ;;  %2038 = vmatpush.bf16.msra.mxu0 %v8793_v8 }
 0x27f   : > { %v9497_v10 = vpop.permute.xlu0 %2461 }
 0x280   : > { %v9336_v7 = vpop.permute.xlu1 %2451  ;;  %7478 = vmatmul.msk.bf16.gmra.mxu3 %vm1034_vm1, %v8762_v45  ;;  %7493 = vmatmul.msk.bf16.gmra.mxu0 %vm1034_vm1, %v8736_v22  ;;  %12679 = vst [vmem:[#allocation48_spill] sm:$0xff] %v9497_v10 }
 0x281   : > { %2120 = vmatpush.bf16.msrb.mxu0 %v9219_v30  ;;  %3191 = vmatpush.bf16.msra.mxu3 %v12476_v60  ;;  %12669 = vst [vmem:[#allocation42_spill] sm:$0xff] %v9336_v7 }
 0x285   : > { %2121 = vmatpush.bf16.msrb.mxu0 %v9153_v51  ;;  %3192 = vmatpush.bf16.msra.mxu3 %v12476_v60 }
 0x288   : > { %v9345_v15 = vpop.permute.xlu1 %2459 }
 0x289   : > { %2122 = vmatpush.bf16.msrb.mxu0 %v9180_v33  ;;  %3193 = vmatpush.bf16.msra.mxu3 %v12476_v60  ;;  %12670 = vst [vmem:[#allocation43_spill] sm:$0xff] %v9345_v15  ;;  %v9509_v15 = vpop.permute.xlu0 %3405 }
 0x28d   : > { %2123 = vmatpush.bf16.msrb.mxu0 %v9213_v49  ;;  %3194 = vmatpush.bf16.msra.mxu3 %v12476_v60 }
 0x290   : > { %v9353_v23 = vpop.permute.xlu1 %3427  ;;  %7479 = vmatmul.msk.bf16.gmra.mxu3 %vm1034_vm1, %v9049_v54  ;;  %7494 = vmatmul.msk.bf16.gmra.mxu0 %vm1034_vm1, %v8762_v45 }
 0x291   : > { %2124 = vmatpush.bf16.msrb.mxu0 %v9235_v48  ;;  %v9523_v7 = vpop.permute.xlu0 %3403 }
 0x295   : > { %2125 = vmatpush.bf16.msrb.mxu0 %v9247_v20 }
 0x298   : > { %v9362_v31 = vpop.permute.xlu1 %3407 }
 0x299   : > { %2126 = vmatpush.bf16.msrb.mxu0 %v9227_v3  ;;  %v9537_v56 = vpop.permute.xlu0 %3415 }
 0x29d   : > { %2127 = vmatpush.bf16.msrb.mxu0 %v9359_v57 }
 0x2a0   : > { %v2496_v41 = vpop.permute.xlu1 %2495  ;;  %7480 = vmatmul.msk.bf16.gmra.mxu3 %vm1034_vm1, %v8804_v62  ;;  %7495 = vmatmul.msk.bf16.gmra.mxu0 %vm1034_vm1, %v9049_v54 }
 0x2a1   : > { %v2591_v40 = vsel %vm1034_vm1, %v2496_v41, 0  ;;  %v9557_v58 = vpop.permute.xlu0 %4022 }
 0x2a2   : > { %2682 = vmatpush.bf16.xpose.msra.mxu2 %v2591_v40 }
 0x2aa   : > { %2683 = vmatpush.bf16.xpose.msra.mxu2 %v2588_v50  ;;  %v9419_v50 = vpop.permute.xlu2 %2453 }
 0x2ab   : > { %12675 = vst [vmem:[#allocation44_spill] sm:$0xff] %v9419_v50 }
 0x2b0   : > { %7481 = vmatmul.msk.bf16.gmra.mxu3 %vm1034_vm1, %v8826_v0  ;;  %7496 = vmatmul.msk.bf16.gmra.mxu0 %vm1034_vm1, %v8804_v62 }
 0x2b2   : > { %2684 = vmatpush.bf16.xpose.msra.mxu2 %v2585_v14 }
 0x2ba   : > { %2685 = vmatpush.bf16.xpose.msra.mxu2 %v2582_v37 }
 0x2c0   : > { %7482 = vmatmul.msk.bf16.gmra.mxu3 %vm1034_vm1, %v8850_v34  ;;  %7497 = vmatmul.msk.bf16.gmra.mxu0 %vm1034_vm1, %v8826_v0 }
 0x2c2   : > { %2686 = vmatpush.bf16.xpose.msra.mxu2 %v2579_v38  ;;  %v9431_v38 = vpop.permute.xlu2 %2455 }
 0x2c3   : > { %12676 = vst [vmem:[#allocation45_spill] sm:$0xff] %v9431_v38 }
 0x2ca   : > { %2687 = vmatpush.bf16.xpose.msra.mxu2 %v2576_v35 }
 0x2d0   : > { %7483 = vmatmul.msk.bf16.gmra.mxu3 %vm1034_vm1, %v9091_v59  ;;  %7498 = vmatmul.msk.bf16.gmra.mxu0 %vm1034_vm1, %v8850_v34 }
 0x2d2   : > { %2688 = vmatpush.bf16.xpose.msra.mxu2 %v2573_v11 }
 0x2d3   : > { %v9391_v9 = vpop.f32.mrf.mxu3 }
 0x2da   : > { %2689 = vmatpush.bf16.xpose.msra.mxu2 %v2570_v27  ;;  %v9443_v27 = vpop.permute.xlu2 %2457 }
 0x2db   : > { %v9395_v46 = vpop.f32.mrf.mxu3  ;;  %12677 = vst [vmem:[#allocation46_spill] sm:$0xff] %v9443_v27 }
 0x2dd   : > { %v9397_v25 = vpop.f32.mrf.mxu0 }
 0x2de   : > { %v1309_v53 = vmax.f32 %v9391_v9, %v9397_v25 }
 0x2e0   : > { %7484 = vmatmul.msk.bf16.gmra.mxu3 %vm1034_vm1, %v9051_v26  ;;  %7499 = vmatmul.msk.bf16.gmra.mxu0 %vm1034_vm1, %v9091_v59 }
 0x2e1   : > { %1310 = vmax.xlane.f32.xlu1 %v1309_v53 }
 0x2e2   : > { %v9453_v60 = vpop.permute.xlu2 %3425 }
 0x2e3   : > { %v9405_v2 = vpop.f32.mrf.mxu3 }
 0x2e5   : > { %v9409_v13 = vpop.f32.mrf.mxu0 }
 0x2e6   : > { %v1312_v16 = vmax.f32 %v9395_v46, %v9409_v13 }
 0x2e8   : > { %1313 = vmax.xlane.f32.xlu2 %v1312_v16 }
 0x2eb   : > { %v9413_v52 = vpop.f32.mrf.mxu3 }
 0x2ed   : > { %v9415_v41 = vpop.f32.mrf.mxu0 }
 0x2ee   : > { %v1315_v40 = vmax.f32 %v9405_v2, %v9415_v41 }
 0x2f0   : > { %7485 = vmatmul.msk.bf16.gmra.mxu3 %vm1034_vm1, %v8979_v61  ;;  %7500 = vmatmul.msk.bf16.gmra.mxu0 %vm1034_vm1, %v9051_v26 }
 0x2f1   : > { %1316 = vmax.xlane.f32.xlu0 %v1315_v40 }
 0x2f3   : > { %v9425_v14 = vpop.f32.mrf.mxu3 }
 0x2f5   : > { %v9427_v1 = vpop.f32.mrf.mxu0 }
 0x2f6   : > { %v1318_v37 = vmax.f32 %v9413_v52, %v9427_v1 }
 0x2f8   : > { %1319 = vmax.xlane.f32.xlu2 %v1318_v37 }
 0x2fb   : > { %v9433_v35 = vpop.f32.mrf.mxu3 }
 0x2fd   : > { %v9435_v29 = vpop.f32.mrf.mxu0 }
 0x2fe   : > { %v1321_v11 = vmax.f32 %v9425_v14, %v9435_v29 }
 0x300   : > { %7486 = vmatmul.msk.bf16.gmra.mxu3 %vm1034_vm1, %v9069_v4  ;;  %7501 = vmatmul.msk.bf16.gmra.mxu0 %vm1034_vm1, %v8979_v61 }
 0x301   : > { %1322 = vmax.xlane.f32.xlu1 %v1321_v11 }
 0x303   : > { %v9445_v53 = vpop.f32.mrf.mxu3 }
 0x305   : > { %v9447_v16 = vpop.f32.mrf.mxu0 }
 0x306   : > { %v1324_v40 = vmax.f32 %v9433_v35, %v9447_v16 }
 0x308   : > { %1325 = vmax.xlane.f32.xlu2 %v1324_v40  ;;  %v9467_v40 = vpop.permute.xlu2 %3411 }
 0x30b   : > { %v9451_v37 = vpop.f32.mrf.mxu3 }
 0x30d   : > { %v9455_v49 = vpop.f32.mrf.mxu0 }
 0x30e   : > { %v1327_v3 = vmax.f32 %v9445_v53, %v9455_v49 }
 0x310   : > { %7487 = vmatmul.msk.bf16.gmra.mxu3 %vm1034_vm1, %v9015_v5  ;;  %7502 = vmatmul.msk.bf16.gmra.mxu0 %vm1034_vm1, %v9069_v4 }
 0x311   : > { %1328 = vmax.xlane.f32.xlu0 %v1327_v3  ;;  %v9479_v3 = vpop.permute.xlu2 %3423 }
 0x313   : > { %v9463_v11 = vpop.f32.mrf.mxu3 }
 0x315   : > { %v9465_v20 = vpop.f32.mrf.mxu0 }
 0x316   : > { %v1330_v10 = vmax.f32 %v9451_v37, %v9465_v20 }
 0x319   : > { %v9491_v47 = vpop.permute.xlu2 %3409 }
 0x31a   : > { %4038 = vrot.lane.b32.xlu1 %v9034_v19, %s8468_s20 }
 0x31b   : > { %v9471_v48 = vpop.f32.mrf.mxu3 }
 0x31d   : > { %v9473_v33 = vpop.f32.mrf.mxu0 }
 0x31e   : > { %v1333_v24 = vmax.f32 %v9463_v11, %v9473_v33 }
 0x320   : > { %7488 = vmatmul.msk.bf16.gmra.mxu3 %vm1034_vm1, %v8948_v18  ;;  %7503 = vmatmul.msk.bf16.gmra.mxu0 %vm1034_vm1, %v9015_v5 }
 0x321   : > { %3413 = vrot.lane.b32.xlu2 %v9359_v57, %s8467_s18  ;;  %v9505_v6 = vpop.permute.xlu2 %3421 }
 0x323   : > { %v9483_v43 = vpop.f32.mrf.mxu3 }
 0x325   : > { %3399 = vrot.lane.b32.xlu0 %v8815_v39, %s8467_s18  ;;  %v9489_v51 = vpop.f32.mrf.mxu0 }
 0x329   : > { %v9515_v50 = vpop.permute.xlu2 %3419 }
 0x32b   : > { %v9493_v30 = vpop.f32.mrf.mxu3 }
 0x32d   : > { %v9495_v12 = vpop.f32.mrf.mxu0 }
 0x32e   : > { %v1339_v32 = vmax.f32 %v9483_v43, %v9495_v12 }
 0x330   : > { %7489 = vmatmul.msk.bf16.gmra.mxu3 %vm1034_vm1, %v8981_v28  ;;  %7504 = vmatmul.msk.bf16.gmra.mxu0 %vm1034_vm1, %v8948_v18 }
 0x331   : > { %v9531_v63 = vpop.permute.xlu2 %3417 }
 0x333   : > { %v9503_v57 = vpop.f32.mrf.mxu3 }
 0x334   : > { %12680 = vst [vmem:[#allocation49_spill] sm:$0xff] %v9503_v57 }
 0x335   : > { %v9507_v39 = vpop.f32.mrf.mxu0 }
 0x339   : > { %v9549_v34 = vpop.permute.xlu2 %2463 }
 0x33a   : > { %12686 = vst [vmem:[#allocation55_spill] sm:$0xff] %v9549_v34 }
 0x33b   : > { %v9511_v27 = vpop.f32.mrf.mxu3 }
 0x33c   : > { %12681 = vst [vmem:[#allocation50_spill] sm:$0xff] %v9511_v27 }
 0x33d   : > { %v9513_v38 = vpop.f32.mrf.mxu0 }
 0x33e   : > { %12682 = vst [vmem:[#allocation51_spill] sm:$0xff] %v9513_v38 }
 0x340   : > { %7490 = vmatmul.msk.bf16.gmra.mxu3 %vm1034_vm1, %v9034_v19  ;;  %7505 = vmatmul.msk.bf16.gmra.mxu0 %vm1034_vm1, %v8981_v28 }
 0x343   : > { %v9525_v55 = vpop.f32.mrf.mxu3 }
 0x344   : > { %12683 = vst [vmem:[#allocation52_spill] sm:$0xff] %v9525_v55  ;;  %1331 = vmax.xlane.f32.xlu1 %v1330_v10  ;;  %v1336_v10 = vmax.f32 %v9471_v48, %v9489_v51 }
 0x345   : > { %v9527_v44 = vpop.f32.mrf.mxu0 }
 0x346   : > { %12684 = vst [vmem:[#allocation53_spill] sm:$0xff] %v9527_v44  ;;  %v1348_v42 = vmax.f32 %v9511_v27, %v9527_v44 }
 0x34a   : > { %1334 = vmax.xlane.f32.xlu2 %v1333_v24  ;;  %v1342_v24 = vmax.f32 %v9493_v30, %v9507_v39 }
 0x34b   : > { %v9535_v17 = vpop.f32.mrf.mxu3 }
 0x34c   : > { %1340 = vmax.xlane.f32.xlu1 %v1339_v32 }
 0x34d   : > { %v9539_v21 = vpop.f32.mrf.mxu0 }
 0x34e   : > { %12685 = vst [vmem:[#allocation54_spill] sm:$0xff] %v9539_v21 }
 0x34f   : > { %1337 = vmax.xlane.f32.xlu0 %v1336_v10  ;;  %v1345_v10 = vmax.f32 %v9503_v57, %v9513_v38 }
 0x350   : > { %7506 = vmatmul.msk.bf16.gmra.mxu0 %vm1034_vm1, %v9034_v19  ;;  %v1351_v19 = vmax.f32 %v9525_v55, %v9539_v21 }
 0x352   : > { %1343 = vmax.xlane.f32.xlu2 %v1342_v24 }
 0x353   : > { %v9551_v32 = vpop.f32.mrf.mxu3 }
 0x354   : > { %12687 = vst [vmem:[#allocation56_spill] sm:$0xff] %v9551_v32  ;;  %1349 = vmax.xlane.f32.xlu1 %v1348_v42  ;;  %v1311_v24 = vpop.xlane.xlu1 %1310 }
 0x355   : > { %v9553_v59 = vpop.f32.mrf.mxu0  ;;  %v1405_v34 = vsub.f32 %v9391_v9, %v1311_v24  ;;  %v1406_v42 = vsub.f32 %v9397_v25, %v1311_v24  ;;  %v9573_v25 = vpop.permute.xlu0 %3401 }
 0x357   : > { %1346 = vmax.xlane.f32.xlu0 %v1345_v10  ;;  %v1354_v10 = vmax.f32 %v9535_v17, %v9553_v59 }
 0x35a   : > { %1352 = vmax.xlane.f32.xlu2 %v1351_v19 }
 0x35b   : > { %v9561_v26 = vpop.f32.mrf.mxu3  ;;  %v1314_v4 = vpop.xlane.xlu2 %1313 }
 0x35c   : > { %12688 = vst [vmem:[#allocation57_spill] sm:$0xff] %v9561_v26  ;;  %v1407_v5 = vsub.f32 %v9395_v46, %v1314_v4  ;;  %v1408_v22 = vsub.f32 %v9409_v13, %v1314_v4 }
 0x35d   : > { %v9567_v44 = vpop.f32.mrf.mxu0 }
 0x35e   : > { %12689 = vst [vmem:[#allocation58_spill] sm:$0xff] %v9567_v44  ;;  %v1469_v38 = vpack.c.bf16 %v1407_v5, %v1405_v34  ;;  %v1470_v21 = vpack.c.bf16 %v1408_v22, %v1406_v42  ;;  %v1357_v19 = vmax.f32 %v9551_v32, %v9567_v44 }
 0x35f   : > { %1355 = vmax.xlane.f32.xlu0 %v1354_v10 }
 0x360   : > { %v1501_v55 = vunpack.c.l.bf16 %v1469_v38  ;;  %v1502_v27 = vunpack.c.l.bf16 %v1470_v21  ;;  %v1503_v9 = vunpack.c.h.bf16 %v1469_v38  ;;  %v1504_v57 = vunpack.c.h.bf16 %v1470_v21  ;;  %1358 = vmax.xlane.f32.xlu1 %v1357_v19 }
 0x362   : > { %v1565_v46 = vmul.f32 1.442695, %v1501_v55  ;;  %v1567_v4 = vmul.f32 1.442695, %v1502_v27  ;;  %v1569_v13 = vmul.f32 1.442695, %v1503_v9 }
 0x363   : > { %v1571_v24 = vmul.f32 1.442695, %v1504_v57  ;;  %v9575_v54 = vpop.f32.mrf.mxu3 }
 0x364   : > { %7688 = vpow2.f32 %v1565_v46  ;;  %v1317_v5 = vpop.xlane.xlu0 %1316 }
 0x365   : > { %7690 = vpow2.f32 %v1567_v4  ;;  %v9577_v22 = vpop.f32.mrf.mxu0  ;;  %v1409_v57 = vsub.f32 %v9405_v2, %v1317_v5  ;;  %v1410_v10 = vsub.f32 %v9415_v41, %v1317_v5 }
 0x366   : > { %12690 = vst [vmem:[#allocation59_spill] sm:$0xff] %v9577_v22  ;;  %7692 = vpow2.f32 %v1569_v13  ;;  %v1360_v34 = vmax.f32 %v9561_v26, %v9577_v22 }
 0x367   : > { %7694 = vpow2.f32 %v1571_v24 }
 0x368   : > { %1361 = vmax.xlane.f32.xlu2 %v1360_v34 }
 0x36a   : > { %v7689_v21 = vpop.eup %7688 }
 0x36b   : > { %v7691_v38 = vpop.eup %7690  ;;  %v9581_v42 = vpop.f32.mrf.mxu3 }
 0x36c   : > { %v1320_v55 = vpop.xlane.xlu2 %1319  ;;  %v7693_v27 = vpop.eup %7692 }
 0x36d   : > { %v1411_v19 = vsub.f32 %v9413_v52, %v1320_v55  ;;  %v1412_v9 = vsub.f32 %v9427_v1, %v1320_v55  ;;  %v7695_v46 = vpop.eup %7694  ;;  %v9587_v4 = vpop.f32.mrf.mxu0  ;;  %v1693_v13 = vpack.c.bf16 %v7693_v27, %v7689_v21  ;;  %v12691_v52 = vmov 1065369472  }
 0x36e   : > { %v9589_v44 = vpack.c.bf16 %v7695_v46, %v7691_v38 }
 0x36f   : > { %v1471_v24 = vpack.c.bf16 %v1411_v19, %v1409_v57  ;;  %v1472_v34 = vpack.c.bf16 %v1412_v9, %v1410_v10  ;;  %1733 = vmatmul.bf16.vlgmr.msra.gmra.mxu1 %v1693_v13  ;;  %2039 = vmatmul.bf16.vlgmr.msra.gmra.mxu0 %v1693_v13 }
 0x370   : > { %1822 = vmatmul.bf16.vlgmr.msrb.gmra.mxu2 %v9589_v44  ;;  %3445 = vmatpush.bf16.msra.mxu1 %v9467_v40 }
 0x371   : > { %v1505_v22 = vunpack.c.l.bf16 %v1471_v24  ;;  %v1506_v32 = vunpack.c.l.bf16 %v1472_v34  ;;  %v1507_v26 = vunpack.c.h.bf16 %v1471_v24  ;;  %v1508_v2 = vunpack.c.h.bf16 %v1472_v34  ;;  %3534 = vmatpush.bf16.msrb.mxu2 %v9353_v23  ;;  %3276 = vmatpush.bf16.msra.mxu0 %v12691_v52 }
 0x373   : > { %v1573_v41 = vmul.f32 1.442695, %v1505_v22  ;;  %v1575_v1 = vmul.f32 1.442695, %v1506_v32  ;;  %v1577_v5 = vmul.f32 1.442695, %v1507_v26  ;;  %4020 = vrot.lane.b32.xlu0 %v8826_v0, %s8468_s20  ;;  %v9597_v38 = vpop.f32.mrf.mxu3 }
 0x374   : > { %v1579_v21 = vmul.f32 1.442695, %v1508_v2  ;;  %3446 = vmatpush.bf16.msra.mxu1 %v9491_v47  ;;  %v1323_v40 = vpop.xlane.xlu1 %1322 }
 0x375   : > { %7696 = vpow2.f32 %v1573_v41  ;;  %3535 = vmatpush.bf16.msrb.mxu2 %v9453_v60  ;;  %3277 = vmatpush.bf16.msra.mxu0 %v12691_v52  ;;  %v9602_v23 = vpop.f32.mrf.mxu0  ;;  %v1413_v27 = vsub.f32 %v9425_v14, %v1323_v40  ;;  %v1414_v57 = vsub.f32 %v9435_v29, %v1323_v40 }
 0x376   : > { %7698 = vpow2.f32 %v1575_v1  ;;  %v1366_v26 = vmax.f32 %v9581_v42, %v9602_v23 }
 0x377   : > { %7700 = vpow2.f32 %v1577_v5 }
 0x378   : > { %7702 = vpow2.f32 %v1579_v21  ;;  %3447 = vmatpush.bf16.msra.mxu1 %v9362_v31  ;;  %1367 = vmax.xlane.f32.xlu1 %v1366_v26 }
 0x379   : > { %3536 = vmatpush.bf16.msrb.mxu2 %v9479_v3  ;;  %3278 = vmatpush.bf16.msra.mxu0 %v12691_v52 }
 0x37b   : > { %v7697_v47 = vpop.eup %7696  ;;  %v9609_v60 = vpop.f32.mrf.mxu3 }
 0x37c   : > { %v7699_v32 = vpop.eup %7698  ;;  %v1326_v22 = vpop.xlane.xlu2 %1325  ;;  %3448 = vmatpush.bf16.msra.mxu1 %v9509_v15 }
 0x37d   : > { %v7701_v55 = vpop.eup %7700  ;;  %v1415_v31 = vsub.f32 %v9433_v35, %v1326_v22  ;;  %v1416_v10 = vsub.f32 %v9447_v16, %v1326_v22  ;;  %3537 = vmatpush.bf16.msrb.mxu2 %v9505_v6  ;;  %3279 = vmatpush.bf16.msra.mxu0 %v12691_v52  ;;  %v9618_v3 = vpop.f32.mrf.mxu0 }
 0x37e   : > { %v7703_v19 = vpop.eup %7702  ;;  %v1695_v9 = vpack.c.bf16 %v7701_v55, %v7697_v47  ;;  %v1369_v14 = vmax.f32 %v9597_v38, %v9618_v3 }
 0x37f   : > { %v1473_v46 = vpack.c.bf16 %v1415_v31, %v1413_v27  ;;  %v1474_v13 = vpack.c.bf16 %v1416_v10, %v1414_v57  ;;  %v1696_v24 = vpack.c.bf16 %v7703_v19, %v7699_v32  ;;  %v4110_v57 = vsel %vm1034_vm1, %v9557_v58, 0 }
 0x380   : > { %1738 = vmatmul.bf16.gmra.mxu1 %v1695_v9  ;;  %2044 = vmatmul.bf16.gmra.mxu0 %v1695_v9 }
 0x381   : > { %v1509_v15 = vunpack.c.l.bf16 %v1473_v46  ;;  %v1510_v35 = vunpack.c.l.bf16 %v1474_v13  ;;  %v1511_v29 = vunpack.c.h.bf16 %v1473_v46  ;;  %v1512_v16 = vunpack.c.h.bf16 %v1474_v13  ;;  %1827 = vmatmul.bf16.gmra.mxu2 %v1696_v24  ;;  %3449 = vmatpush.bf16.msra.mxu1 %v9523_v7 }
 0x382   : > { %3538 = vmatpush.bf16.msrb.mxu2 %v9515_v50  ;;  %1370 = vmax.xlane.f32.xlu2 %v1369_v14  ;;  %v1363_v46 = vmax.f32 %v9575_v54, %v9587_v4 }
 0x383   : > { %v1581_v6 = vmul.f32 1.442695, %v1509_v15  ;;  %v1583_v34 = vmul.f32 1.442695, %v1510_v35  ;;  %v1585_v2 = vmul.f32 1.442695, %v1511_v29  ;;  %3280 = vmatpush.bf16.msra.mxu0 %v12691_v52  ;;  %v9625_v1 = vpop.f32.mrf.mxu3 }
 0x384   : > { %v1587_v41 = vmul.f32 1.442695, %v1512_v16  ;;  %v3414_v26 = vpop.permute.xlu2 %3413  ;;  %v1329_v27 = vpop.xlane.xlu0 %1328 }
 0x385   : > { %7704 = vpow2.f32 %v1581_v6  ;;  %3450 = vmatpush.bf16.msra.mxu1 %v9573_v25  ;;  %v9629_v5 = vpop.f32.mrf.mxu0 }
 0x386   : > { %7706 = vpow2.f32 %v1583_v34  ;;  %3539 = vmatpush.bf16.msrb.mxu2 %v9531_v63  ;;  %v1372_v13 = vmax.f32 %v9609_v60, %v9629_v5 }
 0x387   : > { %7708 = vpow2.f32 %v1585_v2  ;;  %3281 = vmatpush.bf16.msra.mxu0 %v12691_v52 }
 0x388   : > { %7710 = vpow2.f32 %v1587_v41 }
 0x38a   : > { %3540 = vmatpush.bf16.msrb.mxu2 %v9537_v56 }
 0x38b   : > { %v7705_v7 = vpop.eup %7704  ;;  %3282 = vmatpush.bf16.msra.mxu0 %v12691_v52  ;;  %v9634_v25 = vpop.f32.mrf.mxu3 }
 0x38c   : > { %v7707_v50 = vpop.eup %7706  ;;  %v4039_v40 = vpop.permute.xlu1 %4038 }
 0x38d   : > { %v7709_v21 = vpop.eup %7708  ;;  %v9636_v63 = vpop.f32.mrf.mxu0  ;;  %v4134_v22 = vsel %vm1034_vm1, %v4039_v40, 0 }
 0x38e   : > { %v7711_v47 = vpop.eup %7710  ;;  %3541 = vmatpush.bf16.msrb.mxu2 %v3414_v26  ;;  %v1697_v32 = vpack.c.bf16 %v7709_v21, %v7705_v7  ;;  %v1375_v56 = vmax.f32 %v9625_v1, %v9636_v63  ;;  %v1417_v7 = vsub.f32 %v9445_v53, %v1329_v27 }
 0x38f   : > { %3283 = vmatpush.bf16.msra.mxu0 %v12691_v52  ;;  %v1698_v55 = vpack.c.bf16 %v7711_v47, %v7707_v50  ;;  %v1418_v50 = vsub.f32 %v9455_v49, %v1329_v27 }
 0x390   : > { %1743 = vmatmul.bf16.gmra.mxu1 %v1697_v32  ;;  %2049 = vmatmul.bf16.vlgmr.msrb.gmra.mxu3 %v1697_v32 }
 0x391   : > { %1832 = vmatmul.bf16.gmra.mxu2 %v1698_v55  ;;  %2128 = vmatmul.bf16.vlgmr.msrb.gmra.mxu0 %v9589_v44 }
 0x392   : > { %4136 = vmatpush.bf16.xpose.msrb.mxu3 %v4110_v57  ;;  %1376 = vmax.xlane.f32.xlu1 %v1375_v56 }
 0x393   : > { %4225 = vmatpush.bf16.xpose.msrb.mxu0 %v4134_v22  ;;  %v9649_v19 = vpop.f32.mrf.mxu3 }
 0x395   : > { %v9645_v31 = vpop.f32.mrf.mxu0 }
 0x396   : > { %v1378_v10 = vmax.f32 %v9634_v25, %v9645_v31 }
 0x397   : > { %v3400_v9 = vpop.permute.xlu0 %3399 }
 0x398   : > { %3451 = vmatpush.bf16.msra.mxu1 %v3400_v9  ;;  %1379 = vmax.xlane.f32.xlu2 %v1378_v10 }
 0x39b   : > { %v9655_v44 = vpop.f32.mrf.mxu3 }
 0x39d   : > { %1364 = vmax.xlane.f32.xlu0 %v1363_v46  ;;  %v9653_v58 = vpop.f32.mrf.mxu0 }
 0x39e   : > { %v1381_v29 = vmax.f32 %v9649_v19, %v9653_v58 }
 0x3a1   : > { %2133 = vmatmul.bf16.gmra.mxu0 %v1696_v24 }
 0x3a3   : > { %v9663_v35 = vpop.f32.mrf.mxu3 }
 0x3a5   : > { %1373 = vmax.xlane.f32.xlu0 %v1372_v13  ;;  %v9659_v14 = vpop.f32.mrf.mxu0 }
 0x3a6   : > { %v1384_v15 = vmax.f32 %v9655_v44, %v9659_v14 }
 0x3a8   : > { %1385 = vmax.xlane.f32.xlu1 %v1384_v15 }
 0x3ab   : > { %v9671_v6 = vpop.f32.mrf.mxu3 }
 0x3ad   : > { %1382 = vmax.xlane.f32.xlu0 %v1381_v29  ;;  %v9667_v16 = vpop.f32.mrf.mxu0 }
 0x3ae   : > { %v1387_v24 = vmax.f32 %v9663_v35, %v9667_v16 }
 0x3b0   : > { %1388 = vmax.xlane.f32.xlu2 %v1387_v24 }
 0x3b1   : > { %2138 = vmatmul.bf16.gmra.mxu0 %v1698_v55 }
 0x3b5   : > { %v9673_v34 = vpop.f32.mrf.mxu0 }
 0x3b6   : > { %v1390_v2 = vmax.f32 %v9671_v6, %v9673_v34 }
 0x3b7   : > { %v1332_v41 = vpop.xlane.xlu1 %1331 }
 0x3b8   : > { %v1419_v21 = vsub.f32 %v9451_v37, %v1332_v41  ;;  %v1420_v26 = vsub.f32 %v9465_v20, %v1332_v41  ;;  %1391 = vmax.xlane.f32.xlu0 %v1390_v2 }
 0x3ba   : > { %v1475_v40 = vpack.c.bf16 %v1419_v21, %v1417_v7  ;;  %v1476_v47 = vpack.c.bf16 %v1420_v26, %v1418_v50 }
 0x3bc   : > { %v1513_v32 = vunpack.c.l.bf16 %v1475_v40  ;;  %v1514_v22 = vunpack.c.l.bf16 %v1476_v47  ;;  %v1515_v55 = vunpack.c.h.bf16 %v1475_v40  ;;  %v1516_v56 = vunpack.c.h.bf16 %v1476_v47 }
 0x3bd   : > { %v1335_v13 = vpop.xlane.xlu2 %1334  ;;  %v9687_v2 = vpop.f32.mrf.mxu0 }
 0x3be   : > { %v1589_v57 = vmul.f32 1.442695, %v1513_v32  ;;  %v1591_v10 = vmul.f32 1.442695, %v1514_v22  ;;  %v1593_v9 = vmul.f32 1.442695, %v1515_v55  ;;  %v1421_v49 = vsub.f32 %v9463_v11, %v1335_v13 }
 0x3bf   : > { %v1595_v46 = vmul.f32 1.442695, %v1516_v56  ;;  %v1422_v53 = vsub.f32 %v9473_v33, %v1335_v13  ;;  %v1341_v55 = vpop.xlane.xlu1 %1340 }
 0x3c0   : > { %7712 = vpow2.f32 %v1589_v57  ;;  %v1426_v13 = vsub.f32 %v9495_v12, %v1341_v55 }
 0x3c1   : > { %7714 = vpow2.f32 %v1591_v10  ;;  %4036 = vrot.lane.b32.xlu1 %v8981_v28, %s8468_s20 }
 0x3c2   : > { %7716 = vpow2.f32 %v1593_v9  ;;  %v1338_v20 = vpop.xlane.xlu0 %1337  ;;  %v1425_v9 = vsub.f32 %v9483_v43, %v1341_v55  ;;  %v12695_v55 = vld [vmem:[#allocation51_spill] sm:$0xff] }
 0x3c3   : > { %7718 = vpow2.f32 %v1595_v46  ;;  %v1423_v37 = vsub.f32 %v9471_v48, %v1338_v20  ;;  %v1424_v27 = vsub.f32 %v9489_v51, %v1338_v20 }
 0x3c5   : > { %v1477_v15 = vpack.c.bf16 %v1423_v37, %v1421_v49  ;;  %v1478_v29 = vpack.c.bf16 %v1424_v27, %v1422_v53  ;;  %v1344_v32 = vpop.xlane.xlu2 %1343  ;;  %v9696_v10 = vpop.f32.mrf.mxu0 }
 0x3c6   : > { %v7713_v24 = vpop.eup %7712  ;;  %v1427_v57 = vsub.f32 %v9493_v30, %v1344_v32  ;;  %v1428_v46 = vsub.f32 %v9507_v39, %v1344_v32  ;;  %v12694_v32 = vld [vmem:[#allocation50_spill] sm:$0xff] }
 0x3c7   : > { %v7715_v41 = vpop.eup %7714  ;;  %v1517_v7 = vunpack.c.l.bf16 %v1477_v15  ;;  %v1519_v21 = vunpack.c.h.bf16 %v1477_v15  ;;  %v1518_v26 = vunpack.c.l.bf16 %v1478_v29  ;;  %v1520_v33 = vunpack.c.h.bf16 %v1478_v29 }
 0x3c8   : > { %v7717_v50 = vpop.eup %7716  ;;  %4014 = vrot.lane.b32.xlu2 %v8762_v45, %s8468_s20  ;;  %v1479_v49 = vpack.c.bf16 %v1427_v57, %v1425_v9  ;;  %v1480_v53 = vpack.c.bf16 %v1428_v46, %v1426_v13  ;;  %v12696_v57 = vld [vmem:[#allocation53_spill] sm:$0xff] }
 0x3c9   : > { %v7719_v11 = vpop.eup %7718  ;;  %v1699_v40 = vpack.c.bf16 %v7717_v50, %v7713_v24  ;;  %4018 = vrot.lane.b32.xlu1 %v8804_v62, %s8468_s20  ;;  %v1597_v51 = vmul.f32 1.442695, %v1517_v7  ;;  %v1601_v47 = vmul.f32 1.442695, %v1519_v21  ;;  %v1599_v22 = vmul.f32 1.442695, %v1518_v26 }
 0x3ca   : > { %v1700_v48 = vpack.c.bf16 %v7719_v11, %v7715_v41  ;;  %v1603_v56 = vmul.f32 1.442695, %v1520_v33  ;;  %v1347_v20 = vpop.xlane.xlu0 %1346  ;;  %v1521_v15 = vunpack.c.l.bf16 %v1479_v49  ;;  %v1523_v24 = vunpack.c.h.bf16 %v1479_v49  ;;  %v12692_v41 = vld [vmem:[#allocation20_spill] sm:$0xff] }
 0x3cb   : > { %1748 = vmatmul.bf16.gmra.mxu1 %v1699_v40  ;;  %2054 = vmatmul.bf16.gmra.mxu3 %v1699_v40  ;;  %7720 = vpow2.f32 %v1597_v51  ;;  %v1522_v43 = vunpack.c.l.bf16 %v1480_v53  ;;  %v1524_v7 = vunpack.c.h.bf16 %v1480_v53  ;;  %v1350_v51 = vpop.xlane.xlu1 %1349 }
 0x3cc   : > { %3397 = vrot.lane.b32.xlu0 %v8793_v8, %s8467_s18  ;;  %1837 = vmatmul.bf16.gmra.mxu2 %v1700_v48  ;;  %7722 = vpow2.f32 %v1601_v47  ;;  %v1605_v12 = vmul.f32 1.442695, %v1521_v15  ;;  %v1609_v11 = vmul.f32 1.442695, %v1523_v24  ;;  %v1432_v9 = vsub.f32 %v12696_v57, %v1350_v51 }
 0x3cd   : > { %2143 = vmatmul.bf16.gmra.mxu0 %v1700_v48  ;;  %7724 = vpow2.f32 %v1599_v22  ;;  %v9709_v50 = vpop.f32.mrf.mxu0  ;;  %v1607_v26 = vmul.f32 1.442695, %v1522_v43  ;;  %v1611_v33 = vmul.f32 1.442695, %v1524_v7  ;;  %v12693_v48 = vld [vmem:[#allocation49_spill] sm:$0xff]  ;;  %v1431_v22 = vsub.f32 %v12694_v32, %v1350_v51  ;;  %v9720_v43 = vpop.f32.mrf.mxu3 }
 0x3ce   : > { %7726 = vpow2.f32 %v1603_v56  ;;  %v1429_v47 = vsub.f32 %v12693_v48, %v1347_v20  ;;  %v1430_v56 = vsub.f32 %v12695_v55, %v1347_v20  ;;  %v12697_v20 = vld [vmem:[#allocation5_spill] sm:$0xff]  ;;  %v1353_v32 = vpop.xlane.xlu2 %1352  ;;  %v12698_v55 = vld [vmem:[#allocation52_spill] sm:$0xff] }
 0x3cf   : > { %7728 = vpow2.f32 %v1605_v12 }
 0x3d0   : > { %4028 = vrot.lane.b32.xlu2 %v8979_v61, %s8468_s20  ;;  %7730 = vpow2.f32 %v1609_v11  ;;  %v1481_v46 = vpack.c.bf16 %v1431_v22, %v1429_v47 }
 0x3d1   : > { %4034 = vrot.lane.b32.xlu1 %v8948_v18, %s8468_s20  ;;  %v7721_v30 = vpop.eup %7720  ;;  %7732 = vpow2.f32 %v1607_v26 }
 0x3d2   : > { %v7723_v37 = vpop.eup %7722  ;;  %v1356_v40 = vpop.xlane.xlu0 %1355  ;;  %7734 = vpow2.f32 %v1611_v33 }
 0x3d3   : > { %v7725_v27 = vpop.eup %7724  ;;  %v1701_v39 = vpack.c.bf16 %v7723_v37, %v7721_v30  ;;  %v1482_v30 = vpack.c.bf16 %v1432_v9, %v1430_v56  ;;  %v1435_v22 = vsub.f32 %v9535_v17, %v1356_v40  ;;  %v1433_v56 = vsub.f32 %v12698_v55, %v1353_v32 }
 0x3d4   : > { %v7727_v29 = vpop.eup %7726  ;;  %v1436_v57 = vsub.f32 %v9553_v59, %v1356_v40 }
 0x3d5   : > { %v1702_v21 = vpack.c.bf16 %v7727_v29, %v7725_v27  ;;  %v9717_v13 = vpop.f32.mrf.mxu0  ;;  %v7729_v49 = vpop.eup %7728  ;;  %v1525_v29 = vunpack.c.l.bf16 %v1481_v46  ;;  %v1526_v7 = vunpack.c.l.bf16 %v1482_v30 }
 0x3d6   : > { %v7731_v37 = vpop.eup %7730  ;;  %v9729_v9 = vpop.f32.mrf.mxu3 }
 0x3d7   : > { %v7733_v15 = vpop.eup %7732  ;;  %v1703_v12 = vpack.c.bf16 %v7731_v37, %v7729_v49  ;;  %v1613_v11 = vmul.f32 1.442695, %v1525_v29  ;;  %v1615_v48 = vmul.f32 1.442695, %v1526_v7  ;;  %v1396_v17 = vmax.f32 %v9729_v9, %v9696_v10 }
 0x3d8   : > { %4008 = vrot.lane.b32.xlu2 %v8689_v36, %s8468_s20  ;;  %v7735_v24 = vpop.eup %7734 }
 0x3d9   : > { %4016 = vrot.lane.b32.xlu1 %v12692_v41, %s8468_s20  ;;  %v1704_v26 = vpack.c.bf16 %v7735_v24, %v7733_v15  ;;  %7736 = vpow2.f32 %v1613_v11 }
 0x3db   : > { %1753 = vmatmul.bf16.gmra.mxu1 %v1701_v39  ;;  %2059 = vmatmul.bf16.gmra.mxu3 %v1701_v39  ;;  %v1527_v39 = vunpack.c.h.bf16 %v1481_v46  ;;  %v12699_v46 = vld [vmem:[#allocation54_spill] sm:$0xff] }
 0x3dc   : > { %1842 = vmatmul.bf16.gmra.mxu2 %v1702_v21  ;;  %v1434_v49 = vsub.f32 %v12699_v46, %v1353_v32  ;;  %v1362_v32 = vpop.xlane.xlu2 %1361  ;;  %v12700_v46 = vld [vmem:[#allocation57_spill] sm:$0xff] }
 0x3dd   : > { %2148 = vmatmul.bf16.gmra.mxu0 %v1702_v21  ;;  %v1528_v21 = vunpack.c.h.bf16 %v1482_v30  ;;  %v1617_v33 = vmul.f32 1.442695, %v1527_v39  ;;  %v1483_v30 = vpack.c.bf16 %v1435_v22, %v1433_v56 }
 0x3de   : > { %v1484_v24 = vpack.c.bf16 %v1436_v57, %v1434_v49  ;;  %v1359_v57 = vpop.xlane.xlu1 %1358  ;;  %v1439_v49 = vsub.f32 %v12700_v46, %v1362_v32  ;;  %v12704_v46 = vld [vmem:[#allocation18_spill] sm:$0xff] }
 0x3df   : > { %v1619_v47 = vmul.f32 1.442695, %v1528_v21  ;;  %7738 = vpow2.f32 %v1617_v33  ;;  %v7737_v29 = vpop.eup %7736  ;;  %v1529_v40 = vunpack.c.l.bf16 %v1483_v30 }
 0x3e0   : > { %3976 = vrot.lane.b32.xlu2 %v8689_v36, %s8469_s23  ;;  %7740 = vpow2.f32 %v1615_v48  ;;  %v1530_v21 = vunpack.c.l.bf16 %v1484_v24 }
 0x3e1   : > { %7742 = vpow2.f32 %v1619_v47  ;;  %v1621_v33 = vmul.f32 1.442695, %v1529_v40 }
 0x3e2   : > { %v1623_v55 = vmul.f32 1.442695, %v1530_v21 }
 0x3e3   : > { %7744 = vpow2.f32 %v1621_v33 }
 0x3e5   : > { %v4021_v53 = vpop.permute.xlu0 %4020  ;;  %v7739_v39 = vpop.eup %7738 }
 0x3e6   : > { %v4107_v27 = vsel %vm1034_vm1, %v4021_v53, 0  ;;  %v7741_v59 = vpop.eup %7740  ;;  %v1705_v11 = vpack.c.bf16 %v7739_v39, %v7737_v29  ;;  %v1393_v29 = vmax.f32 %v9720_v43, %v9687_v2 }
 0x3e7   : > { %4137 = vmatpush.bf16.xpose.msrb.mxu3 %v4107_v27  ;;  %v7743_v7 = vpop.eup %7742 }
 0x3e8   : > { %3980 = vrot.lane.b32.xlu2 %v12697_v20, %s8469_s23  ;;  %v1706_v48 = vpack.c.bf16 %v7743_v7, %v7741_v59 }
 0x3e9   : > { %v7745_v7 = vpop.eup %7744 }
 0x3eb   : > { %1758 = vmatmul.bf16.gmra.mxu1 %v1703_v12  ;;  %2064 = vmatmul.bf16.gmra.mxu3 %v1703_v12  ;;  %v1531_v12 = vunpack.c.h.bf16 %v1483_v30  ;;  %v12701_v30 = vld [vmem:[#allocation56_spill] sm:$0xff] }
 0x3ec   : > { %v9724_v51 = vpop.f32.mrf.mxu0  ;;  %1847 = vmatmul.bf16.gmra.mxu2 %v1704_v26  ;;  %v1734_v53 = vpop.f32.mrf.mxu1 }
 0x3ed   : > { %2153 = vmatmul.bf16.gmra.mxu0 %v1704_v26  ;;  %v1532_v26 = vunpack.c.h.bf16 %v1484_v24  ;;  %v1625_v47 = vmul.f32 1.442695, %v1531_v12  ;;  %v12703_v24 = vld [vmem:[#allocation58_spill] sm:$0xff] }
 0x3ee   : > { %v1438_v39 = vsub.f32 %v12703_v24, %v1359_v57 }
 0x3ef   : > { %v1627_v56 = vmul.f32 1.442695, %v1532_v26  ;;  %7746 = vpow2.f32 %v1625_v47 }
 0x3f0   : > { %7748 = vpow2.f32 %v1623_v55 }
 0x3f1   : > { %7750 = vpow2.f32 %v1627_v56 }
 0x3f3   : > { %v1823_v37 = vpop.f32.mrf.mxu2 }
 0x3f4   : > { %v9732_v27 = vadd.f32 %v1823_v37, %v1734_v53  ;;  %v9734_v15 = vpop.f32.mrf.mxu0  ;;  %v1437_v53 = vsub.f32 %v12701_v30, %v1359_v57  ;;  %v12702_v37 = vld [vmem:[#allocation59_spill] sm:$0xff] }
 0x3f5   : > { %v7747_v21 = vpop.eup %7746 }
 0x3f6   : > { %1397 = vmax.xlane.f32.xlu0 %v1396_v17  ;;  %v1440_v17 = vsub.f32 %v12702_v37, %v1362_v32  ;;  %v1485_v59 = vpack.c.bf16 %v1439_v49, %v1437_v53  ;;  %v1707_v55 = vpack.c.bf16 %v7747_v21, %v7745_v7  ;;  %v9752_v37 = vpop.f32.mrf.mxu1 }
 0x3f8   : > { %v1486_v12 = vpack.c.bf16 %v1440_v17, %v1438_v39  ;;  %v1533_v26 = vunpack.c.l.bf16 %v1485_v59  ;;  %v1368_v39 = vpop.xlane.xlu1 %1367 }
 0x3f9   : > { %v1443_v21 = vsub.f32 %v9581_v42, %v1368_v39 }
 0x3fa   : > { %v1534_v47 = vunpack.c.l.bf16 %v1486_v12  ;;  %v1536_v32 = vunpack.c.h.bf16 %v1486_v12  ;;  %v1629_v56 = vmul.f32 1.442695, %v1533_v26 }
 0x3fb   : > { %1763 = vmatmul.bf16.gmra.mxu1 %v1705_v11  ;;  %2069 = vmatmul.bf16.gmra.mxu3 %v1705_v11  ;;  %v7749_v11 = vpop.eup %7748  ;;  %v9750_v30 = vpop.f32.mrf.mxu2 }
 0x3fc   : > { %1852 = vmatmul.bf16.gmra.mxu2 %v1706_v48  ;;  %v7751_v33 = vpop.eup %7750  ;;  %v1631_v53 = vmul.f32 1.442695, %v1534_v47  ;;  %v1635_v24 = vmul.f32 1.442695, %v1536_v32  ;;  %7752 = vpow2.f32 %v1629_v56 }
 0x3fd   : > { %v9738_v22 = vpop.f32.mrf.mxu0  ;;  %2158 = vmatmul.bf16.gmra.mxu0 %v1706_v48  ;;  %v1535_v48 = vunpack.c.h.bf16 %v1485_v59  ;;  %v1708_v57 = vpack.c.bf16 %v7751_v33, %v7749_v11  ;;  %v12705_v33 = vld [vmem:[#allocation22_spill] sm:$0xff] }
 0x3ff   : > { %v1633_v49 = vmul.f32 1.442695, %v1535_v48 }
 0x401   : > { %7754 = vpow2.f32 %v1633_v49 }
 0x402   : > { %7756 = vpow2.f32 %v1631_v53  ;;  %v7753_v47 = vpop.eup %7752 }
 0x403   : > { %1394 = vmax.xlane.f32.xlu1 %v1393_v29  ;;  %v9754_v29 = vpop.f32.mrf.mxu3  ;;  %7758 = vpow2.f32 %v1635_v24 }
 0x404   : > { %v1399_v7 = vmax.f32 %v9754_v29, %v9709_v50 }
 0x405   : > { %v9746_v40 = vpop.f32.mrf.mxu0 }
 0x407   : > { %v7755_v42 = vpop.eup %7754 }
 0x40a   : > { %4032 = vrot.lane.b32.xlu0 %v12704_v46, %s8468_s20 }
 0x40b   : > { %1768 = vmatmul.bf16.gmra.mxu1 %v1707_v55  ;;  %2074 = vmatmul.bf16.gmra.mxu3 %v1707_v55  ;;  %v1828_v55 = vpop.f32.mrf.mxu2  ;;  %v9781_v36 = vpop.f32.mrf.mxu3 }
 0x40c   : > { %1857 = vmatmul.bf16.gmra.mxu2 %v1708_v57 }
 0x40d   : > { %2163 = vmatmul.bf16.gmra.mxu0 %v1708_v57  ;;  %v8470_v57 = vmov 0  }
 0x40e   : > { %v2129_v17 = vpop.f32.mrf.mxu0  ;;  %7686 = vset.pattern.permute.xlu2 %v8470_v57  ;;  %7684 = vset.pattern.permute.xlu0 %v8470_v57 }
 0x40f   : > { %v9757_v59 = vadd.f32 %v2129_v17, %v9724_v51  ;;  %v1444_v51 = vsub.f32 %v9602_v23, %v1368_v39  ;;  %7685 = vset.pattern.permute.xlu1 %v8470_v57 }
 0x410   : > { %v1365_v12 = vpop.xlane.xlu0 %1364 }
 0x411   : > { %v1441_v11 = vsub.f32 %v9575_v54, %v1365_v12  ;;  %v1442_v26 = vsub.f32 %v9587_v4, %v1365_v12  ;;  %1400 = vmax.xlane.f32.xlu2 %v1399_v7  ;;  %v7757_v54 = vpop.eup %7756  ;;  %v1739_v4 = vpop.f32.mrf.mxu1  ;;  %v1709_v7 = vpack.c.bf16 %v7755_v42, %v7753_v47 }
 0x412   : > { %4030 = vrot.lane.b32.xlu0 %v12705_v33, %s8468_s20  ;;  %v7759_v53 = vpop.eup %7758 }
 0x413   : > { %v1487_v48 = vpack.c.bf16 %v1443_v21, %v1441_v11  ;;  %v1488_v32 = vpack.c.bf16 %v1444_v51, %v1442_v26  ;;  %v1710_v39 = vpack.c.bf16 %v7759_v53, %v7757_v54  ;;  %v12706_v26 = vld [vmem:[#allocation21_spill] sm:$0xff] }
 0x415   : > { %v1537_v49 = vunpack.c.l.bf16 %v1487_v48  ;;  %v1539_v17 = vunpack.c.h.bf16 %v1487_v48  ;;  %v1538_v24 = vunpack.c.l.bf16 %v1488_v32  ;;  %v1540_v12 = vunpack.c.h.bf16 %v1488_v32  ;;  %v1371_v48 = vpop.xlane.xlu2 %1370  ;;  %v1830_v32 = vpop.f32.mrf.mxu2 }
 0x416   : > { %v9767_v56 = vpop.f32.mrf.mxu0  ;;  %v1445_v54 = vsub.f32 %v9597_v38, %v1371_v48  ;;  %v1829_v38 = vadd.f32 %v1828_v55, %v1739_v4 }
 0x417   : > { %v1637_v23 = vmul.f32 1.442695, %v1537_v49  ;;  %v1641_v21 = vmul.f32 1.442695, %v1539_v17  ;;  %v1639_v51 = vmul.f32 1.442695, %v1538_v24  ;;  %v1446_v24 = vsub.f32 %v9618_v3, %v1371_v48 }
 0x418   : > { %v1374_v11 = vpop.xlane.xlu0 %1373  ;;  %v1643_v47 = vmul.f32 1.442695, %v1540_v12  ;;  %v12707_v17 = vld [vmem:[#allocation4_spill] sm:$0xff] }
 0x419   : > { %7760 = vpow2.f32 %v1637_v23  ;;  %v1447_v42 = vsub.f32 %v9609_v60, %v1374_v11  ;;  %v1741_v49 = vpop.f32.mrf.mxu1  ;;  %v1448_v53 = vsub.f32 %v9629_v5, %v1374_v11 }
 0x41a   : > { %4012 = vrot.lane.b32.xlu0 %v12697_v20, %s8468_s20  ;;  %7762 = vpow2.f32 %v1641_v21  ;;  %v1831_v3 = vadd.f32 %v1830_v32, %v1741_v49 }
 0x41b   : > { %1773 = vmatmul.bf16.gmra.mxu1 %v1709_v7  ;;  %2079 = vmatmul.bf16.gmra.mxu3 %v1709_v7  ;;  %7764 = vpow2.f32 %v1639_v51  ;;  %v1377_v7 = vpop.xlane.xlu1 %1376  ;;  %v1490_v23 = vpack.c.bf16 %v1448_v53, %v1446_v24 }
 0x41c   : > { %4026 = vrot.lane.b32.xlu1 %v12706_v26, %s8468_s20  ;;  %1862 = vmatmul.bf16.gmra.mxu2 %v1710_v39  ;;  %7766 = vpow2.f32 %v1643_v47 }
 0x41d   : > { %2168 = vmatmul.bf16.gmra.mxu0 %v1710_v39  ;;  %v1489_v39 = vpack.c.bf16 %v1447_v42, %v1445_v54  ;;  %v9785_v11 = vpop.f32.mrf.mxu2  ;;  %v1542_v47 = vunpack.c.l.bf16 %v1490_v23  ;;  %7768 = vrcp.f32 %v1829_v38  ;;  %v1544_v48 = vunpack.c.h.bf16 %v1490_v23  ;;  %v12708_v42 = vld [vmem:[#allocation23_spill] sm:$0xff]  ;;  %v1380_v24 = vpop.xlane.xlu2 %1379 }
 0x41e   : > { %v9773_v57 = vpop.f32.mrf.mxu0  ;;  %7770 = vrcp.f32 %v1831_v3 }
 0x41f   : > { %v7761_v12 = vpop.eup %7760  ;;  %v1541_v51 = vunpack.c.l.bf16 %v1489_v39  ;;  %v1543_v5 = vunpack.c.h.bf16 %v1489_v39  ;;  %v1651_v32 = vmul.f32 1.442695, %v1544_v48 }
 0x420   : > { %v7763_v21 = vpop.eup %7762  ;;  %v9795_v49 = vpop.xlane.xlu0 %1382 }
 0x421   : > { %v7765_v20 = vpop.eup %7764  ;;  %v1711_v18 = vpack.c.bf16 %v7763_v21, %v7761_v12  ;;  %v9791_v54 = vpop.f32.mrf.mxu1  ;;  %v1645_v55 = vmul.f32 1.442695, %v1541_v51  ;;  %v1649_v39 = vmul.f32 1.442695, %v1543_v5  ;;  %v1647_v21 = vmul.f32 1.442695, %v1542_v47 }
 0x422   : > { %4010 = vrot.lane.b32.xlu0 %v12707_v17, %s8468_s20  ;;  %v7767_v8 = vpop.eup %7766  ;;  %v2050_v12 = vpop.f32.mrf.mxu3  ;;  %v1451_v51 = vsub.f32 %v9634_v25, %v1380_v24 }
 0x423   : > { %v9793_v4 = vpop.xlane.xlu1 %1385  ;;  %v1712_v53 = vpack.c.bf16 %v7767_v8, %v7765_v20  ;;  %7772 = vpow2.f32 %v1645_v55  ;;  %v1449_v8 = vsub.f32 %v9625_v1, %v1377_v7  ;;  %v1450_v20 = vsub.f32 %v9636_v63, %v1377_v7 }
 0x424   : > { %7774 = vpow2.f32 %v1649_v39 }
 0x425   : > { %7776 = vpow2.f32 %v1647_v21  ;;  %v1491_v5 = vpack.c.bf16 %v1451_v51, %v1449_v8  ;;  %v1835_v47 = vpop.f32.mrf.mxu2 }
 0x426   : > { %v9783_v60 = vpop.f32.mrf.mxu0  ;;  %7778 = vpow2.f32 %v1651_v32 }
 0x429   : > { %3986 = vrot.lane.b32.xlu2 %v8804_v62, %s8469_s23  ;;  %v7769_v62 = vpop.eup %7768  ;;  %v1746_v39 = vpop.f32.mrf.mxu1 }
 0x42a   : > { %4024 = vrot.lane.b32.xlu0 %v12708_v42, %s8468_s20  ;;  %v7771_v48 = vpop.eup %7770 }
 0x42b   : > { %1778 = vmatmul.bf16.gmra.mxu1 %v1711_v18  ;;  %2084 = vmatmul.bf16.gmra.mxu3 %v1711_v18  ;;  %v1452_v18 = vsub.f32 %v9645_v31, %v1380_v24  ;;  %v7773_v55 = vpop.eup %7772  ;;  %v1836_v31 = vadd.f32 %v1835_v47, %v1746_v39  ;;  %v9806_v24 = vpop.xlane.xlu0 %1391  ;;  %v1454_v39 = vsub.f32 %v9653_v58, %v9795_v49 }
 0x42c   : > { %1867 = vmatmul.bf16.gmra.mxu2 %v1712_v53  ;;  %v7775_v1 = vpop.eup %7774 }
 0x42d   : > { %2173 = vmatmul.bf16.gmra.mxu0 %v1712_v53  ;;  %v1492_v53 = vpack.c.bf16 %v1452_v18, %v1450_v20  ;;  %v1713_v63 = vpack.c.bf16 %v7775_v1, %v7773_v55  ;;  %7780 = vrcp.f32 %v1836_v31 }
 0x42e   : > { %v2139_v38 = vpop.f32.mrf.mxu0 }
 0x42f   : > { %v9797_v23 = vadd.f32 %v2139_v38, %v2050_v12  ;;  %v1545_v12 = vunpack.c.l.bf16 %v1491_v5  ;;  %v1547_v38 = vunpack.c.h.bf16 %v1491_v5  ;;  %v1546_v32 = vunpack.c.l.bf16 %v1492_v53 }
 0x430   : > { %v1548_v7 = vunpack.c.h.bf16 %v1492_v53  ;;  %v1455_v53 = vsub.f32 %v9655_v44, %v9793_v4  ;;  %v1402_v44 = vmax.f32 %v9781_v36, %v9717_v13 }
 0x431   : > { %2221 = vperm.xlu2 %7686, %v7769_v62   ;;  %v7777_v62 = vpop.eup %7776  ;;  %v1653_v51 = vmul.f32 1.442695, %v1545_v12  ;;  %v1657_v20 = vmul.f32 1.442695, %v1547_v38 }
 0x432   : > { %3978 = vrot.lane.b32.xlu0 %v12707_v17, %s8469_s23  ;;  %v7779_v21 = vpop.eup %7778  ;;  %v1659_v5 = vmul.f32 1.442695, %v1548_v7 }
 0x433   : > { %v4037_v3 = vpop.permute.xlu1 %4036  ;;  %v1714_v8 = vpack.c.bf16 %v7779_v21, %v7777_v62  ;;  %7782 = vpow2.f32 %v1653_v51  ;;  %v7781_v55 = vpop.eup %7780 }
 0x434   : > { %v4131_v25 = vsel %vm1034_vm1, %v4037_v3, 0  ;;  %v1655_v3 = vmul.f32 1.442695, %v1546_v32  ;;  %7784 = vpow2.f32 %v1657_v20 }
 0x435   : > { %4226 = vmatpush.bf16.xpose.msrb.mxu0 %v4131_v25 }
 0x436   : > { %7786 = vpow2.f32 %v1655_v3  ;;  %v9817_v1 = vpop.f32.mrf.mxu0 }
 0x437   : > { %7788 = vpow2.f32 %v1659_v5 }
 0x439   : > { %2226 = vperm.xlu2 %7686, %v7771_v48   ;;  %v1453_v48 = vsub.f32 %v9649_v19, %v9795_v49  ;;  %v1456_v19 = vsub.f32 %v9659_v14, %v9793_v4  ;;  %v7783_v21 = vpop.eup %7782  ;;  %v9826_v49 = vpop.f32.mrf.mxu3 }
 0x43a   : > { %3982 = vrot.lane.b32.xlu0 %v8762_v45, %s8469_s23  ;;  %v7785_v58 = vpop.eup %7784 }
 0x43b   : > { %1783 = vmatmul.bf16.gmra.mxu1 %v1713_v63  ;;  %2089 = vmatmul.bf16.gmra.mxu3 %v1713_v63  ;;  %v4019_v18 = vpop.permute.xlu1 %4018  ;;  %v1493_v31 = vpack.c.bf16 %v1455_v53, %v1453_v48  ;;  %v1494_v38 = vpack.c.bf16 %v1456_v19, %v1454_v39 }
 0x43c   : > { %v4104_v47 = vsel %vm1034_vm1, %v4019_v18, 0  ;;  %1872 = vmatmul.bf16.gmra.mxu2 %v1714_v8  ;;  %v7787_v32 = vpop.eup %7786  ;;  %v1715_v18 = vpack.c.bf16 %v7785_v58, %v7783_v21  ;;  %v1460_v21 = vsub.f32 %v9673_v34, %v9806_v24  ;;  %v1834_v34 = vadd.f32 %v9785_v11, %v9791_v54 }
 0x43d   : > { %2178 = vmatmul.bf16.gmra.mxu0 %v1714_v8  ;;  %4138 = vmatpush.bf16.xpose.msrb.mxu3 %v4104_v47  ;;  %v1549_v63 = vunpack.c.l.bf16 %v1493_v31  ;;  %v7789_v7 = vpop.eup %7788  ;;  %v1551_v51 = vunpack.c.h.bf16 %v1493_v31  ;;  %v1389_v8 = vpop.xlane.xlu2 %1388  ;;  %v1550_v4 = vunpack.c.l.bf16 %v1494_v38  ;;  %v1552_v20 = vunpack.c.h.bf16 %v1494_v38 }
 0x43e   : > { %v3398_v25 = vpop.permute.xlu0 %3397  ;;  %v1716_v5 = vpack.c.bf16 %v7789_v7, %v7787_v32  ;;  %v1459_v31 = vsub.f32 %v9671_v6, %v9806_v24  ;;  %v1458_v6 = vsub.f32 %v9667_v16, %v1389_v8 }
 0x43f   : > { %3452 = vmatpush.bf16.msra.mxu1 %v3398_v25  ;;  %v1661_v3 = vmul.f32 1.442695, %v1549_v63  ;;  %v1665_v48 = vmul.f32 1.442695, %v1551_v51  ;;  %v1663_v53 = vmul.f32 1.442695, %v1550_v4 }
 0x440   : > { %v1667_v39 = vmul.f32 1.442695, %v1552_v20  ;;  %v1496_v7 = vpack.c.bf16 %v1460_v21, %v1458_v6 }
 0x441   : > { %2236 = vperm.xlu2 %7686, %v7781_v55   ;;  %7790 = vpow2.f32 %v1661_v3 }
 0x442   : > { %3988 = vrot.lane.b32.xlu0 %v8826_v0, %s8469_s23  ;;  %7792 = vpow2.f32 %v1665_v48  ;;  %v1554_v16 = vunpack.c.l.bf16 %v1496_v7 }
 0x443   : > { %v4035_v62 = vpop.permute.xlu1 %4034  ;;  %7794 = vpow2.f32 %v1663_v53 }
 0x444   : > { %v4128_v12 = vsel %vm1034_vm1, %v4035_v62, 0  ;;  %7796 = vpow2.f32 %v1667_v39 }
 0x445   : > { %4227 = vmatpush.bf16.xpose.msrb.mxu0 %v4128_v12  ;;  %v4015_v38 = vpop.permute.xlu2 %4014  ;;  %7798 = vrcp.f32 %v9732_v27 }
 0x446   : > { %1403 = vmax.xlane.f32.xlu1 %v1402_v44  ;;  %v1457_v44 = vsub.f32 %v9663_v35, %v1389_v8  ;;  %v4098_v51 = vsel %vm1034_vm1, %v4015_v38, 0  ;;  %7800 = vrcp.f32 %v1834_v34 }
 0x447   : > { %v7791_v63 = vpop.eup %7790 }
 0x448   : > { %v9828_v14 = vpop.f32.mrf.mxu1  ;;  %v1495_v32 = vpack.c.bf16 %v1459_v31, %v1457_v44  ;;  %v7793_v35 = vpop.eup %7792  ;;  %v1671_v31 = vmul.f32 1.442695, %v1554_v16 }
 0x449   : > { %v7795_v4 = vpop.eup %7794  ;;  %v1717_v48 = vpack.c.bf16 %v7793_v35, %v7791_v63  ;;  %v1826_v35 = vadd.f32 %v9750_v30, %v9752_v37 }
 0x44a   : > { %v9830_v47 = vpop.f32.mrf.mxu0  ;;  %3992 = vrot.lane.b32.xlu0 %v12708_v42, %s8469_s23  ;;  %v7797_v20 = vpop.eup %7796  ;;  %v1555_v3 = vunpack.c.h.bf16 %v1495_v32 }
 0x44b   : > { %1788 = vmatmul.bf16.gmra.mxu1 %v1715_v18  ;;  %2094 = vmatmul.bf16.gmra.mxu3 %v1715_v18  ;;  %v4017_v25 = vpop.permute.xlu1 %4016  ;;  %v1553_v18 = vunpack.c.l.bf16 %v1495_v32  ;;  %v1718_v11 = vpack.c.bf16 %v7797_v20, %v7795_v4 }
 0x44c   : > { %v4101_v55 = vsel %vm1034_vm1, %v4017_v25, 0  ;;  %1877 = vmatmul.bf16.gmra.mxu2 %v1716_v5  ;;  %v7799_v25 = vpop.eup %7798  ;;  %v1673_v54 = vmul.f32 1.442695, %v1555_v3  ;;  %v12709_v3 = vld [vmem:[#allocation12_spill] sm:$0xff] }
 0x44d   : > { %2183 = vmatmul.bf16.gmra.mxu0 %v1716_v5  ;;  %4139 = vmatpush.bf16.xpose.msrb.mxu3 %v4101_v55  ;;  %v1556_v55 = vunpack.c.h.bf16 %v1496_v7  ;;  %v1669_v39 = vmul.f32 1.442695, %v1553_v18  ;;  %v9855_v44 = vpop.permute.xlu2 %4028  ;;  %v7801_v6 = vpop.eup %7800 }
 0x44e   : > { %v9835_v19 = vpop.f32.mrf.mxu3 }
 0x44f   : > { %v1838_v62 = vpop.f32.mrf.mxu2  ;;  %v1675_v21 = vmul.f32 1.442695, %v1556_v55 }
 0x450   : > { %v1751_v12 = vpop.f32.mrf.mxu1 }
 0x452   : > { %v9842_v58 = vpop.f32.mrf.mxu0  ;;  %3994 = vrot.lane.b32.xlu0 %v12706_v26, %s8469_s23 }
 0x455   : > { %4140 = vmatpush.bf16.xpose.msrb.mxu3 %v4098_v51  ;;  %v9868_v20 = vpop.permute.xlu2 %4008 }
 0x456   : > { %v9851_v24 = vpop.f32.mrf.mxu3 }
 0x457   : > { %v1840_v5 = vpop.f32.mrf.mxu2 }
 0x458   : > { %v1754_v27 = vpop.f32.mrf.mxu1  ;;  %v1841_v8 = vadd.f32 %v1840_v5, %v1751_v12  ;;  %v1839_v12 = vadd.f32 %v1838_v62, %v9828_v14 }
 0x45a   : > { %v9853_v53 = vpop.f32.mrf.mxu0  ;;  %2211 = vperm.xlu0 %7684, %v7799_v25   ;;  %7802 = vrcp.f32 %v1841_v8 }
 0x45b   : > { %1793 = vmatmul.bf16.gmra.mxu1 %v1717_v48  ;;  %2099 = vmatmul.bf16.gmra.mxu3 %v1717_v48  ;;  %7804 = vpow2.f32 %v1669_v39 }
 0x45c   : > { %1882 = vmatmul.bf16.gmra.mxu2 %v1718_v11  ;;  %7806 = vpow2.f32 %v1673_v54 }
 0x45d   : > { %2188 = vmatmul.bf16.gmra.mxu0 %v1718_v11  ;;  %7808 = vpow2.f32 %v1671_v31 }
 0x45e   : > { %v9857_v38 = vpop.f32.mrf.mxu3  ;;  %7810 = vpow2.f32 %v1675_v21 }
 0x45f   : > { %3984 = vrot.lane.b32.xlu1 %v12692_v41, %s8469_s23  ;;  %v1843_v32 = vpop.f32.mrf.mxu2  ;;  %7812 = vrcp.f32 %v1839_v12 }
 0x460   : > { %v1756_v63 = vpop.f32.mrf.mxu1  ;;  %v7803_v7 = vpop.eup %7802  ;;  %v1844_v62 = vadd.f32 %v1843_v32, %v1754_v27  ;;  %7814 = vrcp.f32 %v1826_v35 }
 0x461   : > { %2246 = vperm.xlu2 %7686, %v7803_v7   ;;  %v7805_v34 = vpop.eup %7804 }
 0x462   : > { %v9862_v51 = vpop.f32.mrf.mxu0  ;;  %2231 = vperm.xlu0 %7684, %v7801_v6   ;;  %v7807_v14 = vpop.eup %7806  ;;  %7816 = vrcp.f32 %v1844_v62 }
 0x463   : > { %v7809_v18 = vpop.eup %7808  ;;  %v1719_v55 = vpack.c.bf16 %v7807_v14, %v7805_v34  ;;  %v9876_v6 = vpop.permute.xlu2 %3976 }
 0x464   : > { %v7811_v5 = vpop.eup %7810  ;;  %12710 = vst [vmem:[#allocation49_spill] sm:$0xff] %v9876_v6 }
 0x465   : > { %v7813_v8 = vpop.eup %7812  ;;  %v1720_v37 = vpack.c.bf16 %v7811_v5, %v7809_v18 }
 0x466   : > { %v9866_v4 = vpop.f32.mrf.mxu3  ;;  %v7815_v27 = vpop.eup %7814 }
 0x467   : > { %3990 = vrot.lane.b32.xlu1 %v12709_v3, %s8469_s23  ;;  %v1845_v25 = vpop.f32.mrf.mxu2 }
 0x468   : > { %v1759_v16 = vpop.f32.mrf.mxu1  ;;  %v1846_v48 = vadd.f32 %v1845_v25, %v1756_v63  ;;  %v7817_v11 = vpop.eup %7816 }
 0x469   : > { %v1398_v63 = vpop.xlane.xlu0 %1397 }
 0x46a   : > { %v9872_v30 = vpop.f32.mrf.mxu0  ;;  %2241 = vperm.xlu0 %7684, %v7813_v8   ;;  %7818 = vrcp.f32 %v1846_v48  ;;  %v1463_v34 = vsub.f32 %v9729_v9, %v1398_v63  ;;  %v1464_v14 = vsub.f32 %v9696_v10, %v1398_v63 }
 0x46b   : > { %1798 = vmatmul.bf16.gmra.mxu1 %v1719_v55  ;;  %2104 = vmatmul.bf16.gmra.mxu3 %v1719_v55  ;;  %v9888_v9 = vpop.permute.xlu2 %3980 }
 0x46c   : > { %1887 = vmatmul.bf16.gmra.mxu2 %v1720_v37  ;;  %12711 = vst [vmem:[#allocation50_spill] sm:$0xff] %v9888_v9 }
 0x46d   : > { %2193 = vmatmul.bf16.gmra.mxu0 %v1720_v37 }
 0x46e   : > { %v9874_v39 = vpop.f32.mrf.mxu3 }
 0x46f   : > { %2216 = vperm.xlu1 %7685, %v7815_v27   ;;  %v1848_v54 = vpop.f32.mrf.mxu2 }
 0x470   : > { %v1761_v31 = vpop.f32.mrf.mxu1  ;;  %v7819_v21 = vpop.eup %7818  ;;  %v1849_v12 = vadd.f32 %v1848_v54, %v1759_v16 }
 0x471   : > { %2256 = vperm.xlu2 %7686, %v7819_v21  }
 0x472   : > { %v9878_v32 = vpop.f32.mrf.mxu0  ;;  %2251 = vperm.xlu0 %7684, %v7817_v11   ;;  %7820 = vrcp.f32 %v1849_v12 }
 0x476   : > { %v9880_v7 = vpop.f32.mrf.mxu3  ;;  %v1395_v35 = vpop.xlane.xlu1 %1394 }
 0x477   : > { %v1461_v62 = vsub.f32 %v9720_v43, %v1395_v35  ;;  %v1462_v18 = vsub.f32 %v9687_v2, %v1395_v35  ;;  %v1850_v5 = vpop.f32.mrf.mxu2 }
 0x478   : > { %v1764_v25 = vpop.f32.mrf.mxu1  ;;  %v7821_v16 = vpop.eup %7820  ;;  %v1851_v8 = vadd.f32 %v1850_v5, %v1761_v31 }
 0x479   : > { %v1497_v48 = vpack.c.bf16 %v1463_v34, %v1461_v62  ;;  %v1498_v55 = vpack.c.bf16 %v1464_v14, %v1462_v18 }
 0x47a   : > { %v9886_v37 = vpop.f32.mrf.mxu0  ;;  %2261 = vperm.xlu0 %7684, %v7821_v16   ;;  %7822 = vrcp.f32 %v1851_v8 }
 0x47b   : > { %v1557_v27 = vunpack.c.l.bf16 %v1497_v48  ;;  %v1558_v11 = vunpack.c.l.bf16 %v1498_v55  ;;  %v1559_v54 = vunpack.c.h.bf16 %v1497_v48  ;;  %v1560_v10 = vunpack.c.h.bf16 %v1498_v55 }
 0x47c   : > { %v4033_v21 = vpop.permute.xlu0 %4032 }
 0x47d   : > { %v1677_v43 = vmul.f32 1.442695, %v1557_v27  ;;  %v1679_v12 = vmul.f32 1.442695, %v1558_v11  ;;  %v1681_v2 = vmul.f32 1.442695, %v1559_v54 }
 0x47e   : > { %v1683_v63 = vmul.f32 1.442695, %v1560_v10  ;;  %v9890_v35 = vpop.f32.mrf.mxu3  ;;  %v4125_v31 = vsel %vm1034_vm1, %v4033_v21, 0 }
 0x47f   : > { %7824 = vpow2.f32 %v1677_v43  ;;  %4228 = vmatpush.bf16.xpose.msrb.mxu0 %v4125_v31  ;;  %v1853_v34 = vpop.f32.mrf.mxu2 }
 0x480   : > { %7826 = vpow2.f32 %v1679_v12  ;;  %v1766_v14 = vpop.f32.mrf.mxu1  ;;  %v7823_v62 = vpop.eup %7822  ;;  %v1854_v18 = vadd.f32 %v1853_v34, %v1764_v25 }
 0x481   : > { %7828 = vpow2.f32 %v1681_v2  ;;  %2266 = vperm.xlu2 %7686, %v7823_v62  }
 0x482   : > { %7830 = vpow2.f32 %v1683_v63  ;;  %v9893_v5 = vpop.f32.mrf.mxu0 }
 0x483   : > { %7832 = vrcp.f32 %v1854_v18 }
 0x484   : > { %v4031_v16 = vpop.permute.xlu0 %4030  ;;  %v9895_v8 = vpop.xlane.xlu2 %1400 }
 0x485   : > { %v7825_v48 = vpop.eup %7824  ;;  %v4122_v55 = vsel %vm1034_vm1, %v4031_v16, 0  ;;  %v1466_v9 = vsub.f32 %v9709_v50, %v9895_v8 }
 0x486   : > { %v7827_v27 = vpop.eup %7826  ;;  %v9898_v11 = vpop.f32.mrf.mxu3 }
 0x487   : > { %v7829_v54 = vpop.eup %7828  ;;  %4229 = vmatpush.bf16.xpose.msrb.mxu0 %v4122_v55  ;;  %v1855_v21 = vpop.f32.mrf.mxu2 }
 0x488   : > { %v7831_v10 = vpop.eup %7830  ;;  %v1769_v43 = vpop.f32.mrf.mxu1  ;;  %v1721_v25 = vpack.c.bf16 %v7829_v54, %v7825_v48  ;;  %v1856_v2 = vadd.f32 %v1855_v21, %v1766_v14  ;;  %v4119_v14 = vsel %vm1034_vm1, %v9855_v44, 0  ;;  %v2135_v21 = vadd.f32 %v9773_v57, %v9738_v22 }
 0x489   : > { %v7833_v12 = vpop.eup %7832  ;;  %v1722_v63 = vpack.c.bf16 %v7831_v10, %v7827_v27  ;;  %v2137_v57 = vadd.f32 %v9783_v60, %v9746_v40  ;;  %v2142_v60 = vadd.f32 %v9817_v1, %v9826_v49 }
 0x48a   : > { %v9900_v31 = vpop.f32.mrf.mxu0  ;;  %2271 = vperm.xlu0 %7684, %v7833_v12   ;;  %1803 = vmatmul.bf16.gmra.mxu1 %v1721_v25  ;;  %7834 = vrcp.f32 %v1856_v2 }
 0x48b   : > { %1892 = vmatmul.bf16.gmra.mxu2 %v1722_v63  ;;  %2109 = vmatmul.bf16.gmra.mxu3 %v1721_v25 }
 0x48c   : > { %2198 = vmatmul.bf16.gmra.mxu0 %v1722_v63  ;;  %v4013_v34 = vpop.permute.xlu0 %4012  ;;  %v9902_v62 = vpop.permute.xlu2 %3986 }
 0x48d   : > { %12712 = vst [vmem:[#allocation51_spill] sm:$0xff] %v9902_v62  ;;  %v4095_v18 = vsel %vm1034_vm1, %v4013_v34, 0 }
 0x48e   : > { %v9905_v16 = vpop.f32.mrf.mxu3  ;;  %4141 = vmatpush.bf16.xpose.msrb.mxu3 %v4095_v18  ;;  %v4027_v25 = vpop.permute.xlu1 %4026 }
 0x48f   : > { %4230 = vmatpush.bf16.xpose.msrb.mxu0 %v4119_v14  ;;  %v1858_v48 = vpop.f32.mrf.mxu2  ;;  %v4116_v44 = vsel %vm1034_vm1, %v4027_v25, 0  ;;  %v4089_v25 = vsel %vm1034_vm1, %v9868_v20, 0 }
 0x490   : > { %v1771_v55 = vpop.f32.mrf.mxu1  ;;  %v7835_v27 = vpop.eup %7834  ;;  %v1859_v54 = vadd.f32 %v1858_v48, %v1769_v43 }
 0x491   : > { %2276 = vperm.xlu2 %7686, %v7835_v27  }
 0x492   : > { %v9909_v10 = vpop.f32.mrf.mxu0  ;;  %7836 = vrcp.f32 %v1859_v54 }
 0x494   : > { %v4011_v12 = vpop.permute.xlu0 %4010  ;;  %v2222_v2 = vpop.permute.xlu2 %2221 }
 0x495   : > { %v2371_v63 = vmul.f32 %v2222_v2, %v2135_v21  ;;  %v4092_v34 = vsel %vm1034_vm1, %v4011_v12, 0 }
 0x496   : > { %v9914_v18 = vpop.f32.mrf.mxu3  ;;  %4142 = vmatpush.bf16.xpose.msrb.mxu3 %v4092_v34 }
 0x497   : > { %2403 = vst.msk [vmem:[#allocation2 + $0x10] sm:$0xff] %vm1034_vm1, %v2371_v63  ;;  %4231 = vmatpush.bf16.xpose.msrb.mxu0 %v4116_v44  ;;  %v1860_v43 = vpop.f32.mrf.mxu2 }
 0x498   : > { %v1774_v14 = vpop.f32.mrf.mxu1  ;;  %v7837_v48 = vpop.eup %7836  ;;  %v1861_v27 = vadd.f32 %v1860_v43, %v1771_v55 }
 0x499   : > { %2281 = vperm.xlu0 %7684, %v7837_v48  }
 0x49a   : > { %v9918_v22 = vpop.f32.mrf.mxu0  ;;  %7838 = vrcp.f32 %v1861_v27 }
 0x49c   : > { %v4025_v54 = vpop.permute.xlu0 %4024  ;;  %v2227_v21 = vpop.permute.xlu2 %2226 }
 0x49d   : > { %v2372_v12 = vmul.f32 %v2227_v21, %v2137_v57  ;;  %v4113_v2 = vsel %vm1034_vm1, %v4025_v54, 0 }
 0x49e   : > { %v9925_v63 = vpop.f32.mrf.mxu3  ;;  %4143 = vmatpush.bf16.xpose.msrb.mxu3 %v4089_v25 }
 0x49f   : > { %2404 = vst.msk [vmem:[#allocation2 + $0x18] sm:$0xff] %vm1034_vm1, %v2372_v12  ;;  %4232 = vmatpush.bf16.xpose.msrb.mxu0 %v4113_v2  ;;  %v1863_v55 = vpop.f32.mrf.mxu2 }
 0x4a0   : > { %v1776_v34 = vpop.f32.mrf.mxu1  ;;  %v7839_v44 = vpop.eup %7838  ;;  %v1864_v43 = vadd.f32 %v1863_v55, %v1774_v14 }
 0x4a1   : > { %2286 = vperm.xlu1 %7685, %v7839_v44  }
 0x4a2   : > { %v9928_v40 = vpop.f32.mrf.mxu0  ;;  %7840 = vrcp.f32 %v1864_v43 }
 0x4a4   : > { %v9932_v20 = vpop.permute.xlu0 %3978  ;;  %v2237_v48 = vpop.permute.xlu2 %2236 }
 0x4a5   : > { %12713 = vst [vmem:[#allocation53_spill] sm:$0xff] %v9932_v20  ;;  %v2374_v27 = vmul.f32 %v2237_v48, %v2142_v60 }
 0x4a6   : > { %v9934_v57 = vpop.f32.mrf.mxu3 }
 0x4a7   : > { %2406 = vst.msk [vmem:[#allocation2 + $0x28] sm:$0xff] %vm1034_vm1, %v2374_v27  ;;  %v1865_v54 = vpop.f32.mrf.mxu2 }
 0x4a8   : > { %v1779_v21 = vpop.f32.mrf.mxu1  ;;  %v7841_v12 = vpop.eup %7840  ;;  %v1866_v25 = vadd.f32 %v1865_v54, %v1776_v34 }
 0x4a9   : > { %2291 = vperm.xlu0 %7684, %v7841_v12  }
 0x4aa   : > { %7842 = vrcp.f32 %v1866_v25  ;;  %v9937_v14 = vpop.f32.mrf.mxu0 }
 0x4ac   : > { %v9939_v2 = vpop.permute.xlu0 %3982 }
 0x4ad   : > { %12714 = vst [vmem:[#allocation52_spill] sm:$0xff] %v9939_v2  ;;  %v1465_v2 = vsub.f32 %v9754_v29, %v9895_v8 }
 0x4ae   : > { %v9941_v1 = vpop.f32.mrf.mxu3 }
 0x4af   : > { %v1868_v49 = vpop.f32.mrf.mxu2 }
 0x4b0   : > { %v1781_v55 = vpop.f32.mrf.mxu1  ;;  %v7843_v44 = vpop.eup %7842  ;;  %v1869_v43 = vadd.f32 %v1868_v49, %v1779_v21 }
 0x4b1   : > { %2296 = vperm.xlu1 %7685, %v7843_v44   ;;  %v2147_v44 = vadd.f32 %v9842_v58, %v9851_v24 }
 0x4b2   : > { %7844 = vrcp.f32 %v1869_v43  ;;  %v9945_v48 = vpop.f32.mrf.mxu0 }
 0x4b4   : > { %v9943_v60 = vpop.permute.xlu0 %3988 }
 0x4b5   : > { %12715 = vst [vmem:[#allocation54_spill] sm:$0xff] %v9943_v60 }
 0x4b6   : > { %v9947_v27 = vpop.f32.mrf.mxu3 }
 0x4b7   : > { %v1870_v34 = vpop.f32.mrf.mxu2 }
 0x4b8   : > { %v1784_v54 = vpop.f32.mrf.mxu1  ;;  %v7845_v12 = vpop.eup %7844  ;;  %v1871_v25 = vadd.f32 %v1870_v34, %v1781_v55 }
 0x4b9   : > { %v1404_v62 = vpop.xlane.xlu1 %1403  ;;  %2301 = vperm.xlu1 %7685, %v7845_v12  }
 0x4ba   : > { %v1467_v21 = vsub.f32 %v9781_v36, %v1404_v62  ;;  %v1468_v49 = vsub.f32 %v9717_v13, %v1404_v62  ;;  %7846 = vrcp.f32 %v1871_v25  ;;  %v9959_v50 = vpop.f32.mrf.mxu0 }
 0x4bb   : > { %v2247_v43 = vpop.permute.xlu2 %2246 }
 0x4bc   : > { %v1499_v60 = vpack.c.bf16 %v1467_v21, %v1465_v2  ;;  %v1500_v20 = vpack.c.bf16 %v1468_v49, %v1466_v9  ;;  %v9957_v55 = vpop.permute.xlu0 %3992  ;;  %v2376_v34 = vmul.f32 %v2247_v43, %v2147_v44 }
 0x4bd   : > { %12716 = vst [vmem:[#allocation57_spill] sm:$0xff] %v9957_v55 }
 0x4be   : > { %v1561_v6 = vunpack.c.l.bf16 %v1499_v60  ;;  %v1562_v29 = vunpack.c.l.bf16 %v1500_v20  ;;  %v1563_v26 = vunpack.c.h.bf16 %v1499_v60  ;;  %v1564_v42 = vunpack.c.h.bf16 %v1500_v20  ;;  %2408 = vst.msk [vmem:[#allocation2 + $0x38] sm:$0xff] %vm1034_vm1, %v2376_v34  ;;  %v9962_v36 = vpop.f32.mrf.mxu3 }
 0x4bf   : > { %v1873_v24 = vpop.f32.mrf.mxu2 }
 0x4c0   : > { %v1685_v13 = vmul.f32 1.442695, %v1561_v6  ;;  %v1687_v8 = vmul.f32 1.442695, %v1562_v29  ;;  %v1689_v58 = vmul.f32 1.442695, %v1563_v26  ;;  %v1786_v62 = vpop.f32.mrf.mxu1  ;;  %v7847_v2 = vpop.eup %7846  ;;  %v1874_v12 = vadd.f32 %v1873_v24, %v1784_v54 }
 0x4c1   : > { %v1691_v9 = vmul.f32 1.442695, %v1564_v42  ;;  %2306 = vperm.xlu0 %7684, %v7847_v2   ;;  %v2152_v54 = vadd.f32 %v9862_v51, %v9866_v4 }
 0x4c2   : > { %7848 = vpow2.f32 %v1685_v13  ;;  %v9966_v6 = vpop.f32.mrf.mxu0 }
 0x4c3   : > { %7850 = vpow2.f32 %v1687_v8 }
 0x4c4   : > { %7852 = vpow2.f32 %v1689_v58  ;;  %v9964_v60 = vpop.permute.xlu0 %3994 }
 0x4c5   : > { %12717 = vst [vmem:[#allocation56_spill] sm:$0xff] %v9964_v60  ;;  %7854 = vpow2.f32 %v1691_v9  ;;  %v12741_v60 = vld [vmem:[#allocation55_spill] sm:$0xff] }
 0x4c6   : > { %7856 = vrcp.f32 %v1874_v12  ;;  %v9968_v43 = vpop.f32.mrf.mxu3 }
 0x4c7   : > { %v1875_v25 = vpop.f32.mrf.mxu2 }
 0x4c8   : > { %v7849_v20 = vpop.eup %7848  ;;  %v1789_v21 = vpop.f32.mrf.mxu1  ;;  %v1876_v26 = vadd.f32 %v1875_v25, %v1786_v62 }
 0x4c9   : > { %v7851_v49 = vpop.eup %7850 }
 0x4ca   : > { %v7853_v44 = vpop.eup %7852  ;;  %7858 = vrcp.f32 %v1876_v26 }
 0x4cb   : > { %v7855_v42 = vpop.eup %7854  ;;  %v1723_v34 = vpack.c.bf16 %v7853_v44, %v7849_v20  ;;  %v2257_v13 = vpop.permute.xlu2 %2256 }
 0x4cc   : > { %v7857_v29 = vpop.eup %7856  ;;  %v1724_v8 = vpack.c.bf16 %v7855_v42, %v7851_v49  ;;  %v2212_v58 = vpop.permute.xlu0 %2211  ;;  %v2378_v24 = vmul.f32 %v2257_v13, %v2152_v54 }
 0x4cd   : > { %2311 = vperm.xlu2 %7686, %v7857_v29   ;;  %1808 = vmatmul.bf16.gmra.mxu1 %v1723_v34  ;;  %v2369_v2 = vmul.f32 %v2212_v58, %v9757_v59  ;;  %v9977_v20 = vpop.f32.mrf.mxu0 }
 0x4ce   : > { %1897 = vmatmul.bf16.gmra.mxu2 %v1724_v8  ;;  %2114 = vmatmul.bf16.gmra.mxu3 %v1723_v34  ;;  %2410 = vst.msk [vmem:[#allocation2 + $0x48] sm:$0xff] %vm1034_vm1, %v2378_v24  ;;  %v9979_v25 = vpop.f32.mrf.mxu3  ;;  %v2157_v34 = vadd.f32 %v9878_v32, %v9880_v7  ;;  %v12720_v24 = vld [vmem:[#allocation35_spill] sm:$0xff] }
 0x4cf   : > { %2203 = vmatmul.bf16.gmra.mxu0 %v1724_v8  ;;  %v1878_v62 = vpop.f32.mrf.mxu2  ;;  %2401 = vst.msk [vmem:[#allocation2] sm:$0xff] %vm1034_vm1, %v2369_v2 }
 0x4d0   : > { %v7859_v51 = vpop.eup %7858  ;;  %v1879_v4 = vadd.f32 %v1878_v62, %v1789_v21  ;;  %v1791_v9 = vpop.f32.mrf.mxu1  ;;  %v2145_v21 = vadd.f32 %v9830_v47, %v9835_v19  ;;  %v2132_v47 = vadd.f32 %v9767_v56, %v9734_v15 }
 0x4d1   : > { %v9975_v12 = vpop.permute.xlu1 %3984  ;;  %2316 = vperm.xlu1 %7685, %v7859_v51  }
 0x4d2   : > { %12718 = vst [vmem:[#allocation59_spill] sm:$0xff] %v9975_v12  ;;  %7860 = vrcp.f32 %v1879_v4 }
 0x4d4   : > { %v2232_v59 = vpop.permute.xlu0 %2231 }
 0x4d5   : > { %v2373_v49 = vmul.f32 %v2232_v59, %v9797_v23  ;;  %v9989_v58 = vpop.f32.mrf.mxu0 }
 0x4d6   : > { %v9993_v62 = vpop.f32.mrf.mxu3 }
 0x4d7   : > { %2405 = vst.msk [vmem:[#allocation2 + $0x20] sm:$0xff] %vm1034_vm1, %v2373_v49  ;;  %v1880_v26 = vpop.f32.mrf.mxu2 }
 0x4d8   : > { %v7861_v44 = vpop.eup %7860  ;;  %v1881_v42 = vadd.f32 %v1880_v26, %v1791_v9  ;;  %v1794_v29 = vpop.f32.mrf.mxu1  ;;  %v2150_v9 = vadd.f32 %v9853_v53, %v9857_v38 }
 0x4d9   : > { %v9983_v54 = vpop.permute.xlu1 %3990  ;;  %2321 = vperm.xlu2 %7686, %v7861_v44   ;;  %v2155_v44 = vadd.f32 %v9872_v30, %v9874_v39 }
 0x4da   : > { %12719 = vst [vmem:[#allocation58_spill] sm:$0xff] %v9983_v54  ;;  %7862 = vrcp.f32 %v1881_v42  ;;  %v2162_v42 = vadd.f32 %v9893_v5, %v9898_v11 }
 0x4db   : > { %v2267_v13 = vpop.permute.xlu2 %2266 }
 0x4dc   : > { %v2242_v8 = vpop.permute.xlu0 %2241  ;;  %v2380_v23 = vmul.f32 %v2267_v13, %v2157_v34  ;;  %v12721_v13 = vld [vmem:[#allocation47_spill] sm:$0xff] }
 0x4dd   : > { %7507 = vmatmul.msk.bf16.vlgmr.msrb.gmra.mxu1 %vm1034_vm1, %v12720_v24  ;;  %v2375_v2 = vmul.f32 %v2242_v8, %v2145_v21  ;;  %v10011_v49 = vpop.f32.mrf.mxu0 }
 0x4de   : > { %7523 = vmatmul.msk.bf16.vlgmr.msra.gmra.mxu2 %vm1034_vm1, %v12720_v24  ;;  %4730 = vmatpush.bf16.msrb.mxu1 %v12691_v52  ;;  %2412 = vst.msk [vmem:[#allocation2 + $0x58] sm:$0xff] %vm1034_vm1, %v2380_v23  ;;  %v10015_v26 = vpop.f32.mrf.mxu3  ;;  %v2160_v24 = vadd.f32 %v9886_v37, %v9890_v35 }
 0x4df   : > { %4819 = vmatpush.bf16.msra.mxu2 %v12691_v52  ;;  %v1883_v19 = vpop.f32.mrf.mxu2  ;;  %2407 = vst.msk [vmem:[#allocation2 + $0x30] sm:$0xff] %vm1034_vm1, %v2375_v2 }
 0x4e0   : > { %v7863_v32 = vpop.eup %7862  ;;  %v1884_v7 = vadd.f32 %v1883_v19, %v1794_v29  ;;  %v10008_v56 = vpop.f32.mrf.mxu1 }
 0x4e1   : > { %v2217_v51 = vpop.permute.xlu1 %2216  ;;  %2326 = vperm.xlu1 %7685, %v7863_v32  }
 0x4e2   : > { %v2370_v4 = vmul.f32 %v2217_v51, %v2132_v47  ;;  %4731 = vmatpush.bf16.msrb.mxu1 %v12691_v52  ;;  %7864 = vrcp.f32 %v1884_v7  ;;  %v12722_v7 = vld [vmem:[#allocation36_spill] sm:$0xff] }
 0x4e3   : > { %4820 = vmatpush.bf16.msra.mxu2 %v12691_v52 }
 0x4e4   : > { %2402 = vst.msk [vmem:[#allocation2 + $0x8] sm:$0xff] %vm1034_vm1, %v2370_v4  ;;  %v2252_v59 = vpop.permute.xlu0 %2251 }
 0x4e5   : > { %v2377_v15 = vmul.f32 %v2252_v59, %v2150_v9  ;;  %v10033_v5 = vpop.f32.mrf.mxu0  ;;  %v2165_v9 = vadd.f32 %v9900_v31, %v9905_v16  ;;  %v2167_v31 = vadd.f32 %v9909_v10, %v9914_v18  ;;  %v2172_v10 = vadd.f32 %v9928_v40, %v9934_v57 }
 0x4e6   : > { %4732 = vmatpush.bf16.msrb.mxu1 %v12691_v52  ;;  %v10037_v23 = vpop.f32.mrf.mxu3  ;;  %v2177_v40 = vadd.f32 %v9945_v48, %v9947_v27  ;;  %v2185_v57 = vadd.f32 %v9977_v20, %v9979_v25  ;;  %v2182_v48 = vadd.f32 %v9966_v6, %v9968_v43  ;;  %v2190_v27 = vadd.f32 %v10011_v49, %v10015_v26 }
 0x4e7   : > { %2409 = vst.msk [vmem:[#allocation2 + $0x40] sm:$0xff] %vm1034_vm1, %v2377_v15  ;;  %4821 = vmatpush.bf16.msra.mxu2 %v12691_v52  ;;  %v10017_v53 = vpop.f32.mrf.mxu2 }
 0x4e8   : > { %v7865_v38 = vpop.eup %7864  ;;  %v1799_v30 = vpop.f32.mrf.mxu1 }
 0x4e9   : > { %2331 = vperm.xlu2 %7686, %v7865_v38  }
 0x4ea   : > { %4733 = vmatpush.bf16.msrb.mxu1 %v12691_v52 }
 0x4eb   : > { %4822 = vmatpush.bf16.msra.mxu2 %v12691_v52  ;;  %v2277_v21 = vpop.permute.xlu2 %2276 }
 0x4ec   : > { %v2262_v34 = vpop.permute.xlu0 %2261  ;;  %v2382_v29 = vmul.f32 %v2277_v21, %v2162_v42  ;;  %v12723_v42 = vld [vmem:[#allocation15_spill] sm:$0xff] }
 0x4ed   : > { %7508 = vmatmul.msk.bf16.gmra.mxu1 %vm1034_vm1, %v12721_v13  ;;  %v2379_v8 = vmul.f32 %v2262_v34, %v2155_v44  ;;  %v10046_v2 = vpop.f32.mrf.mxu0 }
 0x4ee   : > { %7524 = vmatmul.msk.bf16.gmra.mxu2 %vm1034_vm1, %v12721_v13  ;;  %4734 = vmatpush.bf16.msrb.mxu1 %v12691_v52  ;;  %2414 = vst.msk [vmem:[#allocation2 + $0x68] sm:$0xff] %vm1034_vm1, %v2382_v29  ;;  %v10049_v47 = vpop.f32.mrf.mxu3 }
 0x4ef   : > { %4823 = vmatpush.bf16.msra.mxu2 %v12691_v52  ;;  %v1888_v39 = vpop.f32.mrf.mxu2  ;;  %2411 = vst.msk [vmem:[#allocation2 + $0x50] sm:$0xff] %vm1034_vm1, %v2379_v8 }
 0x4f0   : > { %v10035_v11 = vadd.f32 %v1888_v39, %v1799_v30  ;;  %v10056_v51 = vpop.f32.mrf.mxu1  ;;  %v2170_v30 = vadd.f32 %v9918_v22, %v9925_v63  ;;  %v2175_v63 = vadd.f32 %v9937_v14, %v9941_v1  ;;  %v12727_v1 = vld [vmem:[#allocation39_spill] sm:$0xff] }
 0x4f2   : > { %4735 = vmatpush.bf16.msrb.mxu1 %v12691_v52 }
 0x4f3   : > { %4824 = vmatpush.bf16.msra.mxu2 %v12691_v52 }
 0x4f5   : > { %v10058_v4 = vpop.f32.mrf.mxu0 }
 0x4f6   : > { %4736 = vmatpush.bf16.msrb.mxu1 %v12691_v52  ;;  %v10062_v35 = vpop.f32.mrf.mxu3 }
 0x4f7   : > { %4825 = vmatpush.bf16.msra.mxu2 %v12691_v52  ;;  %v10060_v37 = vpop.f32.mrf.mxu2 }
 0x4fa   : > { %4737 = vmatpush.bf16.msrb.mxu1 %v12691_v52 }
 0x4fb   : > { %4826 = vmatpush.bf16.msra.mxu2 %v12691_v52 }
 0x4fc   : > { %v2272_v19 = vpop.permute.xlu0 %2271 }
 0x4fd   : > { %v2381_v32 = vmul.f32 %v2272_v19, %v2160_v24  ;;  %7509 = vmatmul.msk.bf16.gmra.mxu1 %vm1034_vm1, %v12722_v7  ;;  %v12725_v19 = vld [vmem:[#allocation37_spill] sm:$0xff] }
 0x4fe   : > { %7525 = vmatmul.msk.bf16.gmra.mxu2 %vm1034_vm1, %v12722_v7  ;;  %v2180_v7 = vadd.f32 %v9959_v50, %v9962_v36 }
 0x4ff   : > { %2413 = vst.msk [vmem:[#allocation2 + $0x60] sm:$0xff] %vm1034_vm1, %v2381_v32 }
 0x507   : > { %v1804_v15 = vpop.f32.mrf.mxu1 }
 0x509   : > { %v2199_v38 = vpop.f32.mrf.mxu0 }
 0x50b   : > { %v2282_v59 = vpop.permute.xlu0 %2281 }
 0x50c   : > { %v2383_v44 = vmul.f32 %v2282_v59, %v2165_v9 }
 0x50d   : > { %7510 = vmatmul.msk.bf16.gmra.mxu1 %vm1034_vm1, %v12723_v42 }
 0x50e   : > { %v1893_v21 = vpop.f32.mrf.mxu2  ;;  %v2110_v34 = vpop.f32.mrf.mxu3  ;;  %7526 = vmatmul.msk.bf16.gmra.mxu2 %vm1034_vm1, %v12723_v42  ;;  %2415 = vst.msk [vmem:[#allocation2 + $0x70] sm:$0xff] %vm1034_vm1, %v2383_v44 }
 0x50f   : > { %v10071_v29 = vadd.f32 %v1893_v21, %v1804_v15  ;;  %v10073_v13 = vadd.f32 %v2199_v38, %v2110_v34  ;;  %v12726_v38 = vld [vmem:[#allocation38_spill] sm:$0xff]  ;;  %v10108_v42 = vpop.f32.mrf.mxu1 }
 0x511   : > { %12724 = vst [vmem:[#allocation35_spill] sm:$0xff] %v10073_v13 }
 0x513   : > { %v2287_v16 = vpop.permute.xlu1 %2286 }
 0x514   : > { %v2384_v8 = vmul.f32 %v2287_v16, %v2167_v31  ;;  %v10115_v31 = vpop.f32.mrf.mxu0 }
 0x515   : > { %12728 = vst [vmem:[#allocation47_spill] sm:$0xff] %v10115_v31 }
 0x516   : > { %2416 = vst.msk [vmem:[#allocation2 + $0x78] sm:$0xff] %vm1034_vm1, %v2384_v8  ;;  %v10118_v16 = vpop.f32.mrf.mxu2  ;;  %v10120_v8 = vpop.f32.mrf.mxu3 }
 0x517   : > { %12729 = vst [vmem:[#allocation36_spill] sm:$0xff] %v10120_v8 }
 0x51b   : > { %v2292_v39 = vpop.permute.xlu0 %2291 }
 0x51c   : > { %v2385_v24 = vmul.f32 %v2292_v39, %v2170_v30  ;;  %v12730_v39 = vld [vmem:[#allocation40_spill] sm:$0xff] }
 0x51d   : > { %7511 = vmatmul.msk.bf16.gmra.mxu1 %vm1034_vm1, %v12725_v19 }
 0x51e   : > { %7527 = vmatmul.msk.bf16.gmra.mxu2 %vm1034_vm1, %v12725_v19  ;;  %2417 = vst.msk [vmem:[#allocation2 + $0x80] sm:$0xff] %vm1034_vm1, %v2385_v24 }
 0x523   : > { %v2297_v18 = vpop.permute.xlu1 %2296 }
 0x524   : > { %v2386_v32 = vmul.f32 %v2297_v18, %v2172_v10  ;;  %v2187_v10 = vadd.f32 %v9989_v58, %v9993_v62 }
 0x526   : > { %2418 = vst.msk [vmem:[#allocation2 + $0x88] sm:$0xff] %vm1034_vm1, %v2386_v32 }
 0x527   : > { %v2312_v9 = vpop.permute.xlu2 %2311 }
 0x528   : > { %v2389_v22 = vmul.f32 %v2312_v9, %v2180_v7 }
 0x52a   : > { %2421 = vst.msk [vmem:[#allocation2 + $0xa0] sm:$0xff] %vm1034_vm1, %v2389_v22 }
 0x52b   : > { %v2302_v59 = vpop.permute.xlu1 %2301 }
 0x52c   : > { %v2387_v15 = vmul.f32 %v2302_v59, %v2175_v63  ;;  %v12734_v63 = vld [vmem:[#allocation41_spill] sm:$0xff] }
 0x52d   : > { %7512 = vmatmul.msk.bf16.gmra.mxu1 %vm1034_vm1, %v12726_v38 }
 0x52e   : > { %7528 = vmatmul.msk.bf16.gmra.mxu2 %vm1034_vm1, %v12726_v38  ;;  %2419 = vst.msk [vmem:[#allocation2 + $0x90] sm:$0xff] %vm1034_vm1, %v2387_v15 }
 0x533   : > { %v2307_v50 = vpop.permute.xlu0 %2306  ;;  %v2322_v36 = vpop.permute.xlu2 %2321 }
 0x534   : > { %v2388_v44 = vmul.f32 %v2307_v50, %v2177_v40  ;;  %v2391_v14 = vmul.f32 %v2322_v36, %v2185_v57  ;;  %v12735_v57 = vld [vmem:[#allocation42_spill] sm:$0xff] }
 0x536   : > { %2420 = vst.msk [vmem:[#allocation2 + $0x98] sm:$0xff] %vm1034_vm1, %v2388_v44 }
 0x537   : > { %2423 = vst.msk [vmem:[#allocation2 + $0xb0] sm:$0xff] %vm1034_vm1, %v2391_v14 }
 0x53d   : > { %7513 = vmatmul.msk.bf16.gmra.mxu1 %vm1034_vm1, %v12727_v1 }
 0x53e   : > { %7529 = vmatmul.msk.bf16.gmra.mxu2 %vm1034_vm1, %v12727_v1  ;;  %v1886_v1 = vadd.f32 %v10017_v53, %v10008_v56 }
 0x540   : > { %7866 = vrcp.f32 %v1886_v1 }
 0x541   : > { %7868 = vrcp.f32 %v10035_v11 }
 0x543   : > { %v2332_v20 = vpop.permute.xlu2 %2331  ;;  %v2317_v25 = vpop.permute.xlu1 %2316 }
 0x544   : > { %v2393_v21 = vmul.f32 %v2332_v20, %v2190_v27  ;;  %v2390_v34 = vmul.f32 %v2317_v25, %v2182_v48  ;;  %v12736_v20 = vld [vmem:[#allocation44_spill] sm:$0xff] }
 0x546   : > { %2425 = vst.msk [vmem:[#allocation2 + $0xc0] sm:$0xff] %vm1034_vm1, %v2393_v21  ;;  %v7867_v56 = vpop.eup %7866 }
 0x547   : > { %2422 = vst.msk [vmem:[#allocation2 + $0xa8] sm:$0xff] %vm1034_vm1, %v2390_v34 }
 0x54a   : > { %v1809_v30 = vpop.f32.mrf.mxu1 }
 0x54c   : > { %v2204_v6 = vpop.f32.mrf.mxu0 }
 0x54d   : > { %7514 = vmatmul.msk.bf16.gmra.mxu1 %vm1034_vm1, %v12730_v39 }
 0x54e   : > { %7530 = vmatmul.msk.bf16.gmra.mxu2 %vm1034_vm1, %v12730_v39  ;;  %v7869_v39 = vpop.eup %7868 }
 0x551   : > { %v1898_v43 = vpop.f32.mrf.mxu2  ;;  %v2115_v49 = vpop.f32.mrf.mxu3 }
 0x552   : > { %v10126_v26 = vadd.f32 %v1898_v43, %v1809_v30  ;;  %v10128_v24 = vadd.f32 %v2204_v6, %v2115_v49  ;;  %v1811_v19 = vpop.f32.mrf.mxu1  ;;  %v12737_v6 = vld [vmem:[#allocation45_spill] sm:$0xff] }
 0x553   : > { %v2327_v18 = vpop.permute.xlu1 %2326 }
 0x554   : > { %12731 = vst [vmem:[#allocation15_spill] sm:$0xff] %v10126_v26  ;;  %v2392_v32 = vmul.f32 %v2327_v18, %v2187_v10  ;;  %v12738_v10 = vld [vmem:[#allocation46_spill] sm:$0xff] }
 0x555   : > { %12732 = vst [vmem:[#allocation37_spill] sm:$0xff] %v10128_v24 }
 0x556   : > { %2424 = vst.msk [vmem:[#allocation2 + $0xb8] sm:$0xff] %vm1034_vm1, %v2392_v32 }
 0x559   : > { %v1900_v7 = vpop.f32.mrf.mxu2 }
 0x55a   : > { %v10133_v9 = vadd.f32 %v1900_v7, %v1811_v19  ;;  %v10135_v22 = vpop.f32.mrf.mxu1 }
 0x55c   : > { %12733 = vst [vmem:[#allocation38_spill] sm:$0xff] %v10133_v9 }
 0x55d   : > { %7515 = vmatmul.msk.bf16.gmra.mxu1 %vm1034_vm1, %v12734_v63 }
 0x55e   : > { %7531 = vmatmul.msk.bf16.gmra.mxu2 %vm1034_vm1, %v12734_v63 }
 0x561   : > { %v10141_v59 = vpop.f32.mrf.mxu2 }
 0x562   : > { %v2771_v58 = vmax.f32 %v10135_v22, %v10141_v59  ;;  %v10145_v62 = vpop.f32.mrf.mxu1 }
 0x564   : > { %2772 = vmax.xlane.f32.xlu0 %v2771_v58  ;;  %v12739_v58 = vld [vmem:[#allocation43_spill] sm:$0xff] }
 0x569   : > { %v10147_v15 = vpop.f32.mrf.mxu2 }
 0x56a   : > { %v10149_v38 = vpop.f32.mrf.mxu1  ;;  %v2774_v40 = vmax.f32 %v10145_v62, %v10147_v15 }
 0x56c   : > { %2775 = vmax.xlane.f32.xlu1 %v2774_v40 }
 0x56d   : > { %7516 = vmatmul.msk.bf16.gmra.mxu1 %vm1034_vm1, %v12735_v57 }
 0x56e   : > { %7532 = vmatmul.msk.bf16.gmra.mxu2 %vm1034_vm1, %v12735_v57 }
 0x571   : > { %v10157_v50 = vpop.f32.mrf.mxu2 }
 0x572   : > { %v2777_v36 = vmax.f32 %v10149_v38, %v10157_v50  ;;  %v10161_v44 = vpop.f32.mrf.mxu1 }
 0x574   : > { %2778 = vmax.xlane.f32.xlu2 %v2777_v36 }
 0x579   : > { %v10163_v14 = vpop.f32.mrf.mxu2 }
 0x57a   : > { %v2780_v48 = vmax.f32 %v10161_v44, %v10163_v14  ;;  %v10169_v27 = vpop.f32.mrf.mxu1 }
 0x57c   : > { %2781 = vmax.xlane.f32.xlu0 %v2780_v48 }
 0x57d   : > { %7517 = vmatmul.msk.bf16.gmra.mxu1 %vm1034_vm1, %v12736_v20 }
 0x57e   : > { %7533 = vmatmul.msk.bf16.gmra.mxu2 %vm1034_vm1, %v12736_v20 }
 0x581   : > { %v10175_v25 = vpop.f32.mrf.mxu2 }
 0x582   : > { %v2783_v21 = vmax.f32 %v10169_v27, %v10175_v25  ;;  %v10179_v34 = vpop.f32.mrf.mxu1 }
 0x584   : > { %2784 = vmax.xlane.f32.xlu0 %v2783_v21 }
 0x585   : > { %2336 = vperm.xlu1 %7685, %v7867_v56  }
 0x589   : > { %v10182_v53 = vpop.f32.mrf.mxu2 }
 0x58a   : > { %v10184_v30 = vpop.f32.mrf.mxu1  ;;  %v2786_v1 = vmax.f32 %v10179_v34, %v10182_v53 }
 0x58c   : > { %2341 = vperm.xlu2 %7686, %v7869_v39  }
 0x58d   : > { %7518 = vmatmul.msk.bf16.gmra.mxu1 %vm1034_vm1, %v12737_v6 }
 0x58e   : > { %7534 = vmatmul.msk.bf16.gmra.mxu2 %vm1034_vm1, %v12737_v6  ;;  %v12740_v6 = vld [vmem:[#allocation48_spill] sm:$0xff] }
 0x591   : > { %v10190_v43 = vpop.f32.mrf.mxu2 }
 0x592   : > { %v10192_v49 = vpop.f32.mrf.mxu1  ;;  %v2789_v56 = vmax.f32 %v10184_v30, %v10190_v43 }
 0x598   : > { %3996 = vrot.lane.b32.xlu0 %v8979_v61, %s8469_s23 }
 0x599   : > { %v10196_v11 = vpop.f32.mrf.mxu2 }
 0x59a   : > { %v10198_v19 = vpop.f32.mrf.mxu1  ;;  %v2792_v40 = vmax.f32 %v10192_v49, %v10196_v11 }
 0x59d   : > { %7519 = vmatmul.msk.bf16.gmra.mxu1 %vm1034_vm1, %v12738_v10 }
 0x59e   : > { %7535 = vmatmul.msk.bf16.gmra.mxu2 %vm1034_vm1, %v12738_v10 }
 0x5a1   : > { %v10204_v18 = vpop.f32.mrf.mxu2 }
 0x5a2   : > { %v10206_v32 = vpop.f32.mrf.mxu1  ;;  %v2795_v10 = vmax.f32 %v10198_v19, %v10204_v18 }
 0x5a9   : > { %v10208_v7 = vpop.f32.mrf.mxu2 }
 0x5aa   : > { %v10210_v63 = vpop.f32.mrf.mxu1 }
 0x5ad   : > { %7520 = vmatmul.msk.bf16.gmra.mxu1 %vm1034_vm1, %v12739_v58 }
 0x5ae   : > { %7536 = vmatmul.msk.bf16.gmra.mxu2 %vm1034_vm1, %v12739_v58 }
 0x5af   : > { %2793 = vmax.xlane.f32.xlu1 %v2792_v40 }
 0x5b1   : > { %v10218_v57 = vpop.f32.mrf.mxu2 }
 0x5b2   : > { %v10220_v36 = vpop.f32.mrf.mxu1  ;;  %v2801_v48 = vmax.f32 %v10210_v63, %v10218_v57 }
 0x5b5   : > { %2787 = vmax.xlane.f32.xlu2 %v2786_v1  ;;  %v2798_v1 = vmax.f32 %v10206_v32, %v10208_v7 }
 0x5b7   : > { %2802 = vmax.xlane.f32.xlu1 %v2801_v48 }
 0x5b9   : > { %v10226_v20 = vpop.f32.mrf.mxu2 }
 0x5ba   : > { %v10228_v21 = vpop.f32.mrf.mxu1  ;;  %v2804_v39 = vmax.f32 %v10220_v36, %v10226_v20 }
 0x5bd   : > { %2790 = vmax.xlane.f32.xlu2 %v2789_v56  ;;  %7521 = vmatmul.msk.bf16.gmra.mxu1 %vm1034_vm1, %v12740_v6 }
 0x5be   : > { %7537 = vmatmul.msk.bf16.gmra.mxu2 %vm1034_vm1, %v12740_v6 }
 0x5bf   : > { %2805 = vmax.xlane.f32.xlu1 %v2804_v39 }
 0x5c1   : > { %v10240_v58 = vpop.f32.mrf.mxu2 }
 0x5c2   : > { %2796 = vmax.xlane.f32.xlu0 %v2795_v10  ;;  %v10242_v40 = vpop.f32.mrf.mxu1  ;;  %v2807_v48 = vmax.f32 %v10228_v21, %v10240_v58 }
 0x5c5   : > { %2799 = vmax.xlane.f32.xlu2 %v2798_v1 }
 0x5c9   : > { %v10248_v56 = vpop.f32.mrf.mxu2 }
 0x5ca   : > { %v2810_v39 = vmax.f32 %v10242_v40, %v10248_v56  ;;  %2808 = vmax.xlane.f32.xlu0 %v2807_v48  ;;  %v10252_v6 = vpop.f32.mrf.mxu1 }
 0x5cc   : > { %2811 = vmax.xlane.f32.xlu1 %v2810_v39 }
 0x5cd   : > { %7522 = vmatmul.msk.bf16.gmra.mxu1 %vm1034_vm1, %v12741_v60 }
 0x5ce   : > { %7538 = vmatmul.msk.bf16.gmra.mxu2 %vm1034_vm1, %v12741_v60 }
 0x5d1   : > { %v10258_v10 = vpop.f32.mrf.mxu2 }
 0x5d2   : > { %v2813_v1 = vmax.f32 %v10252_v6, %v10258_v10  ;;  %v10262_v55 = vpop.f32.mrf.mxu1 }
 0x5d4   : > { %2814 = vmax.xlane.f32.xlu0 %v2813_v1 }
 0x5d7   : > { %v2773_v12 = vpop.xlane.xlu0 %2772 }
 0x5d8   : > { %v2867_v60 = vsub.f32 %v10135_v22, %v2773_v12  ;;  %v2868_v9 = vsub.f32 %v10141_v59, %v2773_v12 }
 0x5d9   : > { %v10264_v54 = vpop.f32.mrf.mxu2 }
 0x5da   : > { %v2816_v48 = vmax.f32 %v10262_v55, %v10264_v54  ;;  %v10268_v39 = vpop.f32.mrf.mxu1 }
 0x5dc   : > { %2817 = vmax.xlane.f32.xlu1 %v2816_v48 }
 0x5df   : > { %v2776_v52 = vpop.xlane.xlu1 %2775 }
 0x5e0   : > { %v2869_v24 = vsub.f32 %v10145_v62, %v2776_v52  ;;  %v2870_v13 = vsub.f32 %v10147_v15, %v2776_v52 }
 0x5e1   : > { %v10274_v41 = vpop.f32.mrf.mxu2 }
 0x5e2   : > { %v2931_v1 = vpack.c.bf16 %v2869_v24, %v2867_v60  ;;  %v2932_v31 = vpack.c.bf16 %v2870_v13, %v2868_v9  ;;  %v2819_v8 = vmax.f32 %v10268_v39, %v10274_v41  ;;  %v10278_v3 = vpop.f32.mrf.mxu1  ;;  %v1891_v13 = vadd.f32 %v10060_v37, %v10056_v51 }
 0x5e4   : > { %v2963_v48 = vunpack.c.l.bf16 %v2931_v1  ;;  %v2964_v61 = vunpack.c.l.bf16 %v2932_v31  ;;  %v2965_v26 = vunpack.c.h.bf16 %v2931_v1  ;;  %v2966_v45 = vunpack.c.h.bf16 %v2932_v31  ;;  %2820 = vmax.xlane.f32.xlu0 %v2819_v8 }
 0x5e6   : > { %v3027_v22 = vmul.f32 1.442695, %v2963_v48  ;;  %v3029_v12 = vmul.f32 1.442695, %v2964_v61  ;;  %v3031_v59 = vmul.f32 1.442695, %v2965_v26 }
 0x5e7   : > { %v3033_v62 = vmul.f32 1.442695, %v2966_v45  ;;  %v2779_v0 = vpop.xlane.xlu2 %2778  ;;  %v2195_v45 = vadd.f32 %v10046_v2, %v10049_v47 }
 0x5e8   : > { %7870 = vpow2.f32 %v3027_v22  ;;  %v2871_v8 = vsub.f32 %v10149_v38, %v2779_v0  ;;  %v2872_v51 = vsub.f32 %v10157_v50, %v2779_v0 }
 0x5e9   : > { %7872 = vpow2.f32 %v3029_v12  ;;  %v10280_v52 = vpop.f32.mrf.mxu2 }
 0x5ea   : > { %7874 = vpow2.f32 %v3031_v59  ;;  %v2822_v24 = vmax.f32 %v10278_v3, %v10280_v52  ;;  %v10286_v9 = vpop.f32.mrf.mxu1 }
 0x5eb   : > { %7876 = vpow2.f32 %v3033_v62 }
 0x5ec   : > { %2823 = vmax.xlane.f32.xlu2 %v2822_v24  ;;  %7878 = vrcp.f32 %v1891_v13 }
 0x5ee   : > { %v7871_v31 = vpop.eup %7870 }
 0x5ef   : > { %v7873_v61 = vpop.eup %7872  ;;  %v2342_v26 = vpop.permute.xlu2 %2341 }
 0x5f0   : > { %v2782_v15 = vpop.xlane.xlu0 %2781  ;;  %v7875_v60 = vpop.eup %7874  ;;  %v2395_v37 = vmul.f32 %v2342_v26, %v2195_v45 }
 0x5f1   : > { %v2873_v1 = vsub.f32 %v10161_v44, %v2782_v15  ;;  %v2874_v48 = vsub.f32 %v10163_v14, %v2782_v15  ;;  %v7877_v22 = vpop.eup %7876  ;;  %v10294_v12 = vpop.f32.mrf.mxu2  ;;  %v3155_v59 = vpack.c.bf16 %v7875_v60, %v7871_v31  ;;  %v2192_v14 = vadd.f32 %v10033_v5, %v10037_v23 }
 0x5f2   : > { %2427 = vst.msk [vmem:[#allocation2 + $0xd0] sm:$0xff] %vm1034_vm1, %v2395_v37  ;;  %v3156_v62 = vpack.c.bf16 %v7877_v22, %v7873_v61  ;;  %v10297_v38 = vpop.f32.mrf.mxu1  ;;  %v7879_v13 = vpop.eup %7878 }
 0x5f3   : > { %v2933_v2 = vpack.c.bf16 %v2873_v1, %v2871_v8  ;;  %v2934_v47 = vpack.c.bf16 %v2874_v48, %v2872_v51  ;;  %3195 = vmatmul.bf16.vlgmr.msra.gmra.mxu3 %v3155_v59  ;;  %3453 = vmatmul.bf16.vlgmr.msra.gmra.mxu1 %v3155_v59 }
 0x5f4   : > { %3284 = vmatmul.bf16.vlgmr.msra.gmra.mxu0 %v3156_v62  ;;  %3542 = vmatmul.bf16.vlgmr.msrb.gmra.mxu2 %v3156_v62 }
 0x5f5   : > { %v2967_v0 = vunpack.c.l.bf16 %v2933_v2  ;;  %v2968_v50 = vunpack.c.l.bf16 %v2934_v47  ;;  %v2969_v24 = vunpack.c.h.bf16 %v2933_v2  ;;  %v2970_v44 = vunpack.c.h.bf16 %v2934_v47  ;;  %2346 = vperm.xlu1 %7685, %v7879_v13  }
 0x5f7   : > { %v3035_v31 = vmul.f32 1.442695, %v2967_v0  ;;  %v3037_v45 = vmul.f32 1.442695, %v2968_v50  ;;  %v3039_v8 = vmul.f32 1.442695, %v2969_v24  ;;  %v2337_v61 = vpop.permute.xlu1 %2336 }
 0x5f8   : > { %v3041_v26 = vmul.f32 1.442695, %v2970_v44  ;;  %v2394_v15 = vmul.f32 %v2337_v61, %v2192_v14  ;;  %3998 = vrot.lane.b32.xlu0 %v12705_v33, %s8469_s23  ;;  %v2785_v61 = vpop.xlane.xlu0 %2784 }
 0x5f9   : > { %7880 = vpow2.f32 %v3035_v31  ;;  %v10303_v60 = vpop.f32.mrf.mxu2  ;;  %v2825_v31 = vmax.f32 %v10286_v9, %v10294_v12 }
 0x5fa   : > { %7882 = vpow2.f32 %v3037_v45  ;;  %2426 = vst.msk [vmem:[#allocation2 + $0xc8] sm:$0xff] %vm1034_vm1, %v2394_v15  ;;  %v2828_v51 = vmax.f32 %v10297_v38, %v10303_v60  ;;  %v10308_v5 = vpop.f32.mrf.mxu1 }
 0x5fb   : > { %7884 = vpow2.f32 %v3039_v8 }
 0x5fc   : > { %7886 = vpow2.f32 %v3041_v26  ;;  %2829 = vmax.xlane.f32.xlu2 %v2828_v51 }
 0x5fd   : > { %4000 = vrot.lane.b32.xlu1 %v12704_v46, %s8469_s23 }
 0x5ff   : > { %v7881_v23 = vpop.eup %7880 }
 0x600   : > { %v7883_v37 = vpop.eup %7882 }
 0x601   : > { %v7885_v1 = vpop.eup %7884  ;;  %v10312_v22 = vpop.f32.mrf.mxu2 }
 0x602   : > { %v7887_v48 = vpop.eup %7886  ;;  %v3157_v59 = vpack.c.bf16 %v7885_v1, %v7881_v23  ;;  %v10314_v47 = vpop.f32.mrf.mxu1  ;;  %v2831_v15 = vmax.f32 %v10308_v5, %v10312_v22  ;;  %v2875_v23 = vsub.f32 %v10169_v27, %v2785_v61 }
 0x603   : > { %v3158_v2 = vpack.c.bf16 %v7887_v48, %v7883_v37  ;;  %v2876_v37 = vsub.f32 %v10175_v25, %v2785_v61 }
 0x604   : > { %3200 = vmatmul.bf16.gmra.mxu3 %v3157_v59  ;;  %3458 = vmatmul.bf16.gmra.mxu1 %v3157_v59 }
 0x605   : > { %3289 = vmatmul.bf16.gmra.mxu0 %v3158_v2  ;;  %3547 = vmatmul.bf16.gmra.mxu2 %v3158_v2 }
 0x609   : > { %v10316_v62 = vpop.f32.mrf.mxu2 }
 0x60a   : > { %v2834_v13 = vmax.f32 %v10314_v47, %v10316_v62  ;;  %v10320_v0 = vpop.f32.mrf.mxu1 }
 0x60c   : > { %2835 = vmax.xlane.f32.xlu2 %v2834_v13 }
 0x611   : > { %v10322_v50 = vpop.f32.mrf.mxu2 }
 0x612   : > { %v10324_v24 = vpop.f32.mrf.mxu1  ;;  %v2837_v27 = vmax.f32 %v10320_v0, %v10322_v50 }
 0x619   : > { %v10326_v44 = vpop.f32.mrf.mxu2 }
 0x61a   : > { %v2840_v14 = vmax.f32 %v10324_v24, %v10326_v44  ;;  %v10334_v8 = vpop.f32.mrf.mxu1 }
 0x61b   : > { %12743 = vst [vmem:[#allocation40_spill] sm:$0xff] %v10334_v8 }
 0x61c   : > { %2841 = vmax.xlane.f32.xlu2 %v2840_v14 }
 0x621   : > { %v10332_v45 = vpop.f32.mrf.mxu2 }
 0x622   : > { %12742 = vst [vmem:[#allocation39_spill] sm:$0xff] %v10332_v45  ;;  %2826 = vmax.xlane.f32.xlu0 %v2825_v31  ;;  %v2843_v26 = vmax.f32 %v10334_v8, %v10332_v45  ;;  %v10344_v46 = vpop.f32.mrf.mxu1 }
 0x627   : > { %2844 = vmax.xlane.f32.xlu1 %v2843_v26  ;;  %v2794_v26 = vpop.xlane.xlu1 %2793 }
 0x628   : > { %v2788_v51 = vpop.xlane.xlu2 %2787 }
 0x629   : > { %v2877_v1 = vsub.f32 %v10179_v34, %v2788_v51  ;;  %v2878_v48 = vsub.f32 %v10182_v53, %v2788_v51  ;;  %v2882_v51 = vsub.f32 %v10196_v11, %v2794_v26 }
 0x62a   : > { %2832 = vmax.xlane.f32.xlu0 %v2831_v15  ;;  %v2881_v15 = vsub.f32 %v10192_v49, %v2794_v26 }
 0x62b   : > { %v2935_v59 = vpack.c.bf16 %v2877_v1, %v2875_v23  ;;  %v2936_v2 = vpack.c.bf16 %v2878_v48, %v2876_v37  ;;  %v10352_v23 = vpop.f32.mrf.mxu2  ;;  %v10356_v1 = vpop.permute.xlu0 %3996 }
 0x62c   : > { %12744 = vst [vmem:[#allocation41_spill] sm:$0xff] %v10356_v1  ;;  %v10360_v48 = vpop.f32.mrf.mxu1 }
 0x62d   : > { %v2971_v13 = vunpack.c.l.bf16 %v2935_v59  ;;  %v2972_v14 = vunpack.c.l.bf16 %v2936_v2  ;;  %v2973_v31 = vunpack.c.h.bf16 %v2935_v59  ;;  %v2974_v33 = vunpack.c.h.bf16 %v2936_v2 }
 0x62f   : > { %v3043_v45 = vmul.f32 1.442695, %v2971_v13  ;;  %v3045_v8 = vmul.f32 1.442695, %v2972_v14  ;;  %v3047_v17 = vmul.f32 1.442695, %v2973_v31 }
 0x630   : > { %v3049_v25 = vmul.f32 1.442695, %v2974_v33  ;;  %v2791_v34 = vpop.xlane.xlu2 %2790 }
 0x631   : > { %7888 = vpow2.f32 %v3043_v45  ;;  %v2879_v53 = vsub.f32 %v10184_v30, %v2791_v34  ;;  %v2880_v61 = vsub.f32 %v10190_v43, %v2791_v34  ;;  %v2846_v43 = vmax.f32 %v10344_v46, %v10352_v23 }
 0x632   : > { %7890 = vpow2.f32 %v3045_v8  ;;  %2838 = vmax.xlane.f32.xlu0 %v2837_v27 }
 0x633   : > { %7892 = vpow2.f32 %v3047_v17  ;;  %v2937_v37 = vpack.c.bf16 %v2881_v15, %v2879_v53  ;;  %v2938_v33 = vpack.c.bf16 %v2882_v51, %v2880_v61  ;;  %v10362_v27 = vpop.f32.mrf.mxu2  ;;  %v12745_v51 = vld [vmem:[#allocation19_spill] sm:$0xff] }
 0x634   : > { %7894 = vpow2.f32 %v3049_v25  ;;  %4004 = vrot.lane.b32.xlu2 %v8981_v28, %s8469_s23 }
 0x635   : > { %v2975_v49 = vunpack.c.l.bf16 %v2937_v37  ;;  %v2976_v17 = vunpack.c.l.bf16 %v2938_v33  ;;  %v2977_v59 = vunpack.c.h.bf16 %v2937_v37  ;;  %v2978_v2 = vunpack.c.h.bf16 %v2938_v33  ;;  %v2797_v61 = vpop.xlane.xlu0 %2796 }
 0x636   : > { %v2883_v33 = vsub.f32 %v10198_v19, %v2797_v61 }
 0x637   : > { %v7889_v45 = vpop.eup %7888  ;;  %v3051_v13 = vmul.f32 1.442695, %v2975_v49  ;;  %v3053_v26 = vmul.f32 1.442695, %v2976_v17  ;;  %v3055_v34 = vmul.f32 1.442695, %v2977_v59 }
 0x638   : > { %v7891_v30 = vpop.eup %7890  ;;  %v2800_v25 = vpop.xlane.xlu2 %2799  ;;  %v3057_v53 = vmul.f32 1.442695, %v2978_v2 }
 0x639   : > { %v7893_v8 = vpop.eup %7892  ;;  %7896 = vpow2.f32 %v3051_v13  ;;  %v2885_v15 = vsub.f32 %v10206_v32, %v2800_v25  ;;  %v2886_v37 = vsub.f32 %v10208_v7, %v2800_v25 }
 0x63a   : > { %v7895_v11 = vpop.eup %7894  ;;  %2847 = vmax.xlane.f32.xlu0 %v2846_v43  ;;  %v3159_v14 = vpack.c.bf16 %v7893_v8, %v7889_v45  ;;  %7898 = vpow2.f32 %v3053_v26  ;;  %v2803_v45 = vpop.xlane.xlu1 %2802  ;;  %v2884_v43 = vsub.f32 %v10204_v18, %v2797_v61 }
 0x63b   : > { %v3160_v31 = vpack.c.bf16 %v7895_v11, %v7891_v30  ;;  %7900 = vpow2.f32 %v3055_v34  ;;  %v10369_v30 = vpop.f32.mrf.mxu1  ;;  %v2939_v49 = vpack.c.bf16 %v2885_v15, %v2883_v33  ;;  %v10372_v32 = vpop.f32.mrf.mxu2 }
 0x63c   : > { %3205 = vmatmul.bf16.gmra.mxu3 %v3159_v14  ;;  %3463 = vmatmul.bf16.gmra.mxu1 %v3159_v14  ;;  %7902 = vpow2.f32 %v3057_v53  ;;  %v2940_v8 = vpack.c.bf16 %v2886_v37, %v2884_v43  ;;  %v12746_v37 = vld [vmem:[#allocation16_spill] sm:$0xff] }
 0x63d   : > { %3294 = vmatmul.bf16.gmra.mxu0 %v3160_v31  ;;  %3552 = vmatmul.bf16.gmra.mxu2 %v3160_v31  ;;  %v2979_v2 = vunpack.c.l.bf16 %v2939_v49  ;;  %v2981_v7 = vunpack.c.h.bf16 %v2939_v49  ;;  %v2887_v49 = vsub.f32 %v10210_v63, %v2803_v45 }
 0x63e   : > { %v2980_v14 = vunpack.c.l.bf16 %v2940_v8  ;;  %v2982_v31 = vunpack.c.h.bf16 %v2940_v8  ;;  %v2888_v8 = vsub.f32 %v10218_v57, %v2803_v45 }
 0x63f   : > { %v7897_v17 = vpop.eup %7896  ;;  %v3059_v26 = vmul.f32 1.442695, %v2979_v2  ;;  %v3063_v18 = vmul.f32 1.442695, %v2981_v7 }
 0x640   : > { %4006 = vrot.lane.b32.xlu1 %v12745_v51, %s8469_s23  ;;  %v7899_v11 = vpop.eup %7898  ;;  %v3061_v53 = vmul.f32 1.442695, %v2980_v14  ;;  %v3065_v61 = vmul.f32 1.442695, %v2982_v31 }
 0x641   : > { %v7901_v59 = vpop.eup %7900  ;;  %7904 = vpow2.f32 %v3059_v26 }
 0x642   : > { %v7903_v13 = vpop.eup %7902  ;;  %v3161_v19 = vpack.c.bf16 %v7901_v59, %v7897_v17  ;;  %v2806_v34 = vpop.xlane.xlu1 %2805  ;;  %7906 = vpow2.f32 %v3061_v53 }
 0x643   : > { %v3162_v25 = vpack.c.bf16 %v7903_v13, %v7899_v11  ;;  %v10374_v1 = vpop.f32.mrf.mxu1  ;;  %v2889_v15 = vsub.f32 %v10220_v36, %v2806_v34  ;;  %v2890_v33 = vsub.f32 %v10226_v20, %v2806_v34  ;;  %v10380_v43 = vpop.f32.mrf.mxu2  ;;  %7908 = vpow2.f32 %v3063_v18 }
 0x644   : > { %7910 = vpow2.f32 %v3065_v61 }
 0x645   : > { %v2941_v17 = vpack.c.bf16 %v2889_v15, %v2887_v49  ;;  %v2942_v11 = vpack.c.bf16 %v2890_v33, %v2888_v8  ;;  %v2809_v15 = vpop.xlane.xlu0 %2808 }
 0x647   : > { %v7905_v59 = vpop.eup %7904  ;;  %v2983_v7 = vunpack.c.l.bf16 %v2941_v17  ;;  %v2984_v20 = vunpack.c.l.bf16 %v2942_v11  ;;  %v2985_v26 = vunpack.c.h.bf16 %v2941_v17  ;;  %v2986_v63 = vunpack.c.h.bf16 %v2942_v11 }
 0x648   : > { %v7907_v2 = vpop.eup %7906  ;;  %v2891_v11 = vsub.f32 %v10228_v21, %v2809_v15  ;;  %v2852_v21 = vmax.f32 %v10369_v30, %v10372_v32 }
 0x649   : > { %v7909_v14 = vpop.eup %7908  ;;  %v3067_v57 = vmul.f32 1.442695, %v2983_v7  ;;  %v3069_v53 = vmul.f32 1.442695, %v2984_v20  ;;  %v3071_v18 = vmul.f32 1.442695, %v2985_v26 }
 0x64a   : > { %v2812_v36 = vpop.xlane.xlu1 %2811  ;;  %v7911_v31 = vpop.eup %7910  ;;  %v3163_v45 = vpack.c.bf16 %v7909_v14, %v7905_v59  ;;  %v3073_v61 = vmul.f32 1.442695, %v2986_v63  ;;  %v2892_v59 = vsub.f32 %v10240_v58, %v2809_v15 }
 0x64b   : > { %v10384_v13 = vpop.f32.mrf.mxu1  ;;  %v3164_v34 = vpack.c.bf16 %v7911_v31, %v7907_v2  ;;  %7912 = vpow2.f32 %v3067_v57  ;;  %v2893_v49 = vsub.f32 %v10242_v40, %v2812_v36  ;;  %v2894_v8 = vsub.f32 %v10248_v56, %v2812_v36  ;;  %v10407_v15 = vpop.f32.mrf.mxu0 }
 0x64c   : > { %3210 = vmatmul.bf16.gmra.mxu3 %v3161_v19  ;;  %3468 = vmatmul.bf16.gmra.mxu1 %v3161_v19  ;;  %v2849_v19 = vmax.f32 %v10360_v48, %v10362_v27  ;;  %7914 = vpow2.f32 %v3069_v53  ;;  %v2855_v2 = vmax.f32 %v10374_v1, %v10380_v43  ;;  %v2197_v56 = vadd.f32 %v10058_v4, %v10062_v35 }
 0x64d   : > { %3299 = vmatmul.bf16.gmra.mxu0 %v3162_v25  ;;  %3557 = vmatmul.bf16.gmra.mxu2 %v3162_v25  ;;  %v10388_v25 = vpop.f32.mrf.mxu2  ;;  %7916 = vpow2.f32 %v3071_v18  ;;  %v2943_v14 = vpack.c.bf16 %v2893_v49, %v2891_v11  ;;  %v2944_v7 = vpack.c.bf16 %v2894_v8, %v2892_v59  ;;  %v10409_v49 = vpop.f32.mrf.mxu3 }
 0x64e   : > { %4002 = vrot.lane.b32.xlu0 %v12746_v37, %s8469_s23  ;;  %7918 = vpow2.f32 %v3073_v61  ;;  %v2815_v59 = vpop.xlane.xlu0 %2814 }
 0x64f   : > { %v2988_v57 = vunpack.c.l.bf16 %v2944_v7 }
 0x651   : > { %v7913_v40 = vpop.eup %7912  ;;  %v3077_v35 = vmul.f32 1.442695, %v2988_v57 }
 0x652   : > { %v2818_v33 = vpop.xlane.xlu1 %2817  ;;  %v7915_v36 = vpop.eup %7914 }
 0x653   : > { %v10392_v17 = vpop.f32.mrf.mxu1  ;;  %v7917_v26 = vpop.eup %7916 }
 0x654   : > { %v7919_v63 = vpop.eup %7918  ;;  %v3165_v61 = vpack.c.bf16 %v7917_v26, %v7913_v40  ;;  %v2895_v40 = vsub.f32 %v10252_v6, %v2815_v59  ;;  %v2858_v6 = vmax.f32 %v10384_v13, %v10388_v25 }
 0x655   : > { %v10398_v31 = vpop.f32.mrf.mxu2  ;;  %v3166_v4 = vpack.c.bf16 %v7919_v63, %v7915_v36 }
 0x65b   : > { %v10405_v53 = vpop.f32.mrf.mxu1 }
 0x65c   : > { %3215 = vmatmul.bf16.gmra.mxu3 %v3163_v45  ;;  %3473 = vmatmul.bf16.gmra.mxu1 %v3163_v45  ;;  %v2989_v45 = vunpack.c.h.bf16 %v2943_v14 }
 0x65d   : > { %2850 = vmax.xlane.f32.xlu2 %v2849_v19  ;;  %3304 = vmatmul.bf16.gmra.mxu0 %v3164_v34  ;;  %v2987_v19 = vunpack.c.l.bf16 %v2943_v14  ;;  %v2897_v14 = vsub.f32 %v10262_v55, %v2818_v33 }
 0x65e   : > { %3562 = vmatmul.bf16.gmra.mxu2 %v3164_v34  ;;  %v2990_v34 = vunpack.c.h.bf16 %v2944_v7  ;;  %v3079_v8 = vmul.f32 1.442695, %v2989_v45  ;;  %v2898_v7 = vsub.f32 %v10264_v54, %v2818_v33  ;;  %v1896_v54 = vadd.f32 %v10118_v16, %v10108_v42  ;;  %v12749_v42 = vld [vmem:[#allocation25_spill] sm:$0xff] }
 0x65f   : > { %v3075_v18 = vmul.f32 1.442695, %v2987_v19 }
 0x660   : > { %v3081_v11 = vmul.f32 1.442695, %v2990_v34 }
 0x661   : > { %7920 = vpow2.f32 %v3075_v18 }
 0x662   : > { %7922 = vpow2.f32 %v3077_v35 }
 0x663   : > { %7924 = vpow2.f32 %v3079_v8 }
 0x664   : > { %7926 = vpow2.f32 %v3081_v11 }
 0x665   : > { %2856 = vmax.xlane.f32.xlu2 %v2855_v2  ;;  %v10411_v2 = vpop.f32.mrf.mxu2  ;;  %7928 = vrcp.f32 %v1896_v54 }
 0x667   : > { %v2347_v20 = vpop.permute.xlu1 %2346 }
 0x668   : > { %v2396_v58 = vmul.f32 %v2347_v20, %v2197_v56  ;;  %v2896_v56 = vsub.f32 %v10258_v10, %v2815_v59  ;;  %v2945_v20 = vpack.c.bf16 %v2897_v14, %v2895_v40  ;;  %v2824_v14 = vpop.xlane.xlu2 %2823 }
 0x66a   : > { %2428 = vst.msk [vmem:[#allocation2 + $0xd8] sm:$0xff] %vm1034_vm1, %v2396_v58  ;;  %2853 = vmax.xlane.f32.xlu1 %v2852_v21  ;;  %v2946_v26 = vpack.c.bf16 %v2898_v7, %v2896_v56  ;;  %v7921_v21 = vpop.eup %7920  ;;  %v2991_v33 = vunpack.c.l.bf16 %v2945_v20  ;;  %v2821_v56 = vpop.xlane.xlu0 %2820 }
 0x66b   : > { %v7923_v63 = vpop.eup %7922 }
 0x66c   : > { %3220 = vmatmul.bf16.gmra.mxu3 %v3165_v61  ;;  %3478 = vmatmul.bf16.gmra.mxu1 %v3165_v61  ;;  %v7925_v55 = vpop.eup %7924  ;;  %v2992_v18 = vunpack.c.l.bf16 %v2946_v26  ;;  %v2993_v61 = vunpack.c.h.bf16 %v2945_v20  ;;  %v3083_v35 = vmul.f32 1.442695, %v2991_v33  ;;  %v2901_v20 = vsub.f32 %v10278_v3, %v2824_v14 }
 0x66d   : > { %3309 = vmatmul.bf16.gmra.mxu0 %v3166_v4  ;;  %v7927_v10 = vpop.eup %7926  ;;  %v3167_v8 = vpack.c.bf16 %v7925_v55, %v7921_v21  ;;  %v12751_v55 = vld [vmem:[#allocation11_spill] sm:$0xff] }
 0x66e   : > { %3567 = vmatmul.bf16.gmra.mxu2 %v3166_v4  ;;  %v2994_v4 = vunpack.c.h.bf16 %v2946_v26  ;;  %v3168_v11 = vpack.c.bf16 %v7927_v10, %v7923_v63  ;;  %v3085_v59 = vmul.f32 1.442695, %v2992_v18  ;;  %v3087_v16 = vmul.f32 1.442695, %v2993_v61  ;;  %v7929_v21 = vpop.eup %7928 }
 0x66f   : > { %7930 = vpow2.f32 %v3083_v35  ;;  %v2902_v26 = vsub.f32 %v10280_v52, %v2824_v14  ;;  %v12753_v35 = vld [vmem:[#allocation28_spill] sm:$0xff] }
 0x670   : > { %v3454_v36 = vpop.f32.mrf.mxu1  ;;  %v3089_v40 = vmul.f32 1.442695, %v2994_v4  ;;  %7932 = vpow2.f32 %v3085_v59 }
 0x671   : > { %v3285_v19 = vpop.f32.mrf.mxu0  ;;  %7934 = vpow2.f32 %v3087_v16 }
 0x672   : > { %7936 = vpow2.f32 %v3089_v40  ;;  %v10442_v16 = vpop.permute.xlu0 %3998  ;;  %v12754_v40 = vld [vmem:[#allocation9_spill] sm:$0xff] }
 0x673   : > { %7938 = vrcp.f32 %v10071_v29 }
 0x675   : > { %v7931_v54 = vpop.eup %7930 }
 0x676   : > { %v3196_v58 = vpop.f32.mrf.mxu3 }
 0x677   : > { %v10417_v57 = vadd.f32 %v3285_v19, %v3196_v58  ;;  %v3543_v45 = vpop.f32.mrf.mxu2  ;;  %v2899_v19 = vsub.f32 %v10268_v39, %v2821_v56  ;;  %v2900_v58 = vsub.f32 %v10274_v41, %v2821_v56 }
 0x678   : > { %v10423_v34 = vadd.f32 %v3543_v45, %v3454_v36  ;;  %2859 = vmax.xlane.f32.xlu0 %v2858_v6  ;;  %v10425_v7 = vpop.f32.mrf.mxu1  ;;  %v7933_v6 = vpop.eup %7932 }
 0x679   : > { %12748 = vst [vmem:[#allocation44_spill] sm:$0xff] %v10425_v7  ;;  %v2947_v63 = vpack.c.bf16 %v2901_v20, %v2899_v19  ;;  %v2948_v45 = vpack.c.bf16 %v2902_v26, %v2900_v58  ;;  %v7935_v10 = vpop.eup %7934  ;;  %v2830_v26 = vpop.xlane.xlu2 %2829 }
 0x67a   : > { %12747 = vst [vmem:[#allocation42_spill] sm:$0xff] %v10423_v34  ;;  %v7937_v61 = vpop.eup %7936  ;;  %v12767_v34 = vld [vmem:[#allocation6_spill] sm:$0xff] }
 0x67b   : > { %v2995_v18 = vunpack.c.l.bf16 %v2947_v63  ;;  %v2996_v39 = vunpack.c.l.bf16 %v2948_v45  ;;  %v2997_v4 = vunpack.c.h.bf16 %v2947_v63  ;;  %v2998_v41 = vunpack.c.h.bf16 %v2948_v45  ;;  %v7939_v20 = vpop.eup %7938 }
 0x67c   : > { %3225 = vmatmul.bf16.gmra.mxu3 %v3167_v8  ;;  %3483 = vmatmul.bf16.gmra.mxu1 %v3167_v8  ;;  %v3170_v59 = vpack.c.bf16 %v7937_v61, %v7933_v6  ;;  %v2905_v63 = vsub.f32 %v10297_v38, %v2830_v26  ;;  %v2906_v45 = vsub.f32 %v10303_v60, %v2830_v26  ;;  %v12757_v38 = vld [vmem:[#allocation24_spill] sm:$0xff] }
 0x67d   : > { %4954 = vrot.lane.b32.xlu2 %v12749_v42, %s8469_s23  ;;  %3314 = vmatmul.bf16.gmra.mxu0 %v3168_v11  ;;  %v3091_v8 = vmul.f32 1.442695, %v2995_v18  ;;  %v3093_v14 = vmul.f32 1.442695, %v2996_v39  ;;  %v3095_v56 = vmul.f32 1.442695, %v2997_v4 }
 0x67e   : > { %3572 = vmatmul.bf16.gmra.mxu2 %v3168_v11  ;;  %v3169_v11 = vpack.c.bf16 %v7935_v10, %v7931_v54  ;;  %v3097_v29 = vmul.f32 1.442695, %v2998_v41  ;;  %v12756_v10 = vld [vmem:[#allocation33_spill] sm:$0xff] }
 0x67f   : > { %v10429_v36 = vpop.f32.mrf.mxu2  ;;  %7940 = vpow2.f32 %v3091_v8 }
 0x680   : > { %12750 = vst [vmem:[#allocation45_spill] sm:$0xff] %v10429_v36  ;;  %7942 = vpow2.f32 %v3093_v14 }
 0x681   : > { %v3459_v33 = vpop.f32.mrf.mxu1  ;;  %7944 = vpow2.f32 %v3095_v56  ;;  %v12758_v56 = vld [vmem:[#allocation7_spill] sm:$0xff]  ;;  %v2836_v26 = vpop.xlane.xlu2 %2835 }
 0x682   : > { %7946 = vpow2.f32 %v3097_v29  ;;  %v10460_v29 = vpop.f32.mrf.mxu0 }
 0x683   : > { %2356 = vperm.xlu1 %7685, %v7929_v21   ;;  %v12755_v21 = vld [vmem:[#allocation30_spill] sm:$0xff] }
 0x685   : > { %4944 = vrot.lane.b32.xlu2 %v12751_v55, %s8469_s23  ;;  %v7941_v58 = vpop.eup %7940 }
 0x688   : > { %v3548_v3 = vpop.f32.mrf.mxu2 }
 0x689   : > { %v10437_v52 = vadd.f32 %v3548_v3, %v3459_v33  ;;  %v7943_v33 = vpop.eup %7942 }
 0x68a   : > { %v7945_v3 = vpop.eup %7944 }
 0x68b   : > { %12752 = vst [vmem:[#allocation46_spill] sm:$0xff] %v10437_v52  ;;  %4952 = vrot.lane.b32.xlu1 %v12753_v35, %s8469_s23  ;;  %v7947_v39 = vpop.eup %7946 }
 0x68c   : > { %3230 = vmatmul.bf16.gmra.mxu3 %v3169_v11  ;;  %3488 = vmatmul.bf16.gmra.mxu1 %v3169_v11 }
 0x68d   : > { %4942 = vrot.lane.b32.xlu2 %v12754_v40, %s8469_s23  ;;  %3319 = vmatmul.bf16.gmra.mxu0 %v3170_v59 }
 0x68e   : > { %3577 = vmatmul.bf16.gmra.mxu2 %v3170_v59  ;;  %2351 = vperm.xlu0 %7684, %v7939_v20   ;;  %v3171_v59 = vpack.c.bf16 %v7945_v3, %v7941_v58  ;;  %v10468_v3 = vpop.f32.mrf.mxu3 }
 0x693   : > { %4970 = vrot.lane.b32.xlu1 %v12755_v21, %s8469_s23 }
 0x695   : > { %v2827_v19 = vpop.xlane.xlu0 %2826  ;;  %5581 = vrot.lane.b32.xlu2 %v12745_v51, %s8471_s24 }
 0x696   : > { %v2903_v54 = vsub.f32 %v10286_v9, %v2827_v19  ;;  %v2904_v6 = vsub.f32 %v10294_v12, %v2827_v19  ;;  %4950 = vrot.lane.b32.xlu0 %v12756_v10, %s8469_s23  ;;  %v3172_v9 = vpack.c.bf16 %v7947_v39, %v7943_v33 }
 0x698   : > { %v2949_v18 = vpack.c.bf16 %v2905_v63, %v2903_v54  ;;  %v2950_v61 = vpack.c.bf16 %v2906_v45, %v2904_v6  ;;  %v12759_v63 = vld [vmem:[#allocation27_spill] sm:$0xff]  ;;  %v2909_v54 = vsub.f32 %v10314_v47, %v2836_v26  ;;  %v2910_v6 = vsub.f32 %v10316_v62, %v2836_v26  ;;  %v10474_v47 = vpop.f32.mrf.mxu0 }
 0x69a   : > { %v2999_v4 = vunpack.c.l.bf16 %v2949_v18  ;;  %v3000_v41 = vunpack.c.l.bf16 %v2950_v61  ;;  %v3001_v8 = vunpack.c.h.bf16 %v2949_v18  ;;  %v3002_v11 = vunpack.c.h.bf16 %v2950_v61 }
 0x69b   : > { %4968 = vrot.lane.b32.xlu1 %v12757_v38, %s8469_s23 }
 0x69c   : > { %v3099_v60 = vmul.f32 1.442695, %v2999_v4  ;;  %v3101_v14 = vmul.f32 1.442695, %v3000_v41  ;;  %v3103_v20 = vmul.f32 1.442695, %v3001_v8  ;;  %3235 = vmatmul.bf16.gmra.mxu3 %v3171_v59  ;;  %3493 = vmatmul.bf16.gmra.mxu1 %v3171_v59 }
 0x69d   : > { %v2833_v12 = vpop.xlane.xlu0 %2832  ;;  %4940 = vrot.lane.b32.xlu2 %v12758_v56, %s8469_s23  ;;  %3324 = vmatmul.bf16.gmra.mxu0 %v3172_v9  ;;  %v3105_v19 = vmul.f32 1.442695, %v3002_v11  ;;  %v12760_v41 = vld [vmem:[#allocation13_spill] sm:$0xff] }
 0x69e   : > { %3582 = vmatmul.bf16.gmra.mxu2 %v3172_v9  ;;  %7948 = vpow2.f32 %v3099_v60  ;;  %4948 = vrot.lane.b32.xlu0 %v12759_v63, %s8469_s23  ;;  %v2907_v58 = vsub.f32 %v10308_v5, %v2833_v12  ;;  %v2908_v45 = vsub.f32 %v10312_v22, %v2833_v12 }
 0x69f   : > { %7950 = vpow2.f32 %v3101_v14 }
 0x6a0   : > { %7952 = vpow2.f32 %v3103_v20  ;;  %v2951_v33 = vpack.c.bf16 %v2909_v54, %v2907_v58  ;;  %v2952_v18 = vpack.c.bf16 %v2910_v6, %v2908_v45  ;;  %v12761_v20 = vld [vmem:[#allocation8_spill] sm:$0xff]  ;;  %v2842_v58 = vpop.xlane.xlu2 %2841  ;;  %v12762_v6 = vld [vmem:[#allocation26_spill] sm:$0xff] }
 0x6a1   : > { %7954 = vpow2.f32 %v3105_v19  ;;  %v10478_v19 = vpop.f32.mrf.mxu3 }
 0x6a2   : > { %v3003_v5 = vunpack.c.l.bf16 %v2951_v33  ;;  %v3004_v8 = vunpack.c.l.bf16 %v2952_v18  ;;  %v3005_v62 = vunpack.c.h.bf16 %v2951_v33  ;;  %v3006_v11 = vunpack.c.h.bf16 %v2952_v18 }
 0x6a3   : > { %v2913_v18 = vsub.f32 %v10324_v24, %v2842_v58  ;;  %v12765_v24 = vld [vmem:[#allocation10_spill] sm:$0xff] }
 0x6a4   : > { %v7949_v61 = vpop.eup %7948  ;;  %v3107_v60 = vmul.f32 1.442695, %v3003_v5  ;;  %v3109_v14 = vmul.f32 1.442695, %v3004_v8  ;;  %v3111_v26 = vmul.f32 1.442695, %v3005_v62 }
 0x6a5   : > { %5579 = vrot.lane.b32.xlu2 %v8981_v28, %s8471_s24  ;;  %v7951_v39 = vpop.eup %7950  ;;  %v2839_v12 = vpop.xlane.xlu0 %2838  ;;  %v3113_v45 = vmul.f32 1.442695, %v3006_v11 }
 0x6a6   : > { %v7953_v4 = vpop.eup %7952  ;;  %4946 = vrot.lane.b32.xlu0 %v12760_v41, %s8469_s23  ;;  %7956 = vpow2.f32 %v3107_v60  ;;  %v2911_v54 = vsub.f32 %v10320_v0, %v2839_v12  ;;  %v2912_v33 = vsub.f32 %v10322_v50, %v2839_v12  ;;  %v12764_v0 = vld [vmem:[#allocation4_spill] sm:$0xff]  ;;  %v10492_v11 = vpop.permute.xlu1 %4000 }
 0x6a7   : > { %v7955_v22 = vpop.eup %7954  ;;  %v3173_v59 = vpack.c.bf16 %v7953_v4, %v7949_v61  ;;  %7958 = vpow2.f32 %v3109_v14  ;;  %v10485_v61 = vpop.f32.mrf.mxu0 }
 0x6a8   : > { %v3174_v9 = vpack.c.bf16 %v7955_v22, %v7951_v39  ;;  %7960 = vpow2.f32 %v3111_v26  ;;  %v2914_v39 = vsub.f32 %v10326_v44, %v2842_v58  ;;  %v10488_v4 = vpop.f32.mrf.mxu1  ;;  %v2953_v5 = vpack.c.bf16 %v2913_v18, %v2911_v54  ;;  %v10498_v14 = vpop.f32.mrf.mxu2 }
 0x6a9   : > { %7962 = vpow2.f32 %v3113_v45  ;;  %12763 = vst [vmem:[#allocation43_spill] sm:$0xff] %v10488_v4 }
 0x6aa   : > { %v2954_v22 = vpack.c.bf16 %v2914_v39, %v2912_v33  ;;  %v3007_v60 = vunpack.c.l.bf16 %v2953_v5  ;;  %12766 = vst [vmem:[#allocation48_spill] sm:$0xff] %v10498_v14  ;;  %v3009_v12 = vunpack.c.h.bf16 %v2953_v5  ;;  %v10519_v14 = vpop.permute.xlu2 %4004 }
 0x6ac   : > { %3240 = vmatmul.bf16.gmra.mxu3 %v3173_v59  ;;  %3498 = vmatmul.bf16.gmra.mxu1 %v3173_v59  ;;  %v7957_v8 = vpop.eup %7956  ;;  %v3008_v44 = vunpack.c.l.bf16 %v2954_v22  ;;  %v3010_v26 = vunpack.c.h.bf16 %v2954_v22  ;;  %v3115_v45 = vmul.f32 1.442695, %v3007_v60  ;;  %v3119_v36 = vmul.f32 1.442695, %v3009_v12  ;;  %v12768_v22 = vld [vmem:[#allocation32_spill] sm:$0xff]  ;;  %v12770_v12 = vld [vmem:[#allocation39_spill] sm:$0xff] }
 0x6ad   : > { %5561 = vrot.lane.b32.xlu2 %v12761_v20, %s8471_s24  ;;  %3329 = vmatmul.bf16.gmra.mxu0 %v3174_v9  ;;  %v7959_v62 = vpop.eup %7958  ;;  %v2848_v4 = vpop.xlane.xlu0 %2847 }
 0x6ae   : > { %3587 = vmatmul.bf16.gmra.mxu2 %v3174_v9  ;;  %4966 = vrot.lane.b32.xlu0 %v12762_v6, %s8469_s23  ;;  %v7961_v50 = vpop.eup %7960  ;;  %v10496_v9 = vpop.f32.mrf.mxu3  ;;  %v3117_v39 = vmul.f32 1.442695, %v3008_v44  ;;  %v3121_v56 = vmul.f32 1.442695, %v3010_v26  ;;  %7964 = vpow2.f32 %v3115_v45  ;;  %v2917_v5 = vsub.f32 %v10344_v46, %v2848_v4 }
 0x6af   : > { %v7963_v59 = vpop.eup %7962  ;;  %v3175_v33 = vpack.c.bf16 %v7961_v50, %v7957_v8  ;;  %v2845_v7 = vpop.xlane.xlu1 %2844  ;;  %v2918_v8 = vsub.f32 %v10352_v23, %v2848_v4  ;;  %v12769_v50 = vld [vmem:[#allocation40_spill] sm:$0xff]  ;;  %v2861_v44 = vmax.f32 %v10392_v17, %v10398_v31  ;;  %v12772_v4 = vld [vmem:[#allocation15_spill] sm:$0xff] }
 0x6b0   : > { %v3176_v18 = vpack.c.bf16 %v7963_v59, %v7959_v62  ;;  %7966 = vpow2.f32 %v3117_v39  ;;  %v2915_v60 = vsub.f32 %v12769_v50, %v2845_v7  ;;  %v2916_v26 = vsub.f32 %v12770_v12, %v2845_v7 }
 0x6b1   : > { %7968 = vpow2.f32 %v3119_v36 }
 0x6b2   : > { %7970 = vpow2.f32 %v3121_v56  ;;  %v2956_v39 = vpack.c.bf16 %v2918_v8, %v2916_v26 }
 0x6b3   : > { %7972 = vrcp.f32 %v12772_v4 }
 0x6b4   : > { %v7965_v23 = vpop.eup %7964  ;;  %v3012_v56 = vunpack.c.l.bf16 %v2956_v39 }
 0x6b5   : > { %5553 = vrot.lane.b32.xlu2 %v12764_v0, %s8471_s24 }
 0x6b6   : > { %5563 = vrot.lane.b32.xlu0 %v12765_v24, %s8471_s24  ;;  %v7967_v36 = vpop.eup %7966  ;;  %v3125_v55 = vmul.f32 1.442695, %v3012_v56 }
 0x6b7   : > { %v7969_v50 = vpop.eup %7968 }
 0x6b8   : > { %v7971_v7 = vpop.eup %7970 }
 0x6b9   : > { %v3464_v54 = vpop.f32.mrf.mxu1  ;;  %v7973_v12 = vpop.eup %7972  ;;  %v3178_v52 = vpack.c.bf16 %v7971_v7, %v7967_v36 }
 0x6ba   : > { %v10500_v58 = vpop.f32.mrf.mxu0 }
 0x6bc   : > { %3245 = vmatmul.bf16.gmra.mxu3 %v3175_v33  ;;  %3503 = vmatmul.bf16.gmra.mxu1 %v3175_v33  ;;  %v2955_v33 = vpack.c.bf16 %v2917_v5, %v2915_v60 }
 0x6bd   : > { %5525 = vrot.lane.b32.xlu2 %v12767_v34, %s8472_s25  ;;  %3334 = vmatmul.bf16.gmra.mxu0 %v3176_v18 }
 0x6be   : > { %3592 = vmatmul.bf16.gmra.mxu2 %v3176_v18  ;;  %4962 = vrot.lane.b32.xlu0 %v12768_v22, %s8469_s23  ;;  %v3011_v40 = vunpack.c.l.bf16 %v2955_v33  ;;  %v3013_v5 = vunpack.c.h.bf16 %v2955_v33 }
 0x6bf   : > { %v10508_v62 = vpop.f32.mrf.mxu3 }
 0x6c0   : > { %v3553_v59 = vpop.f32.mrf.mxu2  ;;  %v3123_v26 = vmul.f32 1.442695, %v3011_v40  ;;  %v3127_v51 = vmul.f32 1.442695, %v3013_v5 }
 0x6c1   : > { %v10514_v45 = vadd.f32 %v3553_v59, %v3464_v54  ;;  %v3466_v18 = vpop.f32.mrf.mxu1 }
 0x6c2   : > { %v3297_v46 = vpop.f32.mrf.mxu0  ;;  %7974 = vpow2.f32 %v3123_v26 }
 0x6c3   : > { %12771 = vst [vmem:[#allocation55_spill] sm:$0xff] %v10514_v45  ;;  %v3177_v45 = vpack.c.bf16 %v7969_v50, %v7965_v23  ;;  %7976 = vpow2.f32 %v3125_v55 }
 0x6c4   : > { %7978 = vpow2.f32 %v3127_v51  ;;  %v12781_v51 = vld [vmem:[#allocation31_spill] sm:$0xff] }
 0x6c5   : > { %5531 = vrot.lane.b32.xlu2 %v12765_v24, %s8472_s25  ;;  %2862 = vmax.xlane.f32.xlu1 %v2861_v44  ;;  %v3014_v24 = vunpack.c.h.bf16 %v2956_v39 }
 0x6c6   : > { %5577 = vrot.lane.b32.xlu0 %v12746_v37, %s8471_s24 }
 0x6c7   : > { %v3208_v54 = vpop.f32.mrf.mxu3  ;;  %v3129_v41 = vmul.f32 1.442695, %v3014_v24 }
 0x6c8   : > { %v10523_v8 = vadd.f32 %v3297_v46, %v3208_v54  ;;  %v3555_v60 = vpop.f32.mrf.mxu2  ;;  %v12775_v46 = vld [vmem:[#allocation34_spill] sm:$0xff]  ;;  %v7975_v7 = vpop.eup %7974 }
 0x6c9   : > { %v10525_v59 = vadd.f32 %v3555_v60, %v3466_v18  ;;  %v3469_v4 = vpop.f32.mrf.mxu1  ;;  %7980 = vpow2.f32 %v3129_v41  ;;  %v7977_v56 = vpop.eup %7976 }
 0x6ca   : > { %12773 = vst [vmem:[#allocation16_spill] sm:$0xff] %v10523_v8  ;;  %v3300_v44 = vpop.f32.mrf.mxu0  ;;  %v7979_v55 = vpop.eup %7978 }
 0x6cb   : > { %12774 = vst [vmem:[#allocation25_spill] sm:$0xff] %v10525_v59  ;;  %v12784_v59 = vld [vmem:[#allocation14_spill] sm:$0xff] }
 0x6cc   : > { %3250 = vmatmul.bf16.gmra.mxu3 %v3177_v45  ;;  %3508 = vmatmul.bf16.gmra.mxu1 %v3177_v45  ;;  %v10537_v45 = vpop.permute.xlu1 %4006 }
 0x6cd   : > { %2361 = vperm.xlu2 %7686, %v7973_v12   ;;  %3339 = vmatmul.bf16.gmra.mxu0 %v3178_v52  ;;  %v3179_v12 = vpack.c.bf16 %v7979_v55, %v7975_v7  ;;  %v12785_v7 = vld [vmem:[#allocation12_spill] sm:$0xff] }
 0x6ce   : > { %3597 = vmatmul.bf16.gmra.mxu2 %v3178_v52  ;;  %4960 = vrot.lane.b32.xlu0 %v12775_v46, %s8469_s23  ;;  %v12780_v52 = vld [vmem:[#allocation17_spill] sm:$0xff] }
 0x6cf   : > { %v3211_v18 = vpop.f32.mrf.mxu3  ;;  %v7981_v5 = vpop.eup %7980 }
 0x6d0   : > { %v2851_v33 = vpop.xlane.xlu2 %2850  ;;  %v10529_v40 = vadd.f32 %v3300_v44, %v3211_v18  ;;  %v3558_v39 = vpop.f32.mrf.mxu2  ;;  %v3180_v26 = vpack.c.bf16 %v7981_v5, %v7977_v56 }
 0x6d1   : > { %v10531_v23 = vadd.f32 %v3558_v39, %v3469_v4  ;;  %v10535_v50 = vpop.f32.mrf.mxu1  ;;  %v2919_v4 = vsub.f32 %v10360_v48, %v2851_v33  ;;  %v2920_v39 = vsub.f32 %v10362_v27, %v2851_v33 }
 0x6d2   : > { %12776 = vst [vmem:[#allocation28_spill] sm:$0xff] %v10529_v40  ;;  %v10533_v36 = vpop.f32.mrf.mxu0 }
 0x6d3   : > { %12777 = vst [vmem:[#allocation30_spill] sm:$0xff] %v10531_v23 }
 0x6d4   : > { %12778 = vst [vmem:[#allocation33_spill] sm:$0xff] %v10533_v36 }
 0x6d5   : > { %12779 = vst [vmem:[#allocation24_spill] sm:$0xff] %v10535_v50  ;;  %5539 = vrot.lane.b32.xlu2 %v12780_v52, %s8472_s25 }
 0x6d6   : > { %4958 = vrot.lane.b32.xlu0 %v12781_v51, %s8469_s23 }
 0x6d7   : > { %v10543_v41 = vpop.f32.mrf.mxu3 }
 0x6d8   : > { %v2857_v54 = vpop.xlane.xlu2 %2856  ;;  %12782 = vst [vmem:[#allocation27_spill] sm:$0xff] %v10543_v41  ;;  %v10545_v60 = vpop.f32.mrf.mxu2 }
 0x6d9   : > { %12783 = vst [vmem:[#allocation8_spill] sm:$0xff] %v10545_v60  ;;  %v3474_v44 = vpop.f32.mrf.mxu1 }
 0x6da   : > { %v3305_v24 = vpop.f32.mrf.mxu0 }
 0x6dc   : > { %3255 = vmatmul.bf16.gmra.mxu3 %v3179_v12  ;;  %3513 = vmatmul.bf16.gmra.mxu1 %v3179_v12 }
 0x6dd   : > { %v2854_v18 = vpop.xlane.xlu1 %2853  ;;  %3344 = vmatmul.bf16.gmra.mxu0 %v3180_v26 }
 0x6de   : > { %v2921_v50 = vsub.f32 %v10369_v30, %v2854_v18  ;;  %v2922_v23 = vsub.f32 %v10372_v32, %v2854_v18  ;;  %3602 = vmatmul.bf16.gmra.mxu2 %v3180_v26  ;;  %4956 = vrot.lane.b32.xlu0 %v12784_v59, %s8469_s23  ;;  %v12795_v59 = vld [vmem:[#allocation18_spill] sm:$0xff] }
 0x6df   : > { %5565 = vrot.lane.b32.xlu1 %v12785_v7, %s8471_s24  ;;  %v3216_v56 = vpop.f32.mrf.mxu3 }
 0x6e0   : > { %v2957_v60 = vpack.c.bf16 %v2921_v50, %v2919_v4  ;;  %v2958_v36 = vpack.c.bf16 %v2922_v23, %v2920_v39  ;;  %v4955_v48 = vpop.permute.xlu2 %4954  ;;  %v10555_v27 = vadd.f32 %v3305_v24, %v3216_v56  ;;  %v10563_v39 = vpop.permute.xlu0 %4002  ;;  %v12790_v24 = vld [vmem:[#allocation5_spill] sm:$0xff] }
 0x6e1   : > { %4988 = vmatpush.bf16.msra.mxu3 %v4955_v48  ;;  %v3563_v33 = vpop.f32.mrf.mxu2  ;;  %v10561_v4 = vpop.f32.mrf.mxu1 }
 0x6e2   : > { %12786 = vst [vmem:[#allocation26_spill] sm:$0xff] %v10555_v27  ;;  %v3015_v55 = vunpack.c.l.bf16 %v2957_v60  ;;  %v3016_v30 = vunpack.c.l.bf16 %v2958_v36  ;;  %v3017_v5 = vunpack.c.h.bf16 %v2957_v60  ;;  %v10557_v32 = vadd.f32 %v3563_v33, %v3474_v44  ;;  %v10559_v26 = vpop.f32.mrf.mxu0  ;;  %v12791_v60 = vld [vmem:[#allocation29_spill] sm:$0xff] }
 0x6e3   : > { %v3018_v12 = vunpack.c.h.bf16 %v2958_v36  ;;  %12788 = vst [vmem:[#allocation10_spill] sm:$0xff] %v10559_v26 }
 0x6e4   : > { %12787 = vst [vmem:[#allocation4_spill] sm:$0xff] %v10557_v32  ;;  %v3131_v18 = vmul.f32 1.442695, %v3015_v55  ;;  %v3133_v50 = vmul.f32 1.442695, %v3016_v30 }
 0x6e5   : > { %v3135_v23 = vmul.f32 1.442695, %v3017_v5  ;;  %12789 = vst [vmem:[#allocation6_spill] sm:$0xff] %v10561_v4  ;;  %v3137_v41 = vmul.f32 1.442695, %v3018_v12 }
 0x6e6   : > { %7982 = vpow2.f32 %v3131_v18  ;;  %5555 = vrot.lane.b32.xlu0 %v12790_v24, %s8471_s24  ;;  %v2923_v18 = vsub.f32 %v10374_v1, %v2857_v54 }
 0x6e7   : > { %7984 = vpow2.f32 %v3133_v50  ;;  %4964 = vrot.lane.b32.xlu1 %v12791_v60, %s8469_s23  ;;  %v10571_v44 = vpop.f32.mrf.mxu3  ;;  %v2924_v50 = vsub.f32 %v10380_v43, %v2857_v54 }
 0x6e8   : > { %7986 = vpow2.f32 %v3135_v23  ;;  %v10569_v36 = vpop.permute.xlu2 %4944  ;;  %12792 = vst [vmem:[#allocation32_spill] sm:$0xff] %v10571_v44 }
 0x6e9   : > { %7988 = vpow2.f32 %v3137_v41  ;;  %v10573_v48 = vpop.f32.mrf.mxu2  ;;  %v3479_v55 = vpop.f32.mrf.mxu1 }
 0x6ea   : > { %12793 = vst [vmem:[#allocation40_spill] sm:$0xff] %v10573_v48  ;;  %v3310_v56 = vpop.f32.mrf.mxu0  ;;  %v12794_v48 = vld [vmem:[#allocation3_spill] sm:$0xff] }
 0x6eb   : > { %v2860_v5 = vpop.xlane.xlu0 %2859 }
 0x6ec   : > { %v7983_v33 = vpop.eup %7982  ;;  %v2925_v23 = vsub.f32 %v10384_v13, %v2860_v5  ;;  %v2926_v4 = vsub.f32 %v10388_v25, %v2860_v5 }
 0x6ed   : > { %v7985_v30 = vpop.eup %7984 }
 0x6ee   : > { %v7987_v12 = vpop.eup %7986  ;;  %v2959_v26 = vpack.c.bf16 %v2925_v23, %v2923_v18  ;;  %v2960_v44 = vpack.c.bf16 %v2926_v4, %v2924_v50  ;;  %5519 = vrot.lane.b32.xlu0 %v12794_v48, %s8472_s25  ;;  %v12799_v18 = vld [vmem:[#allocation36_spill] sm:$0xff] }
 0x6ef   : > { %v7989_v32 = vpop.eup %7988  ;;  %v3181_v41 = vpack.c.bf16 %v7987_v12, %v7983_v33  ;;  %5575 = vrot.lane.b32.xlu1 %v12795_v59, %s8471_s24  ;;  %v3221_v1 = vpop.f32.mrf.mxu3 }
 0x6f0   : > { %v3182_v27 = vpack.c.bf16 %v7989_v32, %v7985_v30  ;;  %v10583_v51 = vpop.permute.xlu2 %4942  ;;  %v3019_v43 = vunpack.c.l.bf16 %v2959_v26  ;;  %v3020_v13 = vunpack.c.l.bf16 %v2960_v44  ;;  %v3021_v54 = vunpack.c.h.bf16 %v2959_v26  ;;  %v12800_v32 = vld [vmem:[#allocation47_spill] sm:$0xff] }
 0x6f1   : > { %3260 = vmatmul.bf16.gmra.mxu3 %v3181_v41  ;;  %3518 = vmatmul.bf16.gmra.mxu1 %v3181_v41  ;;  %v3022_v25 = vunpack.c.h.bf16 %v2960_v44  ;;  %v3568_v5 = vpop.f32.mrf.mxu2  ;;  %v10585_v4 = vadd.f32 %v3310_v56, %v3221_v1  ;;  %v2202_v30 = vadd.f32 %v12800_v32, %v12799_v18  ;;  %v10593_v41 = vpop.f32.mrf.mxu1 }
 0x6f2   : > { %3349 = vmatmul.bf16.gmra.mxu0 %v3182_v27  ;;  %3607 = vmatmul.bf16.gmra.mxu2 %v3182_v27  ;;  %v10587_v33 = vadd.f32 %v3568_v5, %v3479_v55  ;;  %v10589_v12 = vpop.f32.mrf.mxu0  ;;  %v3139_v50 = vmul.f32 1.442695, %v3019_v43  ;;  %v3141_v23 = vmul.f32 1.442695, %v3020_v13  ;;  %v3143_v40 = vmul.f32 1.442695, %v3021_v54 }
 0x6f3   : > { %12796 = vst [vmem:[#allocation39_spill] sm:$0xff] %v10585_v4  ;;  %v3145_v8 = vmul.f32 1.442695, %v3022_v25  ;;  %v12802_v27 = vld [vmem:[#allocation20_spill] sm:$0xff] }
 0x6f4   : > { %12797 = vst [vmem:[#allocation15_spill] sm:$0xff] %v10587_v33  ;;  %7990 = vpow2.f32 %v3139_v50 }
 0x6f5   : > { %12798 = vst [vmem:[#allocation34_spill] sm:$0xff] %v10589_v12  ;;  %v2357_v26 = vpop.permute.xlu1 %2356  ;;  %7992 = vpow2.f32 %v3141_v23 }
 0x6f6   : > { %12801 = vst [vmem:[#allocation17_spill] sm:$0xff] %v10593_v41  ;;  %v2398_v44 = vmul.f32 %v2357_v26, %v2202_v30  ;;  %7994 = vpow2.f32 %v3143_v40  ;;  %5523 = vrot.lane.b32.xlu0 %v12790_v24, %s8472_s25  ;;  %v2864_v40 = vmax.f32 %v10405_v53, %v10411_v2  ;;  %v12805_v30 = vld [vmem:[#allocation22_spill] sm:$0xff] }
 0x6f7   : > { %5559 = vrot.lane.b32.xlu1 %v12802_v27, %s8471_s24  ;;  %7996 = vpow2.f32 %v3145_v8  ;;  %v10600_v55 = vpop.f32.mrf.mxu3 }
 0x6f8   : > { %2430 = vst.msk [vmem:[#allocation2 + $0xe8] sm:$0xff] %vm1034_vm1, %v2398_v44  ;;  %v5582_v56 = vpop.permute.xlu2 %5581 }
 0x6f9   : > { %12803 = vst [vmem:[#allocation12_spill] sm:$0xff] %v10600_v55  ;;  %v5677_v1 = vsel %vm1034_vm1, %v5582_v56, 0  ;;  %v10603_v43 = vpop.f32.mrf.mxu2  ;;  %v3484_v24 = vpop.f32.mrf.mxu1 }
 0x6fa   : > { %12804 = vst [vmem:[#allocation5_spill] sm:$0xff] %v10603_v43  ;;  %5768 = vmatpush.bf16.xpose.msrb.mxu2 %v5677_v1  ;;  %v3315_v13 = vpop.f32.mrf.mxu0  ;;  %v7991_v54 = vpop.eup %7990 }
 0x6fb   : > { %v7993_v25 = vpop.eup %7992 }
 0x6fc   : > { %v7995_v18 = vpop.eup %7994 }
 0x6fd   : > { %v4953_v5 = vpop.permute.xlu1 %4952  ;;  %v7997_v32 = vpop.eup %7996  ;;  %v3183_v8 = vpack.c.bf16 %v7995_v18, %v7991_v54  ;;  %v12808_v54 = vld [vmem:[#allocation35_spill] sm:$0xff] }
 0x6fe   : > { %2865 = vmax.xlane.f32.xlu2 %v2864_v40  ;;  %4989 = vmatpush.bf16.msra.mxu3 %v4953_v5  ;;  %v3184_v50 = vpack.c.bf16 %v7997_v32, %v7993_v25  ;;  %v12811_v32 = vld [vmem:[#allocation23_spill] sm:$0xff] }
 0x6ff   : > { %5529 = vrot.lane.b32.xlu0 %v12761_v20, %s8472_s25  ;;  %5573 = vrot.lane.b32.xlu1 %v12805_v30, %s8471_s24  ;;  %v3226_v26 = vpop.f32.mrf.mxu3 }
 0x700   : > { %v10611_v23 = vpop.permute.xlu2 %4940  ;;  %v10613_v44 = vadd.f32 %v3315_v13, %v3226_v26  ;;  %v2352_v1 = vpop.permute.xlu0 %2351 }
 0x701   : > { %3265 = vmatmul.bf16.gmra.mxu3 %v3183_v8  ;;  %3523 = vmatmul.bf16.gmra.mxu1 %v3183_v8  ;;  %v3573_v56 = vpop.f32.mrf.mxu2  ;;  %v2397_v5 = vmul.f32 %v2352_v1, %v12808_v54  ;;  %v10620_v18 = vpop.f32.mrf.mxu1  ;;  %v3291_v54 = vadd.f32 %v10474_v47, %v10478_v19  ;;  %v3296_v19 = vadd.f32 %v10500_v58, %v10508_v62 }
 0x702   : > { %12806 = vst [vmem:[#allocation29_spill] sm:$0xff] %v10613_v44  ;;  %3354 = vmatmul.bf16.gmra.mxu0 %v3184_v50  ;;  %3612 = vmatmul.bf16.gmra.mxu2 %v3184_v50  ;;  %v10615_v40 = vadd.f32 %v3573_v56, %v3484_v24  ;;  %v10618_v20 = vpop.f32.mrf.mxu0 }
 0x703   : > { %12809 = vst [vmem:[#allocation18_spill] sm:$0xff] %v10618_v20  ;;  %7998 = vrcp.f32 %v3291_v54 }
 0x704   : > { %12807 = vst [vmem:[#allocation3_spill] sm:$0xff] %v10615_v40  ;;  %8000 = vrcp.f32 %v3296_v19 }
 0x705   : > { %12810 = vst [vmem:[#allocation36_spill] sm:$0xff] %v10620_v18  ;;  %v4971_v25 = vpop.permute.xlu1 %4970  ;;  %8002 = vrcp.f32 %v10417_v57 }
 0x706   : > { %2429 = vst.msk [vmem:[#allocation2 + $0xe0] sm:$0xff] %vm1034_vm1, %v2397_v5  ;;  %5077 = vmatpush.bf16.msra.mxu0 %v4971_v25  ;;  %v12814_v25 = vld [vmem:[#allocation21_spill] sm:$0xff] }
 0x707   : > { %5535 = vrot.lane.b32.xlu0 %v12811_v32, %s8472_s25  ;;  %5557 = vrot.lane.b32.xlu1 %v12767_v34, %s8471_s24  ;;  %v10627_v8 = vpop.f32.mrf.mxu3 }
 0x708   : > { %v5580_v13 = vpop.permute.xlu2 %5579  ;;  %12812 = vst [vmem:[#allocation47_spill] sm:$0xff] %v10627_v8  ;;  %v4951_v26 = vpop.permute.xlu0 %4950 }
 0x709   : > { %v5674_v24 = vsel %vm1034_vm1, %v5580_v13, 0  ;;  %v10630_v50 = vpop.f32.mrf.mxu2  ;;  %4990 = vmatpush.bf16.msra.mxu3 %v4951_v26  ;;  %v3489_v1 = vpop.f32.mrf.mxu1 }
 0x70a   : > { %12813 = vst [vmem:[#allocation20_spill] sm:$0xff] %v10630_v50  ;;  %5769 = vmatpush.bf16.xpose.msrb.mxu2 %v5674_v24  ;;  %v3320_v56 = vpop.f32.mrf.mxu0 }
 0x70d   : > { %v4969_v5 = vpop.permute.xlu1 %4968 }
 0x70e   : > { %5078 = vmatpush.bf16.msra.mxu0 %v4969_v5 }
 0x70f   : > { %5537 = vrot.lane.b32.xlu0 %v12814_v25, %s8472_s25  ;;  %5571 = vrot.lane.b32.xlu1 %v12780_v52, %s8471_s24  ;;  %v3231_v13 = vpop.f32.mrf.mxu3  ;;  %v7999_v52 = vpop.eup %7998 }
 0x710   : > { %v10638_v34 = vpop.permute.xlu2 %5561  ;;  %v10640_v50 = vadd.f32 %v3320_v56, %v3231_v13  ;;  %v4949_v26 = vpop.permute.xlu0 %4948 }
 0x711   : > { %v3578_v24 = vpop.f32.mrf.mxu2  ;;  %4991 = vmatpush.bf16.msra.mxu3 %v4949_v26  ;;  %v10646_v47 = vpop.f32.mrf.mxu1 }
 0x712   : > { %12815 = vst [vmem:[#allocation22_spill] sm:$0xff] %v10640_v50  ;;  %v10642_v18 = vadd.f32 %v3578_v24, %v3489_v1  ;;  %v10644_v43 = vpop.f32.mrf.mxu0  ;;  %v8001_v58 = vpop.eup %8000 }
 0x713   : > { %12817 = vst [vmem:[#allocation23_spill] sm:$0xff] %v10644_v43 }
 0x714   : > { %12816 = vst [vmem:[#allocation35_spill] sm:$0xff] %v10642_v18 }
 0x715   : > { %12818 = vst [vmem:[#allocation21_spill] sm:$0xff] %v10646_v47 }
 0x716   : > { %5541 = vrot.lane.b32.xlu2 %v12805_v30, %s8472_s25 }
 0x717   : > { %3635 = vperm.xlu0 %7684, %v7999_v52   ;;  %5569 = vrot.lane.b32.xlu1 %v12814_v25, %s8471_s24  ;;  %v10656_v1 = vpop.f32.mrf.mxu3 }
 0x718   : > { %v10654_v56 = vpop.permute.xlu2 %5553  ;;  %12819 = vst [vmem:[#allocation60_spill] sm:$0xff] %v10656_v1  ;;  %v4947_v5 = vpop.permute.xlu0 %4946 }
 0x719   : > { %v10658_v54 = vpop.f32.mrf.mxu2  ;;  %4992 = vmatpush.bf16.msra.mxu3 %v4947_v5  ;;  %v3494_v24 = vpop.f32.mrf.mxu1 }
 0x71a   : > { %12820 = vst [vmem:[#allocation61_spill] sm:$0xff] %v10658_v54  ;;  %v3325_v13 = vpop.f32.mrf.mxu0 }
 0x71d   : > { %4993 = vmatpush.bf16.msra.mxu3 %v10569_v36 }
 0x71e   : > { %5543 = vrot.lane.b32.xlu2 %v12795_v59, %s8472_s25  ;;  %v8003_v59 = vpop.eup %8002 }
 0x71f   : > { %3645 = vperm.xlu0 %7684, %v8001_v58   ;;  %5567 = vrot.lane.b32.xlu1 %v12811_v32, %s8471_s24  ;;  %v3236_v30 = vpop.f32.mrf.mxu3 }
 0x720   : > { %v10666_v62 = vpop.permute.xlu2 %5525  ;;  %v10668_v25 = vadd.f32 %v3325_v13, %v3236_v30  ;;  %v4967_v19 = vpop.permute.xlu0 %4966 }
 0x721   : > { %12821 = vst [vmem:[#allocation62_spill] sm:$0xff] %v10666_v62  ;;  %v3583_v26 = vpop.f32.mrf.mxu2  ;;  %4994 = vmatpush.bf16.msra.mxu3 %v10583_v51  ;;  %5079 = vmatpush.bf16.msra.mxu0 %v4967_v19  ;;  %v10675_v57 = vpop.f32.mrf.mxu1  ;;  %v12829_v19 = vld [vmem:[#allocation37_spill] sm:$0xff] }
 0x722   : > { %12822 = vst [vmem:[#allocation63_spill] sm:$0xff] %v10668_v25  ;;  %v10670_v52 = vadd.f32 %v3583_v26, %v3494_v24  ;;  %v10672_v5 = vpop.f32.mrf.mxu0 }
 0x723   : > { %12824 = vst [vmem:[#allocation65_spill] sm:$0xff] %v10672_v5 }
 0x724   : > { %12823 = vst [vmem:[#allocation64_spill] sm:$0xff] %v10670_v52 }
 0x725   : > { %12825 = vst [vmem:[#allocation66_spill] sm:$0xff] %v10675_v57  ;;  %4995 = vmatpush.bf16.msra.mxu3 %v10611_v23 }
 0x726   : > { %3625 = vperm.xlu2 %7686, %v8003_v59  }
 0x727   : > { %5551 = vrot.lane.b32.xlu1 %v12794_v48, %s8471_s24  ;;  %v10682_v32 = vpop.f32.mrf.mxu3 }
 0x728   : > { %v10680_v36 = vpop.permute.xlu2 %5531  ;;  %12827 = vst [vmem:[#allocation68_spill] sm:$0xff] %v10682_v32  ;;  %v5564_v24 = vpop.permute.xlu0 %5563 }
 0x729   : > { %12826 = vst [vmem:[#allocation67_spill] sm:$0xff] %v10680_v36  ;;  %v10684_v13 = vpop.f32.mrf.mxu2  ;;  %v3499_v30 = vpop.f32.mrf.mxu1 }
 0x72a   : > { %12828 = vst [vmem:[#allocation69_spill] sm:$0xff] %v10684_v13  ;;  %v3330_v58 = vpop.f32.mrf.mxu0 }
 0x72f   : > { %5521 = vrot.lane.b32.xlu1 %v12764_v0, %s8472_s25  ;;  %v3241_v26 = vpop.f32.mrf.mxu3 }
 0x730   : > { %v2362_v51 = vpop.permute.xlu2 %2361  ;;  %v10689_v23 = vadd.f32 %v3330_v58, %v3241_v26  ;;  %v4963_v48 = vpop.permute.xlu0 %4962 }
 0x731   : > { %v2399_v59 = vmul.f32 %v2362_v51, %v12829_v19  ;;  %v3588_v52 = vpop.f32.mrf.mxu2  ;;  %v10696_v13 = vpop.f32.mrf.mxu1 }
 0x732   : > { %12830 = vst [vmem:[#allocation37_spill] sm:$0xff] %v10689_v23  ;;  %v10691_v57 = vadd.f32 %v3588_v52, %v3499_v30  ;;  %v10693_v18 = vpop.f32.mrf.mxu0  ;;  %v12836_v52 = vld [vmem:[#allocation38_spill] sm:$0xff] }
 0x733   : > { %12832 = vst [vmem:[#allocation71_spill] sm:$0xff] %v10693_v18  ;;  %8004 = vrcp.f32 %v12836_v52 }
 0x734   : > { %12831 = vst [vmem:[#allocation70_spill] sm:$0xff] %v10691_v57 }
 0x735   : > { %2431 = vst.msk [vmem:[#allocation2 + $0xf0] sm:$0xff] %vm1034_vm1, %v2399_v59 }
 0x736   : > { %12833 = vst [vmem:[#allocation72_spill] sm:$0xff] %v10696_v13 }
 0x737   : > { %5527 = vrot.lane.b32.xlu1 %v12802_v27, %s8472_s25  ;;  %v10700_v0 = vpop.f32.mrf.mxu3 }
 0x738   : > { %12834 = vst [vmem:[#allocation73_spill] sm:$0xff] %v10700_v0  ;;  %v5578_v51 = vpop.permute.xlu0 %5577  ;;  %v2863_v52 = vpop.xlane.xlu1 %2862 }
 0x739   : > { %v10702_v54 = vpop.f32.mrf.mxu2  ;;  %v5671_v26 = vsel %vm1034_vm1, %v5578_v51, 0  ;;  %v3504_v19 = vpop.f32.mrf.mxu1  ;;  %v3288_v51 = vadd.f32 %v10460_v29, %v10468_v3 }
 0x73a   : > { %12835 = vst [vmem:[#allocation74_spill] sm:$0xff] %v10702_v54  ;;  %v3335_v58 = vpop.f32.mrf.mxu0  ;;  %5770 = vmatpush.bf16.xpose.msrb.mxu2 %v5671_v26  ;;  %v8005_v57 = vpop.eup %8004 }
 0x73b   : > { %8006 = vrcp.f32 %v3288_v51 }
 0x73f   : > { %5533 = vrot.lane.b32.xlu1 %v12785_v7, %s8472_s25  ;;  %v3246_v30 = vpop.f32.mrf.mxu3 }
 0x740   : > { %v10708_v59 = vadd.f32 %v3335_v58, %v3246_v30 }
 0x741   : > { %v3593_v13 = vpop.f32.mrf.mxu2  ;;  %v10714_v54 = vpop.f32.mrf.mxu1 }
 0x742   : > { %12837 = vst [vmem:[#allocation38_spill] sm:$0xff] %v10708_v59  ;;  %v10710_v27 = vadd.f32 %v3593_v13, %v3504_v19  ;;  %v10712_v47 = vpop.f32.mrf.mxu0  ;;  %v3293_v13 = vadd.f32 %v10485_v61, %v10496_v9  ;;  %v8007_v19 = vpop.eup %8006 }
 0x743   : > { %12839 = vst [vmem:[#allocation76_spill] sm:$0xff] %v10712_v47 }
 0x744   : > { %12838 = vst [vmem:[#allocation75_spill] sm:$0xff] %v10710_v27  ;;  %8008 = vrcp.f32 %v3293_v13 }
 0x745   : > { %12840 = vst [vmem:[#allocation77_spill] sm:$0xff] %v10714_v54 }
 0x747   : > { %2366 = vperm.xlu1 %7685, %v8005_v57   ;;  %v10718_v26 = vpop.f32.mrf.mxu3 }
 0x748   : > { %12841 = vst [vmem:[#allocation78_spill] sm:$0xff] %v10718_v26  ;;  %v4961_v26 = vpop.permute.xlu0 %4960 }
 0x749   : > { %v10720_v7 = vpop.f32.mrf.mxu2  ;;  %v3509_v30 = vpop.f32.mrf.mxu1 }
 0x74a   : > { %12842 = vst [vmem:[#allocation79_spill] sm:$0xff] %v10720_v7  ;;  %v3340_v58 = vpop.f32.mrf.mxu0  ;;  %v8009_v47 = vpop.eup %8008 }
 0x74f   : > { %3630 = vperm.xlu1 %7685, %v8007_v19   ;;  %v3251_v54 = vpop.f32.mrf.mxu3 }
 0x750   : > { %v10724_v27 = vadd.f32 %v3340_v58, %v3251_v54  ;;  %v5650_v58 = vsel %vm1034_vm1, %v5564_v24, 0  ;;  %v4959_v19 = vpop.permute.xlu0 %4958 }
 0x751   : > { %v3598_v29 = vpop.f32.mrf.mxu2  ;;  %v5566_v57 = vpop.permute.xlu1 %5565 }
 0x752   : > { %12843 = vst [vmem:[#allocation80_spill] sm:$0xff] %v10724_v27  ;;  %v10726_v3 = vadd.f32 %v3598_v29, %v3509_v30  ;;  %v10728_v51 = vpop.f32.mrf.mxu0  ;;  %v5653_v7 = vsel %vm1034_vm1, %v5566_v57, 0  ;;  %v10731_v59 = vpop.f32.mrf.mxu1 }
 0x753   : > { %12845 = vst [vmem:[#allocation82_spill] sm:$0xff] %v10728_v51  ;;  %5679 = vmatpush.bf16.xpose.msra.mxu1 %v5653_v7 }
 0x754   : > { %12844 = vst [vmem:[#allocation81_spill] sm:$0xff] %v10726_v3 }
 0x755   : > { %12846 = vst [vmem:[#allocation83_spill] sm:$0xff] %v10731_v59 }
 0x757   : > { %3640 = vperm.xlu1 %7685, %v8009_v47   ;;  %v10733_v61 = vpop.f32.mrf.mxu3 }
 0x758   : > { %12847 = vst [vmem:[#allocation84_spill] sm:$0xff] %v10733_v61 }
 0x759   : > { %v10735_v9 = vpop.f32.mrf.mxu2  ;;  %v4965_v54 = vpop.permute.xlu1 %4964 }
 0x75a   : > { %12848 = vst [vmem:[#allocation85_spill] sm:$0xff] %v10735_v9  ;;  %5080 = vmatpush.bf16.msra.mxu0 %v4965_v54  ;;  %v3345_v30 = vpop.f32.mrf.mxu0  ;;  %v3514_v13 = vpop.f32.mrf.mxu1  ;;  %v5647_v54 = vsel %vm1034_vm1, %v10638_v34, 0 }
 0x75b   : > { %5680 = vmatpush.bf16.xpose.msra.mxu1 %v5650_v58 }
 0x75e   : > { %5081 = vmatpush.bf16.msra.mxu0 %v4963_v48 }
 0x75f   : > { %5547 = vrot.lane.b32.xlu1 %v8981_v28, %s8472_s25  ;;  %v3256_v7 = vpop.f32.mrf.mxu3  ;;  %v10749_v28 = vpop.permute.xlu2 %5539 }
 0x760   : > { %v10740_v29 = vadd.f32 %v3345_v30, %v3256_v7  ;;  %12852 = vst [vmem:[#allocation89_spill] sm:$0xff] %v10749_v28  ;;  %v4957_v30 = vpop.permute.xlu0 %4956 }
 0x761   : > { %v3603_v47 = vpop.f32.mrf.mxu2  ;;  %v5576_v3 = vpop.permute.xlu1 %5575 }
 0x762   : > { %12849 = vst [vmem:[#allocation86_spill] sm:$0xff] %v10740_v29  ;;  %v10742_v57 = vadd.f32 %v3603_v47, %v3514_v13  ;;  %5082 = vmatpush.bf16.msra.mxu0 %v4961_v26  ;;  %v5668_v24 = vsel %vm1034_vm1, %v5576_v3, 0  ;;  %v10747_v48 = vpop.f32.mrf.mxu0  ;;  %v10751_v58 = vpop.f32.mrf.mxu1 }
 0x763   : > { %5681 = vmatpush.bf16.xpose.msra.mxu1 %v5647_v54  ;;  %5771 = vmatpush.bf16.xpose.msrb.mxu2 %v5668_v24  ;;  %12851 = vst [vmem:[#allocation88_spill] sm:$0xff] %v10747_v48  ;;  %v2927_v24 = vsub.f32 %v10392_v17, %v2863_v52 }
 0x764   : > { %12850 = vst [vmem:[#allocation87_spill] sm:$0xff] %v10742_v57 }
 0x765   : > { %12853 = vst [vmem:[#allocation90_spill] sm:$0xff] %v10751_v58 }
 0x766   : > { %5083 = vmatpush.bf16.msra.mxu0 %v4959_v19  ;;  %v2928_v19 = vsub.f32 %v10398_v31, %v2863_v52 }
 0x767   : > { %v10753_v13 = vpop.f32.mrf.mxu3 }
 0x768   : > { %12854 = vst [vmem:[#allocation91_spill] sm:$0xff] %v10753_v13 }
 0x769   : > { %v5560_v7 = vpop.permute.xlu1 %5559  ;;  %v10756_v47 = vpop.f32.mrf.mxu2 }
 0x76a   : > { %5084 = vmatpush.bf16.msra.mxu0 %v4957_v30  ;;  %v5644_v26 = vsel %vm1034_vm1, %v5560_v7, 0  ;;  %12855 = vst [vmem:[#allocation92_spill] sm:$0xff] %v10756_v47 }
 0x76b   : > { %5682 = vmatpush.bf16.xpose.msra.mxu1 %v5644_v26 }
 0x76e   : > { %v3519_v3 = vpop.f32.mrf.mxu1 }
 0x76f   : > { %v3350_v34 = vpop.f32.mrf.mxu0 }
 0x771   : > { %v2866_v54 = vpop.xlane.xlu2 %2865  ;;  %v5574_v9 = vpop.permute.xlu1 %5573 }
 0x772   : > { %v2929_v57 = vsub.f32 %v10405_v53, %v2866_v54  ;;  %v2930_v58 = vsub.f32 %v10411_v2, %v2866_v54  ;;  %v5665_v7 = vsel %vm1034_vm1, %v5574_v9, 0 }
 0x773   : > { %5772 = vmatpush.bf16.xpose.msrb.mxu2 %v5665_v7 }
 0x774   : > { %v2961_v59 = vpack.c.bf16 %v2929_v57, %v2927_v24  ;;  %v2962_v29 = vpack.c.bf16 %v2930_v58, %v2928_v19  ;;  %v3261_v30 = vpop.f32.mrf.mxu3 }
 0x775   : > { %v10763_v27 = vadd.f32 %v3350_v34, %v3261_v30  ;;  %v3608_v26 = vpop.f32.mrf.mxu2 }
 0x776   : > { %v3023_v47 = vunpack.c.l.bf16 %v2961_v59  ;;  %v3024_v48 = vunpack.c.l.bf16 %v2962_v29  ;;  %v3025_v13 = vunpack.c.h.bf16 %v2961_v59  ;;  %v3026_v17 = vunpack.c.h.bf16 %v2962_v29  ;;  %v10769_v58 = vpop.f32.mrf.mxu1 }
 0x777   : > { %12856 = vst [vmem:[#allocation93_spill] sm:$0xff] %v10763_v27  ;;  %v10765_v51 = vadd.f32 %v3608_v26, %v3519_v3  ;;  %v10767_v57 = vpop.f32.mrf.mxu0 }
 0x778   : > { %v3147_v31 = vmul.f32 1.442695, %v3023_v47  ;;  %v3149_v53 = vmul.f32 1.442695, %v3024_v48  ;;  %v3151_v52 = vmul.f32 1.442695, %v3025_v13  ;;  %v5556_v13 = vpop.permute.xlu0 %5555 }
 0x779   : > { %12857 = vst [vmem:[#allocation94_spill] sm:$0xff] %v10765_v51  ;;  %v3153_v2 = vmul.f32 1.442695, %v3026_v17  ;;  %v5558_v9 = vpop.permute.xlu1 %5557  ;;  %v5638_v26 = vsel %vm1034_vm1, %v5556_v13, 0  ;;  %v10972_v0 = vpop.permute.xlu2 %5541 }
 0x77a   : > { %8010 = vpow2.f32 %v3147_v31  ;;  %12858 = vst [vmem:[#allocation95_spill] sm:$0xff] %v10767_v57  ;;  %v5641_v54 = vsel %vm1034_vm1, %v5558_v9, 0 }
 0x77b   : > { %8012 = vpow2.f32 %v3149_v53  ;;  %12859 = vst [vmem:[#allocation96_spill] sm:$0xff] %v10769_v58  ;;  %5683 = vmatpush.bf16.xpose.msra.mxu1 %v5641_v54 }
 0x77c   : > { %8014 = vpow2.f32 %v3151_v52  ;;  %v10771_v34 = vpop.f32.mrf.mxu3  ;;  %12890 = vst [vmem:[#allocation104_spill] sm:$0xff] %v10972_v0 }
 0x77d   : > { %12860 = vst [vmem:[#allocation97_spill] sm:$0xff] %v10771_v34  ;;  %8016 = vpow2.f32 %v3153_v2  ;;  %v10774_v59 = vpop.f32.mrf.mxu2 }
 0x77e   : > { %12861 = vst [vmem:[#allocation98_spill] sm:$0xff] %v10774_v59  ;;  %v3524_v53 = vpop.f32.mrf.mxu1 }
 0x77f   : > { %v3355_v30 = vpop.f32.mrf.mxu0 }
 0x780   : > { %v8011_v29 = vpop.eup %8010 }
 0x781   : > { %v8013_v48 = vpop.eup %8012  ;;  %v5572_v24 = vpop.permute.xlu1 %5571 }
 0x782   : > { %v8015_v47 = vpop.eup %8014  ;;  %v5662_v17 = vsel %vm1034_vm1, %v5572_v24, 0  ;;  %v12865_v24 = vmov 1065369472  }
 0x783   : > { %v8017_v3 = vpop.eup %8016  ;;  %v3185_v19 = vpack.c.bf16 %v8015_v47, %v8011_v29  ;;  %5684 = vmatpush.bf16.xpose.msra.mxu1 %v5638_v26  ;;  %5773 = vmatpush.bf16.xpose.msrb.mxu2 %v5662_v17  ;;  %v5635_v29 = vsel %vm1034_vm1, %v10654_v56, 0 }
 0x784   : > { %v3266_v7 = vpop.f32.mrf.mxu3  ;;  %v3186_v31 = vpack.c.bf16 %v8017_v3, %v8013_v48  ;;  %v12864_v3 = vld [vmem:[#allocation49_spill] sm:$0xff] }
 0x785   : > { %v10778_v52 = vadd.f32 %v3355_v30, %v3266_v7  ;;  %v3613_v2 = vpop.f32.mrf.mxu2  ;;  %3270 = vmatmul.bf16.gmra.mxu3 %v3185_v19  ;;  %3528 = vmatmul.bf16.gmra.mxu1 %v3185_v19  ;;  %v12867_v7 = vld [vmem:[#allocation53_spill] sm:$0xff] }
 0x786   : > { %v10780_v9 = vadd.f32 %v3613_v2, %v3524_v53  ;;  %3359 = vmatmul.bf16.gmra.mxu0 %v3186_v31  ;;  %3617 = vmatmul.bf16.gmra.mxu2 %v3186_v31  ;;  %v12870_v31 = vld [vmem:[#allocation50_spill] sm:$0xff]  ;;  %v2207_v53 = vadd.f32 %v10407_v15, %v10409_v49 }
 0x787   : > { %12862 = vst [vmem:[#allocation99_spill] sm:$0xff] %v10778_v52  ;;  %v12874_v15 = vld [vmem:[#allocation54_spill] sm:$0xff]  ;;  %v10840_v49 = vpop.f32.mrf.mxu0 }
 0x788   : > { %12863 = vst [vmem:[#allocation100_spill] sm:$0xff] %v10780_v9 }
 0x789   : > { %v5570_v54 = vpop.permute.xlu1 %5569  ;;  %12875 = vst [vmem:[#allocation50_spill] sm:$0xff] %v10840_v49 }
 0x78a   : > { %v5659_v13 = vsel %vm1034_vm1, %v5570_v54, 0 }
 0x78b   : > { %5685 = vmatpush.bf16.xpose.msra.mxu1 %v5635_v29  ;;  %5774 = vmatpush.bf16.xpose.msrb.mxu2 %v5659_v13  ;;  %v12871_v29 = vld [vmem:[#allocation52_spill] sm:$0xff]  ;;  %v12872_v13 = vld [vmem:[#allocation59_spill] sm:$0xff] }
 0x791   : > { %v5568_v48 = vpop.permute.xlu1 %5567 }
 0x792   : > { %v5656_v47 = vsel %vm1034_vm1, %v5568_v48, 0  ;;  %v12873_v48 = vld [vmem:[#allocation51_spill] sm:$0xff] }
 0x793   : > { %5775 = vmatpush.bf16.xpose.msrb.mxu2 %v5656_v47  ;;  %v10842_v47 = vpop.f32.mrf.mxu3 }
 0x794   : > { %12876 = vst [vmem:[#allocation52_spill] sm:$0xff] %v10842_v47  ;;  %v10920_v47 = vpop.permute.xlu0 %5519 }
 0x795   : > { %7539 = vmatmul.msk.bf16.vlgmr.msrb.gmra.mxu3 %vm1034_vm1, %v12864_v3 }
 0x796   : > { %7555 = vmatmul.msk.bf16.vlgmr.msrb.gmra.mxu0 %vm1034_vm1, %v12864_v3  ;;  %6273 = vmatpush.bf16.msrb.mxu3 %v12865_v24  ;;  %v10844_v3 = vpop.f32.mrf.mxu1 }
 0x797   : > { %6362 = vmatpush.bf16.msrb.mxu0 %v12865_v24  ;;  %12877 = vst [vmem:[#allocation59_spill] sm:$0xff] %v10844_v3 }
 0x799   : > { %v5552_v19 = vpop.permute.xlu1 %5551 }
 0x79a   : > { %6274 = vmatpush.bf16.msrb.mxu3 %v12865_v24  ;;  %v5632_v56 = vsel %vm1034_vm1, %v5552_v19, 0 }
 0x79b   : > { %6363 = vmatpush.bf16.msrb.mxu0 %v12865_v24  ;;  %5686 = vmatpush.bf16.xpose.msra.mxu1 %v5632_v56  ;;  %v12879_v56 = vld [vmem:[#allocation58_spill] sm:$0xff] }
 0x79e   : > { %6275 = vmatpush.bf16.msrb.mxu3 %v12865_v24 }
 0x79f   : > { %6364 = vmatpush.bf16.msrb.mxu0 %v12865_v24 }
 0x7a1   : > { %v10797_v30 = vpop.permute.xlu1 %5521 }
 0x7a2   : > { %12866 = vst [vmem:[#allocation49_spill] sm:$0xff] %v10797_v30  ;;  %6276 = vmatpush.bf16.msrb.mxu3 %v12865_v24 }
 0x7a3   : > { %6365 = vmatpush.bf16.msrb.mxu0 %v12865_v24 }
 0x7a5   : > { %7540 = vmatmul.msk.bf16.gmra.mxu3 %vm1034_vm1, %v12867_v7 }
 0x7a6   : > { %7556 = vmatmul.msk.bf16.gmra.mxu0 %vm1034_vm1, %v12867_v7  ;;  %6277 = vmatpush.bf16.msrb.mxu3 %v12865_v24 }
 0x7a7   : > { %6366 = vmatpush.bf16.msrb.mxu0 %v12865_v24 }
 0x7a9   : > { %v10807_v26 = vpop.permute.xlu1 %5527 }
 0x7aa   : > { %12868 = vst [vmem:[#allocation53_spill] sm:$0xff] %v10807_v26  ;;  %6278 = vmatpush.bf16.msrb.mxu3 %v12865_v24 }
 0x7ab   : > { %6367 = vmatpush.bf16.msrb.mxu0 %v12865_v24 }
 0x7ae   : > { %6279 = vmatpush.bf16.msrb.mxu3 %v12865_v24 }
 0x7af   : > { %6368 = vmatpush.bf16.msrb.mxu0 %v12865_v24 }
 0x7b1   : > { %v10813_v17 = vpop.permute.xlu1 %5533 }
 0x7b2   : > { %12869 = vst [vmem:[#allocation101_spill] sm:$0xff] %v10813_v17  ;;  %6280 = vmatpush.bf16.msrb.mxu3 %v12865_v24 }
 0x7b3   : > { %6369 = vmatpush.bf16.msrb.mxu0 %v12865_v24  ;;  %v10846_v24 = vpop.f32.mrf.mxu2 }
 0x7b4   : > { %12878 = vst [vmem:[#allocation51_spill] sm:$0xff] %v10846_v24  ;;  %v12883_v24 = vld [vmem:[#allocation57_spill] sm:$0xff] }
 0x7b5   : > { %7541 = vmatmul.msk.bf16.gmra.mxu3 %vm1034_vm1, %v12870_v31  ;;  %12886 = vst [vmem:[#allocation57_spill] sm:$0xff] %v10920_v47 }
 0x7b6   : > { %7557 = vmatmul.msk.bf16.gmra.mxu0 %vm1034_vm1, %v12870_v31 }
 0x7b9   : > { %v2367_v2 = vpop.permute.xlu1 %2366 }
 0x7ba   : > { %v2400_v54 = vmul.f32 %v2367_v2, %v2207_v53 }
 0x7bc   : > { %2432 = vst.msk [vmem:[#allocation2 + $0xf8] sm:$0xff] %vm1034_vm1, %v2400_v54 }
 0x7c5   : > { %7542 = vmatmul.msk.bf16.gmra.mxu3 %vm1034_vm1, %v12871_v29 }
 0x7c6   : > { %7558 = vmatmul.msk.bf16.gmra.mxu0 %vm1034_vm1, %v12871_v29 }
 0x7d5   : > { %7543 = vmatmul.msk.bf16.gmra.mxu3 %vm1034_vm1, %v12872_v13 }
 0x7d6   : > { %7559 = vmatmul.msk.bf16.gmra.mxu0 %vm1034_vm1, %v12872_v13 }
 0x7e5   : > { %7544 = vmatmul.msk.bf16.gmra.mxu3 %vm1034_vm1, %v12873_v48 }
 0x7e6   : > { %7560 = vmatmul.msk.bf16.gmra.mxu0 %vm1034_vm1, %v12873_v48 }
 0x7f5   : > { %7545 = vmatmul.msk.bf16.gmra.mxu3 %vm1034_vm1, %v12874_v15 }
 0x7f6   : > { %7561 = vmatmul.msk.bf16.gmra.mxu0 %vm1034_vm1, %v12874_v15 }
 0x802   : > { %v3529_v31 = vpop.f32.mrf.mxu1 }
 0x803   : > { %v3360_v19 = vpop.f32.mrf.mxu0 }
 0x805   : > { %7546 = vmatmul.msk.bf16.gmra.mxu3 %vm1034_vm1, %v12879_v56 }
 0x806   : > { %7562 = vmatmul.msk.bf16.gmra.mxu0 %vm1034_vm1, %v12879_v56 }
 0x808   : > { %v3271_v7 = vpop.f32.mrf.mxu3 }
 0x809   : > { %v10852_v53 = vadd.f32 %v3360_v19, %v3271_v7  ;;  %v3618_v2 = vpop.f32.mrf.mxu2 }
 0x80a   : > { %v10854_v54 = vadd.f32 %v3618_v2, %v3529_v31 }
 0x80b   : > { %12880 = vst [vmem:[#allocation54_spill] sm:$0xff] %v10852_v53  ;;  %v3362_v29 = vpop.f32.mrf.mxu0 }
 0x80c   : > { %12881 = vst [vmem:[#allocation58_spill] sm:$0xff] %v10854_v54 }
 0x810   : > { %v3273_v13 = vpop.f32.mrf.mxu3 }
 0x811   : > { %v10856_v48 = vadd.f32 %v3362_v29, %v3273_v13  ;;  %v12884_v13 = vld [vmem:[#allocation56_spill] sm:$0xff] }
 0x813   : > { %12882 = vst [vmem:[#allocation102_spill] sm:$0xff] %v10856_v48  ;;  %v10858_v15 = vpop.f32.mrf.mxu0 }
 0x815   : > { %7547 = vmatmul.msk.bf16.gmra.mxu3 %vm1034_vm1, %v12883_v24 }
 0x816   : > { %7563 = vmatmul.msk.bf16.gmra.mxu0 %vm1034_vm1, %v12883_v24 }
 0x818   : > { %v10864_v56 = vpop.f32.mrf.mxu3 }
 0x819   : > { %v4314_v19 = vmax.f32 %v10864_v56, %v10858_v15 }
 0x81b   : > { %v10868_v7 = vpop.f32.mrf.mxu0  ;;  %4315 = vmax.xlane.f32.xlu2 %v4314_v19 }
 0x820   : > { %v10870_v31 = vpop.f32.mrf.mxu3 }
 0x821   : > { %v4317_v2 = vmax.f32 %v10870_v31, %v10868_v7 }
 0x823   : > { %v10874_v29 = vpop.f32.mrf.mxu0  ;;  %4318 = vmax.xlane.f32.xlu0 %v4317_v2  ;;  %v12885_v2 = vld [vmem:[#allocation41_spill] sm:$0xff] }
 0x825   : > { %7548 = vmatmul.msk.bf16.gmra.mxu3 %vm1034_vm1, %v12884_v13 }
 0x826   : > { %7564 = vmatmul.msk.bf16.gmra.mxu0 %vm1034_vm1, %v12884_v13 }
 0x828   : > { %v10880_v24 = vpop.f32.mrf.mxu3 }
 0x829   : > { %v4320_v3 = vmax.f32 %v10880_v24, %v10874_v29 }
 0x82b   : > { %v10884_v19 = vpop.f32.mrf.mxu0  ;;  %4321 = vmax.xlane.f32.xlu1 %v4320_v3 }
 0x830   : > { %v10886_v59 = vpop.f32.mrf.mxu3 }
 0x833   : > { %v10888_v58 = vpop.f32.mrf.mxu0  ;;  %6513 = vrot.lane.b32.xlu2 %v12755_v21, %s8472_s25 }
 0x835   : > { %7549 = vmatmul.msk.bf16.gmra.mxu3 %vm1034_vm1, %v12885_v2 }
 0x836   : > { %7565 = vmatmul.msk.bf16.gmra.mxu0 %vm1034_vm1, %v12885_v2 }
 0x837   : > { %5545 = vrot.lane.b32.xlu0 %v12746_v37, %s8472_s25 }
 0x838   : > { %v10898_v13 = vpop.f32.mrf.mxu3 }
 0x839   : > { %v4326_v57 = vmax.f32 %v10898_v13, %v10888_v58 }
 0x83b   : > { %v10900_v48 = vpop.f32.mrf.mxu0 }
 0x840   : > { %v10902_v3 = vpop.f32.mrf.mxu3 }
 0x841   : > { %v4329_v54 = vmax.f32 %v10902_v3, %v10900_v48 }
 0x843   : > { %v10906_v9 = vpop.f32.mrf.mxu0  ;;  %4330 = vmax.xlane.f32.xlu1 %v4329_v54  ;;  %v4323_v54 = vmax.f32 %v10886_v59, %v10884_v19 }
 0x845   : > { %7550 = vmatmul.msk.bf16.gmra.mxu3 %vm1034_vm1, %v10442_v16 }
 0x846   : > { %7566 = vmatmul.msk.bf16.gmra.mxu0 %vm1034_vm1, %v10442_v16 }
 0x848   : > { %v10912_v21 = vpop.f32.mrf.mxu3 }
 0x849   : > { %v4332_v37 = vmax.f32 %v10912_v21, %v10906_v9 }
 0x84b   : > { %v10916_v2 = vpop.f32.mrf.mxu0  ;;  %4333 = vmax.xlane.f32.xlu1 %v4332_v37  ;;  %v10934_v37 = vpop.permute.xlu0 %5523 }
 0x84c   : > { %12887 = vst [vmem:[#allocation56_spill] sm:$0xff] %v10934_v37 }
 0x850   : > { %v10918_v49 = vpop.f32.mrf.mxu3 }
 0x851   : > { %v4335_v52 = vmax.f32 %v10918_v49, %v10916_v2 }
 0x853   : > { %v10922_v51 = vpop.f32.mrf.mxu0 }
 0x855   : > { %7551 = vmatmul.msk.bf16.gmra.mxu3 %vm1034_vm1, %v10492_v11 }
 0x856   : > { %7567 = vmatmul.msk.bf16.gmra.mxu0 %vm1034_vm1, %v10492_v11 }
 0x858   : > { %v10928_v16 = vpop.f32.mrf.mxu3 }
 0x859   : > { %v4338_v61 = vmax.f32 %v10928_v16, %v10922_v51 }
 0x85b   : > { %v10932_v53 = vpop.f32.mrf.mxu0 }
 0x85c   : > { %4324 = vmax.xlane.f32.xlu2 %v4323_v54  ;;  %v10950_v54 = vpop.permute.xlu0 %5529 }
 0x85d   : > { %12888 = vst [vmem:[#allocation41_spill] sm:$0xff] %v10950_v54 }
 0x860   : > { %v10938_v27 = vpop.f32.mrf.mxu3 }
 0x861   : > { %4336 = vmax.xlane.f32.xlu0 %v4335_v52 }
 0x863   : > { %v10942_v11 = vpop.f32.mrf.mxu0 }
 0x864   : > { %4327 = vmax.xlane.f32.xlu2 %v4326_v57  ;;  %6511 = vrot.lane.b32.xlu1 %v12757_v38, %s8472_s25  ;;  %v10960_v38 = vpop.permute.xlu0 %5535 }
 0x865   : > { %7552 = vmatmul.msk.bf16.gmra.mxu3 %vm1034_vm1, %v10563_v39  ;;  %12889 = vst [vmem:[#allocation103_spill] sm:$0xff] %v10960_v38 }
 0x866   : > { %7568 = vmatmul.msk.bf16.gmra.mxu0 %vm1034_vm1, %v10563_v39 }
 0x868   : > { %v10952_v34 = vpop.f32.mrf.mxu3 }
 0x869   : > { %v4344_v52 = vmax.f32 %v10952_v34, %v10942_v11 }
 0x86b   : > { %v10958_v57 = vpop.f32.mrf.mxu0  ;;  %4345 = vmax.xlane.f32.xlu0 %v4344_v52 }
 0x86c   : > { %4339 = vmax.xlane.f32.xlu2 %v4338_v61  ;;  %v10976_v61 = vpop.permute.xlu0 %5537 }
 0x86d   : > { %12891 = vst [vmem:[#allocation105_spill] sm:$0xff] %v10976_v61 }
 0x870   : > { %v10962_v23 = vpop.f32.mrf.mxu3 }
 0x871   : > { %v4347_v39 = vmax.f32 %v10962_v23, %v10958_v57 }
 0x873   : > { %v10966_v18 = vpop.f32.mrf.mxu0  ;;  %4348 = vmax.xlane.f32.xlu0 %v4347_v39  ;;  %v10984_v39 = vpop.permute.xlu2 %5543 }
 0x874   : > { %12892 = vst [vmem:[#allocation106_spill] sm:$0xff] %v10984_v39  ;;  %v10988_v54 = vpop.permute.xlu0 %3635 }
 0x875   : > { %7553 = vmatmul.msk.bf16.gmra.mxu3 %vm1034_vm1, %v10519_v14 }
 0x876   : > { %7569 = vmatmul.msk.bf16.gmra.mxu0 %vm1034_vm1, %v10519_v14 }
 0x878   : > { %v10974_v52 = vpop.f32.mrf.mxu3 }
 0x87b   : > { %v10978_v28 = vpop.f32.mrf.mxu0  ;;  %v11000_v61 = vpop.permute.xlu2 %3625 }
 0x87c   : > { %12893 = vst [vmem:[#allocation107_spill] sm:$0xff] %v11000_v61  ;;  %v11004_v39 = vpop.permute.xlu0 %3645 }
 0x87d   : > { %12894 = vst [vmem:[#allocation108_spill] sm:$0xff] %v11004_v39 }
 0x880   : > { %v10980_v38 = vpop.f32.mrf.mxu3 }
 0x881   : > { %v4353_v17 = vmax.f32 %v10980_v38, %v10978_v28 }
 0x883   : > { %v10986_v36 = vpop.f32.mrf.mxu0  ;;  %4354 = vmax.xlane.f32.xlu0 %v4353_v17  ;;  %v4341_v17 = vmax.f32 %v10938_v27, %v10932_v53 }
 0x884   : > { %6509 = vrot.lane.b32.xlu2 %v12762_v6, %s8472_s25 }
 0x885   : > { %7554 = vmatmul.msk.bf16.gmra.mxu3 %vm1034_vm1, %v10537_v45 }
 0x886   : > { %7570 = vmatmul.msk.bf16.gmra.mxu0 %vm1034_vm1, %v10537_v45 }
 0x888   : > { %v10996_v14 = vpop.f32.mrf.mxu3 }
 0x88b   : > { %v10998_v0 = vpop.f32.mrf.mxu0 }
 0x88e   : > { %4342 = vmax.xlane.f32.xlu1 %v4341_v17  ;;  %v4316_v45 = vpop.xlane.xlu2 %4315 }
 0x88f   : > { %v4410_v30 = vsub.f32 %v10864_v56, %v4316_v45  ;;  %v4411_v47 = vsub.f32 %v10858_v15, %v4316_v45  ;;  %v11020_v15 = vpop.permute.xlu1 %3630  ;;  %v4356_v45 = vmax.f32 %v10996_v14, %v10986_v36 }
 0x890   : > { %v11006_v26 = vpop.f32.mrf.mxu3  ;;  %12895 = vst [vmem:[#allocation109_spill] sm:$0xff] %v11020_v15 }
 0x891   : > { %v4359_v6 = vmax.f32 %v11006_v26, %v10998_v0 }
 0x893   : > { %v11010_v62 = vpop.f32.mrf.mxu0  ;;  %4360 = vmax.xlane.f32.xlu0 %v4359_v6 }
 0x896   : > { %v4319_v37 = vpop.xlane.xlu0 %4318 }
 0x897   : > { %v4412_v5 = vsub.f32 %v10870_v31, %v4319_v37  ;;  %v4413_v32 = vsub.f32 %v10868_v7, %v4319_v37  ;;  %v6514_v7 = vpop.permute.xlu2 %6513 }
 0x898   : > { %v11016_v41 = vpop.f32.mrf.mxu3 }
 0x899   : > { %v4474_v17 = vpack.c.bf16 %v4412_v5, %v4410_v30  ;;  %v4475_v40 = vpack.c.bf16 %v4413_v32, %v4411_v47 }
 0x89b   : > { %v11018_v43 = vpop.f32.mrf.mxu0  ;;  %v4506_v1 = vunpack.c.l.bf16 %v4474_v17  ;;  %v4507_v20 = vunpack.c.l.bf16 %v4475_v40  ;;  %v4508_v8 = vunpack.c.h.bf16 %v4474_v17  ;;  %v4509_v6 = vunpack.c.h.bf16 %v4475_v40 }
 0x89d   : > { %v4570_v25 = vmul.f32 1.442695, %v4506_v1  ;;  %v4572_v33 = vmul.f32 1.442695, %v4507_v20  ;;  %v4574_v50 = vmul.f32 1.442695, %v4508_v8 }
 0x89e   : > { %v4576_v56 = vmul.f32 1.442695, %v4509_v6 }
 0x89f   : > { %8018 = vpow2.f32 %v4570_v25  ;;  %v11030_v25 = vpop.permute.xlu1 %3640 }
 0x8a0   : > { %8020 = vpow2.f32 %v4572_v33  ;;  %v11022_v31 = vpop.f32.mrf.mxu3  ;;  %12896 = vst [vmem:[#allocation110_spill] sm:$0xff] %v11030_v25 }
 0x8a1   : > { %8022 = vpow2.f32 %v4574_v50  ;;  %v4350_v50 = vmax.f32 %v10974_v52, %v10966_v18 }
 0x8a2   : > { %8024 = vpow2.f32 %v4576_v56  ;;  %v4362_v56 = vmax.f32 %v11016_v41, %v11010_v62 }
 0x8a3   : > { %v11024_v5 = vpop.f32.mrf.mxu0 }
 0x8a5   : > { %v8019_v32 = vpop.eup %8018 }
 0x8a6   : > { %v8021_v30 = vpop.eup %8020 }
 0x8a7   : > { %v8023_v47 = vpop.eup %8022  ;;  %6497 = vrot.lane.b32.xlu1 %v12749_v42, %s8472_s25  ;;  %v11042_v17 = vpop.permute.xlu1 %5547 }
 0x8a8   : > { %v8025_v40 = vpop.eup %8024  ;;  %v11028_v20 = vpop.f32.mrf.mxu3  ;;  %v4698_v8 = vpack.c.bf16 %v8023_v47, %v8019_v32  ;;  %12898 = vst [vmem:[#allocation112_spill] sm:$0xff] %v11042_v17  ;;  %v4365_v17 = vmax.f32 %v11022_v31, %v11018_v43 }
 0x8a9   : > { %v4699_v1 = vpack.c.bf16 %v8025_v40, %v8021_v30  ;;  %v4368_v40 = vmax.f32 %v11028_v20, %v11024_v5 }
 0x8aa   : > { %4738 = vmatmul.bf16.vlgmr.msrb.gmra.mxu1 %v4698_v8  ;;  %4996 = vmatmul.bf16.vlgmr.msra.gmra.mxu3 %v4698_v8 }
 0x8ab   : > { %v11032_v33 = vpop.f32.mrf.mxu0  ;;  %4827 = vmatmul.bf16.vlgmr.msra.gmra.mxu2 %v4699_v1  ;;  %5085 = vmatmul.bf16.vlgmr.msra.gmra.mxu0 %v4699_v1 }
 0x8ac   : > { %6620 = vmatpush.bf16.msra.mxu2 %v6514_v7 }
 0x8ad   : > { %4351 = vmax.xlane.f32.xlu2 %v4350_v50 }
 0x8af   : > { %v4322_v32 = vpop.xlane.xlu1 %4321 }
 0x8b0   : > { %v11036_v42 = vpop.f32.mrf.mxu3  ;;  %v4415_v12 = vsub.f32 %v10874_v29, %v4322_v32 }
 0x8b3   : > { %v11038_v37 = vpop.f32.mrf.mxu0 }
 0x8b4   : > { %12897 = vst [vmem:[#allocation111_spill] sm:$0xff] %v11038_v37 }
 0x8b5   : > { %4357 = vmax.xlane.f32.xlu2 %v4356_v45 }
 0x8b7   : > { %v4331_v8 = vpop.xlane.xlu1 %4330 }
 0x8b8   : > { %v11044_v6 = vpop.f32.mrf.mxu3 }
 0x8b9   : > { %12899 = vst [vmem:[#allocation113_spill] sm:$0xff] %v11044_v6  ;;  %v4374_v45 = vmax.f32 %v11044_v6, %v11038_v37 }
 0x8bb   : > { %v11048_v30 = vpop.f32.mrf.mxu0 }
 0x8bd   : > { %4363 = vmax.xlane.f32.xlu2 %v4362_v56 }
 0x8bf   : > { %v11062_v56 = vpop.xlane.xlu1 %4333 }
 0x8c0   : > { %v11050_v47 = vpop.f32.mrf.mxu3 }
 0x8c3   : > { %v11054_v1 = vpop.f32.mrf.mxu0 }
 0x8c4   : > { %12900 = vst [vmem:[#allocation114_spill] sm:$0xff] %v11054_v1 }
 0x8c5   : > { %4369 = vmax.xlane.f32.xlu2 %v4368_v40  ;;  %v4414_v40 = vsub.f32 %v10880_v24, %v4322_v32 }
 0x8c8   : > { %v11056_v50 = vpop.f32.mrf.mxu3 }
 0x8c9   : > { %12901 = vst [vmem:[#allocation115_spill] sm:$0xff] %v11056_v50  ;;  %v4380_v7 = vmax.f32 %v11056_v50, %v11054_v1 }
 0x8cb   : > { %4381 = vmax.xlane.f32.xlu0 %v4380_v7  ;;  %v11068_v55 = vpop.f32.mrf.mxu0 }
 0x8cd   : > { %4375 = vmax.xlane.f32.xlu2 %v4374_v45 }
 0x8cf   : > { %v4325_v44 = vpop.xlane.xlu2 %4324 }
 0x8d0   : > { %v4416_v25 = vsub.f32 %v10886_v59, %v4325_v44  ;;  %v4417_v61 = vsub.f32 %v10884_v19, %v4325_v44  ;;  %v11072_v1 = vpop.f32.mrf.mxu3  ;;  %v4371_v44 = vmax.f32 %v11036_v42, %v11032_v33 }
 0x8d1   : > { %4366 = vmax.xlane.f32.xlu1 %v4365_v17  ;;  %v4383_v50 = vmax.f32 %v11072_v1, %v11068_v55 }
 0x8d2   : > { %v4476_v7 = vpack.c.bf16 %v4416_v25, %v4414_v40  ;;  %v4477_v45 = vpack.c.bf16 %v4417_v61, %v4415_v12  ;;  %v4420_v12 = vsub.f32 %v10902_v3, %v4331_v8 }
 0x8d4   : > { %v4510_v15 = vunpack.c.l.bf16 %v4476_v7  ;;  %v4511_v4 = vunpack.c.l.bf16 %v4477_v45  ;;  %v4512_v39 = vunpack.c.h.bf16 %v4476_v7  ;;  %v4513_v24 = vunpack.c.h.bf16 %v4477_v45 }
 0x8d5   : > { %4384 = vmax.xlane.f32.xlu2 %v4383_v50  ;;  %v11086_v50 = vpop.permute.xlu0 %5545  ;;  %v4377_v7 = vmax.f32 %v11050_v47, %v11048_v30 }
 0x8d6   : > { %v4578_v29 = vmul.f32 1.442695, %v4510_v15  ;;  %v4580_v32 = vmul.f32 1.442695, %v4511_v4  ;;  %v4582_v37 = vmul.f32 1.442695, %v4512_v39  ;;  %v6512_v6 = vpop.permute.xlu1 %6511  ;;  %v4421_v15 = vsub.f32 %v10900_v48, %v4331_v8  ;;  %v11084_v4 = vpop.f32.mrf.mxu0 }
 0x8d7   : > { %v4584_v59 = vmul.f32 1.442695, %v4513_v24  ;;  %v4328_v19 = vpop.xlane.xlu2 %4327  ;;  %6621 = vmatpush.bf16.msra.mxu2 %v6512_v6 }
 0x8d8   : > { %8026 = vpow2.f32 %v4578_v29  ;;  %v4418_v61 = vsub.f32 %v10898_v13, %v4328_v19  ;;  %v4419_v25 = vsub.f32 %v10888_v58, %v4328_v19  ;;  %v11081_v17 = vpop.f32.mrf.mxu3 }
 0x8d9   : > { %8028 = vpow2.f32 %v4580_v32  ;;  %4372 = vmax.xlane.f32.xlu1 %v4371_v44  ;;  %v4386_v3 = vmax.f32 %v11081_v17, %v11084_v4 }
 0x8da   : > { %8030 = vpow2.f32 %v4582_v37  ;;  %v4478_v39 = vpack.c.bf16 %v4420_v12, %v4418_v61  ;;  %v4479_v6 = vpack.c.bf16 %v4421_v15, %v4419_v25 }
 0x8db   : > { %8032 = vpow2.f32 %v4584_v59 }
 0x8dc   : > { %v4514_v40 = vunpack.c.l.bf16 %v4478_v39  ;;  %v4515_v48 = vunpack.c.l.bf16 %v4479_v6  ;;  %v4516_v45 = vunpack.c.h.bf16 %v4478_v39  ;;  %v4517_v29 = vunpack.c.h.bf16 %v4479_v6 }
 0x8dd   : > { %4387 = vmax.xlane.f32.xlu2 %v4386_v3  ;;  %v4337_v12 = vpop.xlane.xlu0 %4336 }
 0x8de   : > { %v8027_v13 = vpop.eup %8026  ;;  %v4586_v44 = vmul.f32 1.442695, %v4514_v40  ;;  %v4588_v61 = vmul.f32 1.442695, %v4515_v48  ;;  %v4590_v25 = vmul.f32 1.442695, %v4516_v45  ;;  %v11098_v15 = vpop.f32.mrf.mxu0  ;;  %v4424_v39 = vsub.f32 %v10918_v49, %v4337_v12 }
 0x8df   : > { %v8029_v58 = vpop.eup %8028  ;;  %v11092_v8 = vpop.xlane.xlu2 %4339  ;;  %6507 = vrot.lane.b32.xlu0 %v12791_v60, %s8472_s25  ;;  %v4592_v60 = vmul.f32 1.442695, %v4517_v29  ;;  %v4425_v6 = vsub.f32 %v10916_v2, %v4337_v12  ;;  %v4422_v40 = vsub.f32 %v10912_v21, %v11062_v56 }
 0x8e0   : > { %v8031_v37 = vpop.eup %8030  ;;  %v11096_v59 = vpop.f32.mrf.mxu3  ;;  %8034 = vpow2.f32 %v4586_v44 }
 0x8e1   : > { %v8033_v24 = vpop.eup %8032  ;;  %4378 = vmax.xlane.f32.xlu1 %v4377_v7  ;;  %v4700_v32 = vpack.c.bf16 %v8031_v37, %v8027_v13  ;;  %8036 = vpow2.f32 %v4588_v61  ;;  %v4389_v3 = vmax.f32 %v11096_v59, %v11098_v15  ;;  %v4480_v49 = vpack.c.bf16 %v4424_v39, %v4422_v40 }
 0x8e2   : > { %v4701_v19 = vpack.c.bf16 %v8033_v24, %v8029_v58  ;;  %8038 = vpow2.f32 %v4590_v25  ;;  %v4423_v58 = vsub.f32 %v10906_v9, %v11062_v56 }
 0x8e3   : > { %4743 = vmatmul.bf16.gmra.mxu1 %v4700_v32  ;;  %5001 = vmatmul.bf16.gmra.mxu3 %v4700_v32  ;;  %8040 = vpow2.f32 %v4592_v60  ;;  %v4518_v24 = vunpack.c.l.bf16 %v4480_v49  ;;  %v4520_v9 = vunpack.c.h.bf16 %v4480_v49  ;;  %v12902_v49 = vld [vmem:[#allocation13_spill] sm:$0xff] }
 0x8e4   : > { %4832 = vmatmul.bf16.gmra.mxu2 %v4701_v19  ;;  %5090 = vmatmul.bf16.gmra.mxu0 %v4701_v19  ;;  %v4481_v2 = vpack.c.bf16 %v4425_v6, %v4423_v58 }
 0x8e5   : > { %v4594_v19 = vmul.f32 1.442695, %v4518_v24  ;;  %v4598_v25 = vmul.f32 1.442695, %v4520_v9 }
 0x8e6   : > { %v8035_v7 = vpop.eup %8034  ;;  %v11112_v29 = vpop.f32.mrf.mxu0  ;;  %v4519_v32 = vunpack.c.l.bf16 %v4481_v2  ;;  %v4521_v56 = vunpack.c.h.bf16 %v4481_v2 }
 0x8e7   : > { %v6510_v13 = vpop.permute.xlu2 %6509  ;;  %6493 = vrot.lane.b32.xlu0 %v12756_v10, %s8472_s25  ;;  %v8037_v37 = vpop.eup %8036  ;;  %8042 = vpow2.f32 %v4594_v19 }
 0x8e8   : > { %6622 = vmatpush.bf16.msra.mxu2 %v6510_v13  ;;  %v11110_v48 = vpop.f32.mrf.mxu3  ;;  %v8039_v45 = vpop.eup %8038  ;;  %v4596_v61 = vmul.f32 1.442695, %v4519_v32  ;;  %v4600_v60 = vmul.f32 1.442695, %v4521_v56 }
 0x8e9   : > { %4390 = vmax.xlane.f32.xlu1 %v4389_v3  ;;  %v8041_v10 = vpop.eup %8040  ;;  %v4392_v21 = vmax.f32 %v11110_v48, %v11112_v29  ;;  %v4702_v44 = vpack.c.bf16 %v8039_v45, %v8035_v7  ;;  %v4427_v7 = vsub.f32 %v10922_v51, %v11092_v8 }
 0x8ea   : > { %v4703_v12 = vpack.c.bf16 %v8041_v10, %v8037_v37  ;;  %8044 = vpow2.f32 %v4596_v61 }
 0x8eb   : > { %8046 = vpow2.f32 %v4598_v25 }
 0x8ec   : > { %8048 = vpow2.f32 %v4600_v60  ;;  %v12903_v60 = vld [vmem:[#allocation19_spill] sm:$0xff] }
 0x8ed   : > { %v8043_v39 = vpop.eup %8042 }
 0x8ee   : > { %v11122_v3 = vpop.f32.mrf.mxu0 }
 0x8ef   : > { %6505 = vrot.lane.b32.xlu0 %v12768_v22, %s8472_s25  ;;  %v4346_v22 = vpop.xlane.xlu0 %4345 }
 0x8f0   : > { %v8045_v6 = vpop.eup %8044  ;;  %v11124_v13 = vpop.f32.mrf.mxu3  ;;  %v4430_v25 = vsub.f32 %v10952_v34, %v4346_v22 }
 0x8f1   : > { %4393 = vmax.xlane.f32.xlu1 %v4392_v21  ;;  %v8047_v40 = vpop.eup %8046 }
 0x8f2   : > { %v8049_v58 = vpop.eup %8048 }
 0x8f3   : > { %4748 = vmatmul.bf16.gmra.mxu1 %v4702_v44  ;;  %5006 = vmatmul.bf16.gmra.mxu3 %v4702_v44  ;;  %v4705_v37 = vpack.c.bf16 %v8049_v58, %v8045_v6 }
 0x8f4   : > { %4837 = vmatmul.bf16.gmra.mxu2 %v4703_v12  ;;  %5095 = vmatmul.bf16.gmra.mxu0 %v4703_v12 }
 0x8f5   : > { %6495 = vrot.lane.b32.xlu2 %v12753_v35, %s8472_s25  ;;  %v4426_v35 = vsub.f32 %v10928_v16, %v11092_v8 }
 0x8f6   : > { %v11136_v44 = vpop.f32.mrf.mxu0 }
 0x8f7   : > { %6491 = vrot.lane.b32.xlu0 %v12759_v63, %s8472_s25  ;;  %v4704_v63 = vpack.c.bf16 %v8047_v40, %v8043_v39  ;;  %v4349_v32 = vpop.xlane.xlu0 %4348  ;;  %v4431_v39 = vsub.f32 %v10942_v11, %v4346_v22 }
 0x8f8   : > { %v11138_v19 = vpop.f32.mrf.mxu3  ;;  %v4432_v51 = vsub.f32 %v10962_v23, %v4349_v32  ;;  %v4433_v12 = vsub.f32 %v10958_v57, %v4349_v32 }
 0x8fa   : > { %v4484_v6 = vpack.c.bf16 %v4432_v51, %v4430_v25  ;;  %v4485_v40 = vpack.c.bf16 %v4433_v12, %v4431_v39 }
 0x8fc   : > { %v4526_v58 = vunpack.c.l.bf16 %v4484_v6 }
 0x8fd   : > { %6503 = vrot.lane.b32.xlu2 %v12775_v46, %s8472_s25 }
 0x8ff   : > { %6489 = vrot.lane.b32.xlu0 %v12902_v49, %s8472_s25 }
 0x900   : > { %v11148_v57 = vpop.f32.mrf.mxu3 }
 0x901   : > { %v4343_v2 = vpop.xlane.xlu1 %4342 }
 0x902   : > { %v4428_v45 = vsub.f32 %v10938_v27, %v4343_v2  ;;  %v4429_v24 = vsub.f32 %v10932_v53, %v4343_v2  ;;  %v4528_v2 = vunpack.c.h.bf16 %v4484_v6 }
 0x903   : > { %4753 = vmatmul.bf16.gmra.mxu1 %v4704_v63  ;;  %5011 = vmatmul.bf16.gmra.mxu3 %v4704_v63  ;;  %v11146_v63 = vpop.f32.mrf.mxu0 }
 0x904   : > { %4842 = vmatmul.bf16.gmra.mxu2 %v4705_v37  ;;  %5100 = vmatmul.bf16.gmra.mxu0 %v4705_v37  ;;  %v4482_v46 = vpack.c.bf16 %v4428_v45, %v4426_v35  ;;  %v4483_v10 = vpack.c.bf16 %v4429_v24, %v4427_v7  ;;  %v4527_v35 = vunpack.c.l.bf16 %v4485_v40  ;;  %v4529_v37 = vunpack.c.h.bf16 %v4485_v40 }
 0x905   : > { %v4610_v24 = vmul.f32 1.442695, %v4526_v58 }
 0x906   : > { %v4522_v21 = vunpack.c.l.bf16 %v4482_v46  ;;  %v4523_v9 = vunpack.c.l.bf16 %v4483_v10  ;;  %v4524_v16 = vunpack.c.h.bf16 %v4482_v46  ;;  %v4525_v56 = vunpack.c.h.bf16 %v4483_v10 }
 0x907   : > { %v4612_v22 = vmul.f32 1.442695, %v4527_v35  ;;  %v4614_v46 = vmul.f32 1.442695, %v4528_v2  ;;  %v4616_v10 = vmul.f32 1.442695, %v4529_v37 }
 0x908   : > { %v4602_v27 = vmul.f32 1.442695, %v4522_v21  ;;  %v4604_v8 = vmul.f32 1.442695, %v4523_v9  ;;  %v4606_v53 = vmul.f32 1.442695, %v4524_v16  ;;  %v11152_v9 = vpop.f32.mrf.mxu3 }
 0x909   : > { %v4608_v61 = vmul.f32 1.442695, %v4525_v56  ;;  %v4355_v56 = vpop.xlane.xlu0 %4354 }
 0x90a   : > { %8050 = vpow2.f32 %v4602_v27  ;;  %5549 = vrot.lane.b32.xlu1 %v12903_v60, %s8472_s25  ;;  %v4436_v12 = vsub.f32 %v10980_v38, %v4355_v56 }
 0x90b   : > { %8052 = vpow2.f32 %v4604_v8  ;;  %v11150_v21 = vpop.f32.mrf.mxu0 }
 0x90c   : > { %8054 = vpow2.f32 %v4606_v53 }
 0x90d   : > { %8056 = vpow2.f32 %v4608_v61  ;;  %v4437_v61 = vsub.f32 %v10978_v28, %v4355_v56  ;;  %v4398_v28 = vmax.f32 %v11138_v19, %v11136_v44 }
 0x90e   : > { %8058 = vpow2.f32 %v4610_v24 }
 0x90f   : > { %8060 = vpow2.f32 %v4612_v22 }
 0x910   : > { %v8051_v23 = vpop.eup %8050  ;;  %8062 = vpow2.f32 %v4614_v46 }
 0x911   : > { %v8053_v49 = vpop.eup %8052  ;;  %8064 = vpow2.f32 %v4616_v10  ;;  %v4361_v38 = vpop.xlane.xlu0 %4360 }
 0x912   : > { %v8055_v34 = vpop.eup %8054  ;;  %v4440_v10 = vsub.f32 %v11006_v26, %v4361_v38  ;;  %v4401_v26 = vmax.f32 %v11148_v57, %v11146_v63 }
 0x913   : > { %v8057_v7 = vpop.eup %8056  ;;  %v4706_v45 = vpack.c.bf16 %v8055_v34, %v8051_v23  ;;  %v11158_v58 = vpop.f32.mrf.mxu0 }
 0x914   : > { %v4707_v11 = vpack.c.bf16 %v8057_v7, %v8053_v49  ;;  %v8059_v16 = vpop.eup %8058  ;;  %v11160_v49 = vpop.f32.mrf.mxu3 }
 0x915   : > { %4758 = vmatmul.bf16.gmra.mxu1 %v4706_v45  ;;  %5016 = vmatmul.bf16.gmra.mxu3 %v4706_v45  ;;  %v8061_v51 = vpop.eup %8060 }
 0x916   : > { %4847 = vmatmul.bf16.gmra.mxu2 %v4707_v11  ;;  %5105 = vmatmul.bf16.gmra.mxu0 %v4707_v11  ;;  %v8063_v27 = vpop.eup %8062 }
 0x917   : > { %v8065_v53 = vpop.eup %8064  ;;  %v4708_v40 = vpack.c.bf16 %v8063_v27, %v8059_v16 }
 0x918   : > { %v4709_v23 = vpack.c.bf16 %v8065_v53, %v8061_v51 }
 0x919   : > { %v6498_v32 = vpop.permute.xlu1 %6497 }
 0x91a   : > { %6531 = vmatpush.bf16.msrb.mxu1 %v6498_v32  ;;  %v4441_v32 = vsub.f32 %v10998_v0, %v4361_v38  ;;  %v12905_v38 = vld [vmem:[#allocation11_spill] sm:$0xff] }
 0x920   : > { %v4352_v8 = vpop.xlane.xlu2 %4351 }
 0x921   : > { %v4434_v25 = vsub.f32 %v10974_v52, %v4352_v8  ;;  %v4435_v60 = vsub.f32 %v10966_v18, %v4352_v8  ;;  %v4395_v18 = vmax.f32 %v11124_v13, %v11122_v3 }
 0x923   : > { %v4486_v39 = vpack.c.bf16 %v4436_v12, %v4434_v25  ;;  %v4487_v6 = vpack.c.bf16 %v4437_v61, %v4435_v60 }
 0x925   : > { %v4530_v35 = vunpack.c.l.bf16 %v4486_v39  ;;  %v4531_v34 = vunpack.c.l.bf16 %v4487_v6  ;;  %v4532_v2 = vunpack.c.h.bf16 %v4486_v39  ;;  %v4533_v7 = vunpack.c.h.bf16 %v4487_v6  ;;  %4763 = vmatmul.bf16.gmra.mxu1 %v4708_v40  ;;  %5021 = vmatmul.bf16.gmra.mxu3 %v4708_v40 }
 0x926   : > { %4852 = vmatmul.bf16.gmra.mxu2 %v4709_v23  ;;  %5110 = vmatmul.bf16.gmra.mxu0 %v4709_v23 }
 0x927   : > { %v4618_v52 = vmul.f32 1.442695, %v4530_v35  ;;  %v4620_v37 = vmul.f32 1.442695, %v4531_v34  ;;  %v4622_v45 = vmul.f32 1.442695, %v4532_v2  ;;  %4399 = vmax.xlane.f32.xlu2 %v4398_v28 }
 0x928   : > { %v4624_v24 = vmul.f32 1.442695, %v4533_v7  ;;  %v4358_v11 = vpop.xlane.xlu2 %4357  ;;  %v5086_v56 = vpop.f32.mrf.mxu0  ;;  %v12904_v2 = vld [vmem:[#allocation16_spill] sm:$0xff] }
 0x929   : > { %8066 = vpow2.f32 %v4618_v52  ;;  %v4438_v22 = vsub.f32 %v10996_v14, %v4358_v11  ;;  %v4439_v46 = vsub.f32 %v10986_v36, %v4358_v11  ;;  %4396 = vmax.xlane.f32.xlu0 %v4395_v18 }
 0x92a   : > { %8068 = vpow2.f32 %v4620_v37 }
 0x92b   : > { %8070 = vpow2.f32 %v4622_v45  ;;  %v4488_v16 = vpack.c.bf16 %v4440_v10, %v4438_v22  ;;  %v4489_v51 = vpack.c.bf16 %v4441_v32, %v4439_v46  ;;  %v12906_v22 = vld [vmem:[#allocation28_spill] sm:$0xff] }
 0x92c   : > { %8072 = vpow2.f32 %v4624_v24 }
 0x92d   : > { %v4997_v27 = vpop.f32.mrf.mxu3  ;;  %v4534_v61 = vunpack.c.l.bf16 %v4488_v16  ;;  %v4535_v36 = vunpack.c.l.bf16 %v4489_v51  ;;  %v4536_v39 = vunpack.c.h.bf16 %v4488_v16  ;;  %v4537_v6 = vunpack.c.h.bf16 %v4489_v51 }
 0x92e   : > { %v11170_v8 = vadd.f32 %v5086_v56, %v4997_v27  ;;  %8074 = vrcp.f32 %v12904_v2  ;;  %v12909_v2 = vld [vmem:[#allocation31_spill] sm:$0xff] }
 0x92f   : > { %v8067_v53 = vpop.eup %8066  ;;  %v4626_v23 = vmul.f32 1.442695, %v4534_v61  ;;  %v4628_v35 = vmul.f32 1.442695, %v4535_v36  ;;  %v4630_v34 = vmul.f32 1.442695, %v4536_v39 }
 0x930   : > { %v8069_v12 = vpop.eup %8068  ;;  %v4364_v14 = vpop.xlane.xlu2 %4363  ;;  %v4632_v7 = vmul.f32 1.442695, %v4537_v6 }
 0x931   : > { %v8071_v25 = vpop.eup %8070  ;;  %8076 = vpow2.f32 %v4626_v23  ;;  %v4442_v10 = vsub.f32 %v11016_v41, %v4364_v14  ;;  %v4443_v56 = vsub.f32 %v11010_v62, %v4364_v14 }
 0x932   : > { %v8073_v60 = vpop.eup %8072  ;;  %v4710_v0 = vpack.c.bf16 %v8071_v25, %v8067_v53  ;;  %8078 = vpow2.f32 %v4628_v35  ;;  %v11184_v53 = vpop.f32.mrf.mxu1 }
 0x933   : > { %v4711_v40 = vpack.c.bf16 %v8073_v60, %v8069_v12  ;;  %8080 = vpow2.f32 %v4630_v34  ;;  %12907 = vst [vmem:[#allocation13_spill] sm:$0xff] %v11184_v53 }
 0x934   : > { %4402 = vmax.xlane.f32.xlu1 %v4401_v26  ;;  %8082 = vpow2.f32 %v4632_v7  ;;  %v8075_v18 = vpop.eup %8074  ;;  %v12910_v7 = vld [vmem:[#allocation46_spill] sm:$0xff] }
 0x935   : > { %4768 = vmatmul.bf16.gmra.mxu1 %v4710_v0  ;;  %5026 = vmatmul.bf16.gmra.mxu3 %v4710_v0  ;;  %8084 = vrcp.f32 %v12906_v22 }
 0x936   : > { %4857 = vmatmul.bf16.gmra.mxu2 %v4711_v40  ;;  %5115 = vmatmul.bf16.gmra.mxu0 %v4711_v40  ;;  %v11190_v40 = vpop.f32.mrf.mxu2 }
 0x937   : > { %v8077_v52 = vpop.eup %8076  ;;  %12908 = vst [vmem:[#allocation19_spill] sm:$0xff] %v11190_v40 }
 0x938   : > { %v4370_v28 = vpop.xlane.xlu2 %4369  ;;  %v8079_v37 = vpop.eup %8078 }
 0x939   : > { %v8081_v45 = vpop.eup %8080  ;;  %v4446_v23 = vsub.f32 %v11028_v20, %v4370_v28 }
 0x93a   : > { %v8083_v11 = vpop.eup %8082  ;;  %v4712_v46 = vpack.c.bf16 %v8081_v45, %v8077_v52  ;;  %v4447_v52 = vsub.f32 %v11024_v5, %v4370_v28  ;;  %v12912_v28 = vld [vmem:[#allocation9_spill] sm:$0xff] }
 0x93b   : > { %v4713_v32 = vpack.c.bf16 %v8083_v11, %v8079_v37  ;;  %v8085_v12 = vpop.eup %8084 }
 0x93d   : > { %6487 = vrot.lane.b32.xlu0 %v12905_v38, %s8472_s25  ;;  %v11199_v38 = vpop.f32.mrf.mxu1 }
 0x93e   : > { %v11188_v41 = vpop.xlane.xlu0 %4381 }
 0x93f   : > { %3650 = vperm.xlu2 %7686, %v8075_v18   ;;  %v3785_v18 = vmul.f32 %v10988_v54, %v12910_v7  ;;  %v12915_v7 = vld [vmem:[#allocation7_spill] sm:$0xff] }
 0x940   : > { %v11177_v24 = vpop.xlane.xlu2 %4375 }
 0x944   : > { %v4367_v16 = vpop.xlane.xlu1 %4366 }
 0x945   : > { %4773 = vmatmul.bf16.gmra.mxu1 %v4712_v46  ;;  %5031 = vmatmul.bf16.gmra.mxu3 %v4712_v46  ;;  %v4444_v51 = vsub.f32 %v11022_v31, %v4367_v16  ;;  %v4445_v27 = vsub.f32 %v11018_v43, %v4367_v16 }
 0x946   : > { %4862 = vmatmul.bf16.gmra.mxu2 %v4713_v32  ;;  %5120 = vmatmul.bf16.gmra.mxu0 %v4713_v32  ;;  %v4828_v32 = vpop.f32.mrf.mxu2 }
 0x947   : > { %v4490_v61 = vpack.c.bf16 %v4444_v51, %v4442_v10  ;;  %v4491_v25 = vpack.c.bf16 %v4445_v27, %v4443_v56  ;;  %3655 = vperm.xlu2 %7686, %v8085_v12  }
 0x948   : > { %v11186_v36 = vpop.xlane.xlu2 %4384 }
 0x949   : > { %v4538_v60 = vunpack.c.l.bf16 %v4490_v61  ;;  %v4539_v62 = vunpack.c.l.bf16 %v4491_v25  ;;  %v4540_v14 = vunpack.c.h.bf16 %v4490_v61  ;;  %v4541_v26 = vunpack.c.h.bf16 %v4491_v25 }
 0x94b   : > { %v4634_v39 = vmul.f32 1.442695, %v4538_v60  ;;  %v4636_v31 = vmul.f32 1.442695, %v4539_v62  ;;  %v4638_v0 = vmul.f32 1.442695, %v4540_v14  ;;  %v11208_v60 = vpop.f32.mrf.mxu1  ;;  %v11210_v14 = vpop.f32.mrf.mxu0 }
 0x94c   : > { %v4640_v43 = vmul.f32 1.442695, %v4541_v26  ;;  %v4373_v6 = vpop.xlane.xlu1 %4372 }
 0x94d   : > { %8086 = vpow2.f32 %v4634_v39  ;;  %v4448_v35 = vsub.f32 %v11036_v42, %v4373_v6  ;;  %v4449_v34 = vsub.f32 %v11032_v33, %v4373_v6  ;;  %6501 = vrot.lane.b32.xlu1 %v12909_v2, %s8472_s25  ;;  %v12911_v42 = vld [vmem:[#allocation26_spill] sm:$0xff] }
 0x94e   : > { %8088 = vpow2.f32 %v4636_v31 }
 0x94f   : > { %8090 = vpow2.f32 %v4638_v0  ;;  %v4492_v37 = vpack.c.bf16 %v4448_v35, %v4446_v23  ;;  %v4493_v20 = vpack.c.bf16 %v4449_v34, %v4447_v52  ;;  %3851 = vrot.lane.b32.xlu2 %v3785_v18, %s8471_s24  ;;  %v12913_v23 = vld [vmem:[#allocation113_spill] sm:$0xff]  ;;  %v12914_v34 = vld [vmem:[#allocation111_spill] sm:$0xff]  ;;  %v12917_v52 = vld [vmem:[#allocation108_spill] sm:$0xff] }
 0x950   : > { %8092 = vpow2.f32 %v4640_v43  ;;  %v11204_v45 = vpop.xlane.xlu2 %4387  ;;  %v4450_v35 = vsub.f32 %v12913_v23, %v11177_v24  ;;  %v4451_v2 = vsub.f32 %v12914_v34, %v11177_v24  ;;  %v12916_v18 = vld [vmem:[#allocation55_spill] sm:$0xff]  ;;  %v12918_v24 = vld [vmem:[#allocation44_spill] sm:$0xff] }
 0x951   : > { %8094 = vrcp.f32 %v12911_v42  ;;  %v6508_v33 = vpop.permute.xlu0 %6507  ;;  %v4542_v22 = vunpack.c.l.bf16 %v4492_v37  ;;  %v4543_v46 = vunpack.c.l.bf16 %v4493_v20  ;;  %v4544_v5 = vunpack.c.h.bf16 %v4492_v37  ;;  %v11222_v37 = vpop.f32.mrf.mxu3 }
 0x952   : > { %6623 = vmatpush.bf16.msra.mxu2 %v6508_v33  ;;  %v4545_v56 = vunpack.c.h.bf16 %v4493_v20 }
 0x953   : > { %v8087_v11 = vpop.eup %8086  ;;  %v4642_v12 = vmul.f32 1.442695, %v4542_v22  ;;  %v4644_v62 = vmul.f32 1.442695, %v4543_v46  ;;  %v4646_v26 = vmul.f32 1.442695, %v4544_v5 }
 0x954   : > { %v8089_v54 = vpop.eup %8088  ;;  %v4379_v61 = vpop.xlane.xlu1 %4378  ;;  %v4648_v31 = vmul.f32 1.442695, %v4545_v56  ;;  %v12919_v22 = vld [vmem:[#allocation45_spill] sm:$0xff]  ;;  %v12920_v46 = vld [vmem:[#allocation39_spill] sm:$0xff] }
 0x955   : > { %v8091_v10 = vpop.eup %8090  ;;  %6485 = vrot.lane.b32.xlu1 %v12912_v28, %s8472_s25  ;;  %v4452_v0 = vsub.f32 %v11050_v47, %v4379_v61  ;;  %8096 = vpow2.f32 %v4642_v12  ;;  %v4453_v6 = vsub.f32 %v11048_v30, %v4379_v61  ;;  %v3787_v47 = vmul.f32 %v12917_v52, %v12916_v18  ;;  %v11224_v30 = vpop.f32.mrf.mxu2 }
 0x956   : > { %v8093_v16 = vpop.eup %8092  ;;  %v4714_v51 = vpack.c.bf16 %v8091_v10, %v8087_v11  ;;  %8098 = vpow2.f32 %v4644_v62 }
 0x957   : > { %v8095_v27 = vpop.eup %8094  ;;  %v4715_v25 = vpack.c.bf16 %v8093_v16, %v8089_v54  ;;  %8100 = vpow2.f32 %v4646_v26  ;;  %v4494_v20 = vpack.c.bf16 %v4452_v0, %v4450_v35  ;;  %v4495_v42 = vpack.c.bf16 %v4453_v6, %v4451_v2 }
 0x958   : > { %3665 = vperm.xlu2 %7686, %v8095_v27   ;;  %4778 = vmatmul.bf16.gmra.mxu1 %v4714_v51  ;;  %v6496_v43 = vpop.permute.xlu2 %6495  ;;  %8102 = vpow2.f32 %v4648_v31  ;;  %v3546_v54 = vadd.f32 %v12919_v22, %v12918_v24  ;;  %v4829_v16 = vadd.f32 %v4828_v32, %v11199_v38  ;;  %v12921_v27 = vld [vmem:[#allocation109_spill] sm:$0xff]  ;;  %v4404_v26 = vmax.f32 %v11152_v9, %v11150_v21  ;;  %v12922_v22 = vld [vmem:[#allocation115_spill] sm:$0xff] }
 0x959   : > { %4867 = vmatmul.bf16.gmra.mxu2 %v4715_v25  ;;  %5036 = vmatmul.bf16.gmra.mxu3 %v4714_v51  ;;  %v6494_v39 = vpop.permute.xlu0 %6493  ;;  %8104 = vrcp.f32 %v12920_v46  ;;  %v4546_v56 = vunpack.c.l.bf16 %v4494_v20  ;;  %v4547_v61 = vunpack.c.l.bf16 %v4495_v42  ;;  %v4548_v62 = vunpack.c.h.bf16 %v4494_v20  ;;  %v12923_v46 = vld [vmem:[#allocation114_spill] sm:$0xff] }
 0x95a   : > { %5125 = vmatmul.bf16.gmra.mxu0 %v4715_v25  ;;  %6532 = vmatpush.bf16.msrb.mxu1 %v6496_v43  ;;  %v3784_v12 = vmul.f32 %v12921_v27, %v3546_v54  ;;  %8106 = vrcp.f32 %v4829_v16  ;;  %v4457_v24 = vsub.f32 %v11068_v55, %v11186_v36  ;;  %v4454_v54 = vsub.f32 %v12922_v22, %v11188_v41 }
 0x95b   : > { %v8097_v11 = vpop.eup %8096  ;;  %v4650_v0 = vmul.f32 1.442695, %v4546_v56  ;;  %v4652_v32 = vmul.f32 1.442695, %v4547_v61  ;;  %v4654_v2 = vmul.f32 1.442695, %v4548_v62 }
 0x95c   : > { %v8099_v28 = vpop.eup %8098 }
 0x95d   : > { %6483 = vrot.lane.b32.xlu1 %v12915_v7, %s8472_s25  ;;  %v8101_v51 = vpop.eup %8100  ;;  %8108 = vpow2.f32 %v4650_v0 }
 0x95e   : > { %6533 = vmatpush.bf16.msrb.mxu1 %v6494_v39  ;;  %v8103_v25 = vpop.eup %8102  ;;  %v4549_v39 = vunpack.c.h.bf16 %v4495_v42  ;;  %v4716_v6 = vpack.c.bf16 %v8101_v51, %v8097_v11  ;;  %v4456_v42 = vsub.f32 %v11072_v1, %v11186_v36  ;;  %8110 = vpow2.f32 %v4652_v32 }
 0x95f   : > { %v8105_v38 = vpop.eup %8104  ;;  %v4717_v34 = vpack.c.bf16 %v8103_v25, %v8099_v28  ;;  %8112 = vpow2.f32 %v4654_v2 }
 0x960   : > { %3855 = vrot.lane.b32.xlu2 %v3787_v47, %s8471_s24  ;;  %v4744_v33 = vpop.f32.mrf.mxu1  ;;  %v6504_v31 = vpop.permute.xlu2 %6503  ;;  %v4656_v18 = vmul.f32 1.442695, %v4549_v39 }
 0x961   : > { %v5091_v10 = vpop.f32.mrf.mxu0  ;;  %v6506_v5 = vpop.permute.xlu0 %6505 }
 0x962   : > { %6624 = vmatpush.bf16.msra.mxu2 %v6506_v5  ;;  %v8107_v11 = vpop.eup %8106  ;;  %8114 = vpow2.f32 %v4656_v18  ;;  %v4496_v5 = vpack.c.bf16 %v4456_v42, %v4454_v54  ;;  %v4458_v54 = vsub.f32 %v11081_v17, %v11204_v45 }
 0x963   : > { %v8109_v1 = vpop.eup %8108 }
 0x964   : > { %v8111_v51 = vpop.eup %8110  ;;  %v4550_v25 = vunpack.c.l.bf16 %v4496_v5  ;;  %v4552_v39 = vunpack.c.h.bf16 %v4496_v5 }
 0x965   : > { %3849 = vrot.lane.b32.xlu1 %v3784_v12, %s8471_s24  ;;  %v8113_v36 = vpop.eup %8112 }
 0x966   : > { %v5002_v43 = vpop.f32.mrf.mxu3  ;;  %6625 = vmatpush.bf16.msra.mxu2 %v6504_v31  ;;  %v4718_v0 = vpack.c.bf16 %v8113_v36, %v8109_v1  ;;  %v4662_v18 = vmul.f32 1.442695, %v4552_v39  ;;  %v12926_v1 = vld [vmem:[#allocation33_spill] sm:$0xff] }
 0x967   : > { %v4833_v23 = vpop.f32.mrf.mxu2  ;;  %v11235_v35 = vadd.f32 %v5091_v10, %v5002_v43  ;;  %4405 = vmax.xlane.f32.xlu0 %v4404_v26  ;;  %v4455_v10 = vsub.f32 %v12923_v46, %v11188_v41  ;;  %v4658_v43 = vmul.f32 1.442695, %v4550_v25  ;;  %v4459_v46 = vsub.f32 %v11084_v4, %v11204_v45 }
 0x968   : > { %3675 = vperm.xlu2 %7686, %v8105_v38   ;;  %v4746_v7 = vpop.f32.mrf.mxu1  ;;  %4783 = vmatmul.bf16.gmra.mxu1 %v4716_v6  ;;  %v4834_v20 = vadd.f32 %v4833_v23, %v4744_v33  ;;  %v8115_v61 = vpop.eup %8114 }
 0x969   : > { %4872 = vmatmul.bf16.gmra.mxu2 %v4717_v34  ;;  %5041 = vmatmul.bf16.gmra.mxu3 %v4716_v6  ;;  %v11237_v52 = vpop.f32.mrf.mxu0  ;;  %v6492_v47 = vpop.permute.xlu0 %6491  ;;  %v4497_v16 = vpack.c.bf16 %v4457_v24, %v4455_v10  ;;  %v4719_v32 = vpack.c.bf16 %v8115_v61, %v8111_v51 }
 0x96a   : > { %5130 = vmatmul.bf16.gmra.mxu0 %v4717_v34  ;;  %6534 = vmatpush.bf16.msrb.mxu1 %v6492_v47  ;;  %8116 = vrcp.f32 %v4834_v20  ;;  %v4391_v34 = vpop.xlane.xlu1 %4390 }
 0x96b   : > { %v4551_v26 = vunpack.c.l.bf16 %v4497_v16  ;;  %v4553_v41 = vunpack.c.h.bf16 %v4497_v16  ;;  %v4460_v42 = vsub.f32 %v11096_v59, %v4391_v34  ;;  %v4461_v22 = vsub.f32 %v11098_v15, %v4391_v34 }
 0x96d   : > { %5168 = vperm.xlu1 %7685, %v8107_v11   ;;  %v4660_v23 = vmul.f32 1.442695, %v4551_v26  ;;  %v4664_v20 = vmul.f32 1.442695, %v4553_v41  ;;  %v12924_v11 = vld [vmem:[#allocation14_spill] sm:$0xff]  ;;  %v4498_v5 = vpack.c.bf16 %v4460_v42, %v4458_v54 }
 0x96e   : > { %v11247_v33 = vpop.f32.mrf.mxu3 }
 0x96f   : > { %v4835_v28 = vpop.f32.mrf.mxu2  ;;  %v4554_v25 = vunpack.c.l.bf16 %v4498_v5 }
 0x970   : > { %v4749_v56 = vpop.f32.mrf.mxu1  ;;  %v4836_v12 = vadd.f32 %v4835_v28, %v4746_v7  ;;  %v8117_v62 = vpop.eup %8116  ;;  %v12925_v28 = vld [vmem:[#allocation27_spill] sm:$0xff] }
 0x971   : > { %v5096_v27 = vpop.f32.mrf.mxu0  ;;  %v6490_v55 = vpop.permute.xlu0 %6489  ;;  %v3303_v16 = vadd.f32 %v12926_v1, %v12925_v28  ;;  %v12931_v28 = vld [vmem:[#allocation32_spill] sm:$0xff]  ;;  %v12932_v1 = vld [vmem:[#allocation10_spill] sm:$0xff] }
 0x972   : > { %6535 = vmatpush.bf16.msrb.mxu1 %v6490_v55  ;;  %8118 = vrcp.f32 %v4836_v12  ;;  %v12928_v55 = vld [vmem:[#allocation107_spill] sm:$0xff] }
 0x973   : > { %8120 = vpow2.f32 %v4658_v43 }
 0x974   : > { %8122 = vpow2.f32 %v4660_v23 }
 0x975   : > { %5178 = vperm.xlu1 %7685, %v8117_v62   ;;  %8124 = vpow2.f32 %v4662_v18  ;;  %v4556_v62 = vunpack.c.h.bf16 %v4498_v5 }
 0x976   : > { %v5007_v31 = vpop.f32.mrf.mxu3  ;;  %8126 = vpow2.f32 %v4664_v20 }
 0x977   : > { %v4838_v6 = vpop.f32.mrf.mxu2  ;;  %v11249_v38 = vadd.f32 %v5096_v27, %v5007_v31  ;;  %v12927_v27 = vld [vmem:[#allocation42_spill] sm:$0xff]  ;;  %8128 = vrcp.f32 %v3303_v16  ;;  %v4666_v31 = vmul.f32 1.442695, %v4554_v25  ;;  %v4670_v34 = vmul.f32 1.442695, %v4556_v62 }
 0x978   : > { %v11251_v2 = vadd.f32 %v4838_v6, %v4749_v56  ;;  %v11253_v7 = vpop.f32.mrf.mxu1  ;;  %4788 = vmatmul.bf16.gmra.mxu1 %v4718_v0  ;;  %v8119_v24 = vpop.eup %8118  ;;  %v4499_v56 = vpack.c.bf16 %v4461_v22, %v4459_v46  ;;  %v3783_v36 = vmul.f32 %v12928_v55, %v12927_v27  ;;  %v12930_v22 = vld [vmem:[#allocation48_spill] sm:$0xff]  ;;  %v4407_v46 = vmax.f32 %v11160_v49, %v11158_v58 }
 0x979   : > { %4877 = vmatmul.bf16.gmra.mxu2 %v4719_v32  ;;  %5046 = vmatmul.bf16.gmra.mxu3 %v4718_v0  ;;  %v11255_v47 = vpop.f32.mrf.mxu0  ;;  %v8121_v15 = vpop.eup %8120  ;;  %v3308_v16 = vadd.f32 %v12932_v1, %v12931_v28  ;;  %v12935_v28 = vld [vmem:[#allocation12_spill] sm:$0xff]  ;;  %v12936_v1 = vld [vmem:[#allocation34_spill] sm:$0xff] }
 0x97a   : > { %5135 = vmatmul.bf16.gmra.mxu0 %v4719_v32  ;;  %v8123_v12 = vpop.eup %8122  ;;  %v4555_v45 = vunpack.c.l.bf16 %v4499_v56  ;;  %v4557_v26 = vunpack.c.h.bf16 %v4499_v56 }
 0x97b   : > { %6499 = vrot.lane.b32.xlu0 %v12924_v11, %s8472_s25  ;;  %v8125_v61 = vpop.eup %8124 }
 0x97c   : > { %v8127_v4 = vpop.eup %8126  ;;  %v4720_v41 = vpack.c.bf16 %v8125_v61, %v8121_v15  ;;  %v4668_v32 = vmul.f32 1.442695, %v4555_v45  ;;  %v4672_v20 = vmul.f32 1.442695, %v4557_v26  ;;  %v12933_v15 = vld [vmem:[#allocation110_spill] sm:$0xff]  ;;  %v4394_v45 = vpop.xlane.xlu1 %4393 }
 0x97d   : > { %5183 = vperm.xlu1 %7685, %v8119_v24   ;;  %v4721_v6 = vpack.c.bf16 %v8127_v4, %v8123_v12  ;;  %v8129_v18 = vpop.eup %8128  ;;  %v12929_v24 = vld [vmem:[#allocation43_spill] sm:$0xff] }
 0x97e   : > { %v11265_v10 = vpop.f32.mrf.mxu3  ;;  %v3551_v54 = vadd.f32 %v12930_v22, %v12929_v24 }
 0x97f   : > { %v11267_v59 = vpop.f32.mrf.mxu2 }
 0x980   : > { %v4754_v51 = vpop.f32.mrf.mxu1  ;;  %v3786_v27 = vmul.f32 %v12933_v15, %v3551_v54 }
 0x981   : > { %v5101_v17 = vpop.f32.mrf.mxu0 }
 0x983   : > { %3847 = vrot.lane.b32.xlu0 %v3783_v36, %s8471_s24 }
 0x984   : > { %v11302_v54 = vpop.permute.xlu1 %5549 }
 0x985   : > { %12934 = vst [vmem:[#allocation16_spill] sm:$0xff] %v11302_v54 }
 0x986   : > { %v5012_v39 = vpop.f32.mrf.mxu3 }
 0x987   : > { %v4843_v0 = vpop.f32.mrf.mxu2  ;;  %v11274_v43 = vadd.f32 %v5101_v17, %v5012_v39 }
 0x988   : > { %v4844_v23 = vadd.f32 %v4843_v0, %v4754_v51  ;;  %4793 = vmatmul.bf16.gmra.mxu1 %v4720_v41  ;;  %v11276_v42 = vpop.f32.mrf.mxu1 }
 0x989   : > { %4882 = vmatmul.bf16.gmra.mxu2 %v4721_v6  ;;  %5051 = vmatmul.bf16.gmra.mxu3 %v4720_v41  ;;  %v11278_v11 = vpop.f32.mrf.mxu0 }
 0x98a   : > { %8130 = vrcp.f32 %v4844_v23  ;;  %5140 = vmatmul.bf16.gmra.mxu0 %v4721_v6 }
 0x98b   : > { %8132 = vpow2.f32 %v4666_v31  ;;  %3660 = vperm.xlu0 %7684, %v8129_v18   ;;  %v4462_v18 = vsub.f32 %v11110_v48, %v4394_v45 }
 0x98c   : > { %8134 = vpow2.f32 %v4668_v32 }
 0x98d   : > { %8136 = vpow2.f32 %v4670_v34 }
 0x98e   : > { %8138 = vpow2.f32 %v4672_v20  ;;  %v11286_v56 = vpop.f32.mrf.mxu3  ;;  %v4463_v20 = vsub.f32 %v11112_v29, %v4394_v45 }
 0x98f   : > { %v11289_v55 = vpop.f32.mrf.mxu2  ;;  %8140 = vrcp.f32 %v3308_v16  ;;  %v3313_v16 = vadd.f32 %v12936_v1, %v12935_v28 }
 0x990   : > { %v8131_v5 = vpop.eup %8130 }
 0x991   : > { %v8133_v51 = vpop.eup %8132  ;;  %5198 = vperm.xlu1 %7685, %v8131_v5   ;;  %4408 = vmax.xlane.f32.xlu2 %v4407_v46 }
 0x992   : > { %v8135_v36 = vpop.eup %8134  ;;  %v4759_v17 = vpop.f32.mrf.mxu1 }
 0x993   : > { %v8137_v12 = vpop.eup %8136  ;;  %v5106_v61 = vpop.f32.mrf.mxu0  ;;  %3853 = vrot.lane.b32.xlu0 %v3786_v27, %s8471_s24 }
 0x994   : > { %v8139_v25 = vpop.eup %8138  ;;  %v4722_v4 = vpack.c.bf16 %v8137_v12, %v8133_v51 }
 0x995   : > { %v4723_v62 = vpack.c.bf16 %v8139_v25, %v8135_v36  ;;  %v8141_v31 = vpop.eup %8140 }
 0x998   : > { %4798 = vmatmul.bf16.gmra.mxu1 %v4722_v4  ;;  %v5017_v26 = vpop.f32.mrf.mxu3 }
 0x999   : > { %v4848_v39 = vpop.f32.mrf.mxu2  ;;  %4887 = vmatmul.bf16.gmra.mxu2 %v4723_v62  ;;  %v11292_v41 = vadd.f32 %v5106_v61, %v5017_v26  ;;  %5056 = vmatmul.bf16.gmra.mxu3 %v4722_v4 }
 0x99a   : > { %v4849_v0 = vadd.f32 %v4848_v39, %v4759_v17  ;;  %5145 = vmatmul.bf16.gmra.mxu0 %v4723_v62  ;;  %v11294_v6 = vpop.f32.mrf.mxu1  ;;  %v4400_v23 = vpop.xlane.xlu2 %4399  ;;  %v12937_v62 = vld [vmem:[#allocation25_spill] sm:$0xff] }
 0x99b   : > { %v11296_v32 = vpop.f32.mrf.mxu0  ;;  %3670 = vperm.xlu0 %7684, %v8141_v31   ;;  %v4466_v39 = vsub.f32 %v11138_v19, %v4400_v23 }
 0x99c   : > { %8142 = vrcp.f32 %v4849_v0  ;;  %v4397_v34 = vpop.xlane.xlu0 %4396  ;;  %v4467_v0 = vsub.f32 %v11136_v44, %v4400_v23 }
 0x99d   : > { %v4464_v24 = vsub.f32 %v11124_v13, %v4397_v34  ;;  %v4465_v22 = vsub.f32 %v11122_v3, %v4397_v34  ;;  %8144 = vrcp.f32 %v3313_v16 }
 0x99f   : > { %v4500_v46 = vpack.c.bf16 %v4464_v24, %v4462_v18  ;;  %v4501_v5 = vpack.c.bf16 %v4465_v22, %v4463_v20 }
 0x9a0   : > { %v11306_v51 = vpop.f32.mrf.mxu3 }
 0x9a1   : > { %v4558_v15 = vunpack.c.l.bf16 %v4500_v46  ;;  %v4559_v27 = vunpack.c.l.bf16 %v4501_v5  ;;  %v4560_v36 = vunpack.c.h.bf16 %v4500_v46  ;;  %v4561_v17 = vunpack.c.h.bf16 %v4501_v5  ;;  %v11308_v48 = vpop.f32.mrf.mxu2 }
 0x9a2   : > { %v8143_v29 = vpop.eup %8142  ;;  %v4764_v12 = vpop.f32.mrf.mxu1 }
 0x9a3   : > { %v4674_v13 = vmul.f32 1.442695, %v4558_v15  ;;  %v4676_v61 = vmul.f32 1.442695, %v4559_v27  ;;  %v4678_v3 = vmul.f32 1.442695, %v4560_v36  ;;  %v5111_v25 = vpop.f32.mrf.mxu0  ;;  %5208 = vperm.xlu1 %7685, %v8143_v29   ;;  %v3651_v4 = vpop.permute.xlu2 %3650 }
 0x9a4   : > { %v4680_v45 = vmul.f32 1.442695, %v4561_v17  ;;  %v3788_v26 = vmul.f32 %v3651_v4, %v12937_v62  ;;  %v8145_v46 = vpop.eup %8144 }
 0x9a5   : > { %8146 = vpow2.f32 %v4674_v13 }
 0x9a6   : > { %8148 = vpow2.f32 %v4676_v61  ;;  %3857 = vrot.lane.b32.xlu0 %v3788_v26, %s8471_s24 }
 0x9a7   : > { %8150 = vpow2.f32 %v4678_v3  ;;  %v4403_v31 = vpop.xlane.xlu1 %4402 }
 0x9a8   : > { %8152 = vpow2.f32 %v4680_v45  ;;  %v5022_v34 = vpop.f32.mrf.mxu3  ;;  %v4468_v18 = vsub.f32 %v11148_v57, %v4403_v31  ;;  %v4469_v20 = vsub.f32 %v11146_v63, %v4403_v31  ;;  %v12938_v63 = vld [vmem:[#allocation30_spill] sm:$0xff]  ;;  %v12939_v45 = vld [vmem:[#allocation29_spill] sm:$0xff] }
 0x9a9   : > { %v4853_v24 = vpop.f32.mrf.mxu2  ;;  %v11316_v22 = vadd.f32 %v5111_v25, %v5022_v34 }
 0x9aa   : > { %v4854_v5 = vadd.f32 %v4853_v24, %v4764_v12  ;;  %v4502_v28 = vpack.c.bf16 %v4468_v18, %v4466_v39  ;;  %v4503_v1 = vpack.c.bf16 %v4469_v20, %v4467_v0  ;;  %v11318_v16 = vpop.f32.mrf.mxu1 }
 0x9ab   : > { %v8147_v19 = vpop.eup %8146  ;;  %v11320_v15 = vpop.f32.mrf.mxu0 }
 0x9ac   : > { %v3656_v27 = vpop.permute.xlu2 %3655  ;;  %v8149_v44 = vpop.eup %8148  ;;  %8154 = vrcp.f32 %v4854_v5  ;;  %v4562_v23 = vunpack.c.l.bf16 %v4502_v28  ;;  %v4563_v36 = vunpack.c.l.bf16 %v4503_v1  ;;  %v4564_v17 = vunpack.c.h.bf16 %v4502_v28 }
 0x9ad   : > { %v8151_v57 = vpop.eup %8150  ;;  %v3789_v29 = vmul.f32 %v3656_v27, %v12938_v63  ;;  %v4565_v61 = vunpack.c.h.bf16 %v4503_v1  ;;  %8156 = vrcp.f32 %v12939_v45 }
 0x9ae   : > { %v8153_v13 = vpop.eup %8152  ;;  %3680 = vperm.xlu0 %7684, %v8145_v46   ;;  %v4724_v12 = vpack.c.bf16 %v8151_v57, %v8147_v19  ;;  %v4682_v3 = vmul.f32 1.442695, %v4562_v23  ;;  %v4684_v62 = vmul.f32 1.442695, %v4563_v36  ;;  %v4686_v39 = vmul.f32 1.442695, %v4564_v17 }
 0x9af   : > { %3859 = vrot.lane.b32.xlu2 %v3789_v29, %s8471_s24  ;;  %v4725_v25 = vpack.c.bf16 %v8153_v13, %v8149_v44  ;;  %v6488_v4 = vpop.permute.xlu0 %6487  ;;  %v4688_v34 = vmul.f32 1.442695, %v4565_v61  ;;  %v12940_v29 = vld [vmem:[#allocation4_spill] sm:$0xff] }
 0x9b0   : > { %4803 = vmatmul.bf16.gmra.mxu1 %v4724_v12  ;;  %v11325_v26 = vpop.f32.mrf.mxu3  ;;  %5061 = vmatmul.bf16.gmra.mxu3 %v4724_v12  ;;  %8158 = vpow2.f32 %v4682_v3 }
 0x9b1   : > { %v11327_v31 = vpop.f32.mrf.mxu2  ;;  %4892 = vmatmul.bf16.gmra.mxu2 %v4725_v25  ;;  %5150 = vmatmul.bf16.gmra.mxu0 %v4725_v25  ;;  %8160 = vpow2.f32 %v4684_v62  ;;  %v12941_v25 = vld [vmem:[#allocation22_spill] sm:$0xff] }
 0x9b2   : > { %v8155_v0 = vpop.eup %8154  ;;  %v4769_v18 = vpop.f32.mrf.mxu1  ;;  %6536 = vmatpush.bf16.msrb.mxu1 %v6488_v4  ;;  %8162 = vpow2.f32 %v4686_v39 }
 0x9b3   : > { %v5116_v20 = vpop.f32.mrf.mxu0  ;;  %5218 = vperm.xlu1 %7685, %v8155_v0   ;;  %v8157_v46 = vpop.eup %8156  ;;  %8164 = vpow2.f32 %v4688_v34 }
 0x9b4   : > { %v3852_v24 = vpop.permute.xlu2 %3851 }
 0x9b5   : > { %3946 = vst.msk [vmem:[#allocation2 + $0x10] sm:$0xff] %vm3943_vm2, %v3852_v24 }
 0x9b6   : > { %v8159_v28 = vpop.eup %8158 }
 0x9b7   : > { %3685 = vperm.xlu2 %7686, %v8157_v46   ;;  %v8161_v27 = vpop.eup %8160 }
 0x9b8   : > { %v5027_v5 = vpop.f32.mrf.mxu3  ;;  %v8163_v36 = vpop.eup %8162 }
 0x9b9   : > { %v4858_v1 = vpop.f32.mrf.mxu2  ;;  %v11330_v19 = vadd.f32 %v5116_v20, %v5027_v5  ;;  %v8165_v63 = vpop.eup %8164  ;;  %v4726_v61 = vpack.c.bf16 %v8163_v36, %v8159_v28 }
 0x9ba   : > { %v4859_v44 = vadd.f32 %v4858_v1, %v4769_v18  ;;  %v11332_v23 = vpop.f32.mrf.mxu1  ;;  %v4727_v12 = vpack.c.bf16 %v8165_v63, %v8161_v27  ;;  %v12943_v27 = vld [vmem:[#allocation15_spill] sm:$0xff] }
 0x9bb   : > { %v11334_v57 = vpop.f32.mrf.mxu0 }
 0x9bc   : > { %v3666_v17 = vpop.permute.xlu2 %3665  ;;  %8166 = vrcp.f32 %v4859_v44 }
 0x9bd   : > { %v3791_v13 = vmul.f32 %v3666_v17, %v12940_v29  ;;  %8168 = vrcp.f32 %v12941_v25  ;;  %v12945_v29 = vld [vmem:[#allocation63_spill] sm:$0xff] }
 0x9bf   : > { %3863 = vrot.lane.b32.xlu2 %v3791_v13, %s8471_s24  ;;  %v6502_v3 = vpop.permute.xlu1 %6501 }
 0x9c0   : > { %4808 = vmatmul.bf16.gmra.mxu1 %v4726_v61  ;;  %v11339_v4 = vpop.f32.mrf.mxu3  ;;  %5066 = vmatmul.bf16.gmra.mxu3 %v4726_v61 }
 0x9c1   : > { %v11341_v45 = vpop.f32.mrf.mxu2  ;;  %4897 = vmatmul.bf16.gmra.mxu2 %v4727_v12  ;;  %5155 = vmatmul.bf16.gmra.mxu0 %v4727_v12 }
 0x9c2   : > { %v8167_v62 = vpop.eup %8166  ;;  %6626 = vmatpush.bf16.msra.mxu2 %v6502_v3  ;;  %v4774_v39 = vpop.f32.mrf.mxu1 }
 0x9c3   : > { %5228 = vperm.xlu1 %7685, %v8167_v62   ;;  %v5121_v34 = vpop.f32.mrf.mxu0  ;;  %v8169_v18 = vpop.eup %8168 }
 0x9c4   : > { %v3856_v0 = vpop.permute.xlu2 %3855 }
 0x9c5   : > { %3948 = vst.msk [vmem:[#allocation2 + $0x20] sm:$0xff] %vm3943_vm2, %v3856_v0 }
 0x9c7   : > { %3695 = vperm.xlu2 %7686, %v8169_v18   ;;  %v6486_v20 = vpop.permute.xlu1 %6485 }
 0x9c8   : > { %v5032_v24 = vpop.f32.mrf.mxu3  ;;  %6537 = vmatpush.bf16.msrb.mxu1 %v6486_v20 }
 0x9c9   : > { %v4863_v46 = vpop.f32.mrf.mxu2  ;;  %v11344_v5 = vadd.f32 %v5121_v34, %v5032_v24 }
 0x9ca   : > { %v4864_v28 = vadd.f32 %v4863_v46, %v4774_v39  ;;  %v11347_v36 = vpop.f32.mrf.mxu1 }
 0x9cb   : > { %12942 = vst [vmem:[#allocation11_spill] sm:$0xff] %v11344_v5  ;;  %v11349_v17 = vpop.f32.mrf.mxu0 }
 0x9cc   : > { %v3676_v1 = vpop.permute.xlu2 %3675  ;;  %8170 = vrcp.f32 %v4864_v28  ;;  %12944 = vst [vmem:[#allocation28_spill] sm:$0xff] %v11349_v17  ;;  %v12958_v17 = vld [vmem:[#allocation47_spill] sm:$0xff] }
 0x9cd   : > { %v3793_v44 = vmul.f32 %v3676_v1, %v12943_v27  ;;  %8172 = vrcp.f32 %v12945_v29 }
 0x9cf   : > { %3867 = vrot.lane.b32.xlu2 %v3793_v44, %s8471_s24  ;;  %v6484_v63 = vpop.permute.xlu1 %6483 }
 0x9d0   : > { %6538 = vmatpush.bf16.msrb.mxu1 %v6484_v63  ;;  %v11355_v12 = vpop.f32.mrf.mxu3 }
 0x9d1   : > { %v11353_v61 = vpop.f32.mrf.mxu2  ;;  %12946 = vst [vmem:[#allocation31_spill] sm:$0xff] %v11355_v12  ;;  %v12959_v12 = vld [vmem:[#allocation18_spill] sm:$0xff] }
 0x9d2   : > { %v8171_v13 = vpop.eup %8170 }
 0x9d3   : > { %5238 = vperm.xlu1 %7685, %v8171_v13   ;;  %v8173_v25 = vpop.eup %8172 }
 0x9d5   : > { %v4779_v3 = vpop.f32.mrf.mxu1 }
 0x9d7   : > { %v5126_v62 = vpop.f32.mrf.mxu0  ;;  %3705 = vperm.xlu2 %7686, %v8173_v25   ;;  %v3850_v39 = vpop.permute.xlu1 %3849 }
 0x9d8   : > { %3945 = vst.msk [vmem:[#allocation2 + $0x8] sm:$0xff] %vm3943_vm2, %v3850_v39 }
 0x9da   : > { %v4406_v63 = vpop.xlane.xlu0 %4405 }
 0x9dc   : > { %v4868_v0 = vpop.f32.mrf.mxu2  ;;  %v5037_v34 = vpop.f32.mrf.mxu3 }
 0x9dd   : > { %v4869_v18 = vadd.f32 %v4868_v0, %v4779_v3  ;;  %v11358_v20 = vadd.f32 %v5126_v62, %v5037_v34  ;;  %v11360_v24 = vpop.f32.mrf.mxu1 }
 0x9df   : > { %12947 = vst [vmem:[#allocation46_spill] sm:$0xff] %v11358_v20  ;;  %8174 = vrcp.f32 %v4869_v18  ;;  %v11362_v46 = vpop.f32.mrf.mxu0  ;;  %v11364_v28 = vpop.permute.xlu1 %5168 }
 0x9e0   : > { %12948 = vst [vmem:[#allocation26_spill] sm:$0xff] %v11362_v46 }
 0x9e4   : > { %v11366_v1 = vpop.f32.mrf.mxu2  ;;  %v11368_v27 = vpop.f32.mrf.mxu3 }
 0x9e5   : > { %12949 = vst [vmem:[#allocation9_spill] sm:$0xff] %v11368_v27  ;;  %v8175_v44 = vpop.eup %8174  ;;  %v4784_v29 = vpop.f32.mrf.mxu1 }
 0x9e6   : > { %5248 = vperm.xlu1 %7685, %v8175_v44  }
 0x9e7   : > { %v5131_v13 = vpop.f32.mrf.mxu0  ;;  %v5179_v25 = vpop.permute.xlu1 %5178 }
 0x9e8   : > { %v5328_v3 = vmul.f32 %v5179_v25, %v11235_v35  ;;  %v12956_v25 = vld [vmem:[#allocation24_spill] sm:$0xff] }
 0x9ec   : > { %v4873_v62 = vpop.f32.mrf.mxu2  ;;  %v5042_v39 = vpop.f32.mrf.mxu3 }
 0x9ed   : > { %v11371_v0 = vadd.f32 %v4873_v62, %v4784_v29  ;;  %v11373_v34 = vadd.f32 %v5131_v13, %v5042_v39  ;;  %v11375_v18 = vpop.f32.mrf.mxu1  ;;  %v6500_v40 = vpop.permute.xlu0 %6499  ;;  %v12957_v13 = vld [vmem:[#allocation8_spill] sm:$0xff] }
 0x9ee   : > { %12952 = vst [vmem:[#allocation7_spill] sm:$0xff] %v11375_v18  ;;  %5394 = vrot.lane.b32.xlu1 %v5328_v3, %s8468_s20  ;;  %6627 = vmatpush.bf16.msra.mxu2 %v6500_v40  ;;  %v3561_v62 = vadd.f32 %v12957_v13, %v12956_v25  ;;  %v3318_v3 = vadd.f32 %v12959_v12, %v12958_v17 }
 0x9ef   : > { %12950 = vst [vmem:[#allocation113_spill] sm:$0xff] %v11371_v0  ;;  %v11378_v53 = vpop.f32.mrf.mxu0  ;;  %v4470_v17 = vsub.f32 %v11152_v9, %v4406_v63  ;;  %v4471_v12 = vsub.f32 %v11150_v21, %v4406_v63 }
 0x9f0   : > { %12951 = vst [vmem:[#allocation111_spill] sm:$0xff] %v11373_v34  ;;  %8176 = vrcp.f32 %v3318_v3 }
 0x9f1   : > { %12953 = vst [vmem:[#allocation55_spill] sm:$0xff] %v11378_v53 }
 0x9f4   : > { %v11380_v46 = vpop.f32.mrf.mxu2  ;;  %v11382_v44 = vpop.f32.mrf.mxu3 }
 0x9f5   : > { %12954 = vst [vmem:[#allocation108_spill] sm:$0xff] %v11380_v46  ;;  %v4789_v27 = vpop.f32.mrf.mxu1  ;;  %v3848_v35 = vpop.permute.xlu0 %3847 }
 0x9f6   : > { %12955 = vst [vmem:[#allocation44_spill] sm:$0xff] %v11382_v44 }
 0x9f7   : > { %3944 = vst.msk [vmem:[#allocation2] sm:$0xff] %vm3943_vm2, %v3848_v35  ;;  %v5136_v29 = vpop.f32.mrf.mxu0 }
 0x9fc   : > { %v4878_v39 = vpop.f32.mrf.mxu2  ;;  %v5047_v34 = vpop.f32.mrf.mxu3 }
 0x9fd   : > { %v11389_v40 = vadd.f32 %v4878_v39, %v4789_v27  ;;  %v11391_v53 = vadd.f32 %v5136_v29, %v5047_v34  ;;  %v11393_v20 = vpop.f32.mrf.mxu1  ;;  %v3661_v44 = vpop.permute.xlu0 %3660 }
 0x9fe   : > { %12962 = vst [vmem:[#allocation109_spill] sm:$0xff] %v11393_v20  ;;  %v3790_v5 = vmul.f32 %v3661_v44, %v3561_v62  ;;  %v8177_v44 = vpop.eup %8176 }
 0x9ff   : > { %12960 = vst [vmem:[#allocation45_spill] sm:$0xff] %v11389_v40  ;;  %v11395_v46 = vpop.f32.mrf.mxu0  ;;  %v12966_v40 = vld [vmem:[#allocation6_spill] sm:$0xff] }
 0xa00   : > { %12961 = vst [vmem:[#allocation39_spill] sm:$0xff] %v11391_v53  ;;  %3861 = vrot.lane.b32.xlu0 %v3790_v5, %s8471_s24 }
 0xa01   : > { %12963 = vst [vmem:[#allocation115_spill] sm:$0xff] %v11395_v46 }
 0xa04   : > { %v11398_v35 = vpop.f32.mrf.mxu2  ;;  %v11400_v25 = vpop.f32.mrf.mxu3 }
 0xa05   : > { %12964 = vst [vmem:[#allocation114_spill] sm:$0xff] %v11398_v35  ;;  %v4409_v13 = vpop.xlane.xlu2 %4408  ;;  %v3854_v29 = vpop.permute.xlu0 %3853 }
 0xa06   : > { %12965 = vst [vmem:[#allocation14_spill] sm:$0xff] %v11400_v25  ;;  %v4472_v27 = vsub.f32 %v11160_v49, %v4409_v13  ;;  %v4473_v34 = vsub.f32 %v11158_v58, %v4409_v13  ;;  %v4794_v62 = vpop.f32.mrf.mxu1  ;;  %v12967_v58 = vld [vmem:[#allocation40_spill] sm:$0xff] }
 0xa07   : > { %v5141_v39 = vpop.f32.mrf.mxu0  ;;  %3947 = vst.msk [vmem:[#allocation2 + $0x18] sm:$0xff] %vm3943_vm2, %v3854_v29  ;;  %v3566_v13 = vadd.f32 %v12967_v58, %v12966_v40 }
 0xa08   : > { %v4504_v5 = vpack.c.bf16 %v4472_v27, %v4470_v17  ;;  %v4505_v3 = vpack.c.bf16 %v4473_v34, %v4471_v12  ;;  %3690 = vperm.xlu0 %7684, %v8177_v44  }
 0xa0a   : > { %v4566_v46 = vunpack.c.l.bf16 %v4504_v5  ;;  %v4567_v25 = vunpack.c.l.bf16 %v4505_v3  ;;  %v4568_v53 = vunpack.c.h.bf16 %v4504_v5  ;;  %v4569_v35 = vunpack.c.h.bf16 %v4505_v3  ;;  %v12976_v3 = vld [vmem:[#allocation3_spill] sm:$0xff] }
 0xa0c   : > { %v4690_v9 = vmul.f32 1.442695, %v4566_v46  ;;  %v4692_v20 = vmul.f32 1.442695, %v4567_v25  ;;  %v4694_v21 = vmul.f32 1.442695, %v4568_v53  ;;  %v4883_v63 = vpop.f32.mrf.mxu2  ;;  %v5052_v49 = vpop.f32.mrf.mxu3 }
 0xa0d   : > { %v4696_v18 = vmul.f32 1.442695, %v4569_v35  ;;  %v11409_v0 = vadd.f32 %v4883_v63, %v4794_v62  ;;  %v11411_v54 = vadd.f32 %v5141_v39, %v5052_v49  ;;  %v3860_v17 = vpop.permute.xlu2 %3859  ;;  %v3671_v12 = vpop.permute.xlu0 %3670  ;;  %v12970_v46 = vld [vmem:[#allocation60_spill] sm:$0xff]  ;;  %v12971_v25 = vld [vmem:[#allocation23_spill] sm:$0xff] }
 0xa0e   : > { %8178 = vpow2.f32 %v4690_v9  ;;  %3950 = vst.msk [vmem:[#allocation2 + $0x30] sm:$0xff] %vm3943_vm2, %v3860_v17  ;;  %v3792_v27 = vmul.f32 %v3671_v12, %v3566_v13  ;;  %v3323_v53 = vadd.f32 %v12971_v25, %v12970_v46  ;;  %v11416_v34 = vpop.f32.mrf.mxu1  ;;  %v4841_v12 = vadd.f32 %v11267_v59, %v11253_v7 }
 0xa0f   : > { %12968 = vst [vmem:[#allocation27_spill] sm:$0xff] %v11409_v0  ;;  %8180 = vpow2.f32 %v4692_v20  ;;  %v11418_v40 = vpop.f32.mrf.mxu0  ;;  %v4831_v20 = vadd.f32 %v11224_v30, %v11208_v60  ;;  %v4846_v7 = vadd.f32 %v11289_v55, %v11276_v42  ;;  %v4851_v55 = vadd.f32 %v11308_v48, %v11294_v6  ;;  %v13046_v0 = vld [vmem:[#allocation113_spill] sm:$0xff] }
 0xa10   : > { %12969 = vst [vmem:[#allocation33_spill] sm:$0xff] %v11411_v54  ;;  %8182 = vpow2.f32 %v4694_v21  ;;  %3865 = vrot.lane.b32.xlu0 %v3792_v27, %s8471_s24 }
 0xa11   : > { %8184 = vpow2.f32 %v4696_v18  ;;  %12972 = vst [vmem:[#allocation42_spill] sm:$0xff] %v11416_v34 }
 0xa12   : > { %12973 = vst [vmem:[#allocation107_spill] sm:$0xff] %v11418_v40  ;;  %8186 = vrcp.f32 %v3323_v53 }
 0xa13   : > { %8188 = vrcp.f32 %v4831_v20 }
 0xa14   : > { %v8179_v35 = vpop.eup %8178  ;;  %v11421_v29 = vpop.f32.mrf.mxu2  ;;  %8190 = vrcp.f32 %v4841_v12 }
 0xa15   : > { %12974 = vst [vmem:[#allocation43_spill] sm:$0xff] %v11421_v29  ;;  %v11423_v44 = vpop.f32.mrf.mxu3  ;;  %v8181_v62 = vpop.eup %8180 }
 0xa16   : > { %12975 = vst [vmem:[#allocation48_spill] sm:$0xff] %v11423_v44  ;;  %v3686_v39 = vpop.permute.xlu2 %3685  ;;  %v8183_v5 = vpop.eup %8182 }
 0xa17   : > { %v3795_v18 = vmul.f32 %v3686_v39, %v12976_v3  ;;  %v8185_v9 = vpop.eup %8184  ;;  %v4728_v21 = vpack.c.bf16 %v8183_v5, %v8179_v35  ;;  %v4799_v13 = vpop.f32.mrf.mxu1  ;;  %v12979_v35 = vld [vmem:[#allocation17_spill] sm:$0xff]  ;;  %v12981_v39 = vld [vmem:[#allocation68_spill] sm:$0xff] }
 0xa18   : > { %v4729_v63 = vpack.c.bf16 %v8185_v9, %v8181_v62  ;;  %v3858_v49 = vpop.permute.xlu0 %3857  ;;  %v8187_v58 = vpop.eup %8186  ;;  %v12980_v62 = vld [vmem:[#allocation5_spill] sm:$0xff] }
 0xa19   : > { %3871 = vrot.lane.b32.xlu2 %v3795_v18, %s8471_s24  ;;  %4813 = vmatmul.bf16.gmra.mxu1 %v4728_v21  ;;  %3949 = vst.msk [vmem:[#allocation2 + $0x28] sm:$0xff] %vm3943_vm2, %v3858_v49  ;;  %v5146_v60 = vpop.f32.mrf.mxu0  ;;  %v8189_v53 = vpop.eup %8188  ;;  %v3571_v20 = vadd.f32 %v12980_v62, %v12979_v35  ;;  %v12982_v5 = vld [vmem:[#allocation65_spill] sm:$0xff] }
 0xa1a   : > { %5071 = vmatmul.bf16.gmra.mxu3 %v4728_v21  ;;  %4902 = vmatmul.bf16.gmra.mxu2 %v4729_v63  ;;  %v3328_v3 = vadd.f32 %v12982_v5, %v12981_v39  ;;  %v8191_v21 = vpop.eup %8190  ;;  %v11448_v49 = vpop.permute.xlu1 %5183  ;;  %v4856_v5 = vadd.f32 %v11327_v31, %v11318_v16  ;;  %v4861_v31 = vadd.f32 %v11341_v45, %v11332_v23 }
 0xa1b   : > { %5160 = vmatmul.bf16.gmra.mxu0 %v4729_v63  ;;  %3700 = vperm.xlu0 %7684, %v8187_v58   ;;  %v4866_v23 = vadd.f32 %v11353_v61, %v11347_v36  ;;  %v5326_v45 = vmul.f32 %v11364_v28, %v11170_v8  ;;  %v5094_v61 = vadd.f32 %v11237_v52, %v11247_v33  ;;  %v13002_v28 = vld [vmem:[#allocation53_spill] sm:$0xff]  ;;  %v13005_v52 = vld [vmem:[#allocation20_spill] sm:$0xff] }
 0xa1c   : > { %v4888_v30 = vpop.f32.mrf.mxu2  ;;  %8192 = vrcp.f32 %v3328_v3 }
 0xa1d   : > { %v5057_v17 = vpop.f32.mrf.mxu3  ;;  %v11432_v27 = vadd.f32 %v4888_v30, %v4799_v13  ;;  %8194 = vrcp.f32 %v4846_v7  ;;  %v12986_v13 = vld [vmem:[#allocation57_spill] sm:$0xff] }
 0xa1e   : > { %v11434_v46 = vadd.f32 %v5146_v60, %v5057_v17  ;;  %v3864_v25 = vpop.permute.xlu2 %3863  ;;  %8196 = vrcp.f32 %v4851_v55 }
 0xa1f   : > { %12977 = vst [vmem:[#allocation32_spill] sm:$0xff] %v11432_v27  ;;  %v11450_v58 = vpop.f32.mrf.mxu1  ;;  %8198 = vrcp.f32 %v4856_v5 }
 0xa20   : > { %12978 = vst [vmem:[#allocation10_spill] sm:$0xff] %v11434_v46  ;;  %v3681_v18 = vpop.permute.xlu0 %3680  ;;  %8200 = vrcp.f32 %v4861_v31  ;;  %v4871_v31 = vadd.f32 %v11366_v1, %v11360_v24  ;;  %v5329_v24 = vmul.f32 %v11448_v49, %v5094_v61  ;;  %v13006_v49 = vld [vmem:[#allocation41_spill] sm:$0xff]  ;;  %v5089_v61 = vadd.f32 %v11210_v14, %v11222_v37 }
 0xa21   : > { %3952 = vst.msk [vmem:[#allocation2 + $0x40] sm:$0xff] %vm3943_vm2, %v3864_v25  ;;  %5173 = vperm.xlu2 %7686, %v8189_v53   ;;  %v3794_v9 = vmul.f32 %v3681_v18, %v3571_v20  ;;  %v11446_v63 = vpop.f32.mrf.mxu0  ;;  %8202 = vrcp.f32 %v4866_v23  ;;  %v5109_v14 = vadd.f32 %v11296_v32, %v11306_v51 }
 0xa22   : > { %12984 = vst [vmem:[#allocation12_spill] sm:$0xff] %v11446_v63  ;;  %v8193_v60 = vpop.eup %8192  ;;  %v11463_v53 = vpop.permute.xlu1 %5198  ;;  %8204 = vrcp.f32 %v4871_v31  ;;  %v5099_v31 = vadd.f32 %v11255_v47, %v11265_v10  ;;  %v13025_v63 = vld [vmem:[#allocation112_spill] sm:$0xff] }
 0xa23   : > { %3869 = vrot.lane.b32.xlu0 %v3794_v9, %s8471_s24  ;;  %12985 = vst [vmem:[#allocation34_spill] sm:$0xff] %v11450_v58  ;;  %v8195_v12 = vpop.eup %8194  ;;  %v12992_v9 = vld [vmem:[#allocation49_spill] sm:$0xff]  ;;  %8206 = vrcp.f32 %v11251_v2 }
 0xa24   : > { %v11458_v42 = vpop.f32.mrf.mxu2  ;;  %v8197_v6 = vpop.eup %8196 }
 0xa25   : > { %v11456_v30 = vpop.f32.mrf.mxu3  ;;  %12988 = vst [vmem:[#allocation30_spill] sm:$0xff] %v11458_v42 }
 0xa26   : > { %v11444_v59 = vpop.permute.xlu2 %3695  ;;  %12987 = vst [vmem:[#allocation25_spill] sm:$0xff] %v11456_v30 }
 0xa27   : > { %12983 = vst [vmem:[#allocation110_spill] sm:$0xff] %v11444_v59 }
 0xa29   : > { %5193 = vperm.xlu2 %7686, %v8191_v21   ;;  %7571 = vmatmul.msk.bf16.vlgmr.msra.gmra.mxu1 %vm1034_vm1, %v12986_v13 }
 0xa2a   : > { %7587 = vmatmul.msk.bf16.vlgmr.msrb.gmra.mxu2 %vm1034_vm1, %v12986_v13  ;;  %v11471_v48 = vpop.permute.xlu1 %5208  ;;  %v8199_v13 = vpop.eup %8198 }
 0xa2b   : > { %3710 = vperm.xlu0 %7684, %v8193_v60  }
 0xa2d   : > { %v4804_v35 = vpop.f32.mrf.mxu1 }
 0xa2e   : > { %v3868_v17 = vpop.permute.xlu2 %3867  ;;  %v5151_v25 = vpop.f32.mrf.mxu0 }
 0xa2f   : > { %3954 = vst.msk [vmem:[#allocation2 + $0x50] sm:$0xff] %vm3943_vm2, %v3868_v17 }
 0xa31   : > { %5203 = vperm.xlu2 %7686, %v8195_v12  }
 0xa32   : > { %v11487_v60 = vpop.permute.xlu1 %5218 }
 0xa33   : > { %v5062_v62 = vpop.f32.mrf.mxu3 }
 0xa34   : > { %v4893_v20 = vpop.f32.mrf.mxu2  ;;  %v11465_v39 = vadd.f32 %v5151_v25, %v5062_v62 }
 0xa35   : > { %v11469_v3 = vadd.f32 %v4893_v20, %v4804_v35  ;;  %v11477_v7 = vpop.f32.mrf.mxu1  ;;  %v8201_v20 = vpop.eup %8200 }
 0xa36   : > { %12989 = vst [vmem:[#allocation29_spill] sm:$0xff] %v11465_v39  ;;  %v11473_v18 = vpop.f32.mrf.mxu0  ;;  %v11521_v1 = vpop.permute.xlu2 %3705 }
 0xa37   : > { %12990 = vst [vmem:[#allocation4_spill] sm:$0xff] %v11469_v3 }
 0xa38   : > { %12991 = vst [vmem:[#allocation22_spill] sm:$0xff] %v11473_v18 }
 0xa39   : > { %5213 = vperm.xlu2 %7686, %v8197_v6   ;;  %7572 = vmatmul.msk.bf16.gmra.mxu1 %vm1034_vm1, %v12992_v9  ;;  %12993 = vst [vmem:[#allocation15_spill] sm:$0xff] %v11477_v7  ;;  %v12998_v6 = vld [vmem:[#allocation56_spill] sm:$0xff] }
 0xa3a   : > { %7588 = vmatmul.msk.bf16.gmra.mxu2 %vm1034_vm1, %v12992_v9  ;;  %v11493_v5 = vpop.permute.xlu1 %5228  ;;  %13003 = vst [vmem:[#allocation40_spill] sm:$0xff] %v11521_v1 }
 0xa3b   : > { %v11481_v21 = vpop.f32.mrf.mxu3 }
 0xa3c   : > { %12994 = vst [vmem:[#allocation63_spill] sm:$0xff] %v11481_v21  ;;  %v11483_v16 = vpop.f32.mrf.mxu2 }
 0xa3d   : > { %12995 = vst [vmem:[#allocation24_spill] sm:$0xff] %v11483_v16  ;;  %v4809_v12 = vpop.f32.mrf.mxu1 }
 0xa3e   : > { %v5156_v55 = vpop.f32.mrf.mxu0 }
 0xa41   : > { %5223 = vperm.xlu2 %7686, %v8199_v13   ;;  %v8203_v13 = vpop.eup %8202 }
 0xa42   : > { %v8205_v8 = vpop.eup %8204 }
 0xa43   : > { %v5067_v17 = vpop.f32.mrf.mxu3 }
 0xa44   : > { %v4898_v25 = vpop.f32.mrf.mxu2  ;;  %v11489_v35 = vadd.f32 %v5156_v55, %v5067_v17  ;;  %v13001_v17 = vld [vmem:[#allocation62_spill] sm:$0xff] }
 0xa45   : > { %v11491_v62 = vadd.f32 %v4898_v25, %v4809_v12  ;;  %v11503_v9 = vpop.permute.xlu1 %5238 }
 0xa46   : > { %12996 = vst [vmem:[#allocation8_spill] sm:$0xff] %v11489_v35 }
 0xa47   : > { %12997 = vst [vmem:[#allocation47_spill] sm:$0xff] %v11491_v62 }
 0xa48   : > { %12999 = vst [vmem:[#allocation18_spill] sm:$0xff] %v11503_v9 }
 0xa49   : > { %5233 = vperm.xlu2 %7686, %v8201_v20   ;;  %7573 = vmatmul.msk.bf16.gmra.mxu1 %vm1034_vm1, %v12998_v6  ;;  %v13004_v20 = vld [vmem:[#allocation36_spill] sm:$0xff] }
 0xa4a   : > { %7589 = vmatmul.msk.bf16.gmra.mxu2 %vm1034_vm1, %v12998_v6  ;;  %v3576_v33 = vadd.f32 %v13005_v52, %v13004_v20 }
 0xa4b   : > { %v11557_v20 = vpop.f32.mrf.mxu3 }
 0xa4c   : > { %13011 = vst [vmem:[#allocation17_spill] sm:$0xff] %v11557_v20  ;;  %v11559_v52 = vpop.f32.mrf.mxu2 }
 0xa4d   : > { %13012 = vst [vmem:[#allocation5_spill] sm:$0xff] %v11559_v52 }
 0xa51   : > { %5390 = vrot.lane.b32.xlu2 %v5326_v45, %s8468_s20 }
 0xa58   : > { %v11508_v55 = vpop.permute.xlu1 %5248 }
 0xa59   : > { %5243 = vperm.xlu2 %7686, %v8203_v13   ;;  %13000 = vst [vmem:[#allocation6_spill] sm:$0xff] %v11508_v55  ;;  %7574 = vmatmul.msk.bf16.gmra.mxu1 %vm1034_vm1, %v13001_v17 }
 0xa5a   : > { %7590 = vmatmul.msk.bf16.gmra.mxu2 %vm1034_vm1, %v13001_v17 }
 0xa60   : > { %v5395_v36 = vpop.permute.xlu1 %5394 }
 0xa61   : > { %5253 = vperm.xlu2 %7686, %v8205_v8   ;;  %5489 = vst.msk [vmem:[#allocation2 + $0x10] sm:$0xff] %vm5486_vm3, %v5395_v36  ;;  %v8207_v36 = vpop.eup %8206 }
 0xa69   : > { %5396 = vrot.lane.b32.xlu2 %v5329_v24, %s8468_s20  ;;  %7575 = vmatmul.msk.bf16.gmra.mxu1 %vm1034_vm1, %v13002_v28  ;;  %v5104_v24 = vadd.f32 %v11278_v11, %v11286_v56  ;;  %v11555_v56 = vpop.f32.mrf.mxu0 }
 0xa6a   : > { %7591 = vmatmul.msk.bf16.gmra.mxu2 %vm1034_vm1, %v13002_v28  ;;  %v13007_v28 = vld [vmem:[#allocation67_spill] sm:$0xff]  ;;  %13010 = vst [vmem:[#allocation3_spill] sm:$0xff] %v11555_v56 }
 0xa72   : > { %v3862_v25 = vpop.permute.xlu0 %3861 }
 0xa73   : > { %v3872_v12 = vpop.permute.xlu2 %3871  ;;  %3951 = vst.msk [vmem:[#allocation2 + $0x38] sm:$0xff] %vm3943_vm2, %v3862_v25  ;;  %v11551_v25 = vpop.f32.mrf.mxu1 }
 0xa74   : > { %3956 = vst.msk [vmem:[#allocation2 + $0x60] sm:$0xff] %vm3943_vm2, %v3872_v12 }
 0xa75   : > { %13009 = vst [vmem:[#allocation23_spill] sm:$0xff] %v11551_v25  ;;  %v13030_v25 = vld [vmem:[#allocation37_spill] sm:$0xff] }
 0xa79   : > { %7576 = vmatmul.msk.bf16.gmra.mxu1 %vm1034_vm1, %v13006_v49 }
 0xa7a   : > { %7592 = vmatmul.msk.bf16.gmra.mxu2 %vm1034_vm1, %v13006_v49  ;;  %v3691_v23 = vpop.permute.xlu0 %3690 }
 0xa7b   : > { %v5174_v6 = vpop.permute.xlu2 %5173  ;;  %v3796_v45 = vmul.f32 %v3691_v23, %v3576_v33  ;;  %v13013_v23 = vld [vmem:[#allocation101_spill] sm:$0xff] }
 0xa7c   : > { %v5327_v47 = vmul.f32 %v5174_v6, %v5089_v61  ;;  %v5114_v6 = vadd.f32 %v11320_v15, %v11325_v26  ;;  %v5119_v15 = vadd.f32 %v11334_v57, %v11339_v4 }
 0xa7d   : > { %3873 = vrot.lane.b32.xlu0 %v3796_v45, %s8471_s24 }
 0xa82   : > { %v3866_v8 = vpop.permute.xlu0 %3865 }
 0xa83   : > { %v5194_v13 = vpop.permute.xlu2 %5193  ;;  %3953 = vst.msk [vmem:[#allocation2 + $0x48] sm:$0xff] %vm3943_vm2, %v3866_v8 }
 0xa84   : > { %v5331_v17 = vmul.f32 %v5194_v13, %v5099_v31 }
 0xa85   : > { %5188 = vperm.xlu0 %7684, %v8207_v36  }
 0xa86   : > { %5400 = vrot.lane.b32.xlu2 %v5331_v17, %s8468_s20 }
 0xa89   : > { %7577 = vmatmul.msk.bf16.gmra.mxu1 %vm1034_vm1, %v13007_v28 }
 0xa8a   : > { %7593 = vmatmul.msk.bf16.gmra.mxu2 %vm1034_vm1, %v13007_v28 }
 0xa8b   : > { %v5204_v2 = vpop.permute.xlu2 %5203 }
 0xa8c   : > { %v5333_v10 = vmul.f32 %v5204_v2, %v5104_v24 }
 0xa8d   : > { %v11547_v12 = vpop.permute.xlu0 %3700  ;;  %5392 = vrot.lane.b32.xlu0 %v5327_v47, %s8468_s20  ;;  %v13017_v47 = vld [vmem:[#allocation103_spill] sm:$0xff] }
 0xa8e   : > { %13008 = vst [vmem:[#allocation60_spill] sm:$0xff] %v11547_v12  ;;  %5404 = vrot.lane.b32.xlu2 %v5333_v10, %s8468_s20 }
 0xa93   : > { %v5214_v37 = vpop.permute.xlu2 %5213 }
 0xa94   : > { %v5335_v11 = vmul.f32 %v5214_v37, %v5109_v14 }
 0xa95   : > { %v3870_v33 = vpop.permute.xlu0 %3869 }
 0xa96   : > { %5408 = vrot.lane.b32.xlu2 %v5335_v11, %s8468_s20  ;;  %v4814_v49 = vpop.f32.mrf.mxu1  ;;  %3955 = vst.msk [vmem:[#allocation2 + $0x58] sm:$0xff] %vm3943_vm2, %v3870_v33 }
 0xa98   : > { %v5161_v45 = vpop.f32.mrf.mxu0 }
 0xa99   : > { %7578 = vmatmul.msk.bf16.gmra.mxu1 %vm1034_vm1, %v13013_v23 }
 0xa9a   : > { %7594 = vmatmul.msk.bf16.gmra.mxu2 %vm1034_vm1, %v13013_v23 }
 0xa9b   : > { %v5224_v32 = vpop.permute.xlu2 %5223 }
 0xa9c   : > { %v5337_v51 = vmul.f32 %v5224_v32, %v5114_v6 }
 0xa9d   : > { %v5072_v31 = vpop.f32.mrf.mxu3  ;;  %v4903_v13 = vpop.f32.mrf.mxu2 }
 0xa9e   : > { %v11569_v17 = vadd.f32 %v5161_v45, %v5072_v31  ;;  %5412 = vrot.lane.b32.xlu2 %v5337_v51, %s8468_s20  ;;  %v11572_v8 = vadd.f32 %v4903_v13, %v4814_v49  ;;  %v4816_v36 = vpop.f32.mrf.mxu1  ;;  %v13019_v49 = vld [vmem:[#allocation105_spill] sm:$0xff]  ;;  %v11646_v35 = vpop.permute.xlu0 %3710 }
 0xa9f   : > { %v13021_v13 = vld [vmem:[#allocation89_spill] sm:$0xff]  ;;  %13023 = vst [vmem:[#allocation62_spill] sm:$0xff] %v11646_v35 }
 0xaa0   : > { %13014 = vst [vmem:[#allocation68_spill] sm:$0xff] %v11569_v17 }
 0xaa1   : > { %13015 = vst [vmem:[#allocation65_spill] sm:$0xff] %v11572_v8  ;;  %v13024_v8 = vld [vmem:[#allocation106_spill] sm:$0xff] }
 0xaa3   : > { %v5234_v26 = vpop.permute.xlu2 %5233 }
 0xaa4   : > { %v5339_v61 = vmul.f32 %v5234_v26, %v5119_v15 }
 0xaa5   : > { %v4905_v24 = vpop.f32.mrf.mxu2 }
 0xaa6   : > { %5416 = vrot.lane.b32.xlu2 %v5339_v61, %s8468_s20  ;;  %v11577_v28 = vadd.f32 %v4905_v24, %v4816_v36  ;;  %v11579_v2 = vpop.f32.mrf.mxu1 }
 0xaa8   : > { %13016 = vst [vmem:[#allocation57_spill] sm:$0xff] %v11577_v28 }
 0xaa9   : > { %7579 = vmatmul.msk.bf16.gmra.mxu1 %vm1034_vm1, %v13017_v47 }
 0xaaa   : > { %7595 = vmatmul.msk.bf16.gmra.mxu2 %vm1034_vm1, %v13017_v47 }
 0xaab   : > { %v5391_v10 = vpop.permute.xlu2 %5390 }
 0xaac   : > { %5487 = vst.msk [vmem:[#allocation2] sm:$0xff] %vm5486_vm3, %v5391_v10  ;;  %v13022_v10 = vld [vmem:[#allocation104_spill] sm:$0xff] }
 0xaad   : > { %v11586_v14 = vpop.f32.mrf.mxu2 }
 0xaae   : > { %v11588_v57 = vpop.f32.mrf.mxu1 }
 0xab3   : > { %v11590_v4 = vpop.permute.xlu2 %5243 }
 0xab4   : > { %13018 = vst [vmem:[#allocation49_spill] sm:$0xff] %v11590_v4 }
 0xab5   : > { %v11592_v37 = vpop.f32.mrf.mxu2 }
 0xab6   : > { %v5860_v11 = vmax.f32 %v11588_v57, %v11592_v37  ;;  %v11596_v33 = vpop.f32.mrf.mxu1 }
 0xab8   : > { %5861 = vmax.xlane.f32.xlu0 %v5860_v11 }
 0xab9   : > { %7580 = vmatmul.msk.bf16.gmra.mxu1 %vm1034_vm1, %v13019_v49 }
 0xaba   : > { %7596 = vmatmul.msk.bf16.gmra.mxu2 %vm1034_vm1, %v13019_v49 }
 0xabb   : > { %v11602_v6 = vpop.permute.xlu2 %5253 }
 0xabc   : > { %13020 = vst [vmem:[#allocation56_spill] sm:$0xff] %v11602_v6 }
 0xabd   : > { %v11604_v23 = vpop.f32.mrf.mxu2 }
 0xabe   : > { %v11606_v32 = vpop.f32.mrf.mxu1  ;;  %v5863_v36 = vmax.f32 %v11596_v33, %v11604_v23 }
 0xac3   : > { %v5397_v51 = vpop.permute.xlu2 %5396 }
 0xac4   : > { %5490 = vst.msk [vmem:[#allocation2 + $0x18] sm:$0xff] %vm5486_vm3, %v5397_v51 }
 0xac5   : > { %v11609_v45 = vpop.f32.mrf.mxu2 }
 0xac6   : > { %v11611_v31 = vpop.f32.mrf.mxu1 }
 0xac9   : > { %7581 = vmatmul.msk.bf16.gmra.mxu1 %vm1034_vm1, %v13021_v13 }
 0xaca   : > { %7597 = vmatmul.msk.bf16.gmra.mxu2 %vm1034_vm1, %v13021_v13 }
 0xacd   : > { %v11619_v15 = vpop.f32.mrf.mxu2 }
 0xace   : > { %v11621_v26 = vpop.f32.mrf.mxu1  ;;  %v5869_v54 = vmax.f32 %v11611_v31, %v11619_v15 }
 0xacf   : > { %5864 = vmax.xlane.f32.xlu2 %v5863_v36 }
 0xad5   : > { %v11623_v61 = vpop.f32.mrf.mxu2 }
 0xad6   : > { %v5872_v24 = vmax.f32 %v11621_v26, %v11623_v61  ;;  %v11627_v47 = vpop.f32.mrf.mxu1 }
 0xad8   : > { %5873 = vmax.xlane.f32.xlu2 %v5872_v24 }
 0xad9   : > { %7582 = vmatmul.msk.bf16.gmra.mxu1 %vm1034_vm1, %v13022_v10 }
 0xada   : > { %7598 = vmatmul.msk.bf16.gmra.mxu2 %vm1034_vm1, %v13022_v10 }
 0xadd   : > { %v11633_v11 = vpop.f32.mrf.mxu2 }
 0xade   : > { %v5875_v49 = vmax.f32 %v11627_v47, %v11633_v11  ;;  %v11637_v51 = vpop.f32.mrf.mxu1 }
 0xae0   : > { %v5401_v13 = vpop.permute.xlu2 %5400  ;;  %5876 = vmax.xlane.f32.xlu2 %v5875_v49 }
 0xae1   : > { %5492 = vst.msk [vmem:[#allocation2 + $0x28] sm:$0xff] %vm5486_vm3, %v5401_v13 }
 0xae5   : > { %v11640_v36 = vpop.f32.mrf.mxu2 }
 0xae6   : > { %v5878_v24 = vmax.f32 %v11637_v51, %v11640_v36  ;;  %v11644_v17 = vpop.f32.mrf.mxu1 }
 0xae8   : > { %v5405_v10 = vpop.permute.xlu2 %5404  ;;  %5879 = vmax.xlane.f32.xlu0 %v5878_v24 }
 0xae9   : > { %5494 = vst.msk [vmem:[#allocation2 + $0x38] sm:$0xff] %vm5486_vm3, %v5405_v10  ;;  %7583 = vmatmul.msk.bf16.gmra.mxu1 %vm1034_vm1, %v13024_v8 }
 0xaea   : > { %7599 = vmatmul.msk.bf16.gmra.mxu2 %vm1034_vm1, %v13024_v8 }
 0xaed   : > { %v11653_v49 = vpop.f32.mrf.mxu2 }
 0xaee   : > { %v11655_v13 = vpop.f32.mrf.mxu1 }
 0xaef   : > { %v3874_v20 = vpop.permute.xlu0 %3873 }
 0xaf0   : > { %v5409_v56 = vpop.permute.xlu2 %5408  ;;  %3957 = vst.msk [vmem:[#allocation2 + $0x68] sm:$0xff] %vm3943_vm2, %v3874_v20 }
 0xaf1   : > { %5496 = vst.msk [vmem:[#allocation2 + $0x48] sm:$0xff] %vm5486_vm3, %v5409_v56 }
 0xaf5   : > { %v11659_v62 = vpop.f32.mrf.mxu2 }
 0xaf6   : > { %v5884_v24 = vmax.f32 %v11655_v13, %v11659_v62  ;;  %v11663_v10 = vpop.f32.mrf.mxu1 }
 0xaf7   : > { %v5189_v18 = vpop.permute.xlu0 %5188 }
 0xaf8   : > { %v5413_v39 = vpop.permute.xlu2 %5412  ;;  %5885 = vmax.xlane.f32.xlu2 %v5884_v24  ;;  %v5330_v8 = vmul.f32 %v5189_v18, %v11249_v38  ;;  %v5332_v38 = vmul.f32 %v11463_v53, %v11274_v43 }
 0xaf9   : > { %5498 = vst.msk [vmem:[#allocation2 + $0x58] sm:$0xff] %vm5486_vm3, %v5413_v39  ;;  %7584 = vmatmul.msk.bf16.gmra.mxu1 %vm1034_vm1, %v11086_v50 }
 0xafa   : > { %7600 = vmatmul.msk.bf16.gmra.mxu2 %vm1034_vm1, %v11086_v50  ;;  %5398 = vrot.lane.b32.xlu1 %v5330_v8, %s8468_s20  ;;  %v5334_v8 = vmul.f32 %v11471_v48, %v11292_v41 }
 0xafd   : > { %v11672_v56 = vpop.f32.mrf.mxu2 }
 0xafe   : > { %v5887_v20 = vmax.f32 %v11663_v10, %v11672_v56  ;;  %v11676_v21 = vpop.f32.mrf.mxu1 }
 0xaff   : > { %v5393_v28 = vpop.permute.xlu0 %5392 }
 0xb00   : > { %v5417_v24 = vpop.permute.xlu2 %5416  ;;  %5888 = vmax.xlane.f32.xlu2 %v5887_v20  ;;  %5488 = vst.msk [vmem:[#allocation2 + $0x8] sm:$0xff] %vm5486_vm3, %v5393_v28  ;;  %v5336_v28 = vmul.f32 %v11487_v60, %v11316_v22 }
 0xb01   : > { %5500 = vst.msk [vmem:[#allocation2 + $0x68] sm:$0xff] %vm5486_vm3, %v5417_v24  ;;  %v13026_v24 = vld [vmem:[#allocation16_spill] sm:$0xff] }
 0xb02   : > { %5402 = vrot.lane.b32.xlu1 %v5332_v38, %s8468_s20 }
 0xb05   : > { %v11683_v50 = vpop.f32.mrf.mxu2 }
 0xb06   : > { %v5890_v39 = vmax.f32 %v11676_v21, %v11683_v50  ;;  %v11687_v18 = vpop.f32.mrf.mxu1 }
 0xb08   : > { %5891 = vmax.xlane.f32.xlu0 %v5890_v39 }
 0xb09   : > { %7585 = vmatmul.msk.bf16.gmra.mxu1 %vm1034_vm1, %v13025_v63 }
 0xb0a   : > { %7601 = vmatmul.msk.bf16.gmra.mxu2 %vm1034_vm1, %v13025_v63  ;;  %5406 = vrot.lane.b32.xlu1 %v5334_v8, %s8468_s20  ;;  %v5338_v63 = vmul.f32 %v11493_v5, %v11330_v19  ;;  %v13027_v8 = vld [vmem:[#allocation73_spill] sm:$0xff] }
 0xb0d   : > { %v11696_v43 = vpop.f32.mrf.mxu2 }
 0xb0e   : > { %v11698_v53 = vpop.f32.mrf.mxu1  ;;  %v5893_v42 = vmax.f32 %v11687_v18, %v11696_v43 }
 0xb12   : > { %5410 = vrot.lane.b32.xlu1 %v5336_v28, %s8468_s20  ;;  %v13028_v28 = vld [vmem:[#allocation71_spill] sm:$0xff] }
 0xb15   : > { %v11703_v20 = vpop.f32.mrf.mxu2 }
 0xb16   : > { %v5896_v41 = vmax.f32 %v11698_v53, %v11703_v20  ;;  %v11707_v48 = vpop.f32.mrf.mxu1 }
 0xb18   : > { %5897 = vmax.xlane.f32.xlu2 %v5896_v41  ;;  %v3333_v41 = vadd.f32 %v13028_v28, %v13027_v8  ;;  %v5857_v8 = vmax.f32 %v11579_v2, %v11586_v14 }
 0xb19   : > { %7586 = vmatmul.msk.bf16.gmra.mxu1 %vm1034_vm1, %v13026_v24 }
 0xb1a   : > { %7602 = vmatmul.msk.bf16.gmra.mxu2 %vm1034_vm1, %v13026_v24  ;;  %5414 = vrot.lane.b32.xlu1 %v5338_v63, %s8468_s20  ;;  %8208 = vrcp.f32 %v3333_v41 }
 0xb1b   : > { %8210 = vrcp.f32 %v13030_v25 }
 0xb1c   : > { %8212 = vrcp.f32 %v13046_v0 }
 0xb1d   : > { %v11716_v22 = vpop.f32.mrf.mxu2 }
 0xb1e   : > { %v5899_v60 = vmax.f32 %v11707_v48, %v11716_v22  ;;  %v11720_v38 = vpop.f32.mrf.mxu1 }
 0xb20   : > { %5900 = vmax.xlane.f32.xlu0 %v5899_v60  ;;  %v8209_v30 = vpop.eup %8208 }
 0xb25   : > { %v11722_v39 = vpop.f32.mrf.mxu2 }
 0xb26   : > { %v5902_v19 = vmax.f32 %v11720_v38, %v11722_v39  ;;  %v11726_v5 = vpop.f32.mrf.mxu1 }
 0xb28   : > { %5903 = vmax.xlane.f32.xlu2 %v5902_v19  ;;  %v8211_v19 = vpop.eup %8210 }
 0xb2d   : > { %v11730_v63 = vpop.f32.mrf.mxu2 }
 0xb2e   : > { %v11732_v24 = vpop.f32.mrf.mxu1  ;;  %v5905_v7 = vmax.f32 %v11726_v5, %v11730_v63 }
 0xb34   : > { %3720 = vperm.xlu0 %7684, %v8209_v30   ;;  %v5866_v30 = vmax.f32 %v11606_v32, %v11609_v45 }
 0xb35   : > { %v11734_v52 = vpop.f32.mrf.mxu2 }
 0xb36   : > { %v11736_v60 = vpop.f32.mrf.mxu1 }
 0xb37   : > { %13029 = vst [vmem:[#allocation53_spill] sm:$0xff] %v11736_v60 }
 0xb3d   : > { %v11739_v40 = vpop.f32.mrf.mxu2 }
 0xb3e   : > { %13031 = vst [vmem:[#allocation36_spill] sm:$0xff] %v11739_v40  ;;  %v11741_v44 = vpop.f32.mrf.mxu1 }
 0xb3f   : > { %13032 = vst [vmem:[#allocation20_spill] sm:$0xff] %v11741_v44 }
 0xb40   : > { %3715 = vperm.xlu2 %7686, %v8211_v19  }
 0xb42   : > { %v11773_v58 = vpop.xlane.xlu2 %5864 }
 0xb44   : > { %5858 = vmax.xlane.f32.xlu1 %v5857_v8  ;;  %v5881_v8 = vmax.f32 %v11644_v17, %v11653_v49 }
 0xb45   : > { %v11745_v28 = vpop.f32.mrf.mxu2 }
 0xb46   : > { %13033 = vst [vmem:[#allocation41_spill] sm:$0xff] %v11745_v28  ;;  %v11747_v41 = vpop.f32.mrf.mxu1 }
 0xb47   : > { %13034 = vst [vmem:[#allocation67_spill] sm:$0xff] %v11747_v41 }
 0xb4b   : > { %v11788_v27 = vpop.xlane.xlu2 %5873 }
 0xb4c   : > { %5867 = vmax.xlane.f32.xlu1 %v5866_v30 }
 0xb4d   : > { %v11751_v46 = vpop.f32.mrf.mxu2 }
 0xb4e   : > { %13035 = vst [vmem:[#allocation101_spill] sm:$0xff] %v11751_v46  ;;  %v11753_v25 = vpop.f32.mrf.mxu1 }
 0xb4f   : > { %13036 = vst [vmem:[#allocation103_spill] sm:$0xff] %v11753_v25 }
 0xb53   : > { %v11802_v55 = vpop.xlane.xlu2 %5876 }
 0xb54   : > { %5870 = vmax.xlane.f32.xlu1 %v5869_v54  ;;  %v5911_v54 = vmax.f32 %v11736_v60, %v11739_v40  ;;  %v5862_v60 = vpop.xlane.xlu0 %5861 }
 0xb55   : > { %v11757_v19 = vpop.f32.mrf.mxu2 }
 0xb56   : > { %13037 = vst [vmem:[#allocation105_spill] sm:$0xff] %v11757_v19  ;;  %v11759_v16 = vpop.f32.mrf.mxu1 }
 0xb57   : > { %13038 = vst [vmem:[#allocation89_spill] sm:$0xff] %v11759_v16 }
 0xb5c   : > { %5882 = vmax.xlane.f32.xlu1 %v5881_v8  ;;  %v5908_v8 = vmax.f32 %v11732_v24, %v11734_v52 }
 0xb5d   : > { %v11765_v30 = vpop.f32.mrf.mxu2 }
 0xb5e   : > { %13039 = vst [vmem:[#allocation104_spill] sm:$0xff] %v11765_v30  ;;  %5906 = vmax.xlane.f32.xlu0 %v5905_v7  ;;  %v11767_v3 = vpop.f32.mrf.mxu1  ;;  %v5920_v7 = vmax.f32 %v11753_v25, %v11757_v19  ;;  %v5923_v40 = vmax.f32 %v11759_v16, %v11765_v30 }
 0xb5f   : > { %13040 = vst [vmem:[#allocation106_spill] sm:$0xff] %v11767_v3 }
 0xb64   : > { %5894 = vmax.xlane.f32.xlu1 %v5893_v42 }
 0xb65   : > { %v11775_v29 = vpop.f32.mrf.mxu2 }
 0xb66   : > { %13041 = vst [vmem:[#allocation112_spill] sm:$0xff] %v11775_v29  ;;  %5912 = vmax.xlane.f32.xlu0 %v5911_v54  ;;  %v11777_v34 = vpop.f32.mrf.mxu1  ;;  %v5917_v54 = vmax.f32 %v11747_v41, %v11751_v46 }
 0xb67   : > { %13042 = vst [vmem:[#allocation16_spill] sm:$0xff] %v11777_v34 }
 0xb69   : > { %5909 = vmax.xlane.f32.xlu2 %v5908_v8 }
 0xb6c   : > { %v5399_v6 = vpop.permute.xlu1 %5398 }
 0xb6d   : > { %v11783_v1 = vpop.f32.mrf.mxu2  ;;  %5491 = vst.msk [vmem:[#allocation2 + $0x20] sm:$0xff] %vm5486_vm3, %v5399_v6 }
 0xb6e   : > { %13043 = vst [vmem:[#allocation73_spill] sm:$0xff] %v11783_v1  ;;  %5921 = vmax.xlane.f32.xlu0 %v5920_v7  ;;  %v11786_v42 = vpop.f32.mrf.mxu1  ;;  %v5929_v8 = vmax.f32 %v11777_v34, %v11783_v1  ;;  %v5926_v7 = vmax.f32 %v11767_v3, %v11775_v29  ;;  %v13050_v1 = vld [vmem:[#allocation7_spill] sm:$0xff]  ;;  %v13051_v34 = vld [vmem:[#allocation108_spill] sm:$0xff] }
 0xb6f   : > { %13044 = vst [vmem:[#allocation71_spill] sm:$0xff] %v11786_v42  ;;  %v4876_v29 = vadd.f32 %v13051_v34, %v13050_v1 }
 0xb71   : > { %5918 = vmax.xlane.f32.xlu2 %v5917_v54  ;;  %v8213_v54 = vpop.eup %8212  ;;  %8214 = vrcp.f32 %v4876_v29 }
 0xb74   : > { %v5403_v35 = vpop.permute.xlu1 %5402 }
 0xb75   : > { %v11794_v4 = vpop.f32.mrf.mxu2  ;;  %5493 = vst.msk [vmem:[#allocation2 + $0x30] sm:$0xff] %vm5486_vm3, %v5403_v35  ;;  %v11809_v35 = vpop.xlane.xlu2 %5885 }
 0xb76   : > { %13045 = vst [vmem:[#allocation37_spill] sm:$0xff] %v11794_v4  ;;  %5930 = vmax.xlane.f32.xlu0 %v5929_v8  ;;  %v11798_v6 = vpop.f32.mrf.mxu1 }
 0xb77   : > { %v8215_v25 = vpop.eup %8214 }
 0xb79   : > { %5927 = vmax.xlane.f32.xlu2 %v5926_v7 }
 0xb7c   : > { %v5407_v59 = vpop.permute.xlu1 %5406 }
 0xb7d   : > { %v11804_v12 = vpop.f32.mrf.mxu2  ;;  %5495 = vst.msk [vmem:[#allocation2 + $0x40] sm:$0xff] %vm5486_vm3, %v5407_v59  ;;  %5258 = vperm.xlu1 %7685, %v8213_v54   ;;  %v11820_v59 = vpop.xlane.xlu2 %5888 }
 0xb7e   : > { %13047 = vst [vmem:[#allocation113_spill] sm:$0xff] %v11804_v12  ;;  %v11807_v9 = vpop.f32.mrf.mxu1 }
 0xb7f   : > { %13048 = vst [vmem:[#allocation116_spill] sm:$0xff] %v11807_v9 }
 0xb84   : > { %v5411_v0 = vpop.permute.xlu1 %5410 }
 0xb85   : > { %v11811_v8 = vpop.f32.mrf.mxu2  ;;  %5497 = vst.msk [vmem:[#allocation2 + $0x50] sm:$0xff] %vm5486_vm3, %v5411_v0 }
 0xb86   : > { %13049 = vst [vmem:[#allocation117_spill] sm:$0xff] %v11811_v8  ;;  %v5938_v7 = vmax.f32 %v11807_v9, %v11811_v8  ;;  %v11818_v3 = vpop.f32.mrf.mxu1 }
 0xb87   : > { %13052 = vst [vmem:[#allocation7_spill] sm:$0xff] %v11818_v3 }
 0xb88   : > { %5939 = vmax.xlane.f32.xlu0 %v5938_v7 }
 0xb8b   : > { %v11829_v1 = vpop.xlane.xlu2 %5897 }
 0xb8c   : > { %v5415_v54 = vpop.permute.xlu1 %5414 }
 0xb8d   : > { %v11822_v19 = vpop.f32.mrf.mxu2  ;;  %5499 = vst.msk [vmem:[#allocation2 + $0x60] sm:$0xff] %vm5486_vm3, %v5415_v54  ;;  %v13054_v54 = vld [vmem:[#allocation70_spill] sm:$0xff] }
 0xb8e   : > { %13053 = vst [vmem:[#allocation108_spill] sm:$0xff] %v11822_v19  ;;  %v5941_v0 = vmax.f32 %v11818_v3, %v11822_v19  ;;  %v11827_v34 = vpop.f32.mrf.mxu1 }
 0xb90   : > { %5942 = vmax.xlane.f32.xlu0 %v5941_v0  ;;  %v5914_v0 = vmax.f32 %v11741_v44, %v11745_v28  ;;  %v5956_v28 = vsub.f32 %v11592_v37, %v5862_v60  ;;  %v5935_v44 = vmax.f32 %v11798_v6, %v11804_v12 }
 0xb91   : > { %5263 = vperm.xlu2 %7686, %v8215_v25  }
 0xb95   : > { %v11831_v8 = vpop.f32.mrf.mxu2 }
 0xb96   : > { %v11833_v29 = vpop.f32.mrf.mxu1 }
 0xb9b   : > { %v11835_v7 = vpop.xlane.xlu2 %5903 }
 0xb9d   : > { %v11837_v9 = vpop.f32.mrf.mxu2 }
 0xb9e   : > { %v11844_v19 = vpop.f32.mrf.mxu1 }
 0xb9f   : > { %13056 = vst [vmem:[#allocation118_spill] sm:$0xff] %v11844_v19 }
 0xba3   : > { %v3716_v46 = vpop.permute.xlu2 %3715 }
 0xba4   : > { %v11840_v41 = vmul.f32 %v3716_v46, %v13054_v54  ;;  %v5932_v46 = vmax.f32 %v11786_v42, %v11794_v4  ;;  %v5955_v54 = vsub.f32 %v11588_v57, %v5862_v60  ;;  %v5947_v57 = vmax.f32 %v11833_v29, %v11837_v9 }
 0xba5   : > { %v11846_v25 = vpop.f32.mrf.mxu2  ;;  %v5957_v60 = vsub.f32 %v11596_v33, %v11773_v58 }
 0xba6   : > { %13055 = vst [vmem:[#allocation70_spill] sm:$0xff] %v11840_v41  ;;  %v5950_v3 = vmax.f32 %v11844_v19, %v11846_v25 }
 0xba7   : > { %13057 = vst [vmem:[#allocation119_spill] sm:$0xff] %v11846_v25  ;;  %5915 = vmax.xlane.f32.xlu1 %v5914_v0 }
 0xba8   : > { %5951 = vmax.xlane.f32.xlu0 %v5950_v3 }
 0xbaf   : > { %5924 = vmax.xlane.f32.xlu1 %v5923_v40 }
 0xbb7   : > { %5933 = vmax.xlane.f32.xlu1 %v5932_v46  ;;  %v5859_v41 = vpop.xlane.xlu1 %5858 }
 0xbb8   : > { %v5953_v0 = vsub.f32 %v11579_v2, %v5859_v41  ;;  %v5954_v3 = vsub.f32 %v11586_v14, %v5859_v41  ;;  %v5958_v41 = vsub.f32 %v11604_v23, %v11773_v58 }
 0xbba   : > { %5936 = vmax.xlane.f32.xlu2 %v5935_v44  ;;  %v6017_v25 = vpack.c.bf16 %v5955_v54, %v5953_v0  ;;  %v6018_v40 = vpack.c.bf16 %v5956_v28, %v5954_v3  ;;  %v5944_v44 = vmax.f32 %v11827_v34, %v11831_v8 }
 0xbbc   : > { %v6049_v19 = vunpack.c.l.bf16 %v6017_v25  ;;  %v6050_v30 = vunpack.c.l.bf16 %v6018_v40  ;;  %v6051_v16 = vunpack.c.h.bf16 %v6017_v25  ;;  %v6052_v4 = vunpack.c.h.bf16 %v6018_v40 }
 0xbbe   : > { %v6113_v46 = vmul.f32 1.442695, %v6049_v19  ;;  %v6115_v42 = vmul.f32 1.442695, %v6050_v30  ;;  %v6117_v37 = vmul.f32 1.442695, %v6051_v16 }
 0xbbf   : > { %v6119_v12 = vmul.f32 1.442695, %v6052_v4  ;;  %5948 = vmax.xlane.f32.xlu1 %v5947_v57  ;;  %v5868_v2 = vpop.xlane.xlu1 %5867 }
 0xbc0   : > { %8216 = vpow2.f32 %v6113_v46  ;;  %v5959_v14 = vsub.f32 %v11606_v32, %v5868_v2  ;;  %v5960_v28 = vsub.f32 %v11609_v45, %v5868_v2 }
 0xbc1   : > { %8218 = vpow2.f32 %v6115_v42 }
 0xbc2   : > { %8220 = vpow2.f32 %v6117_v37  ;;  %5945 = vmax.xlane.f32.xlu2 %v5944_v44  ;;  %v6019_v16 = vpack.c.bf16 %v5959_v14, %v5957_v60  ;;  %v6020_v33 = vpack.c.bf16 %v5960_v28, %v5958_v41  ;;  %v5963_v37 = vsub.f32 %v11621_v26, %v11788_v27 }
 0xbc3   : > { %8222 = vpow2.f32 %v6119_v12  ;;  %v5964_v60 = vsub.f32 %v11623_v61, %v11788_v27 }
 0xbc4   : > { %v6053_v19 = vunpack.c.l.bf16 %v6019_v16  ;;  %v6054_v25 = vunpack.c.l.bf16 %v6020_v33  ;;  %v6055_v0 = vunpack.c.h.bf16 %v6019_v16  ;;  %v6056_v40 = vunpack.c.h.bf16 %v6020_v33 }
 0xbc6   : > { %v8217_v4 = vpop.eup %8216  ;;  %v6121_v57 = vmul.f32 1.442695, %v6053_v19  ;;  %v6123_v46 = vmul.f32 1.442695, %v6054_v25  ;;  %v6125_v58 = vmul.f32 1.442695, %v6055_v0  ;;  %v5880_v0 = vpop.xlane.xlu0 %5879 }
 0xbc7   : > { %v8219_v30 = vpop.eup %8218  ;;  %v5871_v2 = vpop.xlane.xlu1 %5870  ;;  %v6127_v12 = vmul.f32 1.442695, %v6056_v40  ;;  %v5967_v61 = vsub.f32 %v11637_v51, %v5880_v0  ;;  %v5968_v40 = vsub.f32 %v11640_v36, %v5880_v0 }
 0xbc8   : > { %v8221_v54 = vpop.eup %8220  ;;  %8224 = vpow2.f32 %v6121_v57  ;;  %v5961_v23 = vsub.f32 %v11611_v31, %v5871_v2  ;;  %v5962_v42 = vsub.f32 %v11619_v15, %v5871_v2  ;;  %v5966_v57 = vsub.f32 %v11633_v11, %v11802_v55 }
 0xbc9   : > { %v8223_v3 = vpop.eup %8222  ;;  %v6241_v32 = vpack.c.bf16 %v8221_v54, %v8217_v4  ;;  %8226 = vpow2.f32 %v6123_v46 }
 0xbca   : > { %v6242_v45 = vpack.c.bf16 %v8223_v3, %v8219_v30  ;;  %8228 = vpow2.f32 %v6125_v58  ;;  %v6021_v44 = vpack.c.bf16 %v5963_v37, %v5961_v23  ;;  %v6022_v14 = vpack.c.bf16 %v5964_v60, %v5962_v42 }
 0xbcb   : > { %6281 = vmatmul.bf16.vlgmr.msrb.gmra.mxu3 %v6241_v32  ;;  %6539 = vmatmul.bf16.vlgmr.msrb.gmra.mxu1 %v6241_v32  ;;  %8230 = vpow2.f32 %v6127_v12  ;;  %v5965_v32 = vsub.f32 %v11627_v47, %v11802_v55  ;;  %v6024_v46 = vpack.c.bf16 %v5968_v40, %v5966_v57 }
 0xbcc   : > { %6370 = vmatmul.bf16.vlgmr.msrb.gmra.mxu0 %v6242_v45  ;;  %6628 = vmatmul.bf16.vlgmr.msra.gmra.mxu2 %v6242_v45  ;;  %v6057_v33 = vunpack.c.l.bf16 %v6021_v44  ;;  %v6058_v19 = vunpack.c.l.bf16 %v6022_v14  ;;  %v6059_v31 = vunpack.c.h.bf16 %v6021_v44  ;;  %v6060_v30 = vunpack.c.h.bf16 %v6022_v14 }
 0xbcd   : > { %v6023_v45 = vpack.c.bf16 %v5967_v61, %v5965_v32  ;;  %v6062_v51 = vunpack.c.l.bf16 %v6024_v46  ;;  %v6064_v60 = vunpack.c.h.bf16 %v6024_v46  ;;  %v5974_v46 = vsub.f32 %v11672_v56, %v11820_v59 }
 0xbce   : > { %v8225_v28 = vpop.eup %8224  ;;  %v6129_v15 = vmul.f32 1.442695, %v6057_v33  ;;  %v6131_v26 = vmul.f32 1.442695, %v6058_v19  ;;  %v6133_v3 = vmul.f32 1.442695, %v6059_v31  ;;  %v5971_v33 = vsub.f32 %v11655_v13, %v11809_v35  ;;  %v5892_v40 = vpop.xlane.xlu0 %5891 }
 0xbcf   : > { %v8227_v41 = vpop.eup %8226  ;;  %v6135_v27 = vmul.f32 1.442695, %v6060_v30  ;;  %v6061_v23 = vunpack.c.l.bf16 %v6023_v45  ;;  %v6063_v37 = vunpack.c.h.bf16 %v6023_v45  ;;  %v5883_v47 = vpop.xlane.xlu1 %5882  ;;  %v6143_v55 = vmul.f32 1.442695, %v6064_v60 }
 0xbd0   : > { %v8229_v16 = vpop.eup %8228  ;;  %8232 = vpow2.f32 %v6129_v15  ;;  %v5969_v11 = vsub.f32 %v11644_v17, %v5883_v47  ;;  %v5976_v57 = vsub.f32 %v11683_v50, %v5892_v40  ;;  %v5973_v45 = vsub.f32 %v11663_v10, %v11820_v59 }
 0xbd1   : > { %v8231_v4 = vpop.eup %8230  ;;  %v6243_v25 = vpack.c.bf16 %v8229_v16, %v8225_v28  ;;  %8234 = vpow2.f32 %v6131_v26  ;;  %v6137_v44 = vmul.f32 1.442695, %v6061_v23  ;;  %v6139_v28 = vmul.f32 1.442695, %v6062_v51 }
 0xbd2   : > { %v6244_v54 = vpack.c.bf16 %v8231_v4, %v8227_v41  ;;  %8236 = vpow2.f32 %v6133_v3  ;;  %v6141_v41 = vmul.f32 1.442695, %v6063_v37  ;;  %v5970_v16 = vsub.f32 %v11653_v49, %v5883_v47 }
 0xbd3   : > { %8238 = vpow2.f32 %v6135_v27  ;;  %v5972_v4 = vsub.f32 %v11659_v62, %v11809_v35  ;;  %v6025_v19 = vpack.c.bf16 %v5971_v33, %v5969_v11  ;;  %v5975_v35 = vsub.f32 %v11676_v21, %v5892_v40 }
 0xbd4   : > { %8240 = vpow2.f32 %v6137_v44  ;;  %v5980_v11 = vsub.f32 %v11703_v20, %v11829_v1 }
 0xbd5   : > { %8242 = vpow2.f32 %v6139_v28  ;;  %v6026_v31 = vpack.c.bf16 %v5972_v4, %v5970_v16  ;;  %v6067_v17 = vunpack.c.h.bf16 %v6025_v19 }
 0xbd6   : > { %v8233_v2 = vpop.eup %8232  ;;  %8244 = vpow2.f32 %v6141_v41  ;;  %v5901_v20 = vpop.xlane.xlu0 %5900 }
 0xbd7   : > { %v8235_v58 = vpop.eup %8234  ;;  %8246 = vpow2.f32 %v6143_v55  ;;  %v6066_v26 = vunpack.c.l.bf16 %v6026_v31  ;;  %v6068_v3 = vunpack.c.h.bf16 %v6026_v31  ;;  %v6149_v13 = vmul.f32 1.442695, %v6067_v17  ;;  %v5895_v10 = vpop.xlane.xlu1 %5894 }
 0xbd8   : > { %v8237_v12 = vpop.eup %8236  ;;  %v5977_v59 = vsub.f32 %v11687_v18, %v5895_v10  ;;  %v5978_v41 = vsub.f32 %v11696_v43, %v5895_v10  ;;  %v5979_v55 = vsub.f32 %v11698_v53, %v11829_v1 }
 0xbd9   : > { %v8239_v42 = vpop.eup %8238  ;;  %v6245_v36 = vpack.c.bf16 %v8237_v12, %v8233_v2  ;;  %v6147_v32 = vmul.f32 1.442695, %v6066_v26  ;;  %v6151_v62 = vmul.f32 1.442695, %v6068_v3  ;;  %v6027_v2 = vpack.c.bf16 %v5975_v35, %v5973_v45 }
 0xbda   : > { %v6246_v14 = vpack.c.bf16 %v8239_v42, %v8235_v58  ;;  %v8241_v30 = vpop.eup %8240  ;;  %v6028_v58 = vpack.c.bf16 %v5976_v57, %v5974_v46  ;;  %v6029_v16 = vpack.c.bf16 %v5979_v55, %v5977_v59  ;;  %v6030_v33 = vpack.c.bf16 %v5980_v11, %v5978_v41 }
 0xbdb   : > { %6286 = vmatmul.bf16.gmra.mxu3 %v6243_v25  ;;  %6544 = vmatmul.bf16.gmra.mxu1 %v6243_v25  ;;  %v8243_v25 = vpop.eup %8242  ;;  %v6069_v51 = vunpack.c.l.bf16 %v6027_v2  ;;  %v6071_v60 = vunpack.c.h.bf16 %v6027_v2  ;;  %v5983_v3 = vsub.f32 %v11720_v38, %v11835_v7 }
 0xbdc   : > { %6375 = vmatmul.bf16.gmra.mxu0 %v6244_v54  ;;  %6633 = vmatmul.bf16.gmra.mxu2 %v6244_v54  ;;  %v8245_v15 = vpop.eup %8244  ;;  %v6065_v54 = vunpack.c.l.bf16 %v6025_v19  ;;  %v6070_v21 = vunpack.c.l.bf16 %v6028_v58  ;;  %v6075_v18 = vunpack.c.h.bf16 %v6029_v16 }
 0xbdd   : > { %v8247_v0 = vpop.eup %8246  ;;  %v6247_v27 = vpack.c.bf16 %v8245_v15, %v8241_v30  ;;  %v6153_v44 = vmul.f32 1.442695, %v6069_v51  ;;  %v6157_v47 = vmul.f32 1.442695, %v6071_v60  ;;  %v6073_v30 = vunpack.c.l.bf16 %v6029_v16 }
 0xbde   : > { %v6145_v49 = vmul.f32 1.442695, %v6065_v54  ;;  %v6248_v61 = vpack.c.bf16 %v8247_v0, %v8243_v25  ;;  %v6155_v28 = vmul.f32 1.442695, %v6070_v21  ;;  %v6074_v15 = vunpack.c.l.bf16 %v6030_v33  ;;  %v11906_v35 = vpop.permute.xlu0 %3720 }
 0xbdf   : > { %v6076_v54 = vunpack.c.h.bf16 %v6030_v33  ;;  %v6161_v43 = vmul.f32 1.442695, %v6073_v30  ;;  %v6165_v53 = vmul.f32 1.442695, %v6075_v18  ;;  %v13060_v18 = vld [vmem:[#allocation53_spill] sm:$0xff] }
 0xbe0   : > { %8248 = vpow2.f32 %v6145_v49  ;;  %v6163_v17 = vmul.f32 1.442695, %v6074_v15  ;;  %v5981_v49 = vsub.f32 %v11707_v48, %v5901_v20 }
 0xbe1   : > { %8250 = vpow2.f32 %v6147_v32  ;;  %v6167_v1 = vmul.f32 1.442695, %v6076_v54 }
 0xbe2   : > { %8252 = vpow2.f32 %v6149_v13  ;;  %v6031_v40 = vpack.c.bf16 %v5983_v3, %v5981_v49  ;;  %v11920_v49 = vpop.f32.mrf.mxu3 }
 0xbe3   : > { %8254 = vpow2.f32 %v6151_v62 }
 0xbe4   : > { %8256 = vpow2.f32 %v6153_v44  ;;  %v6077_v45 = vunpack.c.l.bf16 %v6031_v40  ;;  %v6079_v2 = vunpack.c.h.bf16 %v6031_v40 }
 0xbe5   : > { %8258 = vpow2.f32 %v6155_v28 }
 0xbe6   : > { %v8249_v12 = vpop.eup %8248  ;;  %8260 = vpow2.f32 %v6157_v47  ;;  %v5907_v51 = vpop.xlane.xlu0 %5906 }
 0xbe7   : > { %v8251_v23 = vpop.eup %8250  ;;  %v5985_v60 = vsub.f32 %v11726_v5, %v5907_v51 }
 0xbe8   : > { %v8253_v42 = vpop.eup %8252 }
 0xbe9   : > { %v8255_v37 = vpop.eup %8254  ;;  %v6249_v50 = vpack.c.bf16 %v8253_v42, %v8249_v12 }
 0xbea   : > { %v8257_v4 = vpop.eup %8256 }
 0xbeb   : > { %6291 = vmatmul.bf16.gmra.mxu3 %v6245_v36  ;;  %6549 = vmatmul.bf16.gmra.mxu1 %v6245_v36  ;;  %v6072_v36 = vunpack.c.h.bf16 %v6028_v58  ;;  %v8259_v19 = vpop.eup %8258 }
 0xbec   : > { %6380 = vmatmul.bf16.gmra.mxu0 %v6246_v14  ;;  %6638 = vmatmul.bf16.gmra.mxu2 %v6246_v14  ;;  %v6250_v14 = vpack.c.bf16 %v8255_v37, %v8251_v23  ;;  %v8261_v31 = vpop.eup %8260  ;;  %v5910_v23 = vpop.xlane.xlu2 %5909 }
 0xbed   : > { %v6159_v56 = vmul.f32 1.442695, %v6072_v36  ;;  %v6251_v0 = vpack.c.bf16 %v8261_v31, %v8257_v4  ;;  %v5987_v37 = vsub.f32 %v11732_v24, %v5910_v23  ;;  %v5988_v21 = vsub.f32 %v11734_v52, %v5910_v23  ;;  %v13058_v31 = vld [vmem:[#allocation20_spill] sm:$0xff] }
 0xbee   : > { %v5986_v36 = vsub.f32 %v11730_v63, %v5907_v51  ;;  %v5913_v63 = vpop.xlane.xlu0 %5912 }
 0xbef   : > { %8262 = vpow2.f32 %v6159_v56  ;;  %v11912_v44 = vpop.permute.xlu1 %5258  ;;  %v5989_v54 = vsub.f32 %v13060_v18, %v5913_v63 }
 0xbf0   : > { %8264 = vpow2.f32 %v6161_v43 }
 0xbf1   : > { %8266 = vpow2.f32 %v6163_v17 }
 0xbf2   : > { %8268 = vpow2.f32 %v6165_v53 }
 0xbf3   : > { %8270 = vpow2.f32 %v6167_v1 }
 0xbf5   : > { %v8263_v25 = vpop.eup %8262 }
 0xbf6   : > { %v6252_v26 = vpack.c.bf16 %v8263_v25, %v8259_v19  ;;  %v8265_v13 = vpop.eup %8264  ;;  %v13059_v25 = vld [vmem:[#allocation41_spill] sm:$0xff] }
 0xbf7   : > { %v8267_v62 = vpop.eup %8266 }
 0xbf8   : > { %v8269_v57 = vpop.eup %8268 }
 0xbf9   : > { %v8271_v38 = vpop.eup %8270 }
 0xbfa   : > { %v6254_v12 = vpack.c.bf16 %v8271_v38, %v8267_v62 }
 0xbfb   : > { %6296 = vmatmul.bf16.gmra.mxu3 %v6247_v27  ;;  %6554 = vmatmul.bf16.gmra.mxu1 %v6247_v27  ;;  %v5984_v27 = vsub.f32 %v11722_v39, %v11835_v7  ;;  %v6253_v39 = vpack.c.bf16 %v8269_v57, %v8265_v13  ;;  %v6169_v7 = vmul.f32 1.442695, %v6077_v45 }
 0xbfc   : > { %6385 = vmatmul.bf16.gmra.mxu0 %v6248_v61  ;;  %6643 = vmatmul.bf16.gmra.mxu2 %v6248_v61  ;;  %v5982_v61 = vsub.f32 %v11716_v22, %v5901_v20  ;;  %v6173_v22 = vmul.f32 1.442695, %v6079_v2 }
 0xbfd   : > { %8272 = vpow2.f32 %v6169_v7  ;;  %v5922_v7 = vpop.xlane.xlu0 %5921 }
 0xbfe   : > { %v6032_v32 = vpack.c.bf16 %v5984_v27, %v5982_v61 }
 0xc00   : > { %v6078_v46 = vunpack.c.l.bf16 %v6032_v32  ;;  %v6080_v58 = vunpack.c.h.bf16 %v6032_v32 }
 0xc02   : > { %v6171_v48 = vmul.f32 1.442695, %v6078_v46  ;;  %v6175_v42 = vmul.f32 1.442695, %v6080_v58  ;;  %v5919_v46 = vpop.xlane.xlu2 %5918 }
 0xc03   : > { %v8273_v28 = vpop.eup %8272 }
 0xc04   : > { %8274 = vpow2.f32 %v6171_v48  ;;  %v13062_v48 = vld [vmem:[#allocation67_spill] sm:$0xff] }
 0xc05   : > { %8276 = vpow2.f32 %v6173_v22  ;;  %v5993_v23 = vsub.f32 %v13062_v48, %v5919_v46  ;;  %v13063_v22 = vld [vmem:[#allocation101_spill] sm:$0xff] }
 0xc06   : > { %8278 = vpow2.f32 %v6175_v42  ;;  %v5994_v42 = vsub.f32 %v13063_v22, %v5919_v46  ;;  %v13069_v46 = vld [vmem:[#allocation112_spill] sm:$0xff] }
 0xc0a   : > { %v8275_v10 = vpop.eup %8274 }
 0xc0b   : > { %6301 = vmatmul.bf16.gmra.mxu3 %v6249_v50  ;;  %6559 = vmatmul.bf16.gmra.mxu1 %v6249_v50  ;;  %v6033_v50 = vpack.c.bf16 %v5987_v37, %v5985_v60  ;;  %v8277_v47 = vpop.eup %8276  ;;  %v13064_v37 = vld [vmem:[#allocation103_spill] sm:$0xff] }
 0xc0c   : > { %6390 = vmatmul.bf16.gmra.mxu0 %v6250_v14  ;;  %6648 = vmatmul.bf16.gmra.mxu2 %v6250_v14  ;;  %v6034_v14 = vpack.c.bf16 %v5988_v21, %v5986_v36  ;;  %v8279_v59 = vpop.eup %8278  ;;  %v6255_v11 = vpack.c.bf16 %v8277_v47, %v8273_v28  ;;  %v5995_v21 = vsub.f32 %v13064_v37, %v5922_v7 }
 0xc0d   : > { %v6081_v56 = vunpack.c.l.bf16 %v6033_v50  ;;  %v6083_v24 = vunpack.c.h.bf16 %v6033_v50  ;;  %v6256_v33 = vpack.c.bf16 %v8279_v59, %v8275_v10  ;;  %v13065_v50 = vld [vmem:[#allocation105_spill] sm:$0xff] }
 0xc0e   : > { %v6082_v41 = vunpack.c.l.bf16 %v6034_v14  ;;  %v6084_v55 = vunpack.c.h.bf16 %v6034_v14  ;;  %v5996_v14 = vsub.f32 %v13065_v50, %v5922_v7  ;;  %v6037_v47 = vpack.c.bf16 %v5995_v21, %v5993_v23 }
 0xc0f   : > { %v6177_v52 = vmul.f32 1.442695, %v6081_v56  ;;  %v6181_v4 = vmul.f32 1.442695, %v6083_v24 }
 0xc10   : > { %v6179_v5 = vmul.f32 1.442695, %v6082_v41  ;;  %v6183_v19 = vmul.f32 1.442695, %v6084_v55  ;;  %v6038_v59 = vpack.c.bf16 %v5996_v14, %v5994_v42 }
 0xc11   : > { %8280 = vpow2.f32 %v6177_v52 }
 0xc12   : > { %8282 = vpow2.f32 %v6179_v5 }
 0xc13   : > { %8284 = vpow2.f32 %v6181_v4 }
 0xc14   : > { %8286 = vpow2.f32 %v6183_v19 }
 0xc17   : > { %v8281_v20 = vpop.eup %8280 }
 0xc18   : > { %v8283_v1 = vpop.eup %8282 }
 0xc19   : > { %v8285_v27 = vpop.eup %8284 }
 0xc1a   : > { %v5916_v16 = vpop.xlane.xlu1 %5915  ;;  %v8287_v40 = vpop.eup %8286  ;;  %v6257_v38 = vpack.c.bf16 %v8285_v27, %v8281_v20 }
 0xc1b   : > { %6306 = vmatmul.bf16.gmra.mxu3 %v6251_v0  ;;  %6564 = vmatmul.bf16.gmra.mxu1 %v6251_v0  ;;  %v5991_v30 = vsub.f32 %v13058_v31, %v5916_v16  ;;  %v5992_v15 = vsub.f32 %v13059_v25, %v5916_v16  ;;  %v13061_v0 = vld [vmem:[#allocation36_spill] sm:$0xff]  ;;  %v6258_v58 = vpack.c.bf16 %v8287_v40, %v8283_v1  ;;  %v6090_v16 = vunpack.c.l.bf16 %v6038_v59  ;;  %v5928_v1 = vpop.xlane.xlu2 %5927 }
 0xc1c   : > { %6395 = vmatmul.bf16.gmra.mxu0 %v6252_v26  ;;  %6653 = vmatmul.bf16.gmra.mxu2 %v6252_v26  ;;  %v5990_v43 = vsub.f32 %v13061_v0, %v5913_v63  ;;  %v11918_v26 = vpop.f32.mrf.mxu0  ;;  %v6091_v63 = vunpack.c.h.bf16 %v6037_v47  ;;  %v6092_v31 = vunpack.c.h.bf16 %v6038_v59 }
 0xc1d   : > { %v6035_v17 = vpack.c.bf16 %v5991_v30, %v5989_v54  ;;  %v6195_v0 = vmul.f32 1.442695, %v6090_v16 }
 0xc1e   : > { %v6036_v53 = vpack.c.bf16 %v5992_v15, %v5990_v43  ;;  %v6199_v20 = vmul.f32 1.442695, %v6092_v31  ;;  %v13071_v31 = vld [vmem:[#allocation37_spill] sm:$0xff] }
 0xc1f   : > { %v6085_v3 = vunpack.c.l.bf16 %v6035_v17  ;;  %v6087_v32 = vunpack.c.h.bf16 %v6035_v17 }
 0xc20   : > { %v6086_v61 = vunpack.c.l.bf16 %v6036_v53  ;;  %v6088_v13 = vunpack.c.h.bf16 %v6036_v53  ;;  %v6197_v53 = vmul.f32 1.442695, %v6091_v63 }
 0xc21   : > { %v6185_v57 = vmul.f32 1.442695, %v6085_v3  ;;  %v13066_v3 = vld [vmem:[#allocation89_spill] sm:$0xff] }
 0xc22   : > { %v6187_v2 = vmul.f32 1.442695, %v6086_v61  ;;  %v5925_v43 = vpop.xlane.xlu1 %5924  ;;  %v13067_v61 = vld [vmem:[#allocation104_spill] sm:$0xff] }
 0xc23   : > { %8288 = vpow2.f32 %v6185_v57  ;;  %v5997_v27 = vsub.f32 %v13066_v3, %v5925_v43  ;;  %v5998_v40 = vsub.f32 %v13067_v61, %v5925_v43  ;;  %v11944_v61 = vpop.permute.xlu2 %5263 }
 0xc24   : > { %8290 = vpow2.f32 %v6187_v2  ;;  %v6000_v2 = vsub.f32 %v13069_v46, %v5928_v1 }
 0xc26   : > { %v6040_v48 = vpack.c.bf16 %v6000_v2, %v5998_v40 }
 0xc28   : > { %v6094_v21 = vunpack.c.l.bf16 %v6040_v48 }
 0xc29   : > { %v8289_v41 = vpop.eup %8288 }
 0xc2a   : > { %v8291_v24 = vpop.eup %8290 }
 0xc2b   : > { %6311 = vmatmul.bf16.gmra.mxu3 %v6253_v39  ;;  %6569 = vmatmul.bf16.gmra.mxu1 %v6253_v39  ;;  %v6189_v39 = vmul.f32 1.442695, %v6087_v32 }
 0xc2c   : > { %6400 = vmatmul.bf16.gmra.mxu0 %v6254_v12  ;;  %6658 = vmatmul.bf16.gmra.mxu2 %v6254_v12  ;;  %v6191_v12 = vmul.f32 1.442695, %v6088_v13 }
 0xc2d   : > { %8292 = vpow2.f32 %v6189_v39 }
 0xc2e   : > { %8294 = vpow2.f32 %v6191_v12 }
 0xc33   : > { %v8293_v55 = vpop.eup %8292 }
 0xc34   : > { %v8295_v52 = vpop.eup %8294  ;;  %v6259_v54 = vpack.c.bf16 %v8293_v55, %v8289_v41 }
 0xc35   : > { %v6260_v17 = vpack.c.bf16 %v8295_v52, %v8291_v24  ;;  %v5934_v52 = vpop.xlane.xlu1 %5933 }
 0xc3b   : > { %6316 = vmatmul.bf16.gmra.mxu3 %v6255_v11  ;;  %6574 = vmatmul.bf16.gmra.mxu1 %v6255_v11  ;;  %v6089_v11 = vunpack.c.l.bf16 %v6037_v47  ;;  %v6096_v47 = vunpack.c.h.bf16 %v6040_v48 }
 0xc3c   : > { %6405 = vmatmul.bf16.gmra.mxu0 %v6256_v33  ;;  %6663 = vmatmul.bf16.gmra.mxu2 %v6256_v33 }
 0xc3d   : > { %v6193_v15 = vmul.f32 1.442695, %v6089_v11  ;;  %v6203_v11 = vmul.f32 1.442695, %v6094_v21  ;;  %v6207_v63 = vmul.f32 1.442695, %v6096_v47  ;;  %v5937_v21 = vpop.xlane.xlu2 %5936 }
 0xc3e   : > { %v6005_v47 = vsub.f32 %v11798_v6, %v5937_v21 }
 0xc48   : > { %v6540_v62 = vpop.f32.mrf.mxu1 }
 0xc49   : > { %v6371_v45 = vpop.f32.mrf.mxu0 }
 0xc4b   : > { %6321 = vmatmul.bf16.gmra.mxu3 %v6257_v38  ;;  %6579 = vmatmul.bf16.gmra.mxu1 %v6257_v38 }
 0xc4c   : > { %6410 = vmatmul.bf16.gmra.mxu0 %v6258_v58  ;;  %6668 = vmatmul.bf16.gmra.mxu2 %v6258_v58 }
 0xc4e   : > { %v6282_v51 = vpop.f32.mrf.mxu3 }
 0xc4f   : > { %v6372_v60 = vadd.f32 %v6371_v45, %v6282_v51  ;;  %v6629_v36 = vpop.f32.mrf.mxu2 }
 0xc50   : > { %v11926_v28 = vadd.f32 %v6629_v36, %v6540_v62  ;;  %v6542_v10 = vpop.f32.mrf.mxu1  ;;  %v13068_v62 = vld [vmem:[#allocation106_spill] sm:$0xff] }
 0xc51   : > { %8296 = vrcp.f32 %v6372_v60  ;;  %v6373_v56 = vpop.f32.mrf.mxu0  ;;  %v5999_v57 = vsub.f32 %v13068_v62, %v5928_v1 }
 0xc53   : > { %v6039_v7 = vpack.c.bf16 %v5999_v57, %v5997_v27 }
 0xc55   : > { %v6093_v51 = vunpack.c.l.bf16 %v6039_v7  ;;  %v6095_v50 = vunpack.c.h.bf16 %v6039_v7 }
 0xc56   : > { %v6284_v33 = vpop.f32.mrf.mxu3 }
 0xc57   : > { %v8297_v5 = vpop.eup %8296  ;;  %v6374_v4 = vadd.f32 %v6373_v56, %v6284_v33  ;;  %v6631_v19 = vpop.f32.mrf.mxu2  ;;  %v6201_v59 = vmul.f32 1.442695, %v6093_v51  ;;  %v6205_v33 = vmul.f32 1.442695, %v6095_v50 }
 0xc58   : > { %v11928_v30 = vadd.f32 %v6631_v19, %v6542_v10  ;;  %6711 = vperm.xlu0 %7684, %v8297_v5   ;;  %v6545_v25 = vpop.f32.mrf.mxu1  ;;  %v5931_v5 = vpop.xlane.xlu0 %5930 }
 0xc59   : > { %8298 = vrcp.f32 %v6374_v4  ;;  %v6376_v18 = vpop.f32.mrf.mxu0  ;;  %v13070_v4 = vld [vmem:[#allocation71_spill] sm:$0xff] }
 0xc5a   : > { %8300 = vpow2.f32 %v6193_v15  ;;  %v6003_v19 = vsub.f32 %v13070_v4, %v5934_v52 }
 0xc5b   : > { %6326 = vmatmul.bf16.gmra.mxu3 %v6259_v54  ;;  %6584 = vmatmul.bf16.gmra.mxu1 %v6259_v54  ;;  %8302 = vpow2.f32 %v6195_v0  ;;  %v13072_v54 = vld [vmem:[#allocation16_spill] sm:$0xff] }
 0xc5c   : > { %6415 = vmatmul.bf16.gmra.mxu0 %v6260_v17  ;;  %6673 = vmatmul.bf16.gmra.mxu2 %v6260_v17  ;;  %8304 = vpow2.f32 %v6197_v53  ;;  %v6001_v0 = vsub.f32 %v13072_v54, %v5931_v5  ;;  %v13073_v53 = vld [vmem:[#allocation73_spill] sm:$0xff] }
 0xc5d   : > { %8306 = vpow2.f32 %v6199_v20  ;;  %v6002_v20 = vsub.f32 %v13073_v53, %v5931_v5 }
 0xc5e   : > { %v6287_v32 = vpop.f32.mrf.mxu3  ;;  %v6041_v3 = vpack.c.bf16 %v6003_v19, %v6001_v0 }
 0xc5f   : > { %v8299_v13 = vpop.eup %8298  ;;  %v6377_v45 = vadd.f32 %v6376_v18, %v6287_v32  ;;  %v6634_v38 = vpop.f32.mrf.mxu2 }
 0xc60   : > { %v11934_v58 = vadd.f32 %v6634_v38, %v6545_v25  ;;  %6716 = vperm.xlu1 %7685, %v8299_v13   ;;  %v6547_v39 = vpop.f32.mrf.mxu1  ;;  %v8301_v23 = vpop.eup %8300  ;;  %v6004_v25 = vsub.f32 %v13071_v31, %v5934_v52  ;;  %v6099_v7 = vunpack.c.h.bf16 %v6041_v3  ;;  %v13075_v52 = vld [vmem:[#allocation116_spill] sm:$0xff] }
 0xc61   : > { %8308 = vrcp.f32 %v6377_v45  ;;  %v6378_v12 = vpop.f32.mrf.mxu0  ;;  %v8303_v22 = vpop.eup %8302  ;;  %v6097_v45 = vunpack.c.l.bf16 %v6041_v3 }
 0xc62   : > { %v8305_v42 = vpop.eup %8304  ;;  %v6042_v40 = vpack.c.bf16 %v6004_v25, %v6002_v20  ;;  %v6213_v50 = vmul.f32 1.442695, %v6099_v7 }
 0xc63   : > { %v8307_v37 = vpop.eup %8306  ;;  %v6261_v55 = vpack.c.bf16 %v8305_v42, %v8301_v23  ;;  %v6209_v42 = vmul.f32 1.442695, %v6097_v45 }
 0xc64   : > { %v6262_v16 = vpack.c.bf16 %v8307_v37, %v8303_v22  ;;  %v6098_v46 = vunpack.c.l.bf16 %v6042_v40  ;;  %v6100_v23 = vunpack.c.h.bf16 %v6042_v40 }
 0xc66   : > { %v6289_v60 = vpop.f32.mrf.mxu3 }
 0xc67   : > { %v8309_v36 = vpop.eup %8308  ;;  %v6379_v14 = vadd.f32 %v6378_v12, %v6289_v60  ;;  %v6636_v10 = vpop.f32.mrf.mxu2  ;;  %v6211_v60 = vmul.f32 1.442695, %v6098_v46 }
 0xc68   : > { %v11936_v56 = vadd.f32 %v6636_v10, %v6547_v39  ;;  %6721 = vperm.xlu1 %7685, %v8309_v36   ;;  %v6550_v24 = vpop.f32.mrf.mxu1  ;;  %v6215_v10 = vmul.f32 1.442695, %v6100_v23 }
 0xc69   : > { %8310 = vrcp.f32 %v6379_v14  ;;  %v6381_v41 = vpop.f32.mrf.mxu0  ;;  %v5940_v14 = vpop.xlane.xlu0 %5939 }
 0xc6a   : > { %8312 = vpow2.f32 %v6201_v59 }
 0xc6b   : > { %6331 = vmatmul.bf16.gmra.mxu3 %v6261_v55  ;;  %6589 = vmatmul.bf16.gmra.mxu1 %v6261_v55  ;;  %8314 = vpow2.f32 %v6203_v11 }
 0xc6c   : > { %6420 = vmatmul.bf16.gmra.mxu0 %v6262_v16  ;;  %6678 = vmatmul.bf16.gmra.mxu2 %v6262_v16  ;;  %8316 = vpow2.f32 %v6205_v33  ;;  %v6007_v16 = vsub.f32 %v13075_v52, %v5940_v14 }
 0xc6d   : > { %8318 = vpow2.f32 %v6207_v63  ;;  %v13076_v63 = vld [vmem:[#allocation117_spill] sm:$0xff] }
 0xc6e   : > { %v6292_v15 = vpop.f32.mrf.mxu3  ;;  %v6008_v4 = vsub.f32 %v13076_v63, %v5940_v14  ;;  %v6043_v31 = vpack.c.bf16 %v6007_v16, %v6005_v47 }
 0xc6f   : > { %v8311_v18 = vpop.eup %8310  ;;  %v6382_v43 = vadd.f32 %v6381_v41, %v6292_v15  ;;  %v6639_v17 = vpop.f32.mrf.mxu2  ;;  %v13074_v41 = vld [vmem:[#allocation113_spill] sm:$0xff] }
 0xc70   : > { %v11942_v1 = vadd.f32 %v6639_v17, %v6550_v24  ;;  %6726 = vperm.xlu1 %7685, %v8311_v18   ;;  %v8313_v32 = vpop.eup %8312  ;;  %v6552_v13 = vpop.f32.mrf.mxu1  ;;  %v6006_v24 = vsub.f32 %v13074_v41, %v5937_v21  ;;  %v6101_v0 = vunpack.c.l.bf16 %v6043_v31  ;;  %v6103_v3 = vunpack.c.h.bf16 %v6043_v31  ;;  %v13077_v21 = vld [vmem:[#allocation7_spill] sm:$0xff] }
 0xc71   : > { %8320 = vrcp.f32 %v6382_v43  ;;  %v6383_v27 = vpop.f32.mrf.mxu0  ;;  %v8315_v62 = vpop.eup %8314 }
 0xc72   : > { %v8317_v57 = vpop.eup %8316  ;;  %v6044_v25 = vpack.c.bf16 %v6008_v4, %v6006_v24  ;;  %v6221_v7 = vmul.f32 1.442695, %v6103_v3 }
 0xc73   : > { %v8319_v38 = vpop.eup %8318  ;;  %v6263_v37 = vpack.c.bf16 %v8317_v57, %v8313_v32  ;;  %v6217_v57 = vmul.f32 1.442695, %v6101_v0 }
 0xc74   : > { %v6264_v36 = vpack.c.bf16 %v8319_v38, %v8315_v62  ;;  %v6102_v17 = vunpack.c.l.bf16 %v6044_v25 }
 0xc76   : > { %v6294_v2 = vpop.f32.mrf.mxu3  ;;  %v6219_v46 = vmul.f32 1.442695, %v6102_v17 }
 0xc77   : > { %v8321_v39 = vpop.eup %8320  ;;  %v6384_v12 = vadd.f32 %v6383_v27, %v6294_v2  ;;  %v6641_v48 = vpop.f32.mrf.mxu2 }
 0xc78   : > { %v11946_v22 = vadd.f32 %v6641_v48, %v6552_v13  ;;  %6731 = vperm.xlu0 %7684, %v8321_v39   ;;  %v6555_v59 = vpop.f32.mrf.mxu1  ;;  %v6104_v13 = vunpack.c.h.bf16 %v6044_v25  ;;  %v5946_v2 = vpop.xlane.xlu2 %5945 }
 0xc79   : > { %8322 = vrcp.f32 %v6384_v12  ;;  %v6386_v51 = vpop.f32.mrf.mxu0  ;;  %v5943_v12 = vpop.xlane.xlu0 %5942  ;;  %v6011_v23 = vsub.f32 %v11827_v34, %v5946_v2 }
 0xc7a   : > { %8324 = vpow2.f32 %v6209_v42  ;;  %v6223_v48 = vmul.f32 1.442695, %v6104_v13  ;;  %v6012_v42 = vsub.f32 %v11831_v8, %v5946_v2  ;;  %v13080_v13 = vld [vmem:[#allocation119_spill] sm:$0xff] }
 0xc7b   : > { %6336 = vmatmul.bf16.gmra.mxu3 %v6263_v37  ;;  %6594 = vmatmul.bf16.gmra.mxu1 %v6263_v37  ;;  %8326 = vpow2.f32 %v6211_v60  ;;  %v6009_v60 = vsub.f32 %v13077_v21, %v5943_v12 }
 0xc7c   : > { %6425 = vmatmul.bf16.gmra.mxu0 %v6264_v36  ;;  %6683 = vmatmul.bf16.gmra.mxu2 %v6264_v36  ;;  %8328 = vpow2.f32 %v6213_v50  ;;  %v13078_v50 = vld [vmem:[#allocation108_spill] sm:$0xff] }
 0xc7d   : > { %8330 = vpow2.f32 %v6215_v10  ;;  %v6010_v14 = vsub.f32 %v13078_v50, %v5943_v12  ;;  %v6045_v10 = vpack.c.bf16 %v6011_v23, %v6009_v60 }
 0xc7e   : > { %v6297_v55 = vpop.f32.mrf.mxu3 }
 0xc7f   : > { %v8323_v11 = vpop.eup %8322  ;;  %v6387_v33 = vadd.f32 %v6386_v51, %v6297_v55  ;;  %v6644_v5 = vpop.f32.mrf.mxu2  ;;  %v6105_v55 = vunpack.c.l.bf16 %v6045_v10 }
 0xc80   : > { %v11952_v19 = vadd.f32 %v6644_v5, %v6555_v59  ;;  %6736 = vperm.xlu2 %7686, %v8323_v11   ;;  %v8325_v15 = vpop.eup %8324  ;;  %v6557_v27 = vpop.f32.mrf.mxu1  ;;  %v6046_v59 = vpack.c.bf16 %v6012_v42, %v6010_v14 }
 0xc81   : > { %8332 = vrcp.f32 %v6387_v33  ;;  %v6388_v6 = vpop.f32.mrf.mxu0  ;;  %v8327_v18 = vpop.eup %8326  ;;  %v6107_v33 = vunpack.c.h.bf16 %v6045_v10  ;;  %v6225_v4 = vmul.f32 1.442695, %v6105_v55 }
 0xc82   : > { %v8329_v54 = vpop.eup %8328  ;;  %v6106_v8 = vunpack.c.l.bf16 %v6046_v59  ;;  %v6108_v63 = vunpack.c.h.bf16 %v6046_v59  ;;  %v5952_v0 = vpop.xlane.xlu0 %5951 }
 0xc83   : > { %v8331_v43 = vpop.eup %8330  ;;  %v6265_v38 = vpack.c.bf16 %v8329_v54, %v8325_v15  ;;  %v5949_v15 = vpop.xlane.xlu1 %5948  ;;  %v6229_v54 = vmul.f32 1.442695, %v6107_v33 }
 0xc84   : > { %v6266_v39 = vpack.c.bf16 %v8331_v43, %v8327_v18  ;;  %v6227_v25 = vmul.f32 1.442695, %v6106_v8  ;;  %v6231_v43 = vmul.f32 1.442695, %v6108_v63  ;;  %v6013_v17 = vsub.f32 %v11833_v29, %v5949_v15 }
 0xc86   : > { %v6299_v53 = vpop.f32.mrf.mxu3 }
 0xc87   : > { %v8333_v20 = vpop.eup %8332  ;;  %v6389_v40 = vadd.f32 %v6388_v6, %v6299_v53  ;;  %v6646_v32 = vpop.f32.mrf.mxu2  ;;  %v6014_v53 = vsub.f32 %v11837_v9, %v5949_v15 }
 0xc88   : > { %v11954_v62 = vadd.f32 %v6646_v32, %v6557_v27  ;;  %6741 = vperm.xlu0 %7684, %v8333_v20   ;;  %v13079_v27 = vld [vmem:[#allocation118_spill] sm:$0xff] }
 0xc89   : > { %8334 = vrcp.f32 %v6389_v40  ;;  %v6391_v45 = vpop.f32.mrf.mxu0  ;;  %v6015_v40 = vsub.f32 %v13079_v27, %v5952_v0  ;;  %v13085_v27 = vld [vmem:[#allocation61_spill] sm:$0xff] }
 0xc8a   : > { %8336 = vpow2.f32 %v6217_v57  ;;  %v6016_v57 = vsub.f32 %v13080_v13, %v5952_v0  ;;  %v13087_v13 = vld [vmem:[#allocation76_spill] sm:$0xff] }
 0xc8b   : > { %6341 = vmatmul.bf16.gmra.mxu3 %v6265_v38  ;;  %6599 = vmatmul.bf16.gmra.mxu1 %v6265_v38  ;;  %8338 = vpow2.f32 %v6219_v46 }
 0xc8c   : > { %6430 = vmatmul.bf16.gmra.mxu0 %v6266_v39  ;;  %6688 = vmatmul.bf16.gmra.mxu2 %v6266_v39  ;;  %8340 = vpow2.f32 %v6221_v7  ;;  %v6048_v46 = vpack.c.bf16 %v6016_v57, %v6014_v53 }
 0xc8d   : > { %8342 = vpow2.f32 %v6223_v48 }
 0xc8e   : > { %v6302_v51 = vpop.f32.mrf.mxu3  ;;  %v6110_v9 = vunpack.c.l.bf16 %v6048_v46 }
 0xc8f   : > { %v8335_v37 = vpop.eup %8334  ;;  %v6392_v36 = vadd.f32 %v6391_v45, %v6302_v51  ;;  %v6047_v45 = vpack.c.bf16 %v6015_v40, %v6013_v17  ;;  %v13083_v17 = vld [vmem:[#allocation45_spill] sm:$0xff] }
 0xc90   : > { %6746 = vperm.xlu1 %7685, %v8335_v37   ;;  %v8337_v41 = vpop.eup %8336  ;;  %v6112_v37 = vunpack.c.h.bf16 %v6048_v46 }
 0xc91   : > { %8344 = vrcp.f32 %v6392_v36  ;;  %v6393_v47 = vpop.f32.mrf.mxu0  ;;  %v8339_v24 = vpop.eup %8338  ;;  %v6109_v7 = vunpack.c.l.bf16 %v6047_v45  ;;  %v6111_v42 = vunpack.c.h.bf16 %v6047_v45  ;;  %v6235_v36 = vmul.f32 1.442695, %v6110_v9  ;;  %v13088_v45 = vld [vmem:[#allocation60_spill] sm:$0xff]  ;;  %v13092_v9 = vld [vmem:[#allocation6_spill] sm:$0xff] }
 0xc92   : > { %v8341_v34 = vpop.eup %8340 }
 0xc93   : > { %v8343_v11 = vpop.eup %8342  ;;  %v6267_v6 = vpack.c.bf16 %v8341_v34, %v8337_v41  ;;  %v6233_v21 = vmul.f32 1.442695, %v6109_v7  ;;  %v6237_v10 = vmul.f32 1.442695, %v6111_v42  ;;  %v13093_v42 = vld [vmem:[#allocation31_spill] sm:$0xff] }
 0xc94   : > { %v6268_v18 = vpack.c.bf16 %v8343_v11, %v8339_v24 }
 0xc96   : > { %v6304_v52 = vpop.f32.mrf.mxu3 }
 0xc97   : > { %v8345_v16 = vpop.eup %8344  ;;  %v6394_v5 = vadd.f32 %v6393_v47, %v6304_v52  ;;  %v6239_v47 = vmul.f32 1.442695, %v6112_v37 }
 0xc98   : > { %6751 = vperm.xlu0 %7684, %v8345_v16  }
 0xc99   : > { %8346 = vrcp.f32 %v6394_v5  ;;  %v6396_v31 = vpop.f32.mrf.mxu0 }
 0xc9a   : > { %8348 = vpow2.f32 %v6225_v4 }
 0xc9b   : > { %6346 = vmatmul.bf16.gmra.mxu3 %v6267_v6  ;;  %6604 = vmatmul.bf16.gmra.mxu1 %v6267_v6  ;;  %8350 = vpow2.f32 %v6227_v25 }
 0xc9c   : > { %6435 = vmatmul.bf16.gmra.mxu0 %v6268_v18  ;;  %6693 = vmatmul.bf16.gmra.mxu2 %v6268_v18  ;;  %8352 = vpow2.f32 %v6229_v54  ;;  %v13081_v18 = vld [vmem:[#allocation11_spill] sm:$0xff]  ;;  %v13082_v54 = vld [vmem:[#allocation18_spill] sm:$0xff] }
 0xc9d   : > { %8354 = vpow2.f32 %v6231_v43  ;;  %v5340_v0 = vmul.f32 %v13082_v54, %v13081_v18 }
 0xc9e   : > { %v6307_v20 = vpop.f32.mrf.mxu3 }
 0xc9f   : > { %v8347_v3 = vpop.eup %8346  ;;  %v6397_v32 = vadd.f32 %v6396_v31, %v6307_v20 }
 0xca0   : > { %6756 = vperm.xlu1 %7685, %v8347_v3   ;;  %v8349_v2 = vpop.eup %8348  ;;  %v13084_v3 = vld [vmem:[#allocation21_spill] sm:$0xff] }
 0xca1   : > { %8356 = vrcp.f32 %v6397_v32  ;;  %v6398_v38 = vpop.f32.mrf.mxu0  ;;  %v8351_v39 = vpop.eup %8350  ;;  %v3581_v40 = vadd.f32 %v13085_v27, %v13084_v3  ;;  %v13086_v32 = vld [vmem:[#allocation78_spill] sm:$0xff]  ;;  %v13111_v27 = vld [vmem:[#allocation64_spill] sm:$0xff] }
 0xca2   : > { %v8353_v29 = vpop.eup %8352  ;;  %v3338_v57 = vadd.f32 %v13087_v13, %v13086_v32  ;;  %v13113_v13 = vld [vmem:[#allocation9_spill] sm:$0xff] }
 0xca3   : > { %v8355_v12 = vpop.eup %8354  ;;  %v6269_v60 = vpack.c.bf16 %v8353_v29, %v8349_v2  ;;  %v13090_v29 = vld [vmem:[#allocation110_spill] sm:$0xff] }
 0xca4   : > { %v6270_v14 = vpack.c.bf16 %v8355_v12, %v8351_v39  ;;  %v13089_v39 = vld [vmem:[#allocation35_spill] sm:$0xff]  ;;  %v13091_v12 = vld [vmem:[#allocation46_spill] sm:$0xff] }
 0xca5   : > { %v3797_v7 = vmul.f32 %v13090_v29, %v13089_v39  ;;  %v13116_v39 = vld [vmem:[#allocation80_spill] sm:$0xff]  ;;  %v13117_v29 = vld [vmem:[#allocation42_spill] sm:$0xff] }
 0xca6   : > { %v6309_v48 = vpop.f32.mrf.mxu3 }
 0xca7   : > { %v8357_v23 = vpop.eup %8356  ;;  %v6399_v51 = vadd.f32 %v6398_v38, %v6309_v48  ;;  %v3798_v38 = vmul.f32 %v13088_v45, %v3581_v40  ;;  %v5342_v48 = vmul.f32 %v13092_v9, %v13091_v12  ;;  %v13112_v40 = vld [vmem:[#allocation40_spill] sm:$0xff] }
 0xca8   : > { %6761 = vperm.xlu0 %7684, %v8357_v23   ;;  %v3799_v32 = vmul.f32 %v13112_v40, %v13111_v27  ;;  %v13128_v27 = vld [vmem:[#allocation115_spill] sm:$0xff] }
 0xca9   : > { %8358 = vrcp.f32 %v6399_v51  ;;  %v6401_v50 = vpop.f32.mrf.mxu0  ;;  %v13094_v51 = vld [vmem:[#allocation28_spill] sm:$0xff] }
 0xcaa   : > { %8360 = vpow2.f32 %v6233_v21  ;;  %v5124_v37 = vadd.f32 %v13094_v51, %v13093_v42  ;;  %v13095_v21 = vld [vmem:[#allocation27_spill] sm:$0xff]  ;;  %v13119_v51 = vld [vmem:[#allocation70_spill] sm:$0xff] }
 0xcab   : > { %6351 = vmatmul.bf16.gmra.mxu3 %v6269_v60  ;;  %6609 = vmatmul.bf16.gmra.mxu1 %v6269_v60  ;;  %8362 = vpow2.f32 %v6235_v36  ;;  %v13096_v36 = vld [vmem:[#allocation49_spill] sm:$0xff] }
 0xcac   : > { %6440 = vmatmul.bf16.gmra.mxu0 %v6270_v14  ;;  %6698 = vmatmul.bf16.gmra.mxu2 %v6270_v14  ;;  %8364 = vpow2.f32 %v6237_v10  ;;  %v13097_v14 = vld [vmem:[#allocation66_spill] sm:$0xff]  ;;  %v13098_v10 = vld [vmem:[#allocation69_spill] sm:$0xff] }
 0xcad   : > { %8366 = vpow2.f32 %v6239_v47  ;;  %v3586_v47 = vadd.f32 %v13098_v10, %v13097_v14  ;;  %v13124_v14 = vld [vmem:[#allocation30_spill] sm:$0xff] }
 0xcae   : > { %v6312_v59 = vpop.f32.mrf.mxu3 }
 0xcaf   : > { %v8359_v41 = vpop.eup %8358  ;;  %v6402_v24 = vadd.f32 %v6401_v50, %v6312_v59  ;;  %v5341_v50 = vmul.f32 %v13096_v36, %v5124_v37  ;;  %v13099_v59 = vld [vmem:[#allocation84_spill] sm:$0xff]  ;;  %v13121_v37 = vld [vmem:[#allocation55_spill] sm:$0xff]  ;;  %v13122_v36 = vld [vmem:[#allocation86_spill] sm:$0xff] }
 0xcb0   : > { %6766 = vperm.xlu1 %7685, %v8359_v41   ;;  %v8361_v34 = vpop.eup %8360  ;;  %v13100_v41 = vld [vmem:[#allocation82_spill] sm:$0xff] }
 0xcb1   : > { %8368 = vrcp.f32 %v6402_v24  ;;  %v8363_v55 = vpop.eup %8362  ;;  %v6403_v11 = vpop.f32.mrf.mxu0  ;;  %v3343_v24 = vadd.f32 %v13100_v41, %v13099_v59 }
 0xcb2   : > { %v8365_v8 = vpop.eup %8364 }
 0xcb3   : > { %v8367_v52 = vpop.eup %8366  ;;  %v6271_v63 = vpack.c.bf16 %v8365_v8, %v8361_v34  ;;  %v13101_v34 = vld [vmem:[#allocation38_spill] sm:$0xff] }
 0xcb4   : > { %v6272_v4 = vpack.c.bf16 %v8367_v52, %v8363_v55  ;;  %v13102_v55 = vld [vmem:[#allocation62_spill] sm:$0xff]  ;;  %v13103_v52 = vld [vmem:[#allocation109_spill] sm:$0xff] }
 0xcb6   : > { %v6314_v16 = vpop.f32.mrf.mxu3 }
 0xcb7   : > { %v8369_v33 = vpop.eup %8368  ;;  %v6404_v5 = vadd.f32 %v6403_v11, %v6314_v16  ;;  %v3800_v11 = vmul.f32 %v13102_v55, %v3586_v47 }
 0xcb8   : > { %6771 = vperm.xlu0 %7684, %v8369_v33  }
 0xcb9   : > { %8370 = vrcp.f32 %v6404_v5  ;;  %v6406_v31 = vpop.f32.mrf.mxu0 }
 0xcbb   : > { %6356 = vmatmul.bf16.gmra.mxu3 %v6271_v63  ;;  %6614 = vmatmul.bf16.gmra.mxu1 %v6271_v63 }
 0xcbc   : > { %6445 = vmatmul.bf16.gmra.mxu0 %v6272_v4  ;;  %6703 = vmatmul.bf16.gmra.mxu2 %v6272_v4  ;;  %v13105_v4 = vld [vmem:[#allocation111_spill] sm:$0xff] }
 0xcbe   : > { %v6317_v6 = vpop.f32.mrf.mxu3 }
 0xcbf   : > { %v8371_v25 = vpop.eup %8370  ;;  %v6407_v15 = vadd.f32 %v6406_v31, %v6317_v6  ;;  %v5344_v31 = vmul.f32 %v11912_v44, %v13105_v4 }
 0xcc0   : > { %6776 = vperm.xlu1 %7685, %v8371_v25   ;;  %v13106_v25 = vld [vmem:[#allocation32_spill] sm:$0xff] }
 0xcc1   : > { %8372 = vrcp.f32 %v6407_v15 }
 0xcc2   : > { %8374 = vrcp.f32 %v13083_v17  ;;  %v13109_v17 = vld [vmem:[#allocation91_spill] sm:$0xff] }
 0xcc3   : > { %8376 = vrcp.f32 %v3338_v57  ;;  %v13114_v57 = vld [vmem:[#allocation26_spill] sm:$0xff] }
 0xcc4   : > { %8378 = vrcp.f32 %v13095_v21  ;;  %v5129_v45 = vadd.f32 %v13114_v57, %v13113_v13 }
 0xcc5   : > { %8380 = vrcp.f32 %v13101_v34 }
 0xcc6   : > { %8382 = vrcp.f32 %v3343_v24  ;;  %v6319_v24 = vpop.f32.mrf.mxu3 }
 0xcc7   : > { %v8373_v43 = vpop.eup %8372 }
 0xcc8   : > { %5418 = vrot.lane.b32.xlu1 %v5340_v0, %s8468_s20  ;;  %6781 = vperm.xlu0 %7684, %v8373_v43   ;;  %v8375_v46 = vpop.eup %8374  ;;  %v13107_v0 = vld [vmem:[#allocation72_spill] sm:$0xff] }
 0xcc9   : > { %v8377_v23 = vpop.eup %8376 }
 0xcca   : > { %v6712_v53 = vpop.permute.xlu0 %6711  ;;  %v8379_v8 = vpop.eup %8378 }
 0xccb   : > { %v6869_v20 = vmul.f32 %v6712_v53, %v11926_v28  ;;  %v8381_v63 = vpop.eup %8380  ;;  %v13110_v53 = vld [vmem:[#allocation88_spill] sm:$0xff] }
 0xccc   : > { %v8383_v6 = vpop.eup %8382 }
 0xccd   : > { %6933 = vrot.lane.b32.xlu2 %v6869_v20, %s8465_s13  ;;  %v3348_v20 = vadd.f32 %v13110_v53, %v13109_v17  ;;  %v13126_v53 = vld [vmem:[#allocation39_spill] sm:$0xff] }
 0xcd0   : > { %5268 = vperm.xlu1 %7685, %v8375_v46   ;;  %3877 = vrot.lane.b32.xlu0 %v3798_v38, %s8471_s24  ;;  %v13115_v46 = vld [vmem:[#allocation56_spill] sm:$0xff] }
 0xcd2   : > { %v6717_v2 = vpop.permute.xlu1 %6716 }
 0xcd3   : > { %v11979_v28 = vmul.f32 %v6717_v2, %v11928_v30  ;;  %v5343_v2 = vmul.f32 %v13115_v46, %v5129_v45  ;;  %v13130_v45 = vld [vmem:[#allocation77_spill] sm:$0xff] }
 0xcd5   : > { %3875 = vrot.lane.b32.xlu2 %v3797_v7, %s8471_s24  ;;  %v13118_v7 = vld [vmem:[#allocation43_spill] sm:$0xff] }
 0xcd6   : > { %v4886_v12 = vadd.f32 %v13118_v7, %v13117_v29 }
 0xcd8   : > { %5422 = vrot.lane.b32.xlu1 %v5342_v48, %s8468_s20  ;;  %3730 = vperm.xlu0 %7684, %v8377_v23  }
 0xcda   : > { %v6722_v60 = vpop.permute.xlu1 %6721 }
 0xcdb   : > { %v11990_v30 = vmul.f32 %v6722_v60, %v11934_v58  ;;  %v13104_v58 = vld [vmem:[#allocation114_spill] sm:$0xff] }
 0xcdc   : > { %v4881_v16 = vadd.f32 %v13104_v58, %v13103_v52  ;;  %v12055_v58 = vpop.f32.mrf.mxu3 }
 0xcdd   : > { %5420 = vrot.lane.b32.xlu2 %v5341_v50, %s8468_s20  ;;  %v12041_v50 = vpop.permute.xlu2 %6736 }
 0xcde   : > { %8384 = vrcp.f32 %v4881_v16 }
 0xcdf   : > { %8386 = vrcp.f32 %v13106_v25 }
 0xce0   : > { %5278 = vperm.xlu1 %7685, %v8379_v8   ;;  %3881 = vrot.lane.b32.xlu0 %v3800_v11, %s8471_s24  ;;  %8388 = vrcp.f32 %v3348_v20 }
 0xce1   : > { %8390 = vrcp.f32 %v13116_v39  ;;  %v13133_v39 = vld [vmem:[#allocation95_spill] sm:$0xff] }
 0xce2   : > { %v6727_v33 = vpop.permute.xlu1 %6726  ;;  %8392 = vrcp.f32 %v4886_v12 }
 0xce3   : > { %v12003_v5 = vmul.f32 %v6727_v33, %v11936_v56  ;;  %v13108_v56 = vld [vmem:[#allocation74_spill] sm:$0xff]  ;;  %8394 = vrcp.f32 %v13122_v36 }
 0xce4   : > { %v8385_v54 = vpop.eup %8384  ;;  %v3591_v43 = vadd.f32 %v13108_v56, %v13107_v0  ;;  %v6324_v25 = vpop.f32.mrf.mxu3  ;;  %v13125_v0 = vld [vmem:[#allocation75_spill] sm:$0xff] }
 0xce5   : > { %3725 = vperm.xlu2 %7686, %v8381_v63   ;;  %v8387_v3 = vpop.eup %8386 }
 0xce6   : > { %v3802_v44 = vmul.f32 %v11906_v35, %v3591_v43 }
 0xce8   : > { %3740 = vperm.xlu0 %7684, %v8383_v6   ;;  %5426 = vrot.lane.b32.xlu1 %v5344_v31, %s8468_s20 }
 0xcea   : > { %v6732_v15 = vpop.permute.xlu0 %6731 }
 0xceb   : > { %v12010_v18 = vmul.f32 %v6732_v15, %v11942_v1  ;;  %v8389_v1 = vpop.eup %8388 }
 0xcec   : > { %v8391_v23 = vpop.eup %8390 }
 0xced   : > { %5273 = vperm.xlu2 %7686, %v8385_v54   ;;  %v8393_v42 = vpop.eup %8392 }
 0xcee   : > { %v8395_v41 = vpop.eup %8394 }
 0xcf0   : > { %3885 = vrot.lane.b32.xlu0 %v3802_v44, %s8471_s24  ;;  %5288 = vperm.xlu1 %7685, %v8387_v3   ;;  %v12071_v44 = vpop.f32.mrf.mxu3  ;;  %v13127_v3 = vld [vmem:[#allocation14_spill] sm:$0xff] }
 0xcf1   : > { %v5139_v40 = vadd.f32 %v13128_v27, %v13127_v3  ;;  %v13140_v27 = vld [vmem:[#allocation81_spill] sm:$0xff] }
 0xcf5   : > { %3879 = vrot.lane.b32.xlu2 %v3799_v32, %s8471_s24  ;;  %v13129_v32 = vld [vmem:[#allocation4_spill] sm:$0xff] }
 0xcf8   : > { %3750 = vperm.xlu0 %7684, %v8389_v1  }
 0xcfa   : > { %v6742_v38 = vpop.permute.xlu0 %6741 }
 0xcfb   : > { %v12025_v35 = vmul.f32 %v6742_v38, %v11952_v19  ;;  %v13120_v19 = vld [vmem:[#allocation44_spill] sm:$0xff]  ;;  %v13131_v38 = vld [vmem:[#allocation79_spill] sm:$0xff] }
 0xcfc   : > { %v5134_v21 = vadd.f32 %v13121_v37, %v13120_v19  ;;  %v3596_v46 = vadd.f32 %v13131_v38, %v13130_v45  ;;  %v13135_v19 = vld [vmem:[#allocation15_spill] sm:$0xff]  ;;  %v13136_v37 = vld [vmem:[#allocation24_spill] sm:$0xff] }
 0xcfd   : > { %5424 = vrot.lane.b32.xlu2 %v5343_v2, %s8468_s20  ;;  %v13132_v2 = vld [vmem:[#allocation97_spill] sm:$0xff] }
 0xcfe   : > { %v5345_v60 = vmul.f32 %v11944_v61, %v5134_v21  ;;  %v6408_v61 = vpop.f32.mrf.mxu0  ;;  %v3353_v29 = vadd.f32 %v13133_v39, %v13132_v2  ;;  %v4896_v21 = vadd.f32 %v13136_v37, %v13135_v19  ;;  %v12110_v39 = vpop.f32.mrf.mxu2 }
 0xcff   : > { %v6409_v7 = vadd.f32 %v6408_v61, %v6319_v24  ;;  %v13137_v61 = vld [vmem:[#allocation33_spill] sm:$0xff] }
 0xd02   : > { %v6747_v9 = vpop.permute.xlu1 %6746 }
 0xd03   : > { %v12032_v48 = vmul.f32 %v6747_v9, %v11954_v62  ;;  %v13123_v62 = vld [vmem:[#allocation34_spill] sm:$0xff] }
 0xd04   : > { %v4891_v10 = vadd.f32 %v13124_v14, %v13123_v62 }
 0xd05   : > { %3735 = vperm.xlu2 %7686, %v8391_v23   ;;  %v13134_v23 = vld [vmem:[#allocation93_spill] sm:$0xff] }
 0xd06   : > { %8396 = vrcp.f32 %v4891_v10  ;;  %v12061_v63 = vpop.f32.mrf.mxu0 }
 0xd07   : > { %8398 = vrcp.f32 %v13129_v32  ;;  %v6412_v32 = vadd.f32 %v12061_v63, %v12055_v58  ;;  %v13142_v58 = vld [vmem:[#allocation48_spill] sm:$0xff]  ;;  %v13143_v63 = vld [vmem:[#allocation107_spill] sm:$0xff] }
 0xd08   : > { %8400 = vrcp.f32 %v13134_v23 }
 0xd09   : > { %8402 = vrcp.f32 %v3353_v29 }
 0xd0a   : > { %v12045_v47 = vpop.permute.xlu0 %6751  ;;  %8404 = vrcp.f32 %v6409_v7  ;;  %v5144_v7 = vadd.f32 %v13143_v63, %v13142_v58 }
 0xd0b   : > { %8406 = vrcp.f32 %v4896_v21  ;;  %v13145_v21 = vld [vmem:[#allocation23_spill] sm:$0xff] }
 0xd0c   : > { %v8397_v8 = vpop.eup %8396 }
 0xd0d   : > { %5283 = vperm.xlu2 %7686, %v8393_v42  }
 0xd0e   : > { %v6413_v15 = vpop.f32.mrf.mxu0 }
 0xd0f   : > { %v6414_v10 = vadd.f32 %v6413_v15, %v6324_v25  ;;  %v13139_v25 = vld [vmem:[#allocation85_spill] sm:$0xff] }
 0xd11   : > { %8408 = vrcp.f32 %v6414_v10 }
 0xd12   : > { %v12047_v59 = vpop.permute.xlu1 %6756  ;;  %8410 = vrcp.f32 %v6412_v32 }
 0xd15   : > { %3883 = vrot.lane.b32.xlu2 %v13119_v51, %s8471_s24  ;;  %v8399_v51 = vpop.eup %8398 }
 0xd16   : > { %v12077_v1 = vpop.f32.mrf.mxu0  ;;  %v8401_v62 = vpop.eup %8400 }
 0xd1a   : > { %v12050_v55 = vpop.permute.xlu0 %6761 }
 0xd1d   : > { %5428 = vrot.lane.b32.xlu2 %v5345_v60, %s8468_s20  ;;  %v6329_v60 = vpop.f32.mrf.mxu3 }
 0xd1e   : > { %v6418_v14 = vpop.f32.mrf.mxu0 }
 0xd22   : > { %v12052_v11 = vpop.permute.xlu1 %6766 }
 0xd25   : > { %3745 = vperm.xlu2 %7686, %v8395_v41  }
 0xd27   : > { %v6934_v34 = vpop.permute.xlu2 %6933 }
 0xd28   : > { %7030 = vst.msk [vmem:[#allocation2] sm:$0xff] %vm7029_vm4, %v6934_v34  ;;  %v8403_v34 = vpop.eup %8402 }
 0xd2a   : > { %v12057_v16 = vpop.permute.xlu0 %6771 }
 0xd2d   : > { %5293 = vperm.xlu2 %7686, %v8397_v8  }
 0xd2f   : > { %v3876_v52 = vpop.permute.xlu2 %3875 }
 0xd30   : > { %3958 = vst.msk [vmem:[#allocation2 + $0x70] sm:$0xff] %vm3943_vm2, %v3876_v52  ;;  %v8405_v52 = vpop.eup %8404 }
 0xd32   : > { %v12059_v33 = vpop.permute.xlu1 %6776 }
 0xd37   : > { %v5421_v4 = vpop.permute.xlu2 %5420 }
 0xd3a   : > { %v12063_v31 = vpop.permute.xlu0 %6781  ;;  %v5419_v6 = vpop.permute.xlu1 %5418 }
 0xd3b   : > { %5501 = vst.msk [vmem:[#allocation2 + $0x70] sm:$0xff] %vm5486_vm3, %v5419_v6  ;;  %v8407_v6 = vpop.eup %8406 }
 0xd3f   : > { %v3726_v54 = vpop.permute.xlu2 %3725 }
 0xd40   : > { %v3803_v56 = vmul.f32 %v3726_v54, %v13125_v0  ;;  %v13138_v54 = vld [vmem:[#allocation83_spill] sm:$0xff]  ;;  %v12097_v0 = vpop.f32.mrf.mxu3 }
 0xd41   : > { %v3601_v15 = vadd.f32 %v13139_v25, %v13138_v54 }
 0xd42   : > { %3887 = vrot.lane.b32.xlu2 %v3803_v56, %s8471_s24  ;;  %v3878_v43 = vpop.permute.xlu0 %3877  ;;  %v5269_v17 = vpop.permute.xlu1 %5268 }
 0xd43   : > { %3959 = vst.msk [vmem:[#allocation2 + $0x78] sm:$0xff] %vm3943_vm2, %v3878_v43  ;;  %v5346_v20 = vmul.f32 %v5269_v17, %v13126_v53  ;;  %v12099_v17 = vpop.f32.mrf.mxu0 }
 0xd44   : > { %5502 = vst.msk [vmem:[#allocation2 + $0x78] sm:$0xff] %vm5486_vm3, %v5421_v4 }
 0xd45   : > { %5430 = vrot.lane.b32.xlu1 %v5346_v20, %s8468_s20  ;;  %v8409_v20 = vpop.eup %8408 }
 0xd47   : > { %v5274_v13 = vpop.permute.xlu2 %5273 }
 0xd48   : > { %v5347_v57 = vmul.f32 %v5274_v13, %v5139_v40  ;;  %v6419_v13 = vadd.f32 %v6418_v14, %v6329_v60  ;;  %v6334_v38 = vpop.f32.mrf.mxu3 }
 0xd4a   : > { %5432 = vrot.lane.b32.xlu2 %v5347_v57, %s8468_s20  ;;  %v3731_v12 = vpop.permute.xlu0 %3730  ;;  %v5423_v9 = vpop.permute.xlu1 %5422  ;;  %8412 = vrcp.f32 %v6419_v13 }
 0xd4b   : > { %v3804_v42 = vmul.f32 %v3731_v12, %v3596_v46  ;;  %v13141_v46 = vld [vmem:[#allocation10_spill] sm:$0xff]  ;;  %v6423_v29 = vpop.f32.mrf.mxu0  ;;  %v12118_v12 = vpop.f32.mrf.mxu1 }
 0xd4d   : > { %3889 = vrot.lane.b32.xlu0 %v3804_v42, %s8471_s24  ;;  %5298 = vperm.xlu1 %7685, %v8399_v51   ;;  %v8411_v42 = vpop.eup %8410  ;;  %v13144_v51 = vld [vmem:[#allocation99_spill] sm:$0xff] }
 0xd4e   : > { %8414 = vrcp.f32 %v13144_v51 }
 0xd4f   : > { %v3880_v36 = vpop.permute.xlu2 %3879 }
 0xd50   : > { %3960 = vst.msk [vmem:[#allocation2 + $0x80] sm:$0xff] %vm3943_vm2, %v3880_v36  ;;  %v8413_v19 = vpop.eup %8412  ;;  %v6337_v37 = vpop.f32.mrf.mxu3 }
 0xd51   : > { %5503 = vst.msk [vmem:[#allocation2 + $0x80] sm:$0xff] %vm5486_vm3, %v5423_v9 }
 0xd52   : > { %3755 = vperm.xlu2 %7686, %v8401_v62   ;;  %v3882_v41 = vpop.permute.xlu0 %3881  ;;  %v5279_v24 = vpop.permute.xlu1 %5278 }
 0xd53   : > { %3961 = vst.msk [vmem:[#allocation2 + $0x88] sm:$0xff] %vm3943_vm2, %v3882_v41  ;;  %v12092_v8 = vmul.f32 %v5279_v24, %v13137_v61  ;;  %v6426_v36 = vpop.f32.mrf.mxu0  ;;  %v6562_v14 = vpop.f32.mrf.mxu1  ;;  %v6417_v41 = vadd.f32 %v12077_v1, %v12071_v44  ;;  %v6424_v24 = vadd.f32 %v6423_v29, %v6334_v38 }
 0xd54   : > { %v8415_v10 = vpop.eup %8414  ;;  %v6427_v63 = vadd.f32 %v6426_v36, %v6337_v37 }
 0xd55   : > { %3760 = vperm.xlu0 %7684, %v8403_v34   ;;  %6786 = vperm.xlu1 %7685, %v8405_v52   ;;  %v6874_v34 = vmul.f32 %v12041_v50, %v11946_v22 }
 0xd57   : > { %v5425_v4 = vpop.permute.xlu2 %5424 }
 0xd58   : > { %5504 = vst.msk [vmem:[#allocation2 + $0x88] sm:$0xff] %vm5486_vm3, %v5425_v4  ;;  %v6339_v61 = vpop.f32.mrf.mxu3 }
 0xd5a   : > { %5303 = vperm.xlu2 %7686, %v8407_v6   ;;  %v3741_v56 = vpop.permute.xlu0 %3740  ;;  %v5427_v43 = vpop.permute.xlu1 %5426 }
 0xd5b   : > { %v3806_v53 = vmul.f32 %v3741_v56, %v3601_v15  ;;  %v6428_v1 = vpop.f32.mrf.mxu0  ;;  %v12136_v6 = vpop.f32.mrf.mxu1  ;;  %v6422_v15 = vadd.f32 %v12099_v17, %v12097_v0 }
 0xd5d   : > { %3893 = vrot.lane.b32.xlu0 %v3806_v53, %s8471_s24  ;;  %6796 = vperm.xlu1 %7685, %v8409_v20   ;;  %v6429_v53 = vadd.f32 %v6428_v1, %v6339_v61 }
 0xd5f   : > { %v3736_v3 = vpop.permute.xlu2 %3735 }
 0xd60   : > { %v3805_v40 = vmul.f32 %v3736_v3, %v13140_v27  ;;  %v6342_v56 = vpop.f32.mrf.mxu3  ;;  %v13148_v27 = vld [vmem:[#allocation25_spill] sm:$0xff] }
 0xd62   : > { %3891 = vrot.lane.b32.xlu2 %v3805_v40, %s8471_s24  ;;  %v3886_v57 = vpop.permute.xlu0 %3885  ;;  %v5289_v45 = vpop.permute.xlu1 %5288  ;;  %v13149_v40 = vld [vmem:[#allocation12_spill] sm:$0xff] }
 0xd63   : > { %3963 = vst.msk [vmem:[#allocation2 + $0x98] sm:$0xff] %vm3943_vm2, %v3886_v57  ;;  %v12108_v2 = vmul.f32 %v5289_v45, %v13141_v46  ;;  %v6431_v20 = vpop.f32.mrf.mxu0  ;;  %v6567_v3 = vpop.f32.mrf.mxu1  ;;  %v5149_v32 = vadd.f32 %v13149_v40, %v13148_v27  ;;  %v13150_v57 = vld [vmem:[#allocation54_spill] sm:$0xff] }
 0xd65   : > { %6935 = vrot.lane.b32.xlu0 %v11979_v28, %s8465_s13  ;;  %6939 = vrot.lane.b32.xlu1 %v12003_v5, %s8465_s13  ;;  %v6651_v28 = vpop.f32.mrf.mxu2  ;;  %v13146_v5 = vld [vmem:[#allocation5_spill] sm:$0xff] }
 0xd66   : > { %v4901_v60 = vadd.f32 %v13146_v5, %v13145_v21  ;;  %v6652_v58 = vadd.f32 %v6651_v28, %v6562_v14  ;;  %v6432_v14 = vadd.f32 %v6431_v20, %v6342_v56  ;;  %v13154_v56 = vld [vmem:[#allocation22_spill] sm:$0xff] }
 0xd67   : > { %v5284_v9 = vpop.permute.xlu2 %5283 }
 0xd68   : > { %v5349_v23 = vmul.f32 %v5284_v9, %v5144_v7  ;;  %8416 = vrcp.f32 %v4901_v60  ;;  %v6344_v45 = vpop.f32.mrf.mxu3  ;;  %v13151_v9 = vld [vmem:[#allocation57_spill] sm:$0xff] }
 0xd69   : > { %8418 = vrcp.f32 %v6417_v41 }
 0xd6a   : > { %5436 = vrot.lane.b32.xlu2 %v5349_v23, %s8468_s20  ;;  %8420 = vrcp.f32 %v6424_v24  ;;  %v6878_v23 = vmul.f32 %v12047_v59, %v6652_v58 }
 0xd6b   : > { %8422 = vrcp.f32 %v6422_v15  ;;  %v6433_v29 = vpop.f32.mrf.mxu0  ;;  %v13153_v15 = vld [vmem:[#allocation63_spill] sm:$0xff] }
 0xd6c   : > { %8424 = vrcp.f32 %v6429_v53  ;;  %v6434_v7 = vadd.f32 %v6433_v29, %v6344_v45  ;;  %v13155_v29 = vld [vmem:[#allocation29_spill] sm:$0xff] }
 0xd6d   : > { %6791 = vperm.xlu0 %7684, %v8411_v42   ;;  %6806 = vperm.xlu1 %7685, %v8413_v19   ;;  %v12133_v4 = vpop.f32.mrf.mxu2  ;;  %8426 = vrcp.f32 %v13150_v57 }
 0xd6e   : > { %v8417_v44 = vpop.eup %8416  ;;  %8428 = vrcp.f32 %v13151_v9 }
 0xd6f   : > { %v3884_v62 = vpop.permute.xlu2 %3883  ;;  %v8419_v54 = vpop.eup %8418  ;;  %8430 = vrcp.f32 %v6427_v63 }
 0xd70   : > { %3962 = vst.msk [vmem:[#allocation2 + $0x90] sm:$0xff] %vm3943_vm2, %v3884_v62  ;;  %v8421_v22 = vpop.eup %8420  ;;  %v6347_v42 = vpop.f32.mrf.mxu3  ;;  %8432 = vrcp.f32 %v6434_v7  ;;  %v13157_v7 = vld [vmem:[#allocation50_spill] sm:$0xff] }
 0xd71   : > { %5505 = vst.msk [vmem:[#allocation2 + $0x90] sm:$0xff] %vm5486_vm3, %v5427_v43  ;;  %v8423_v17 = vpop.eup %8422  ;;  %8434 = vrcp.f32 %v6432_v14 }
 0xd72   : > { %3765 = vperm.xlu2 %7686, %v8415_v10   ;;  %v8425_v38 = vpop.eup %8424 }
 0xd73   : > { %v6436_v19 = vpop.f32.mrf.mxu0 }
 0xd75   : > { %6937 = vrot.lane.b32.xlu0 %v11990_v30, %s8465_s13  ;;  %6943 = vrot.lane.b32.xlu1 %v6874_v34, %s8465_s13  ;;  %v13147_v30 = vld [vmem:[#allocation87_spill] sm:$0xff]  ;;  %v6656_v43 = vpop.f32.mrf.mxu2 }
 0xd76   : > { %v6657_v62 = vadd.f32 %v6656_v43, %v6567_v3  ;;  %v5154_v43 = vadd.f32 %v13154_v56, %v13153_v15 }
 0xd77   : > { %v5429_v52 = vpop.permute.xlu2 %5428 }
 0xd78   : > { %5506 = vst.msk [vmem:[#allocation2 + $0x98] sm:$0xff] %vm5486_vm3, %v5429_v52  ;;  %v6349_v59 = vpop.f32.mrf.mxu3  ;;  %v6880_v61 = vmul.f32 %v12052_v11, %v6657_v62  ;;  %v6655_v11 = vadd.f32 %v12133_v4, %v12136_v6  ;;  %v7653_v4 = vld [vmem:[%s12471_s2 + $0x10] sm:$0xff] }
 0xd7a   : > { %5313 = vperm.xlu2 %7686, %v8417_v44   ;;  %v6879_v53 = vmul.f32 %v12050_v55, %v6655_v11 }
 0xd7b   : > { %v6438_v10 = vpop.f32.mrf.mxu0 }
 0xd7c   : > { %v6439_v24 = vadd.f32 %v6438_v10, %v6349_v59 }
 0xd7d   : > { %6801 = vperm.xlu0 %7684, %v8419_v54   ;;  %6816 = vperm.xlu1 %7685, %v8421_v22   ;;  %v12150_v46 = vpop.f32.mrf.mxu2  ;;  %v13152_v22 = vld [vmem:[#allocation94_spill] sm:$0xff] }
 0xd7e   : > { %8436 = vrcp.f32 %v6439_v24 }
 0xd7f   : > { %v3746_v50 = vpop.permute.xlu2 %3745 }
 0xd80   : > { %v3807_v25 = vmul.f32 %v3746_v50, %v13147_v30 }
 0xd82   : > { %3895 = vrot.lane.b32.xlu2 %v3807_v25, %s8471_s24  ;;  %v6437_v25 = vadd.f32 %v6436_v19, %v6347_v42 }
 0xd84   : > { %8438 = vrcp.f32 %v6437_v25 }
 0xd85   : > { %6941 = vrot.lane.b32.xlu0 %v12010_v18, %s8465_s13  ;;  %6947 = vrot.lane.b32.xlu1 %v12032_v48, %s8465_s13  ;;  %v12152_v18 = vpop.f32.mrf.mxu1  ;;  %v8427_v48 = vpop.eup %8426 }
 0xd86   : > { %v6661_v51 = vpop.f32.mrf.mxu2  ;;  %v8429_v5 = vpop.eup %8428  ;;  %v6660_v58 = vadd.f32 %v12150_v46, %v12152_v18  ;;  %v13158_v18 = vld [vmem:[#allocation47_spill] sm:$0xff] }
 0xd87   : > { %v5294_v13 = vpop.permute.xlu2 %5293  ;;  %v8431_v37 = vpop.eup %8430 }
 0xd88   : > { %v5351_v0 = vmul.f32 %v5294_v13, %v5149_v32  ;;  %v8433_v28 = vpop.eup %8432  ;;  %v12190_v32 = vpop.permute.xlu0 %3750 }
 0xd89   : > { %v8435_v1 = vpop.eup %8434  ;;  %v6352_v46 = vpop.f32.mrf.mxu3 }
 0xd8a   : > { %5440 = vrot.lane.b32.xlu2 %v5351_v0, %s8468_s20 }
 0xd8d   : > { %6811 = vperm.xlu0 %7684, %v8423_v17   ;;  %6826 = vperm.xlu1 %7685, %v8425_v38   ;;  %v6572_v21 = vpop.f32.mrf.mxu1  ;;  %v7651_v17 = vld [vmem:[%s12471_s2] sm:$0xff] }
 0xd8e   : > { %v12160_v36 = vpop.f32.mrf.mxu2  ;;  %v6662_v30 = vadd.f32 %v6661_v51, %v6572_v21 }
 0xd90   : > { %v6882_v20 = vmul.f32 %v12059_v33, %v6662_v30  ;;  %v7652_v33 = vld [vmem:[%s12471_s2 + $0x8] sm:$0xff] }
 0xd92   : > { %3775 = vperm.xlu2 %7686, %v8427_v48  }
 0xd95   : > { %6945 = vrot.lane.b32.xlu0 %v12025_v35, %s8465_s13  ;;  %6951 = vrot.lane.b32.xlu1 %v6878_v23, %s8465_s13  ;;  %v6650_v35 = vadd.f32 %v12110_v39, %v12118_v12  ;;  %v12164_v41 = vpop.f32.mrf.mxu1  ;;  %v8437_v39 = vpop.eup %8436  ;;  %v6881_v23 = vmul.f32 %v12057_v16, %v6660_v58 }
 0xd96   : > { %v6666_v44 = vpop.f32.mrf.mxu2  ;;  %v8439_v13 = vpop.eup %8438 }
 0xd97   : > { %v6877_v34 = vmul.f32 %v12045_v47, %v6650_v35  ;;  %v7654_v47 = vld [vmem:[%s12471_s2 + $0x18] sm:$0xff]  ;;  %v6441_v16 = vpop.f32.mrf.mxu0  ;;  %v13159_v35 = vld [vmem:[#allocation100_spill] sm:$0xff] }
 0xd98   : > { %7198 = vmatpush.bf16.msra.mxu3 %v7654_v47 }
 0xd9a   : > { %5323 = vperm.xlu2 %7686, %v8429_v5  }
 0xd9c   : > { %v3888_v60 = vpop.permute.xlu2 %3887  ;;  %7199 = vmatpush.bf16.msra.mxu3 %v7653_v4 }
 0xd9d   : > { %3964 = vst.msk [vmem:[#allocation2 + $0xa0] sm:$0xff] %vm3943_vm2, %v3888_v60  ;;  %6821 = vperm.xlu0 %7684, %v8431_v37   ;;  %6836 = vperm.xlu1 %7685, %v8433_v28   ;;  %v6577_v12 = vpop.f32.mrf.mxu1 }
 0xd9e   : > { %v12181_v3 = vpop.f32.mrf.mxu2  ;;  %v6667_v51 = vadd.f32 %v6666_v44, %v6577_v12  ;;  %v13161_v44 = vld [vmem:[#allocation3_spill] sm:$0xff] }
 0xd9f   : > { %v6443_v30 = vpop.f32.mrf.mxu0 }
 0xda0   : > { %7200 = vmatpush.bf16.msra.mxu3 %v7652_v33 }
 0xda4   : > { %v5433_v52 = vpop.permute.xlu2 %5432  ;;  %7201 = vmatpush.bf16.msra.mxu3 %v7651_v17 }
 0xda5   : > { %6949 = vrot.lane.b32.xlu0 %v6877_v34, %s8465_s13  ;;  %6955 = vrot.lane.b32.xlu1 %v6880_v61, %s8465_s13  ;;  %v12188_v6 = vpop.f32.mrf.mxu1  ;;  %v6665_v34 = vadd.f32 %v12160_v36, %v12164_v41  ;;  %v6442_v61 = vadd.f32 %v6441_v16, %v6352_v46 }
 0xda6   : > { %v6671_v57 = vpop.f32.mrf.mxu2 }
 0xda7   : > { %v6883_v12 = vmul.f32 %v12063_v31, %v6665_v34 }
 0xdac   : > { %v3756_v54 = vpop.permute.xlu2 %3755 }
 0xdad   : > { %v3809_v50 = vmul.f32 %v3756_v54, %v13152_v22  ;;  %6831 = vperm.xlu0 %7684, %v8435_v1   ;;  %6846 = vperm.xlu1 %7685, %v8437_v39   ;;  %v6582_v63 = vpop.f32.mrf.mxu1  ;;  %v6354_v54 = vpop.f32.mrf.mxu3 }
 0xdae   : > { %v12216_v37 = vpop.f32.mrf.mxu2  ;;  %v6672_v47 = vadd.f32 %v6671_v57, %v6582_v63  ;;  %v6444_v36 = vadd.f32 %v6443_v30, %v6354_v54  ;;  %v13162_v63 = vld [vmem:[#allocation90_spill] sm:$0xff] }
 0xdaf   : > { %3899 = vrot.lane.b32.xlu2 %v3809_v50, %s8471_s24 }
 0xdb4   : > { %v5304_v27 = vpop.permute.xlu2 %5303 }
 0xdb5   : > { %v5353_v40 = vmul.f32 %v5304_v27, %v5154_v43  ;;  %6953 = vrot.lane.b32.xlu0 %v6879_v53, %s8465_s13  ;;  %6959 = vrot.lane.b32.xlu1 %v6882_v20, %s8465_s13  ;;  %v12220_v28 = vpop.f32.mrf.mxu1  ;;  %v7062_v27 = vld [vmem:[#allocation2] sm:$0xff] }
 0xdb6   : > { %v6676_v39 = vpop.f32.mrf.mxu2 }
 0xdb7   : > { %5444 = vrot.lane.b32.xlu2 %v5353_v40, %s8468_s20  ;;  %v5431_v55 = vpop.permute.xlu1 %5430 }
 0xdb8   : > { %5507 = vst.msk [vmem:[#allocation2 + $0xa0] sm:$0xff] %vm5486_vm3, %v5431_v55 }
 0xdbc   : > { %v3892_v0 = vpop.permute.xlu2 %3891 }
 0xdbd   : > { %3966 = vst.msk [vmem:[#allocation2 + $0xb0] sm:$0xff] %vm3943_vm2, %v3892_v0  ;;  %6841 = vperm.xlu0 %7684, %v8439_v13   ;;  %5434 = vrot.lane.b32.xlu1 %v12092_v8, %s8468_s20  ;;  %v13156_v8 = vld [vmem:[#allocation52_spill] sm:$0xff]  ;;  %v6587_v11 = vpop.f32.mrf.mxu1  ;;  %v6670_v13 = vadd.f32 %v12181_v3, %v12188_v6 }
 0xdbe   : > { %v3358_v9 = vadd.f32 %v13157_v7, %v13156_v8  ;;  %v12237_v43 = vpop.f32.mrf.mxu2  ;;  %v6677_v57 = vadd.f32 %v6676_v39, %v6587_v11  ;;  %v13163_v8 = vld [vmem:[#allocation92_spill] sm:$0xff] }
 0xdbf   : > { %v3890_v45 = vpop.permute.xlu0 %3889  ;;  %v5299_v38 = vpop.permute.xlu1 %5298  ;;  %v3606_v7 = vadd.f32 %v13163_v8, %v13162_v63 }
 0xdc0   : > { %3965 = vst.msk [vmem:[#allocation2 + $0xa8] sm:$0xff] %vm3943_vm2, %v3890_v45  ;;  %v12205_v48 = vmul.f32 %v5299_v38, %v13155_v29  ;;  %8440 = vrcp.f32 %v3358_v9 }
 0xdc1   : > { %5508 = vst.msk [vmem:[#allocation2 + $0xa8] sm:$0xff] %vm5486_vm3, %v5433_v52  ;;  %8442 = vrcp.f32 %v13158_v18  ;;  %v13160_v52 = vld [vmem:[#allocation17_spill] sm:$0xff]  ;;  %v3808_v6 = vmul.f32 %v12190_v32, %v3606_v7  ;;  %v5164_v32 = vadd.f32 %v11918_v26, %v11920_v49  ;;  %v6357_v49 = vpop.f32.mrf.mxu3 }
 0xdc2   : > { %v5159_v1 = vadd.f32 %v13161_v44, %v13160_v52  ;;  %8444 = vrcp.f32 %v6442_v61  ;;  %v13166_v26 = vld [vmem:[#allocation65_spill] sm:$0xff]  ;;  %v6446_v52 = vpop.f32.mrf.mxu0 }
 0xdc3   : > { %8446 = vrcp.f32 %v6444_v36 }
 0xdc4   : > { %v5437_v42 = vpop.permute.xlu2 %5436 }
 0xdc5   : > { %6957 = vrot.lane.b32.xlu0 %v6881_v23, %s8465_s13  ;;  %v6590_v4 = vpop.f32.mrf.mxu1  ;;  %v13164_v23 = vld [vmem:[#allocation58_spill] sm:$0xff] }
 0xdc6   : > { %v8441_v60 = vpop.eup %8440  ;;  %v6681_v29 = vpop.f32.mrf.mxu2 }
 0xdc7   : > { %v12214_v19 = vpop.permute.xlu0 %3760  ;;  %v6787_v21 = vpop.permute.xlu1 %6786 }
 0xdc8   : > { %v6884_v5 = vmul.f32 %v6787_v21, %v6667_v51  ;;  %v8443_v24 = vpop.eup %8442 }
 0xdc9   : > { %v8445_v31 = vpop.eup %8444  ;;  %v6359_v30 = vpop.f32.mrf.mxu3 }
 0xdca   : > { %6963 = vrot.lane.b32.xlu1 %v6884_v5, %s8465_s13  ;;  %v8447_v33 = vpop.eup %8446 }
 0xdcc   : > { %v3766_v59 = vpop.permute.xlu2 %3765 }
 0xdcd   : > { %v3811_v62 = vmul.f32 %v3766_v59, %v13159_v35  ;;  %3770 = vperm.xlu0 %7684, %v8441_v60   ;;  %v6592_v3 = vpop.f32.mrf.mxu1  ;;  %v6675_v60 = vadd.f32 %v12216_v37, %v12220_v28 }
 0xdce   : > { %v6684_v16 = vpop.f32.mrf.mxu2 }
 0xdcf   : > { %3903 = vrot.lane.b32.xlu2 %v3811_v62, %s8471_s24  ;;  %v3894_v14 = vpop.permute.xlu0 %3893  ;;  %v6797_v10 = vpop.permute.xlu1 %6796 }
 0xdd0   : > { %3967 = vst.msk [vmem:[#allocation2 + $0xb8] sm:$0xff] %vm3943_vm2, %v3894_v14  ;;  %v6886_v15 = vmul.f32 %v6797_v10, %v6672_v47  ;;  %v13165_v10 = vld [vmem:[#allocation102_spill] sm:$0xff]  ;;  %v6680_v47 = vadd.f32 %v12237_v43, %v6590_v4 }
 0xdd1   : > { %5510 = vst.msk [vmem:[#allocation2 + $0xb8] sm:$0xff] %vm5486_vm3, %v5437_v42  ;;  %8448 = vrcp.f32 %v13165_v10 }
 0xdd2   : > { %5308 = vperm.xlu1 %7685, %v8443_v24   ;;  %v6682_v24 = vadd.f32 %v6681_v29, %v6592_v3  ;;  %8450 = vrcp.f32 %v13166_v26 }
 0xdd4   : > { %v5314_v22 = vpop.permute.xlu2 %5313 }
 0xdd5   : > { %v5355_v50 = vmul.f32 %v5314_v22, %v5159_v1  ;;  %6961 = vrot.lane.b32.xlu0 %v6883_v12, %s8465_s13  ;;  %v6595_v35 = vpop.f32.mrf.mxu1 }
 0xdd6   : > { %v6686_v61 = vpop.f32.mrf.mxu2 }
 0xdd7   : > { %5448 = vrot.lane.b32.xlu2 %v5355_v50, %s8468_s20  ;;  %v6936_v41 = vpop.permute.xlu0 %6935  ;;  %v6940_v25 = vpop.permute.xlu1 %6939 }
 0xdd8   : > { %7031 = vst.msk [vmem:[#allocation2 + $0x8] sm:$0xff] %vm7029_vm4, %v6936_v41 }
 0xdd9   : > { %7033 = vst.msk [vmem:[#allocation2 + $0x18] sm:$0xff] %vm7029_vm4, %v6940_v25  ;;  %v6448_v25 = vpop.f32.mrf.mxu0 }
 0xdda   : > { %6967 = vrot.lane.b32.xlu1 %v6886_v15, %s8465_s13 }
 0xddc   : > { %v3896_v56 = vpop.permute.xlu2 %3895 }
 0xddd   : > { %3968 = vst.msk [vmem:[#allocation2 + $0xc0] sm:$0xff] %vm3943_vm2, %v3896_v56  ;;  %6851 = vperm.xlu0 %7684, %v8445_v31   ;;  %v6597_v44 = vpop.f32.mrf.mxu1 }
 0xdde   : > { %v6687_v36 = vadd.f32 %v6686_v61, %v6597_v44  ;;  %v6689_v41 = vpop.f32.mrf.mxu2 }
 0xddf   : > { %v6792_v53 = vpop.permute.xlu0 %6791  ;;  %v6807_v20 = vpop.permute.xlu1 %6806  ;;  %v7063_v40 = vld [vmem:[#allocation2 + $0x8] sm:$0xff] }
 0xde0   : > { %v7094_v55 = vpack.c.bf16 %v7063_v40, %v7062_v27  ;;  %v6885_v0 = vmul.f32 %v6792_v53, %v6670_v13  ;;  %v6888_v58 = vmul.f32 %v6807_v20, %v6677_v57  ;;  %v7065_v46 = vld [vmem:[#allocation2 + $0x18] sm:$0xff]  ;;  %v6449_v53 = vadd.f32 %v6448_v25, %v6359_v30  ;;  %v13171_v25 = vld [vmem:[#allocation8_spill] sm:$0xff] }
 0xde1   : > { %v6685_v27 = vadd.f32 %v6684_v16, %v6595_v35  ;;  %v6447_v40 = vadd.f32 %v6446_v52, %v6357_v49 }
 0xde2   : > { %7619 = vmatmul.msk.bf16.vlgmr.msra.gmra.mxu3 %vm382_vm0, %v7094_v55  ;;  %6856 = vperm.xlu1 %7685, %v8447_v33   ;;  %8452 = vrcp.f32 %v6449_v53 }
 0xde3   : > { %8454 = vrcp.f32 %v6447_v40 }
 0xde4   : > { %v12242_v17 = vpop.permute.xlu2 %5440 }
 0xde5   : > { %6965 = vrot.lane.b32.xlu0 %v6885_v0, %s8465_s13  ;;  %v6600_v56 = vpop.f32.mrf.mxu1 }
 0xde6   : > { %v6691_v0 = vpop.f32.mrf.mxu2 }
 0xde7   : > { %v6938_v45 = vpop.permute.xlu0 %6937  ;;  %v6944_v38 = vpop.permute.xlu1 %6943 }
 0xde8   : > { %7032 = vst.msk [vmem:[#allocation2 + $0x10] sm:$0xff] %vm7029_vm4, %v6938_v45 }
 0xde9   : > { %7035 = vst.msk [vmem:[#allocation2 + $0x28] sm:$0xff] %vm7029_vm4, %v6944_v38 }
 0xdea   : > { %6971 = vrot.lane.b32.xlu1 %v6888_v58, %s8465_s13 }
 0xdec   : > { %v3776_v9 = vpop.permute.xlu2 %3775 }
 0xded   : > { %v3813_v42 = vmul.f32 %v3776_v9, %v13164_v23  ;;  %3897 = vrot.lane.b32.xlu0 %v3808_v6, %s8471_s24  ;;  %v6602_v29 = vpop.f32.mrf.mxu1  ;;  %v6690_v23 = vadd.f32 %v6689_v41, %v6600_v56 }
 0xdee   : > { %v6692_v58 = vadd.f32 %v6691_v0, %v6602_v29  ;;  %v6694_v6 = vpop.f32.mrf.mxu2 }
 0xdef   : > { %3907 = vrot.lane.b32.xlu2 %v3813_v42, %s8471_s24  ;;  %v6802_v51 = vpop.permute.xlu0 %6801  ;;  %v6817_v21 = vpop.permute.xlu1 %6816  ;;  %v7064_v5 = vld [vmem:[#allocation2 + $0x10] sm:$0xff] }
 0xdf0   : > { %v7095_v18 = vpack.c.bf16 %v7065_v46, %v7064_v5  ;;  %v6887_v59 = vmul.f32 %v6802_v51, %v6675_v60  ;;  %v6890_v34 = vmul.f32 %v6817_v21, %v6682_v24  ;;  %v7067_v54 = vld [vmem:[#allocation2 + $0x28] sm:$0xff] }
 0xdf2   : > { %7620 = vmatmul.msk.bf16.gmra.mxu3 %vm382_vm0, %v7095_v18  ;;  %5438 = vrot.lane.b32.xlu1 %v12108_v2, %s8468_s20  ;;  %v8449_v2 = vpop.eup %8448 }
 0xdf3   : > { %v8451_v50 = vpop.eup %8450 }
 0xdf4   : > { %v5324_v62 = vpop.permute.xlu2 %5323  ;;  %v8453_v38 = vpop.eup %8452 }
 0xdf5   : > { %v5357_v14 = vmul.f32 %v5324_v62, %v5164_v32  ;;  %6969 = vrot.lane.b32.xlu0 %v6887_v59, %s8465_s13  ;;  %v8455_v7 = vpop.eup %8454  ;;  %v6605_v9 = vpop.f32.mrf.mxu1  ;;  %v13167_v32 = vld [vmem:[#allocation96_spill] sm:$0xff]  ;;  %v13168_v59 = vld [vmem:[#allocation98_spill] sm:$0xff] }
 0xdf6   : > { %v6696_v16 = vpop.f32.mrf.mxu2  ;;  %v3611_v35 = vadd.f32 %v13168_v59, %v13167_v32 }
 0xdf7   : > { %5452 = vrot.lane.b32.xlu2 %v5357_v14, %s8468_s20  ;;  %v6942_v37 = vpop.permute.xlu0 %6941  ;;  %v6948_v28 = vpop.permute.xlu1 %6947 }
 0xdf8   : > { %7034 = vst.msk [vmem:[#allocation2 + $0x20] sm:$0xff] %vm7029_vm4, %v6942_v37  ;;  %v3810_v37 = vmul.f32 %v12214_v19, %v3611_v35 }
 0xdf9   : > { %7037 = vst.msk [vmem:[#allocation2 + $0x38] sm:$0xff] %vm7029_vm4, %v6948_v28 }
 0xdfa   : > { %6975 = vrot.lane.b32.xlu1 %v6890_v34, %s8465_s13 }
 0xdfd   : > { %3780 = vperm.xlu0 %7684, %v8449_v2   ;;  %v6607_v62 = vpop.f32.mrf.mxu1 }
 0xdfe   : > { %v6697_v14 = vadd.f32 %v6696_v16, %v6607_v62 }
 0xdff   : > { %v6812_v1 = vpop.permute.xlu0 %6811  ;;  %v6827_v39 = vpop.permute.xlu1 %6826  ;;  %v7066_v12 = vld [vmem:[#allocation2 + $0x20] sm:$0xff] }
 0xe00   : > { %v7096_v22 = vpack.c.bf16 %v7067_v54, %v7066_v12  ;;  %v6889_v11 = vmul.f32 %v6812_v1, %v6680_v47  ;;  %v6892_v20 = vmul.f32 %v6827_v39, %v6687_v36  ;;  %v7069_v13 = vld [vmem:[#allocation2 + $0x38] sm:$0xff]  ;;  %v13169_v39 = vld [vmem:[#allocation59_spill] sm:$0xff] }
 0xe01   : > { %v13170_v12 = vld [vmem:[#allocation51_spill] sm:$0xff] }
 0xe02   : > { %7621 = vmatmul.msk.bf16.gmra.mxu3 %vm382_vm0, %v7096_v22  ;;  %5318 = vperm.xlu1 %7685, %v8451_v50   ;;  %v3616_v54 = vadd.f32 %v13170_v12, %v13169_v39 }
 0xe05   : > { %6973 = vrot.lane.b32.xlu0 %v6889_v11, %s8465_s13  ;;  %v6610_v53 = vpop.f32.mrf.mxu1 }
 0xe07   : > { %v6946_v15 = vpop.permute.xlu0 %6945  ;;  %v6952_v31 = vpop.permute.xlu1 %6951 }
 0xe08   : > { %7036 = vst.msk [vmem:[#allocation2 + $0x30] sm:$0xff] %vm7029_vm4, %v6946_v15 }
 0xe09   : > { %7039 = vst.msk [vmem:[#allocation2 + $0x48] sm:$0xff] %vm7029_vm4, %v6952_v31  ;;  %v3900_v43 = vpop.permute.xlu2 %3899  ;;  %v6699_v31 = vpop.f32.mrf.mxu2 }
 0xe0a   : > { %3970 = vst.msk [vmem:[#allocation2 + $0xd0] sm:$0xff] %vm3943_vm2, %v3900_v43  ;;  %6979 = vrot.lane.b32.xlu1 %v6892_v20, %s8465_s13 }
 0xe0f   : > { %v6822_v4 = vpop.permute.xlu0 %6821  ;;  %v6837_v55 = vpop.permute.xlu1 %6836  ;;  %v7068_v33 = vld [vmem:[#allocation2 + $0x30] sm:$0xff] }
 0xe10   : > { %v6891_v57 = vmul.f32 %v6822_v4, %v6685_v27  ;;  %v7097_v45 = vpack.c.bf16 %v7069_v13, %v7068_v33  ;;  %v6894_v3 = vmul.f32 %v6837_v55, %v6692_v58  ;;  %v7071_v5 = vld [vmem:[#allocation2 + $0x48] sm:$0xff]  ;;  %v6700_v27 = vadd.f32 %v6699_v31, %v6610_v53 }
 0xe11   : > { %v12280_v60 = vpop.permute.xlu2 %5444  ;;  %v6701_v33 = vpop.f32.mrf.mxu2 }
 0xe12   : > { %6977 = vrot.lane.b32.xlu0 %v6891_v57, %s8465_s13  ;;  %7622 = vmatmul.msk.bf16.gmra.mxu3 %vm382_vm0, %v7097_v45  ;;  %v6612_v57 = vpop.f32.mrf.mxu1 }
 0xe13   : > { %6866 = vperm.xlu1 %7685, %v8453_v38   ;;  %v6702_v45 = vadd.f32 %v6701_v33, %v6612_v57 }
 0xe17   : > { %v6950_v63 = vpop.permute.xlu0 %6949  ;;  %v6956_v8 = vpop.permute.xlu1 %6955 }
 0xe18   : > { %7038 = vst.msk [vmem:[#allocation2 + $0x40] sm:$0xff] %vm7029_vm4, %v6950_v63 }
 0xe19   : > { %7041 = vst.msk [vmem:[#allocation2 + $0x58] sm:$0xff] %vm7029_vm4, %v6956_v8 }
 0xe1a   : > { %6861 = vperm.xlu0 %7684, %v8455_v7  }
 0xe1b   : > { %6983 = vrot.lane.b32.xlu1 %v6894_v3, %s8465_s13 }
 0xe1f   : > { %v6832_v42 = vpop.permute.xlu0 %6831  ;;  %v6847_v51 = vpop.permute.xlu1 %6846  ;;  %v7070_v21 = vld [vmem:[#allocation2 + $0x40] sm:$0xff] }
 0xe20   : > { %v6893_v46 = vmul.f32 %v6832_v42, %v6690_v23  ;;  %v7098_v18 = vpack.c.bf16 %v7071_v5, %v7070_v21  ;;  %v6896_v28 = vmul.f32 %v6847_v51, %v6697_v14  ;;  %v7073_v61 = vld [vmem:[#allocation2 + $0x58] sm:$0xff] }
 0xe22   : > { %6981 = vrot.lane.b32.xlu0 %v6893_v46, %s8465_s13  ;;  %7623 = vmatmul.msk.bf16.gmra.mxu3 %vm382_vm0, %v7098_v18  ;;  %v13172_v46 = vld [vmem:[#allocation13_spill] sm:$0xff]  ;;  %v13173_v18 = vld [vmem:[#allocation19_spill] sm:$0xff] }
 0xe23   : > { %5442 = vrot.lane.b32.xlu1 %v12205_v48, %s8468_s20  ;;  %v6695_v48 = vadd.f32 %v6694_v6, %v6605_v9  ;;  %v12322_v9 = vld [vmem:[%s12472_s3] ss:$0 sm:$0xff]  ;;  %v3621_v16 = vadd.f32 %v13173_v18, %v13172_v46 }
 0xe27   : > { %v6954_v10 = vpop.permute.xlu0 %6953  ;;  %v6960_v24 = vpop.permute.xlu1 %6959 }
 0xe28   : > { %7040 = vst.msk [vmem:[#allocation2 + $0x50] sm:$0xff] %vm7029_vm4, %v6954_v10 }
 0xe29   : > { %7043 = vst.msk [vmem:[#allocation2 + $0x68] sm:$0xff] %vm7029_vm4, %v6960_v24  ;;  %v3904_v34 = vpop.permute.xlu2 %3903 }
 0xe2a   : > { %3972 = vst.msk [vmem:[#allocation2 + $0xe0] sm:$0xff] %vm3943_vm2, %v3904_v34  ;;  %3901 = vrot.lane.b32.xlu0 %v3810_v37, %s8471_s24  ;;  %v13174_v37 = vld [vmem:[#allocation68_spill] sm:$0xff] }
 0xe2b   : > { %6987 = vrot.lane.b32.xlu1 %v6896_v28, %s8465_s13 }
 0xe2f   : > { %v6842_v26 = vpop.permute.xlu0 %6841  ;;  %v5435_v49 = vpop.permute.xlu1 %5434  ;;  %v7072_v2 = vld [vmem:[#allocation2 + $0x50] sm:$0xff] }
 0xe30   : > { %v6895_v52 = vmul.f32 %v6842_v26, %v6695_v48  ;;  %5509 = vst.msk [vmem:[#allocation2 + $0xb0] sm:$0xff] %vm5486_vm3, %v5435_v49  ;;  %v7099_v19 = vpack.c.bf16 %v7073_v61, %v7072_v2  ;;  %v7075_v47 = vld [vmem:[#allocation2 + $0x68] sm:$0xff]  ;;  %v6704_v26 = vpop.f32.mrf.mxu2  ;;  %v6615_v2 = vpop.f32.mrf.mxu1 }
 0xe31   : > { %v12301_v36 = vpop.permute.xlu2 %5448 }
 0xe32   : > { %6985 = vrot.lane.b32.xlu0 %v6895_v52, %s8465_s13  ;;  %7624 = vmatmul.msk.bf16.gmra.mxu3 %vm382_vm0, %v7099_v19 }
 0xe37   : > { %v6958_v44 = vpop.permute.xlu0 %6957 }
 0xe38   : > { %7042 = vst.msk [vmem:[#allocation2 + $0x60] sm:$0xff] %vm7029_vm4, %v6958_v44  ;;  %v6706_v39 = vpop.f32.mrf.mxu2 }
 0xe3c   : > { %v6964_v1 = vpop.permute.xlu1 %6963 }
 0xe3d   : > { %7045 = vst.msk [vmem:[#allocation2 + $0x78] sm:$0xff] %vm7029_vm4, %v6964_v1 }
 0xe3f   : > { %v3771_v22 = vpop.permute.xlu0 %3770  ;;  %v7074_v50 = vld [vmem:[#allocation2 + $0x60] sm:$0xff] }
 0xe40   : > { %v3812_v11 = vmul.f32 %v3771_v22, %v3616_v54  ;;  %v7100_v30 = vpack.c.bf16 %v7075_v47, %v7074_v50  ;;  %v6617_v54 = vpop.f32.mrf.mxu1 }
 0xe41   : > { %v6707_v22 = vadd.f32 %v6706_v39, %v6617_v54 }
 0xe42   : > { %3905 = vrot.lane.b32.xlu0 %v3812_v11, %s8471_s24  ;;  %7625 = vmatmul.msk.bf16.gmra.mxu3 %vm382_vm0, %v7100_v30 }
 0xe44   : > { %v5309_v41 = vpop.permute.xlu1 %5308  ;;  %v7077_v55 = vld [vmem:[#allocation2 + $0x78] sm:$0xff] }
 0xe45   : > { %v5354_v15 = vmul.f32 %v5309_v41, %v13171_v25  ;;  %v6705_v25 = vadd.f32 %v6704_v26, %v6615_v2 }
 0xe47   : > { %v6962_v56 = vpop.permute.xlu0 %6961  ;;  %5446 = vrot.lane.b32.xlu1 %v5354_v15, %s8468_s20 }
 0xe48   : > { %7044 = vst.msk [vmem:[#allocation2 + $0x70] sm:$0xff] %vm7029_vm4, %v6962_v56 }
 0xe49   : > { %v3908_v20 = vpop.permute.xlu2 %3907 }
 0xe4a   : > { %3974 = vst.msk [vmem:[#allocation2 + $0xf0] sm:$0xff] %vm3943_vm2, %v3908_v20 }
 0xe4c   : > { %v6968_v43 = vpop.permute.xlu1 %6967 }
 0xe4d   : > { %7047 = vst.msk [vmem:[#allocation2 + $0x88] sm:$0xff] %vm7029_vm4, %v6968_v43 }
 0xe4f   : > { %v6852_v40 = vpop.permute.xlu0 %6851  ;;  %v7076_v4 = vld [vmem:[#allocation2 + $0x70] sm:$0xff] }
 0xe50   : > { %v6897_v13 = vmul.f32 %v6852_v40, %v6700_v27  ;;  %v7101_v0 = vpack.c.bf16 %v7077_v55, %v7076_v4 }
 0xe51   : > { %v5453_v2 = vpop.permute.xlu2 %5452 }
 0xe52   : > { %6989 = vrot.lane.b32.xlu0 %v6897_v13, %s8465_s13  ;;  %7626 = vmatmul.msk.bf16.gmra.mxu3 %vm382_vm0, %v7101_v0 }
 0xe54   : > { %v6857_v38 = vpop.permute.xlu1 %6856  ;;  %v7079_v3 = vld [vmem:[#allocation2 + $0x88] sm:$0xff] }
 0xe55   : > { %v6898_v29 = vmul.f32 %v6857_v38, %v6702_v45 }
 0xe57   : > { %v6966_v58 = vpop.permute.xlu0 %6965  ;;  %6991 = vrot.lane.b32.xlu1 %v6898_v29, %s8465_s13 }
 0xe58   : > { %7046 = vst.msk [vmem:[#allocation2 + $0x80] sm:$0xff] %vm7029_vm4, %v6966_v58 }
 0xe5c   : > { %v6972_v63 = vpop.permute.xlu1 %6971 }
 0xe5d   : > { %7049 = vst.msk [vmem:[#allocation2 + $0x98] sm:$0xff] %vm7029_vm4, %v6972_v63 }
 0xe5f   : > { %v3898_v8 = vpop.permute.xlu0 %3897  ;;  %v7078_v7 = vld [vmem:[#allocation2 + $0x80] sm:$0xff] }
 0xe60   : > { %3969 = vst.msk [vmem:[#allocation2 + $0xc8] sm:$0xff] %vm3943_vm2, %v3898_v8  ;;  %v7102_v6 = vpack.c.bf16 %v7079_v3, %v7078_v7 }
 0xe61   : > { %5512 = vst.msk [vmem:[#allocation2 + $0xc8] sm:$0xff] %vm5486_vm3, %v12242_v17 }
 0xe62   : > { %7627 = vmatmul.msk.bf16.gmra.mxu3 %vm382_vm0, %v7102_v6 }
 0xe64   : > { %v5439_v23 = vpop.permute.xlu1 %5438  ;;  %v7081_v14 = vld [vmem:[#allocation2 + $0x98] sm:$0xff] }
 0xe65   : > { %5511 = vst.msk [vmem:[#allocation2 + $0xc0] sm:$0xff] %vm5486_vm3, %v5439_v23  ;;  %v7203_v42 = vpop.f32.mrf.mxu3 }
 0xe66   : > { %v7204_v17 = vadd.f32 %v12322_v9, %v7203_v42 }
 0xe67   : > { %v6970_v51 = vpop.permute.xlu0 %6969 }
 0xe68   : > { %7283 = vst.msk [vmem:[%s12330_s16] sm:$0xff] %vm382_vm0, %v7204_v17 }
 0xe69   : > { %7048 = vst.msk [vmem:[#allocation2 + $0x90] sm:$0xff] %vm7029_vm4, %v6970_v51 }
 0xe6c   : > { %v6976_v21 = vpop.permute.xlu1 %6975 }
 0xe6d   : > { %7051 = vst.msk [vmem:[#allocation2 + $0xa8] sm:$0xff] %vm7029_vm4, %v6976_v21  ;;  %v7205_v5 = vpop.f32.mrf.mxu3 }
 0xe6e   : > { %v7206_v32 = vadd.f32 %v12322_v9, %v7205_v5 }
 0xe6f   : > { %v3781_v59 = vpop.permute.xlu0 %3780 }
 0xe70   : > { %7284 = vst.msk [vmem:[%s12330_s16 + $0x8] sm:$0xff] %vm382_vm0, %v7206_v32  ;;  %v3814_v35 = vmul.f32 %v3781_v59, %v3621_v16  ;;  %v7080_v62 = vld [vmem:[#allocation2 + $0x90] sm:$0xff] }
 0xe71   : > { %v7103_v10 = vpack.c.bf16 %v7081_v14, %v7080_v62 }
 0xe72   : > { %3909 = vrot.lane.b32.xlu0 %v3814_v35, %s8471_s24 }
 0xe73   : > { %7628 = vmatmul.msk.bf16.gmra.mxu3 %vm382_vm0, %v7103_v10 }
 0xe74   : > { %v5319_v24 = vpop.permute.xlu1 %5318  ;;  %v7083_v1 = vld [vmem:[#allocation2 + $0xa8] sm:$0xff] }
 0xe75   : > { %v5356_v28 = vmul.f32 %v5319_v24, %v13174_v37  ;;  %v7208_v34 = vpop.f32.mrf.mxu3 }
 0xe76   : > { %v7209_v48 = vadd.f32 %v12322_v9, %v7208_v34 }
 0xe77   : > { %v6974_v49 = vpop.permute.xlu0 %6973  ;;  %5450 = vrot.lane.b32.xlu1 %v5356_v28, %s8468_s20 }
 0xe78   : > { %7285 = vst.msk [vmem:[%s12330_s16 + $0x10] sm:$0xff] %vm382_vm0, %v7209_v48 }
 0xe79   : > { %7050 = vst.msk [vmem:[#allocation2 + $0xa0] sm:$0xff] %vm7029_vm4, %v6974_v49 }
 0xe7c   : > { %v6980_v61 = vpop.permute.xlu1 %6979 }
 0xe7d   : > { %7053 = vst.msk [vmem:[#allocation2 + $0xb8] sm:$0xff] %vm7029_vm4, %v6980_v61  ;;  %v7210_v52 = vpop.f32.mrf.mxu3 }
 0xe7e   : > { %v7211_v19 = vadd.f32 %v12322_v9, %v7210_v52 }
 0xe80   : > { %7286 = vst.msk [vmem:[%s12330_s16 + $0x18] sm:$0xff] %vm382_vm0, %v7211_v19  ;;  %v7082_v44 = vld [vmem:[#allocation2 + $0xa0] sm:$0xff] }
 0xe81   : > { %v7104_v12 = vpack.c.bf16 %v7083_v1, %v7082_v44 }
 0xe83   : > { %7629 = vmatmul.msk.bf16.gmra.mxu3 %vm382_vm0, %v7104_v12 }
 0xe84   : > { %v6978_v50 = vpop.permute.xlu0 %6977  ;;  %v7085_v27 = vld [vmem:[#allocation2 + $0xb8] sm:$0xff] }
 0xe85   : > { %7052 = vst.msk [vmem:[#allocation2 + $0xb0] sm:$0xff] %vm7029_vm4, %v6978_v50  ;;  %v6867_v47 = vpop.permute.xlu1 %6866  ;;  %v7213_v11 = vpop.f32.mrf.mxu3 }
 0xe86   : > { %v6900_v30 = vmul.f32 %v6867_v47, %v6707_v22  ;;  %v7214_v41 = vadd.f32 %v12322_v9, %v7213_v11 }
 0xe88   : > { %7287 = vst.msk [vmem:[%s12330_s16 + $0x20] sm:$0xff] %vm382_vm0, %v7214_v41  ;;  %6995 = vrot.lane.b32.xlu1 %v6900_v30, %s8465_s13 }
 0xe8c   : > { %v6862_v15 = vpop.permute.xlu0 %6861  ;;  %v7084_v43 = vld [vmem:[#allocation2 + $0xb0] sm:$0xff] }
 0xe8d   : > { %v6899_v31 = vmul.f32 %v6862_v15, %v6705_v25  ;;  %v6984_v56 = vpop.permute.xlu1 %6983  ;;  %v7215_v53 = vpop.f32.mrf.mxu3  ;;  %v7105_v40 = vpack.c.bf16 %v7085_v27, %v7084_v43 }
 0xe8e   : > { %7055 = vst.msk [vmem:[#allocation2 + $0xc8] sm:$0xff] %vm7029_vm4, %v6984_v56  ;;  %v7216_v20 = vadd.f32 %v12322_v9, %v7215_v53 }
 0xe8f   : > { %6993 = vrot.lane.b32.xlu0 %v6899_v31, %s8465_s13 }
 0xe90   : > { %7288 = vst.msk [vmem:[%s12330_s16 + $0x28] sm:$0xff] %vm382_vm0, %v7216_v20 }
 0xe93   : > { %7630 = vmatmul.msk.bf16.gmra.mxu3 %vm382_vm0, %v7105_v40 }
 0xe94   : > { %v6982_v4 = vpop.permute.xlu0 %6981 }
 0xe95   : > { %7054 = vst.msk [vmem:[#allocation2 + $0xc0] sm:$0xff] %vm7029_vm4, %v6982_v4  ;;  %v5443_v55 = vpop.permute.xlu1 %5442  ;;  %v7218_v33 = vpop.f32.mrf.mxu3  ;;  %v7087_v58 = vld [vmem:[#allocation2 + $0xc8] sm:$0xff] }
 0xe96   : > { %5513 = vst.msk [vmem:[#allocation2 + $0xd0] sm:$0xff] %vm5486_vm3, %v5443_v55  ;;  %v7219_v13 = vadd.f32 %v12322_v9, %v7218_v33 }
 0xe98   : > { %7289 = vst.msk [vmem:[%s12330_s16 + $0x30] sm:$0xff] %vm382_vm0, %v7219_v13 }
 0xe9c   : > { %v3902_v0 = vpop.permute.xlu0 %3901  ;;  %v7086_v29 = vld [vmem:[#allocation2 + $0xc0] sm:$0xff] }
 0xe9d   : > { %3971 = vst.msk [vmem:[#allocation2 + $0xd8] sm:$0xff] %vm3943_vm2, %v3902_v0  ;;  %v7220_v57 = vpop.f32.mrf.mxu3  ;;  %v6988_v45 = vpop.permute.xlu1 %6987  ;;  %v7106_v63 = vpack.c.bf16 %v7087_v58, %v7086_v29 }
 0xe9e   : > { %5514 = vst.msk [vmem:[#allocation2 + $0xd8] sm:$0xff] %vm5486_vm3, %v12280_v60  ;;  %v7221_v38 = vadd.f32 %v12322_v9, %v7220_v57 }
 0xe9f   : > { %7057 = vst.msk [vmem:[#allocation2 + $0xd8] sm:$0xff] %vm7029_vm4, %v6988_v45 }
 0xea0   : > { %7290 = vst.msk [vmem:[%s12330_s16 + $0x38] sm:$0xff] %vm382_vm0, %v7221_v38 }
 0xea3   : > { %7631 = vmatmul.msk.bf16.gmra.mxu3 %vm382_vm0, %v7106_v63 }
 0xea4   : > { %v6986_v8 = vpop.permute.xlu0 %6985 }
 0xea5   : > { %7056 = vst.msk [vmem:[#allocation2 + $0xd0] sm:$0xff] %vm7029_vm4, %v6986_v8  ;;  %v7223_v7 = vpop.f32.mrf.mxu3 }
 0xea6   : > { %v7224_v60 = vadd.f32 %v12322_v9, %v7223_v7  ;;  %v7089_v42 = vld [vmem:[#allocation2 + $0xd8] sm:$0xff] }
 0xea8   : > { %7291 = vst.msk [vmem:[%s12330_s16 + $0x40] sm:$0xff] %vm382_vm0, %v7224_v60 }
 0xeac   : > { %v7088_v23 = vld [vmem:[#allocation2 + $0xd0] sm:$0xff] }
 0xead   : > { %v7225_v3 = vpop.f32.mrf.mxu3  ;;  %v7107_v17 = vpack.c.bf16 %v7089_v42, %v7088_v23 }
 0xeae   : > { %v7226_v6 = vadd.f32 %v12322_v9, %v7225_v3 }
 0xeb0   : > { %7292 = vst.msk [vmem:[%s12330_s16 + $0x48] sm:$0xff] %vm382_vm0, %v7226_v6 }
 0xeb3   : > { %7632 = vmatmul.msk.bf16.gmra.mxu3 %vm382_vm0, %v7107_v17 }
 0xeb4   : > { %v3906_v51 = vpop.permute.xlu0 %3905 }
 0xeb5   : > { %3973 = vst.msk [vmem:[#allocation2 + $0xe8] sm:$0xff] %vm3943_vm2, %v3906_v51  ;;  %v7228_v21 = vpop.f32.mrf.mxu3 }
 0xeb6   : > { %5516 = vst.msk [vmem:[#allocation2 + $0xe8] sm:$0xff] %vm5486_vm3, %v12301_v36  ;;  %v7229_v5 = vadd.f32 %v12322_v9, %v7228_v21 }
 0xeb8   : > { %7293 = vst.msk [vmem:[%s12330_s16 + $0x50] sm:$0xff] %vm382_vm0, %v7229_v5 }
 0xeb9   : > { %v5447_v46 = vpop.permute.xlu1 %5446 }
 0xeba   : > { %5515 = vst.msk [vmem:[#allocation2 + $0xe0] sm:$0xff] %vm5486_vm3, %v5447_v46 }
 0xebd   : > { %v7230_v18 = vpop.f32.mrf.mxu3 }
 0xebe   : > { %v7231_v16 = vadd.f32 %v12322_v9, %v7230_v18 }
 0xec0   : > { %7294 = vst.msk [vmem:[%s12330_s16 + $0x58] sm:$0xff] %vm382_vm0, %v7231_v16 }
 0xec4   : > { %v6990_v32 = vpop.permute.xlu0 %6989 }
 0xec5   : > { %7058 = vst.msk [vmem:[#allocation2 + $0xe0] sm:$0xff] %vm7029_vm4, %v6990_v32  ;;  %v7233_v59 = vpop.f32.mrf.mxu3 }
 0xec6   : > { %v7234_v36 = vadd.f32 %v12322_v9, %v7233_v59 }
 0xec8   : > { %7295 = vst.msk [vmem:[%s12330_s16 + $0x60] sm:$0xff] %vm382_vm0, %v7234_v36 }
 0xec9   : > { %v6992_v35 = vpop.permute.xlu1 %6991 }
 0xeca   : > { %7059 = vst.msk [vmem:[#allocation2 + $0xe8] sm:$0xff] %vm7029_vm4, %v6992_v35 }
 0xecc   : > { %v7090_v10 = vld [vmem:[#allocation2 + $0xe0] sm:$0xff] }
 0xecd   : > { %v7235_v62 = vpop.f32.mrf.mxu3 }
 0xece   : > { %v7236_v14 = vadd.f32 %v12322_v9, %v7235_v62 }
 0xed0   : > { %7296 = vst.msk [vmem:[%s12330_s16 + $0x68] sm:$0xff] %vm382_vm0, %v7236_v14 }
 0xed1   : > { %v7091_v24 = vld [vmem:[#allocation2 + $0xe8] sm:$0xff] }
 0xed2   : > { %v7108_v37 = vpack.c.bf16 %v7091_v24, %v7090_v10 }
 0xed4   : > { %7633 = vmatmul.msk.bf16.gmra.mxu3 %vm382_vm0, %v7108_v37 }
 0xed5   : > { %v7238_v28 = vpop.f32.mrf.mxu3 }
 0xed6   : > { %v7239_v34 = vadd.f32 %v12322_v9, %v7238_v28 }
 0xed8   : > { %7297 = vst.msk [vmem:[%s12330_s16 + $0x70] sm:$0xff] %vm382_vm0, %v7239_v34 }
 0xedd   : > { %v7240_v48 = vpop.f32.mrf.mxu3 }
 0xede   : > { %v7241_v26 = vadd.f32 %v12322_v9, %v7240_v48 }
 0xee0   : > { %7298 = vst.msk [vmem:[%s12330_s16 + $0x78] sm:$0xff] %vm382_vm0, %v7241_v26 }
 0xee4   : > { %v3910_v49 = vpop.permute.xlu0 %3909 }
 0xee5   : > { %3975 = vst.msk [vmem:[#allocation2 + $0xf8] sm:$0xff] %vm3943_vm2, %v3910_v49  ;;  %v7243_v61 = vpop.f32.mrf.mxu3 }
 0xee6   : > { %5518 = vst.msk [vmem:[#allocation2 + $0xf8] sm:$0xff] %vm5486_vm3, %v5453_v2  ;;  %v7244_v52 = vadd.f32 %v12322_v9, %v7243_v61 }
 0xee8   : > { %7299 = vst.msk [vmem:[%s12330_s16 + $0x80] sm:$0xff] %vm382_vm0, %v7244_v52 }
 0xee9   : > { %v5451_v19 = vpop.permute.xlu1 %5450 }
 0xeea   : > { %5517 = vst.msk [vmem:[#allocation2 + $0xf0] sm:$0xff] %vm5486_vm3, %v5451_v19 }
 0xeed   : > { %v7245_v44 = vpop.f32.mrf.mxu3 }
 0xeee   : > { %v7246_v1 = vadd.f32 %v12322_v9, %v7245_v44 }
 0xef0   : > { %7300 = vst.msk [vmem:[%s12330_s16 + $0x88] sm:$0xff] %vm382_vm0, %v7246_v1 }
 0xef6   : > { %v7248_v39 = vpop.f32.mrf.mxu3 }
 0xef7   : > { %v7249_v12 = vadd.f32 %v12322_v9, %v7248_v39 }
 0xef9   : > { %7301 = vst.msk [vmem:[%s12330_s16 + $0x90] sm:$0xff] %vm382_vm0, %v7249_v12 }
 0xefa   : > { %v6996_v54 = vpop.permute.xlu1 %6995 }
 0xefb   : > { %7061 = vst.msk [vmem:[#allocation2 + $0xf8] sm:$0xff] %vm7029_vm4, %v6996_v54 }
 0xefe   : > { %v7250_v22 = vpop.f32.mrf.mxu3 }
 0xeff   : > { %v7251_v50 = vadd.f32 %v12322_v9, %v7250_v22 }
 0xf01   : > { %7302 = vst.msk [vmem:[%s12330_s16 + $0x98] sm:$0xff] %vm382_vm0, %v7251_v50  ;;  %v6994_v47 = vpop.permute.xlu0 %6993 }
 0xf02   : > { %7060 = vst.msk [vmem:[#allocation2 + $0xf0] sm:$0xff] %vm7029_vm4, %v6994_v47  ;;  %v7093_v25 = vld [vmem:[#allocation2 + $0xf8] sm:$0xff] }
 0xf06   : > { %v7253_v11 = vpop.f32.mrf.mxu3 }
 0xf07   : > { %v7254_v30 = vadd.f32 %v12322_v9, %v7253_v11 }
 0xf09   : > { %7303 = vst.msk [vmem:[%s12330_s16 + $0xa0] sm:$0xff] %vm382_vm0, %v7254_v30  ;;  %v7092_v41 = vld [vmem:[#allocation2 + $0xf0] sm:$0xff] }
 0xf0a   : > { %v7109_v15 = vpack.c.bf16 %v7093_v25, %v7092_v41 }
 0xf0c   : > { %7634 = vmatmul.msk.bf16.gmra.mxu3 %vm382_vm0, %v7109_v15 }
 0xf0e   : > { %v7255_v31 = vpop.f32.mrf.mxu3 }
 0xf0f   : > { %v7256_v56 = vadd.f32 %v12322_v9, %v7255_v31 }
 0xf11   : > { %7304 = vst.msk [vmem:[%s12330_s16 + $0xa8] sm:$0xff] %vm382_vm0, %v7256_v56 }
 0xf16   : > { %v7258_v53 = vpop.f32.mrf.mxu3 }
 0xf17   : > { %v7259_v20 = vadd.f32 %v12322_v9, %v7258_v53 }
 0xf19   : > { %7305 = vst.msk [vmem:[%s12330_s16 + $0xb0] sm:$0xff] %vm382_vm0, %v7259_v20 }
 0xf1e   : > { %v7260_v43 = vpop.f32.mrf.mxu3 }
 0xf1f   : > { %v7261_v27 = vadd.f32 %v12322_v9, %v7260_v43 }
 0xf21   : > { %7306 = vst.msk [vmem:[%s12330_s16 + $0xb8] sm:$0xff] %vm382_vm0, %v7261_v27 }
 0xf26   : > { %v7263_v40 = vpop.f32.mrf.mxu3 }
 0xf27   : > { %v7264_v4 = vadd.f32 %v12322_v9, %v7263_v40 }
 0xf29   : > { %7307 = vst.msk [vmem:[%s12330_s16 + $0xc0] sm:$0xff] %vm382_vm0, %v7264_v4 }
 0xf2e   : > { %v7265_v55 = vpop.f32.mrf.mxu3 }
 0xf2f   : > { %v7266_v33 = vadd.f32 %v12322_v9, %v7265_v55 }
 0xf31   : > { %7308 = vst.msk [vmem:[%s12330_s16 + $0xc8] sm:$0xff] %vm382_vm0, %v7266_v33 }
 0xf36   : > { %v7268_v13 = vpop.f32.mrf.mxu3 }
 0xf37   : > { %v7269_v0 = vadd.f32 %v12322_v9, %v7268_v13 }
 0xf39   : > { %7309 = vst.msk [vmem:[%s12330_s16 + $0xd0] sm:$0xff] %vm382_vm0, %v7269_v0 }
 0xf3e   : > { %v7270_v57 = vpop.f32.mrf.mxu3 }
 0xf3f   : > { %v7271_v45 = vadd.f32 %v12322_v9, %v7270_v57 }
 0xf41   : > { %7310 = vst.msk [vmem:[%s12330_s16 + $0xd8] sm:$0xff] %vm382_vm0, %v7271_v45 }
 0xf57   : > { %v7273_v38 = vpop.f32.mrf.mxu3 }
 0xf58   : > { %v7274_v29 = vadd.f32 %v12322_v9, %v7273_v38 }
 0xf5a   : > { %7311 = vst.msk [vmem:[%s12330_s16 + $0xe0] sm:$0xff] %vm382_vm0, %v7274_v29 }
 0xf5f   : > { %v7275_v58 = vpop.f32.mrf.mxu3 }
 0xf60   : > { %v7276_v63 = vadd.f32 %v12322_v9, %v7275_v58 }
 0xf62   : > { %7312 = vst.msk [vmem:[%s12330_s16 + $0xe8] sm:$0xff] %vm382_vm0, %v7276_v63 }
 0xf8f   : > { %v7278_v8 = vpop.f32.mrf.mxu3 }
 0xf90   : > { %v7279_v7 = vadd.f32 %v12322_v9, %v7278_v8 }
 0xf92   : > { %7313 = vst.msk [vmem:[%s12330_s16 + $0xf0] sm:$0xff] %vm382_vm0, %v7279_v7 }
 0xf97   : > { %v7280_v60 = vpop.f32.mrf.mxu3 }
 0xf98   : > { %v7281_v3 = vadd.f32 %v12322_v9, %v7280_v60 }
 0xf9a   : > { %7314 = vst.msk [vmem:[%s12330_s16 + $0xf8] sm:$0xff] %vm382_vm0, %v7281_v3 }
 0xf9b PF: > { %s16_s21 = sadd.s32 1, %s8462_s21  }
 0xf9c   : > { %p13_p4 = scmp.ge.s32.totalorder %s16_s21, 4  }
 0xf9e   :  { %15 = sbr.rel (!%p13_p4) target bundleno = 1 (0x1), region = 74 }

</bundles_post_ra>
